<compile_context>
chip_gen: v7x
topology: tpu7x:2x2x1
jax: 0.10.0
libtpu: 0.0.40
codegen_flags: <defaults>
</compile_context>

<pallas_src>
import jax
import jax.numpy as jnp
from jax.experimental import pallas as pl
from jax.experimental.pallas import tpu as pltpu

_PT = 3   # top / bottom halo rows (max dilation = 3)
_PL = 8   # left halo columns (8 keeps the interior store sublane-aligned)
_PR = 3   # right halo columns


def _conv3x3(pad_ref, wf_ref, b_ref, dil, H, W, C):
    """'same' 3x3 conv with dilation `dil` as a single fused im2col matmul."""
    taps = [
        pad_ref[pl.ds(_PT + (dy - 1) * dil, H),
                pl.ds(_PL + (dx - 1) * dil, W), :]
        for dy in range(3) for dx in range(3)
    ]
    patches = jnp.concatenate(taps, axis=-1).reshape(H * W, 9 * C)
    a = jnp.dot(patches, wf_ref[...], preferred_element_type=jnp.float32)
    return (a + b_ref[...]).reshape(H, W, C)


def _pab_kernel(x_ref, w1_ref, b1_ref, w2_ref, b2_ref, w3_ref, b3_ref,
                o_ref, pad_ref):
    H, W, C = x_ref.shape
    WP = _PL + W + _PR
    f32 = jnp.float32

    # Zero only the halo ring.  The interior is fully overwritten before every
    # tap read, and VMEM scratch persists across grid steps, so this is all the
    # initialization the padded buffer ever needs.
    pad_ref[pl.ds(0, _PT), :, :] = jnp.zeros((_PT, WP, C), f32)
    pad_ref[pl.ds(_PT + H, _PT), :, :] = jnp.zeros((_PT, WP, C), f32)
    pad_ref[pl.ds(_PT, H), pl.ds(0, _PL), :] = jnp.zeros((H, _PL, C), f32)
    pad_ref[pl.ds(_PT, H), pl.ds(_PL + W, _PR), :] = jnp.zeros((H, _PR, C), f32)

    xr = jnp.maximum(x_ref[...].astype(f32), 0.0)        # inplace-ReLU effect
    pad_ref[pl.ds(_PT, H), pl.ds(_PL, W), :] = xr
    a = _conv3x3(pad_ref, w1_ref, b1_ref, 1, H, W, C)    # conv3x3, pad=1
    pad_ref[pl.ds(_PT, H), pl.ds(_PL, W), :] = a
    a = _conv3x3(pad_ref, w2_ref, b2_ref, 3, H, W, C)    # conv3x3, pad=3, dil=3
    pad_ref[pl.ds(_PT, H), pl.ds(_PL, W), :] = a
    a = _conv3x3(pad_ref, w3_ref, b3_ref, 1, H, W, C)    # conv3x3, pad=1
    o_ref[...] = (xr * jax.nn.sigmoid(a)).astype(o_ref.dtype)  # torch.mul(x, x1)


def pab_forward(x_nchw, params):
    """x_nchw: (N, C, H, W) float32. params: (w1,b1,w2,b2,w3,b3), weights HWIO."""
    w1, b1, w2, b2, w3, b3 = params
    N, C, H, W = x_nchw.shape
    x = jnp.transpose(x_nchw, (0, 2, 3, 1))                       # -> NHWC
    # Pre-flatten weights for the fused im2col matmul; reshape biases to (1, C).
    wf1, wf2, wf3 = (w.reshape(9 * C, C) for w in (w1, w2, w3))
    b1r, b2r, b3r = (b.reshape(1, C) for b in (b1, b2, b3))

    img_spec = pl.BlockSpec((pl.Squeezed(), H, W, C), lambda n: (n, 0, 0, 0))
    w_spec = pl.BlockSpec((9 * C, C), lambda n: (0, 0))
    b_spec = pl.BlockSpec((1, C), lambda n: (0, 0))

    out = pl.pallas_call(
        _pab_kernel,
        out_shape=jax.ShapeDtypeStruct((N, H, W, C), x.dtype),
        grid_spec=pltpu.PrefetchScalarGridSpec(
            num_scalar_prefetch=0,
            grid=(N,),
            in_specs=[img_spec, w_spec, b_spec, w_spec, b_spec, w_spec, b_spec],
            out_specs=pl.BlockSpec((pl.Squeezed(), H, W, C),
                                   lambda n: (n, 0, 0, 0)),
            scratch_shapes=[
                pltpu.VMEM((H + 2 * _PT, _PL + W + _PR, C), jnp.float32),
            ],
        ),
        compiler_params=pltpu.CompilerParams(
            dimension_semantics=("parallel",)),
    )(x, wf1, b1r, wf2, b2r, wf3, b3r)
    return jnp.transpose(out, (0, 3, 1, 2))                       # -> NCHW


def _pab_reference(x_nchw, w1, b1, w2, b2, w3, b3):
    """Pure-JAX reference (matches PyTorch forward incl. inplace ReLU effect)."""
    xr = jax.nn.relu(x_nchw)

    def conv(a, w, b, dil):
        y = jax.lax.conv_general_dilated(
            a, w, window_strides=(1, 1),
            padding=((dil, dil), (dil, dil)),
            rhs_dilation=(dil, dil),
            dimension_numbers=("NCHW", "HWIO", "NCHW"))
        return y + b[None, :, None, None]

    a = conv(xr, w1, b1, 1)
    a = conv(a, w2, b2, 3)
    a = conv(a, w3, b3, 1)
    return xr * jax.nn.sigmoid(a)


if __name__ == "__main__":
    N, C, H, W = 2, 4, 16, 16
    key = jax.random.PRNGKey(0)
    kx, k1, k2, k3, k4, k5, k6 = jax.random.split(key, 7)
    scale = 0.2
    x = jax.random.normal(kx, (N, C, H, W), jnp.float32)
    w1 = jax.random.normal(k1, (3, 3, C, C), jnp.float32) * scale
    b1 = jax.random.normal(k2, (C,), jnp.float32) * scale
    w2 = jax.random.normal(k3, (3, 3, C, C), jnp.float32) * scale
    b2 = jax.random.normal(k4, (C,), jnp.float32) * scale
    w3 = jax.random.normal(k5, (3, 3, C, C), jnp.float32) * scale
    b3 = jax.random.normal(k6, (C,), jnp.float32) * scale

    out = pab_forward(x, (w1, b1, w2, b2, w3, b3))
    out = jax.block_until_ready(out)

    ref = _pab_reference(x, w1, b1, w2, b2, w3, b3)
    assert out.shape == x.shape
    max_err = float(jnp.max(jnp.abs(out - ref)))
    assert max_err < 1e-4, f"mismatch vs reference: {max_err}"
    print("KERNEL_OK")
</pallas_src>

<mosaic_0001>
module attributes {stable_mosaic.version = 11 : i64} {
  func.func @_pab_kernel(%arg0: i32, %arg1: memref<1x16x16x4xf32, #tpu.memory_space<vmem>>, %arg2: memref<36x4xf32, #tpu.memory_space<vmem>>, %arg3: memref<1x4xf32, #tpu.memory_space<vmem>>, %arg4: memref<36x4xf32, #tpu.memory_space<vmem>>, %arg5: memref<1x4xf32, #tpu.memory_space<vmem>>, %arg6: memref<36x4xf32, #tpu.memory_space<vmem>>, %arg7: memref<1x4xf32, #tpu.memory_space<vmem>>, %arg8: memref<1x16x16x4xf32, #tpu.memory_space<vmem>>, %arg9: memref<22x27x4xf32, #tpu.memory_space<vmem>>) attributes {dimension_semantics = [#tpu.dimension_semantics<parallel>], iteration_bounds = array<i64: 2>, scalar_prefetch = 0 : i64, scratch_operands = 1 : i64, tpu.core_type = #tpu.core_type<tc>, window_params = [{transform_indices = @transform_0, window_bounds = array<i64: 1, 16, 16, 4>}, {pipeline_mode = #tpu.pipeline_mode<synchronous>, transform_indices = @transform_1, window_bounds = array<i64: 36, 4>}, {pipeline_mode = #tpu.pipeline_mode<synchronous>, transform_indices = @transform_2, window_bounds = array<i64: 1, 4>}, {pipeline_mode = #tpu.pipeline_mode<synchronous>, transform_indices = @transform_3, window_bounds = array<i64: 36, 4>}, {pipeline_mode = #tpu.pipeline_mode<synchronous>, transform_indices = @transform_4, window_bounds = array<i64: 1, 4>}, {pipeline_mode = #tpu.pipeline_mode<synchronous>, transform_indices = @transform_5, window_bounds = array<i64: 36, 4>}, {pipeline_mode = #tpu.pipeline_mode<synchronous>, transform_indices = @transform_6, window_bounds = array<i64: 1, 4>}, {transform_indices = @transform_7, window_bounds = array<i64: 1, 16, 16, 4>}]} {
    %cst = arith.constant 0.000000e+00 : f32
    %0 = vector.broadcast %cst : f32 to vector<3x27x4xf32>
    %c0 = arith.constant 0 : index
    %c0_0 = arith.constant 0 : index
    %c0_1 = arith.constant 0 : index
    %1 = vector.load %arg9[%c0, %c0_0, %c0_1] : memref<22x27x4xf32, #tpu.memory_space<vmem>>, vector<3x27x4xf32>
    tpu.vector_store %arg9[%c0, %c0_0, %c0_1], %0 {strides = array<i32>} : memref<22x27x4xf32, #tpu.memory_space<vmem>>, vector<3x27x4xf32>,
    %cst_2 = arith.constant 0.000000e+00 : f32
    %2 = vector.broadcast %cst_2 : f32 to vector<3x27x4xf32>
    %c19 = arith.constant 19 : index
    %c0_3 = arith.constant 0 : index
    %c0_4 = arith.constant 0 : index
    %3 = vector.load %arg9[%c19, %c0_3, %c0_4] : memref<22x27x4xf32, #tpu.memory_space<vmem>>, vector<3x27x4xf32>
    tpu.vector_store %arg9[%c19, %c0_3, %c0_4], %2 {strides = array<i32>} : memref<22x27x4xf32, #tpu.memory_space<vmem>>, vector<3x27x4xf32>,
    %cst_5 = arith.constant 0.000000e+00 : f32
    %4 = vector.broadcast %cst_5 : f32 to vector<16x8x4xf32>
    %c3 = arith.constant 3 : index
    %c0_6 = arith.constant 0 : index
    %c0_7 = arith.constant 0 : index
    %5 = vector.load %arg9[%c3, %c0_6, %c0_7] : memref<22x27x4xf32, #tpu.memory_space<vmem>>, vector<16x8x4xf32>
    tpu.vector_store %arg9[%c3, %c0_6, %c0_7], %4 {strides = array<i32>} : memref<22x27x4xf32, #tpu.memory_space<vmem>>, vector<16x8x4xf32>,
    %cst_8 = arith.constant 0.000000e+00 : f32
    %6 = vector.broadcast %cst_8 : f32 to vector<16x3x4xf32>
    %c3_9 = arith.constant 3 : index
    %c24 = arith.constant 24 : index
    %c0_10 = arith.constant 0 : index
    %7 = vector.load %arg9[%c3_9, %c24, %c0_10] : memref<22x27x4xf32, #tpu.memory_space<vmem>>, vector<16x3x4xf32>
    tpu.vector_store %arg9[%c3_9, %c24, %c0_10], %6 {strides = array<i32>} : memref<22x27x4xf32, #tpu.memory_space<vmem>>, vector<16x3x4xf32>,
    %c0_11 = arith.constant 0 : index
    %c0_12 = arith.constant 0 : index
    %c0_13 = arith.constant 0 : index
    %c0_14 = arith.constant 0 : index
    %8 = vector.load %arg1[%c0_11, %c0_12, %c0_13, %c0_14] : memref<1x16x16x4xf32, #tpu.memory_space<vmem>>, vector<1x16x16x4xf32>
    %9 = vector.shape_cast %8 : vector<1x16x16x4xf32> to vector<16x16x4xf32>
    %cst_15 = arith.constant 0.000000e+00 : f32
    %10 = vector.broadcast %cst_15 : f32 to vector<16x16x4xf32>
    %11 = arith.maximumf %9, %10 : vector<16x16x4xf32>
    %c3_16 = arith.constant 3 : index
    %c8 = arith.constant 8 : index
    %c0_17 = arith.constant 0 : index
    %12 = vector.load %arg9[%c3_16, %c8, %c0_17] : memref<22x27x4xf32, #tpu.memory_space<vmem>>, vector<16x16x4xf32>
    tpu.vector_store %arg9[%c3_16, %c8, %c0_17], %11 {strides = array<i32>} : memref<22x27x4xf32, #tpu.memory_space<vmem>>, vector<16x16x4xf32>,
    %c2 = arith.constant 2 : index
    %c7 = arith.constant 7 : index
    %c0_18 = arith.constant 0 : index
    %13 = vector.load %arg9[%c2, %c7, %c0_18] : memref<22x27x4xf32, #tpu.memory_space<vmem>>, vector<16x16x4xf32>
    %c2_19 = arith.constant 2 : index
    %c8_20 = arith.constant 8 : index
    %c0_21 = arith.constant 0 : index
    %14 = vector.load %arg9[%c2_19, %c8_20, %c0_21] : memref<22x27x4xf32, #tpu.memory_space<vmem>>, vector<16x16x4xf32>
    %c2_22 = arith.constant 2 : index
    %c9 = arith.constant 9 : index
    %c0_23 = arith.constant 0 : index
    %15 = vector.load %arg9[%c2_22, %c9, %c0_23] : memref<22x27x4xf32, #tpu.memory_space<vmem>>, vector<16x16x4xf32>
    %c3_24 = arith.constant 3 : index
    %c7_25 = arith.constant 7 : index
    %c0_26 = arith.constant 0 : index
    %16 = vector.load %arg9[%c3_24, %c7_25, %c0_26] : memref<22x27x4xf32, #tpu.memory_space<vmem>>, vector<16x16x4xf32>
    %c3_27 = arith.constant 3 : index
    %c8_28 = arith.constant 8 : index
    %c0_29 = arith.constant 0 : index
    %17 = vector.load %arg9[%c3_27, %c8_28, %c0_29] : memref<22x27x4xf32, #tpu.memory_space<vmem>>, vector<16x16x4xf32>
    %c3_30 = arith.constant 3 : index
    %c9_31 = arith.constant 9 : index
    %c0_32 = arith.constant 0 : index
    %18 = vector.load %arg9[%c3_30, %c9_31, %c0_32] : memref<22x27x4xf32, #tpu.memory_space<vmem>>, vector<16x16x4xf32>
    %c4 = arith.constant 4 : index
    %c7_33 = arith.constant 7 : index
    %c0_34 = arith.constant 0 : index
    %19 = vector.load %arg9[%c4, %c7_33, %c0_34] : memref<22x27x4xf32, #tpu.memory_space<vmem>>, vector<16x16x4xf32>
    %c4_35 = arith.constant 4 : index
    %c8_36 = arith.constant 8 : index
    %c0_37 = arith.constant 0 : index
    %20 = vector.load %arg9[%c4_35, %c8_36, %c0_37] : memref<22x27x4xf32, #tpu.memory_space<vmem>>, vector<16x16x4xf32>
    %c4_38 = arith.constant 4 : index
    %c9_39 = arith.constant 9 : index
    %c0_40 = arith.constant 0 : index
    %21 = vector.load %arg9[%c4_38, %c9_39, %c0_40] : memref<22x27x4xf32, #tpu.memory_space<vmem>>, vector<16x16x4xf32>
    %22 = tpu.concatenate %13, %14, %15, %16, %17, %18, %19, %20, %21 in 2 : vector<16x16x4xf32>, vector<16x16x4xf32>, vector<16x16x4xf32>, vector<16x16x4xf32>, vector<16x16x4xf32>, vector<16x16x4xf32>, vector<16x16x4xf32>, vector<16x16x4xf32>, vector<16x16x4xf32> -> vector<16x16x36xf32>
    %23 = vector.shape_cast %22 : vector<16x16x36xf32> to vector<256x36xf32>
    %c0_41 = arith.constant 0 : index
    %c0_42 = arith.constant 0 : index
    %24 = vector.load %arg2[%c0_41, %c0_42] : memref<36x4xf32, #tpu.memory_space<vmem>>, vector<36x4xf32>
    %cst_43 = arith.constant dense<0.000000e+00> : vector<256x4xf32>
    %25 = tpu.matmul %23, %24, %cst_43 {dimension_numbers = #tpu.dot_dimension_numbers<[1], [0], [0], [1], [0, 0, 1, 1], [], []>} : vector<256x36xf32>, vector<36x4xf32>, vector<256x4xf32> -> vector<256x4xf32>
    %c0_44 = arith.constant 0 : index
    %c0_45 = arith.constant 0 : index
    %26 = vector.load %arg3[%c0_44, %c0_45] : memref<1x4xf32, #tpu.memory_space<vmem>>, vector<1x4xf32>
    %27 = vector.broadcast %26 : vector<1x4xf32> to vector<256x4xf32>
    %28 = arith.addf %25, %27 : vector<256x4xf32>
    %29 = vector.shape_cast %28 : vector<256x4xf32> to vector<16x16x4xf32>
    %c3_46 = arith.constant 3 : index
    %c8_47 = arith.constant 8 : index
    %c0_48 = arith.constant 0 : index
    %30 = vector.load %arg9[%c3_46, %c8_47, %c0_48] : memref<22x27x4xf32, #tpu.memory_space<vmem>>, vector<16x16x4xf32>
    tpu.vector_store %arg9[%c3_46, %c8_47, %c0_48], %29 {strides = array<i32>} : memref<22x27x4xf32, #tpu.memory_space<vmem>>, vector<16x16x4xf32>,
    %c0_49 = arith.constant 0 : index
    %c5 = arith.constant 5 : index
    %c0_50 = arith.constant 0 : index
    %31 = vector.load %arg9[%c0_49, %c5, %c0_50] : memref<22x27x4xf32, #tpu.memory_space<vmem>>, vector<16x16x4xf32>
    %c0_51 = arith.constant 0 : index
    %c8_52 = arith.constant 8 : index
    %c0_53 = arith.constant 0 : index
    %32 = vector.load %arg9[%c0_51, %c8_52, %c0_53] : memref<22x27x4xf32, #tpu.memory_space<vmem>>, vector<16x16x4xf32>
    %c0_54 = arith.constant 0 : index
    %c11 = arith.constant 11 : index
    %c0_55 = arith.constant 0 : index
    %33 = vector.load %arg9[%c0_54, %c11, %c0_55] : memref<22x27x4xf32, #tpu.memory_space<vmem>>, vector<16x16x4xf32>
    %c3_56 = arith.constant 3 : index
    %c5_57 = arith.constant 5 : index
    %c0_58 = arith.constant 0 : index
    %34 = vector.load %arg9[%c3_56, %c5_57, %c0_58] : memref<22x27x4xf32, #tpu.memory_space<vmem>>, vector<16x16x4xf32>
    %c3_59 = arith.constant 3 : index
    %c8_60 = arith.constant 8 : index
    %c0_61 = arith.constant 0 : index
    %35 = vector.load %arg9[%c3_59, %c8_60, %c0_61] : memref<22x27x4xf32, #tpu.memory_space<vmem>>, vector<16x16x4xf32>
    %c3_62 = arith.constant 3 : index
    %c11_63 = arith.constant 11 : index
    %c0_64 = arith.constant 0 : index
    %36 = vector.load %arg9[%c3_62, %c11_63, %c0_64] : memref<22x27x4xf32, #tpu.memory_space<vmem>>, vector<16x16x4xf32>
    %c6 = arith.constant 6 : index
    %c5_65 = arith.constant 5 : index
    %c0_66 = arith.constant 0 : index
    %37 = vector.load %arg9[%c6, %c5_65, %c0_66] : memref<22x27x4xf32, #tpu.memory_space<vmem>>, vector<16x16x4xf32>
    %c6_67 = arith.constant 6 : index
    %c8_68 = arith.constant 8 : index
    %c0_69 = arith.constant 0 : index
    %38 = vector.load %arg9[%c6_67, %c8_68, %c0_69] : memref<22x27x4xf32, #tpu.memory_space<vmem>>, vector<16x16x4xf32>
    %c6_70 = arith.constant 6 : index
    %c11_71 = arith.constant 11 : index
    %c0_72 = arith.constant 0 : index
    %39 = vector.load %arg9[%c6_70, %c11_71, %c0_72] : memref<22x27x4xf32, #tpu.memory_space<vmem>>, vector<16x16x4xf32>
    %40 = tpu.concatenate %31, %32, %33, %34, %35, %36, %37, %38, %39 in 2 : vector<16x16x4xf32>, vector<16x16x4xf32>, vector<16x16x4xf32>, vector<16x16x4xf32>, vector<16x16x4xf32>, vector<16x16x4xf32>, vector<16x16x4xf32>, vector<16x16x4xf32>, vector<16x16x4xf32> -> vector<16x16x36xf32>
    %41 = vector.shape_cast %40 : vector<16x16x36xf32> to vector<256x36xf32>
    %c0_73 = arith.constant 0 : index
    %c0_74 = arith.constant 0 : index
    %42 = vector.load %arg4[%c0_73, %c0_74] : memref<36x4xf32, #tpu.memory_space<vmem>>, vector<36x4xf32>
    %cst_75 = arith.constant dense<0.000000e+00> : vector<256x4xf32>
    %43 = tpu.matmul %41, %42, %cst_75 {dimension_numbers = #tpu.dot_dimension_numbers<[1], [0], [0], [1], [0, 0, 1, 1], [], []>} : vector<256x36xf32>, vector<36x4xf32>, vector<256x4xf32> -> vector<256x4xf32>
    %c0_76 = arith.constant 0 : index
    %c0_77 = arith.constant 0 : index
    %44 = vector.load %arg5[%c0_76, %c0_77] : memref<1x4xf32, #tpu.memory_space<vmem>>, vector<1x4xf32>
    %45 = vector.broadcast %44 : vector<1x4xf32> to vector<256x4xf32>
    %46 = arith.addf %43, %45 : vector<256x4xf32>
    %47 = vector.shape_cast %46 : vector<256x4xf32> to vector<16x16x4xf32>
    %c3_78 = arith.constant 3 : index
    %c8_79 = arith.constant 8 : index
    %c0_80 = arith.constant 0 : index
    %48 = vector.load %arg9[%c3_78, %c8_79, %c0_80] : memref<22x27x4xf32, #tpu.memory_space<vmem>>, vector<16x16x4xf32>
    tpu.vector_store %arg9[%c3_78, %c8_79, %c0_80], %47 {strides = array<i32>} : memref<22x27x4xf32, #tpu.memory_space<vmem>>, vector<16x16x4xf32>,
    %c2_81 = arith.constant 2 : index
    %c7_82 = arith.constant 7 : index
    %c0_83 = arith.constant 0 : index
    %49 = vector.load %arg9[%c2_81, %c7_82, %c0_83] : memref<22x27x4xf32, #tpu.memory_space<vmem>>, vector<16x16x4xf32>
    %c2_84 = arith.constant 2 : index
    %c8_85 = arith.constant 8 : index
    %c0_86 = arith.constant 0 : index
    %50 = vector.load %arg9[%c2_84, %c8_85, %c0_86] : memref<22x27x4xf32, #tpu.memory_space<vmem>>, vector<16x16x4xf32>
    %c2_87 = arith.constant 2 : index
    %c9_88 = arith.constant 9 : index
    %c0_89 = arith.constant 0 : index
    %51 = vector.load %arg9[%c2_87, %c9_88, %c0_89] : memref<22x27x4xf32, #tpu.memory_space<vmem>>, vector<16x16x4xf32>
    %c3_90 = arith.constant 3 : index
    %c7_91 = arith.constant 7 : index
    %c0_92 = arith.constant 0 : index
    %52 = vector.load %arg9[%c3_90, %c7_91, %c0_92] : memref<22x27x4xf32, #tpu.memory_space<vmem>>, vector<16x16x4xf32>
    %c3_93 = arith.constant 3 : index
    %c8_94 = arith.constant 8 : index
    %c0_95 = arith.constant 0 : index
    %53 = vector.load %arg9[%c3_93, %c8_94, %c0_95] : memref<22x27x4xf32, #tpu.memory_space<vmem>>, vector<16x16x4xf32>
    %c3_96 = arith.constant 3 : index
    %c9_97 = arith.constant 9 : index
    %c0_98 = arith.constant 0 : index
    %54 = vector.load %arg9[%c3_96, %c9_97, %c0_98] : memref<22x27x4xf32, #tpu.memory_space<vmem>>, vector<16x16x4xf32>
    %c4_99 = arith.constant 4 : index
    %c7_100 = arith.constant 7 : index
    %c0_101 = arith.constant 0 : index
    %55 = vector.load %arg9[%c4_99, %c7_100, %c0_101] : memref<22x27x4xf32, #tpu.memory_space<vmem>>, vector<16x16x4xf32>
    %c4_102 = arith.constant 4 : index
    %c8_103 = arith.constant 8 : index
    %c0_104 = arith.constant 0 : index
    %56 = vector.load %arg9[%c4_102, %c8_103, %c0_104] : memref<22x27x4xf32, #tpu.memory_space<vmem>>, vector<16x16x4xf32>
    %c4_105 = arith.constant 4 : index
    %c9_106 = arith.constant 9 : index
    %c0_107 = arith.constant 0 : index
    %57 = vector.load %arg9[%c4_105, %c9_106, %c0_107] : memref<22x27x4xf32, #tpu.memory_space<vmem>>, vector<16x16x4xf32>
    %58 = tpu.concatenate %49, %50, %51, %52, %53, %54, %55, %56, %57 in 2 : vector<16x16x4xf32>, vector<16x16x4xf32>, vector<16x16x4xf32>, vector<16x16x4xf32>, vector<16x16x4xf32>, vector<16x16x4xf32>, vector<16x16x4xf32>, vector<16x16x4xf32>, vector<16x16x4xf32> -> vector<16x16x36xf32>
    %59 = vector.shape_cast %58 : vector<16x16x36xf32> to vector<256x36xf32>
    %c0_108 = arith.constant 0 : index
    %c0_109 = arith.constant 0 : index
    %60 = vector.load %arg6[%c0_108, %c0_109] : memref<36x4xf32, #tpu.memory_space<vmem>>, vector<36x4xf32>
    %cst_110 = arith.constant dense<0.000000e+00> : vector<256x4xf32>
    %61 = tpu.matmul %59, %60, %cst_110 {dimension_numbers = #tpu.dot_dimension_numbers<[1], [0], [0], [1], [0, 0, 1, 1], [], []>} : vector<256x36xf32>, vector<36x4xf32>, vector<256x4xf32> -> vector<256x4xf32>
    %c0_111 = arith.constant 0 : index
    %c0_112 = arith.constant 0 : index
    %62 = vector.load %arg7[%c0_111, %c0_112] : memref<1x4xf32, #tpu.memory_space<vmem>>, vector<1x4xf32>
    %63 = vector.broadcast %62 : vector<1x4xf32> to vector<256x4xf32>
    %64 = arith.addf %61, %63 : vector<256x4xf32>
    %65 = vector.shape_cast %64 : vector<256x4xf32> to vector<16x16x4xf32>
    %66 = arith.negf %65 : vector<16x16x4xf32>
    %67 = math.exp %66 : vector<16x16x4xf32>
    %cst_113 = arith.constant 1.000000e+00 : f32
    %68 = vector.broadcast %cst_113 : f32 to vector<16x16x4xf32>
    %69 = arith.addf %68, %67 : vector<16x16x4xf32>
    %70 = arith.divf %68, %69 : vector<16x16x4xf32>
    %71 = arith.mulf %11, %70 : vector<16x16x4xf32>
    %c0_114 = arith.constant 0 : index
    %c0_115 = arith.constant 0 : index
    %c0_116 = arith.constant 0 : index
    %c0_117 = arith.constant 0 : index
    %72 = vector.load %arg8[%c0_114, %c0_115, %c0_116, %c0_117] : memref<1x16x16x4xf32, #tpu.memory_space<vmem>>, vector<1x16x16x4xf32>
    %73 = vector.shape_cast %72 : vector<1x16x16x4xf32> to vector<16x16x4xf32>
    %74 = vector.shape_cast %71 : vector<16x16x4xf32> to vector<1x16x16x4xf32>
    tpu.vector_store %arg8[%c0_114, %c0_115, %c0_116, %c0_117], %74 {strides = array<i32>} : memref<1x16x16x4xf32, #tpu.memory_space<vmem>>, vector<1x16x16x4xf32>,
    return
  }
  func.func @transform_0(%arg0: i32) -> (i32, i32, i32, i32) {
    %c0_i32 = arith.constant 0 : i32
    %c0_i32_0 = arith.constant 0 : i32
    %c0_i32_1 = arith.constant 0 : i32
    %c0_i32_2 = arith.constant 0 : i32
    return %arg0, %c0_i32, %c0_i32_0, %c0_i32_1 : i32, i32, i32, i32
  }
  func.func @transform_1(%arg0: i32) -> (i32, i32) {
    %c0_i32 = arith.constant 0 : i32
    %c0_i32_0 = arith.constant 0 : i32
    %c0_i32_1 = arith.constant 0 : i32
    return %c0_i32, %c0_i32_0 : i32, i32
  }
  func.func @transform_2(%arg0: i32) -> (i32, i32) {
    %c0_i32 = arith.constant 0 : i32
    %c0_i32_0 = arith.constant 0 : i32
    %c0_i32_1 = arith.constant 0 : i32
    return %c0_i32, %c0_i32_0 : i32, i32
  }
  func.func @transform_3(%arg0: i32) -> (i32, i32) {
    %c0_i32 = arith.constant 0 : i32
    %c0_i32_0 = arith.constant 0 : i32
    %c0_i32_1 = arith.constant 0 : i32
    return %c0_i32, %c0_i32_0 : i32, i32
  }
  func.func @transform_4(%arg0: i32) -> (i32, i32) {
    %c0_i32 = arith.constant 0 : i32
    %c0_i32_0 = arith.constant 0 : i32
    %c0_i32_1 = arith.constant 0 : i32
    return %c0_i32, %c0_i32_0 : i32, i32
  }
  func.func @transform_5(%arg0: i32) -> (i32, i32) {
    %c0_i32 = arith.constant 0 : i32
    %c0_i32_0 = arith.constant 0 : i32
    %c0_i32_1 = arith.constant 0 : i32
    return %c0_i32, %c0_i32_0 : i32, i32
  }
  func.func @transform_6(%arg0: i32) -> (i32, i32) {
    %c0_i32 = arith.constant 0 : i32
    %c0_i32_0 = arith.constant 0 : i32
    %c0_i32_1 = arith.constant 0 : i32
    return %c0_i32, %c0_i32_0 : i32, i32
  }
  func.func @transform_7(%arg0: i32) -> (i32, i32, i32, i32) {
    %c0_i32 = arith.constant 0 : i32
    %c0_i32_0 = arith.constant 0 : i32
    %c0_i32_1 = arith.constant 0 : i32
    %c0_i32_2 = arith.constant 0 : i32
    return %arg0, %c0_i32, %c0_i32_0, %c0_i32_1 : i32, i32, i32, i32
  }
}

</mosaic_0001>

<bundles_post_ra>
// kernel: tpu_custom_call.1
= control target key start
LH: loop header
LB: loop body
LE: loop exit
PB: predicated region body
PF: predicated region fallthrough
CT: control target
= control target key end

     0   :  { %s7254_s24 = smov 0   ;;  %s12080_s0 = inlined_call_operand.vmem [shape: f32[2,16,16,4], index: 0, kind: input, shape index: {}]   ;;  %s12081_s1 = inlined_call_operand.vmem [shape: f32[36,4], index: 1, kind: input, shape index: {}]   ;;  %s12082_s2 = inlined_call_operand.vmem [shape: f32[1,4], index: 2, kind: input, shape index: {}]   ;;  %s12083_s3 = inlined_call_operand.vmem [shape: f32[36,4], index: 3, kind: input, shape index: {}]   ;;  %s12084_s4 = inlined_call_operand.vmem [shape: f32[1,4], index: 4, kind: input, shape index: {}]   ;;  %s12085_s5 = inlined_call_operand.vmem [shape: f32[36,4], index: 5, kind: input, shape index: {}]   ;;  %s12086_s6 = inlined_call_operand.vmem [shape: f32[1,4], index: 6, kind: input, shape index: {}]   ;;  %s12087_s7 = inlined_call_operand.vmem [shape: f32[2,16,16,4], index: 7, kind: output, shape index: {}]  }
   0x1 LB: > { %s6534_s25 = sadd.s32 4294967295, %s7203_s24   ;;  %p6538_p0 = scmp.ge.s32.totalorder %s7203_s24, 1  ;;  %s7203_s24 = sphi %s7254_s24, %s17_s24  }
   0x2   : > { %p237_p1 = scmp.lt.s32.totalorder %s7203_s24, 3 }
   0x4   : > { %p238_p2 = pnand %p6538_p0, %p237_p1 }
   0x6   : > { %241 = sbr.rel (%p238_p2) target bundleno = 2481 (0x9b1), region = 48 }
   0xd   : > { %vm279_vm0 = vcmask 31744   ;;  %p7264_p3 = scmp.lt.s32.totalorder %s6534_s25, 1  ;;  %vm283_vm1 = vcmask 26624   ;;  %v7205_v0 = vmov 0.0   ;;  %s7206_s8 = smov 4   ;;  %vm2121_vm2 = vcmask 1043456  }
   0xe   : > { %290 = vst.msk [vmem:[#allocation2 + $0x48] sm:$0xff] %vm279_vm0, %v7205_v0  ;;  %280 = vst.msk [vmem:[#allocation2] sm:$0xff] %vm279_vm0, %v7205_v0  ;;  %s7207_s9 = smov 8   ;;  %s7208_s10 = smov 12   ;;  %vm1781_vm3 = vcmask 64512   ;;  %vm1814_vm4 = vcmask 97280  }
   0xf   : > { %281 = vst.msk [vmem:[#allocation2 + $0x8] sm:$0xff] %vm279_vm0, %v7205_v0  ;;  %282 = vst.msk [vmem:[#allocation2 + $0x10] sm:$0xff] %vm279_vm0, %v7205_v0  ;;  %s13120_s25 = smov (!%p7264_p3, %s6534_s25), 1  ;;  %s7209_s11 = smov 16   ;;  %vm1847_vm5 = vcmask 130048   ;;  %vm1880_vm6 = vcmask 162816  }
  0x10   : > { %285 = vst.msk [vmem:[#allocation2 + $0x20] sm:$0xff] %vm279_vm0, %v7205_v0  ;;  %286 = vst.msk [vmem:[#allocation2 + $0x28] sm:$0xff] %vm279_vm0, %v7205_v0  ;;  %s6679_s27 = sshll.u32 %s13120_s25, 8  ;;  %s7210_s12 = smov 20   ;;  %vm1913_vm7 = vcmask 195584   ;;  %vm1946_vm8 = vcmask 228352  }
  0x11   : > { %287 = vst.msk [vmem:[#allocation2 + $0x30] sm:$0xff] %vm279_vm0, %v7205_v0  ;;  %289 = vst.msk [vmem:[#allocation2 + $0x40] sm:$0xff] %vm279_vm0, %v7205_v0  ;;  %s7336_s30 = scalar_lea.vmem %s12080_s0, %s6679_s27  ;;  %s7211_s13 = smov 24   ;;  %vm1979_vm9 = vcmask 261120   ;;  %vm2024_vm10 = vcmask 293888  }
  0x12   : > { %291 = vst.msk [vmem:[#allocation2 + $0x50] sm:$0xff] %vm279_vm0, %v7205_v0  ;;  %294 = vst.msk [vmem:[#allocation2 + $0x260] sm:$0xff] %vm279_vm0, %v7205_v0  ;;  %v7339_v1 = vld [vmem:[%s7336_s30 + $0x10] sm:$0xff]  ;;  %v7342_v2 = vld [vmem:[%s7336_s30] sm:$0xff]  ;;  %s7212_s14 = smov 28   ;;  %s7213_s28 = smov 32  }
  0x13   : > { %295 = vst.msk [vmem:[#allocation2 + $0x268] sm:$0xff] %vm279_vm0, %v7205_v0  ;;  %296 = vst.msk [vmem:[#allocation2 + $0x270] sm:$0xff] %vm279_vm0, %v7205_v0  ;;  %v7345_v3 = vld [vmem:[%s7336_s30 + $0x20] sm:$0xff]  ;;  %v12114_v4 = vmax.f32 %v7339_v1, 0.0  ;;  %v12117_v5 = vmax.f32 %v7342_v2, 0.0  ;;  %v7351_v7 = vld [vmem:[%s7336_s30 + $0x8] sm:$0xff] }
  0x14   : > { %298 = vst.msk [vmem:[#allocation2 + $0x280] sm:$0xff] %vm279_vm0, %v7205_v0  ;;  %299 = vst.msk [vmem:[#allocation2 + $0x288] sm:$0xff] %vm279_vm0, %v7205_v0  ;;  %v12112_v6 = vmax.f32 %v7345_v3, 0.0  ;;  %v7354_v8 = vld [vmem:[%s7336_s30 + $0x30] sm:$0xff]  ;;  %v7357_v9 = vld [vmem:[%s7336_s30 + $0x18] sm:$0xff]  ;;  %v12118_v12 = vmax.f32 %v7351_v7, 0.0 }
  0x15   : > { %300 = vst.msk [vmem:[#allocation2 + $0x290] sm:$0xff] %vm279_vm0, %v7205_v0  ;;  %302 = vst.msk [vmem:[#allocation2 + $0x2a0] sm:$0xff] %vm279_vm0, %v7205_v0  ;;  %v468_v10 = vld [vmem:[#allocation2 + $0x48] sm:$0xff]  ;;  %v12110_v13 = vmax.f32 %v7354_v8, 0.0  ;;  %v12115_v14 = vmax.f32 %v7357_v9, 0.0  ;;  %v7363_v15 = vld [vmem:[%s7336_s30 + $0x40] sm:$0xff] }
  0x16   : > { %303 = vst.msk [vmem:[#allocation2 + $0x2a8] sm:$0xff] %vm279_vm0, %v7205_v0  ;;  %304 = vst.msk [vmem:[#allocation2 + $0x2b0] sm:$0xff] %vm279_vm0, %v7205_v0  ;;  %757 = vrot.lane.b32.xlu0 %v468_v10, %s7206_s8  ;;  %v12108_v16 = vmax.f32 %v7363_v15, 0.0  ;;  %v7377_v17 = vld [vmem:[%s7336_s30 + $0x28] sm:$0xff]  ;;  %v7380_v18 = vld [vmem:[%s7336_s30 + $0x50] sm:$0xff] }
  0x17   : > { %307 = vst.msk [vmem:[#allocation2 + $0x60] sm:$0xff] %vm279_vm0, %v7205_v0  ;;  %308 = vst.msk [vmem:[#allocation2 + $0x80] sm:$0xff] %vm279_vm0, %v7205_v0  ;;  %v7383_v19 = vld [vmem:[%s7336_s30 + $0x38] sm:$0xff]  ;;  %v12113_v20 = vmax.f32 %v7377_v17, 0.0  ;;  %v12106_v21 = vmax.f32 %v7380_v18, 0.0  ;;  %v7398_v23 = vld [vmem:[%s7336_s30 + $0x60] sm:$0xff] }
  0x18   : > { %309 = vst.msk [vmem:[#allocation2 + $0xa0] sm:$0xff] %vm279_vm0, %v7205_v0  ;;  %310 = vst.msk [vmem:[#allocation2 + $0xc0] sm:$0xff] %vm279_vm0, %v7205_v0  ;;  %v12111_v22 = vmax.f32 %v7383_v19, 0.0  ;;  %v7401_v24 = vld [vmem:[%s7336_s30 + $0x48] sm:$0xff]  ;;  %v7404_v25 = vld [vmem:[%s7336_s30 + $0x70] sm:$0xff]  ;;  %v12104_v26 = vmax.f32 %v7398_v23, 0.0 }
  0x19   : > { %311 = vst.msk [vmem:[#allocation2 + $0xe0] sm:$0xff] %vm279_vm0, %v7205_v0  ;;  %312 = vst.msk [vmem:[#allocation2 + $0x100] sm:$0xff] %vm279_vm0, %v7205_v0  ;;  %v469_v11 = vld [vmem:[#allocation2 + $0x50] sm:$0xff]  ;;  %v12109_v27 = vmax.f32 %v7401_v24, 0.0  ;;  %v12102_v28 = vmax.f32 %v7404_v25, 0.0  ;;  %v7413_v29 = vld [vmem:[%s7336_s30 + $0x58] sm:$0xff] }
  0x1a   : > { %313 = vst.msk [vmem:[#allocation2 + $0x120] sm:$0xff] %vm279_vm0, %v7205_v0  ;;  %314 = vst.msk [vmem:[#allocation2 + $0x140] sm:$0xff] %vm279_vm0, %v7205_v0  ;;  %v7416_v30 = vld [vmem:[%s7336_s30 + $0x80] sm:$0xff]  ;;  %v7419_v31 = vld [vmem:[%s7336_s30 + $0x68] sm:$0xff]  ;;  %v12107_v32 = vmax.f32 %v7413_v29, 0.0  ;;  %759 = vrot.lane.b32.xlu0 %v469_v11, %s7206_s8 }
  0x1b   : > { %315 = vst.msk [vmem:[#allocation2 + $0x160] sm:$0xff] %vm279_vm0, %v7205_v0  ;;  %316 = vst.msk [vmem:[#allocation2 + $0x180] sm:$0xff] %vm279_vm0, %v7205_v0  ;;  %v12100_v33 = vmax.f32 %v7416_v30, 0.0  ;;  %v12105_v34 = vmax.f32 %v7419_v31, 0.0  ;;  %v7434_v35 = vld [vmem:[%s7336_s30 + $0x90] sm:$0xff]  ;;  %v7437_v36 = vld [vmem:[%s7336_s30 + $0x78] sm:$0xff] }
  0x1c   : > { %317 = vst.msk [vmem:[#allocation2 + $0x1a0] sm:$0xff] %vm279_vm0, %v7205_v0  ;;  %318 = vst.msk [vmem:[#allocation2 + $0x1c0] sm:$0xff] %vm279_vm0, %v7205_v0  ;;  %v7440_v37 = vld [vmem:[%s7336_s30 + $0xa0] sm:$0xff]  ;;  %v12098_v38 = vmax.f32 %v7434_v35, 0.0  ;;  %v12103_v39 = vmax.f32 %v7437_v36, 0.0  ;;  %v7456_v41 = vld [vmem:[%s7336_s30 + $0x88] sm:$0xff] }
  0x1d   : > { %319 = vst.msk [vmem:[#allocation2 + $0x1e0] sm:$0xff] %vm279_vm0, %v7205_v0  ;;  %320 = vst.msk [vmem:[#allocation2 + $0x200] sm:$0xff] %vm279_vm0, %v7205_v0  ;;  %v12095_v40 = vmax.f32 %v7440_v37, 0.0  ;;  %v7459_v42 = vld [vmem:[%s7336_s30 + $0xb0] sm:$0xff]  ;;  %v7462_v43 = vld [vmem:[%s7336_s30 + $0x98] sm:$0xff]  ;;  %v12101_v44 = vmax.f32 %v7456_v41, 0.0 }
  0x1e   : > { %321 = vst.msk [vmem:[#allocation2 + $0x220] sm:$0xff] %vm279_vm0, %v7205_v0  ;;  %322 = vst.msk [vmem:[#allocation2 + $0x240] sm:$0xff] %vm279_vm0, %v7205_v0  ;;  %v12093_v45 = vmax.f32 %v7459_v42, 0.0  ;;  %v12099_v46 = vmax.f32 %v7462_v43, 0.0  ;;  %v7477_v47 = vld [vmem:[%s7336_s30 + $0xc0] sm:$0xff]  ;;  %v7480_v48 = vld [vmem:[%s7336_s30 + $0xa8] sm:$0xff] }
  0x1f   : > { %292 = vst.msk [vmem:[#allocation2 + $0x58] sm:$0x7] %vm283_vm1, %v7205_v0  ;;  %284 = vst.msk [vmem:[#allocation2 + $0x18] sm:$0x7] %vm283_vm1, %v7205_v0  ;;  %v7483_v49 = vld [vmem:[%s7336_s30 + $0xd0] sm:$0xff]  ;;  %v12090_v50 = vmax.f32 %v7477_v47, 0.0 }
  0x20   : > { %288 = vst.msk [vmem:[#allocation2 + $0x38] sm:$0x7] %vm283_vm1, %v7205_v0  ;;  %297 = vst.msk [vmem:[#allocation2 + $0x278] sm:$0x7] %vm283_vm1, %v7205_v0  ;;  %v12097_v51 = vmax.f32 %v7480_v48, 0.0  ;;  %v12089_v52 = vmax.f32 %v7483_v49, 0.0 }
  0x21   : > { %301 = vst.msk [vmem:[#allocation2 + $0x298] sm:$0x7] %vm283_vm1, %v7205_v0  ;;  %305 = vst.msk [vmem:[#allocation2 + $0x2b8] sm:$0x7] %vm283_vm1, %v7205_v0  ;;  %v7498_v53 = vld [vmem:[%s7336_s30 + $0xb8] sm:$0xff]  ;;  %v7501_v54 = vld [vmem:[%s7336_s30 + $0xe0] sm:$0xff] }
  0x22   : > { %323 = vst.msk [vmem:[#allocation2 + $0x78] sm:$0x7] %vm283_vm1, %v7205_v0  ;;  %324 = vst.msk [vmem:[#allocation2 + $0x98] sm:$0x7] %vm283_vm1, %v7205_v0  ;;  %v7504_v55 = vld [vmem:[%s7336_s30 + $0xc8] sm:$0xff]  ;;  %v12094_v58 = vmax.f32 %v7498_v53, 0.0 }
  0x23   : > { %325 = vst.msk [vmem:[#allocation2 + $0xb8] sm:$0x7] %vm283_vm1, %v7205_v0  ;;  %326 = vst.msk [vmem:[#allocation2 + $0xd8] sm:$0x7] %vm283_vm1, %v7205_v0  ;;  %v12088_v59 = vmax.f32 %v7501_v54, 0.0  ;;  %v12091_v60 = vmax.f32 %v7504_v55, 0.0 }
  0x24   : > { %327 = vst.msk [vmem:[#allocation2 + $0xf8] sm:$0x7] %vm283_vm1, %v7205_v0  ;;  %328 = vst.msk [vmem:[#allocation2 + $0x118] sm:$0x7] %vm283_vm1, %v7205_v0  ;;  %v7549_v63 = vld [vmem:[%s7336_s30 + $0xd8] sm:$0xff] }
  0x25   : > { %329 = vst.msk [vmem:[#allocation2 + $0x138] sm:$0x7] %vm283_vm1, %v7205_v0  ;;  %330 = vst.msk [vmem:[#allocation2 + $0x158] sm:$0x7] %vm283_vm1, %v7205_v0 }
  0x26   : > { %331 = vst.msk [vmem:[#allocation2 + $0x178] sm:$0x7] %vm283_vm1, %v7205_v0  ;;  %332 = vst.msk [vmem:[#allocation2 + $0x198] sm:$0x7] %vm283_vm1, %v7205_v0 }
  0x27   : > { %333 = vst.msk [vmem:[#allocation2 + $0x1b8] sm:$0x7] %vm283_vm1, %v7205_v0  ;;  %334 = vst.msk [vmem:[#allocation2 + $0x1d8] sm:$0x7] %vm283_vm1, %v7205_v0 }
  0x28   : > { %335 = vst.msk [vmem:[#allocation2 + $0x1f8] sm:$0x7] %vm283_vm1, %v7205_v0  ;;  %336 = vst.msk [vmem:[#allocation2 + $0x218] sm:$0x7] %vm283_vm1, %v7205_v0 }
  0x29   : > { %337 = vst.msk [vmem:[#allocation2 + $0x238] sm:$0x7] %vm283_vm1, %v7205_v0  ;;  %338 = vst.msk [vmem:[#allocation2 + $0x258] sm:$0x7] %vm283_vm1, %v7205_v0  ;;  %v12092_v0 = vmax.f32 %v7549_v63, 0.0 }
  0x2a   : > { %12207 = vst [vmem:[#allocation3_spill] sm:$0xff] %v7339_v1  ;;  %12208 = vst [vmem:[#allocation4_spill] sm:$0xff] %v7342_v2 }
  0x2b   : > { %12209 = vst [vmem:[#allocation5_spill] sm:$0xff] %v7345_v3  ;;  %12210 = vst [vmem:[#allocation6_spill] sm:$0xff] %v7351_v7 }
  0x2c   : > { %12211 = vst [vmem:[#allocation7_spill] sm:$0xff] %v7354_v8  ;;  %12212 = vst [vmem:[#allocation8_spill] sm:$0xff] %v7357_v9 }
  0x2d   : > { %12213 = vst [vmem:[#allocation9_spill] sm:$0xff] %v7363_v15  ;;  %405 = vst.msk [vmem:[#allocation2 + $0x88] sm:$0xff] %vm279_vm0, %v12114_v4  ;;  %v7666_v4 = vld [vmem:[%s7336_s30 + $0xf8] sm:$0xff] }
  0x2e   : > { %403 = vst.msk [vmem:[#allocation2 + $0x68] sm:$0xff] %vm279_vm0, %v12117_v5  ;;  %407 = vst.msk [vmem:[#allocation2 + $0xa8] sm:$0xff] %vm279_vm0, %v12112_v6 }
  0x2f   : > { %12214 = vst [vmem:[#allocation10_spill] sm:$0xff] %v7377_v17  ;;  %12215 = vst [vmem:[#allocation11_spill] sm:$0xff] %v7380_v18 }
  0x30   : > { %12216 = vst [vmem:[#allocation12_spill] sm:$0xff] %v7383_v19  ;;  %404 = vst.msk [vmem:[#allocation2 + $0x70] sm:$0xff] %vm279_vm0, %v12118_v12 }
  0x31   : > { %409 = vst.msk [vmem:[#allocation2 + $0xc8] sm:$0xff] %vm279_vm0, %v12110_v13  ;;  %406 = vst.msk [vmem:[#allocation2 + $0x90] sm:$0xff] %vm279_vm0, %v12115_v14  ;;  %v12120_v14 = vmax.f32 %v7666_v4, 0.0 }
  0x32   : > { %12217 = vst [vmem:[#allocation13_spill] sm:$0xff] %v7398_v23  ;;  %12218 = vst [vmem:[#allocation14_spill] sm:$0xff] %v7401_v24 }
  0x33   : > { %12219 = vst [vmem:[#allocation15_spill] sm:$0xff] %v7404_v25  ;;  %411 = vst.msk [vmem:[#allocation2 + $0xe8] sm:$0xff] %vm279_vm0, %v12108_v16  ;;  %v7643_v16 = vld [vmem:[%s7336_s30 + $0xf0] sm:$0xff] }
  0x34   : > { %12220 = vst [vmem:[#allocation16_spill] sm:$0xff] %v7413_v29  ;;  %12221 = vst [vmem:[#allocation17_spill] sm:$0xff] %v7416_v30  ;;  %v7506_v56 = vld [vmem:[#allocation2 + $0x88] sm:$0xff] }
  0x35   : > { %12222 = vst [vmem:[#allocation18_spill] sm:$0xff] %v7419_v31  ;;  %408 = vst.msk [vmem:[#allocation2 + $0xb0] sm:$0xff] %vm279_vm0, %v12113_v20  ;;  %v7508_v57 = vld [vmem:[#allocation2 + $0x68] sm:$0xff]  ;;  %765 = vrot.lane.b32.xlu0 %v7506_v56, %s7206_s8 }
  0x36   : > { %413 = vst.msk [vmem:[#allocation2 + $0x108] sm:$0xff] %vm279_vm0, %v12106_v21  ;;  %410 = vst.msk [vmem:[#allocation2 + $0xd0] sm:$0xff] %vm279_vm0, %v12111_v22  ;;  %761 = vrot.lane.b32.xlu1 %v7508_v57, %s7206_s8  ;;  %v7535_v61 = vld [vmem:[#allocation2 + $0xa8] sm:$0xff] }
  0x37   : > { %12223 = vst [vmem:[#allocation19_spill] sm:$0xff] %v7434_v35  ;;  %12224 = vst [vmem:[#allocation20_spill] sm:$0xff] %v7437_v36  ;;  %v7537_v62 = vld [vmem:[#allocation2 + $0x70] sm:$0xff] }
  0x38   : > { %12225 = vst [vmem:[#allocation21_spill] sm:$0xff] %v7440_v37  ;;  %415 = vst.msk [vmem:[#allocation2 + $0x128] sm:$0xff] %vm279_vm0, %v12104_v26  ;;  %v7559_v10 = vld [vmem:[#allocation2 + $0xc8] sm:$0xff]  ;;  %v7561_v11 = vld [vmem:[#allocation2 + $0x90] sm:$0xff] }
  0x39   : > { %412 = vst.msk [vmem:[#allocation2 + $0xf0] sm:$0xff] %vm279_vm0, %v12109_v27  ;;  %417 = vst.msk [vmem:[#allocation2 + $0x148] sm:$0xff] %vm279_vm0, %v12102_v28  ;;  %769 = vrot.lane.b32.xlu0 %v7535_v61, %s7206_s8  ;;  %v12116_v27 = vmax.f32 %v7643_v16, 0.0  ;;  %v7681_v12 = vld [vmem:[#allocation2 + $0x69] sm:$0xff] }
  0x3a   : > { %12226 = vst [vmem:[#allocation22_spill] sm:$0xff] %v7456_v41  ;;  %12227 = vst [vmem:[#allocation23_spill] sm:$0xff] %v7459_v42  ;;  %763 = vrot.lane.b32.xlu1 %v7537_v62, %s7206_s8 }
  0x3b   : > { %12228 = vst [vmem:[#allocation24_spill] sm:$0xff] %v7462_v43  ;;  %414 = vst.msk [vmem:[#allocation2 + $0x110] sm:$0xff] %vm279_vm0, %v12107_v32 }
  0x3c   : > { %419 = vst.msk [vmem:[#allocation2 + $0x168] sm:$0xff] %vm279_vm0, %v12100_v33  ;;  %416 = vst.msk [vmem:[#allocation2 + $0x130] sm:$0xff] %vm279_vm0, %v12105_v34 }
  0x3d   : > { %12229 = vst [vmem:[#allocation25_spill] sm:$0xff] %v7477_v47  ;;  %12230 = vst [vmem:[#allocation26_spill] sm:$0xff] %v7480_v48  ;;  %773 = vrot.lane.b32.xlu0 %v7559_v10, %s7206_s8 }
  0x3e   : > { %12231 = vst [vmem:[#allocation27_spill] sm:$0xff] %v7483_v49  ;;  %421 = vst.msk [vmem:[#allocation2 + $0x188] sm:$0xff] %vm279_vm0, %v12098_v38  ;;  %767 = vrot.lane.b32.xlu1 %v7561_v11, %s7206_s8  ;;  %v7704_v49 = vld [vmem:[#allocation2 + $0x91] sm:$0xff] }
  0x3f   : > { %418 = vst.msk [vmem:[#allocation2 + $0x150] sm:$0xff] %vm279_vm0, %v12103_v39  ;;  %423 = vst.msk [vmem:[#allocation2 + $0x1a8] sm:$0xff] %vm279_vm0, %v12095_v40 }
  0x40   : > { %12232 = vst [vmem:[#allocation28_spill] sm:$0xff] %v7498_v53  ;;  %12233 = vst [vmem:[#allocation29_spill] sm:$0xff] %v7501_v54  ;;  %v7592_v40 = vld [vmem:[#allocation2 + $0xf0] sm:$0xff] }
  0x41   : > { %12234 = vst [vmem:[#allocation30_spill] sm:$0xff] %v7504_v55  ;;  %420 = vst.msk [vmem:[#allocation2 + $0x170] sm:$0xff] %vm279_vm0, %v12101_v44  ;;  %v7696_v54 = vld [vmem:[#allocation2 + $0x71] sm:$0xff] }
  0x42   : > { %425 = vst.msk [vmem:[#allocation2 + $0x1c8] sm:$0xff] %vm279_vm0, %v12093_v45  ;;  %422 = vst.msk [vmem:[#allocation2 + $0x190] sm:$0xff] %vm279_vm0, %v12099_v46  ;;  %v7584_v45 = vld [vmem:[#allocation2 + $0xd0] sm:$0xff] }
  0x43   : > { %427 = vst.msk [vmem:[#allocation2 + $0x1e8] sm:$0xff] %vm279_vm0, %v12090_v50  ;;  %424 = vst.msk [vmem:[#allocation2 + $0x1b0] sm:$0xff] %vm279_vm0, %v12097_v51  ;;  %v7572_v50 = vld [vmem:[%s7336_s30 + $0xe8] sm:$0xff]  ;;  %v7600_v51 = vld [vmem:[#allocation2 + $0x110] sm:$0xff] }
  0x44   : > { %429 = vst.msk [vmem:[#allocation2 + $0x208] sm:$0xff] %vm279_vm0, %v12089_v52  ;;  %426 = vst.msk [vmem:[#allocation2 + $0x1d0] sm:$0xff] %vm279_vm0, %v12094_v58  ;;  %v7569_v52 = vld [vmem:[#allocation2 + $0xb0] sm:$0xff]  ;;  %v7590_v58 = vld [vmem:[#allocation2 + $0x128] sm:$0xff] }
  0x45   : > { %431 = vst.msk [vmem:[#allocation2 + $0x228] sm:$0xff] %vm279_vm0, %v12088_v59  ;;  %428 = vst.msk [vmem:[#allocation2 + $0x1f0] sm:$0xff] %vm279_vm0, %v12091_v60  ;;  %v7567_v59 = vld [vmem:[#allocation2 + $0xe8] sm:$0xff]  ;;  %v12096_v60 = vmax.f32 %v7572_v50, 0.0  ;;  %771 = vrot.lane.b32.xlu1 %v7569_v52, %s7206_s8  ;;  %v7608_v46 = vld [vmem:[#allocation2 + $0x130] sm:$0xff] }
  0x46   : > { %12235 = vst [vmem:[#allocation31_spill] sm:$0xff] %v7549_v63  ;;  %430 = vst.msk [vmem:[#allocation2 + $0x210] sm:$0xff] %vm279_vm0, %v12092_v0  ;;  %777 = vrot.lane.b32.xlu0 %v7567_v59, %s7206_s8  ;;  %v7582_v0 = vld [vmem:[#allocation2 + $0x108] sm:$0xff]  ;;  %v7616_v44 = vld [vmem:[#allocation2 + $0x150] sm:$0xff] }
  0x47   : > { %12236 = vst [vmem:[#allocation32_spill] sm:$0xff] %v7572_v50  ;;  %432 = vst.msk [vmem:[#allocation2 + $0x230] sm:$0xff] %vm279_vm0, %v12096_v60  ;;  %v7598_v60 = vld [vmem:[#allocation2 + $0x148] sm:$0xff]  ;;  %v7712_v63 = vld [vmem:[#allocation2 + $0xb1] sm:$0xff] }
  0x48   : > { %v7606_v38 = vld [vmem:[#allocation2 + $0x168] sm:$0xff]  ;;  %v7624_v39 = vld [vmem:[#allocation2 + $0x170] sm:$0xff]  ;;  %12237 = vst [vmem:[#allocation33_spill] sm:$0xff] %v7643_v16  ;;  %433 = vst.msk [vmem:[#allocation2 + $0x248] sm:$0xff] %vm279_vm0, %v12116_v27 }
  0x49   : > { %775 = vrot.lane.b32.xlu1 %v7584_v45, %s7206_s8  ;;  %v7614_v33 = vld [vmem:[#allocation2 + $0x188] sm:$0xff]  ;;  %v7632_v34 = vld [vmem:[#allocation2 + $0x190] sm:$0xff]  ;;  %12238 = vst [vmem:[#allocation34_spill] sm:$0xff] %v7666_v4  ;;  %434 = vst.msk [vmem:[#allocation2 + $0x250] sm:$0xff] %vm279_vm0, %v12120_v14 }
  0x4a   : > { %781 = vrot.lane.b32.xlu0 %v7582_v0, %s7206_s8  ;;  %v7622_v28 = vld [vmem:[#allocation2 + $0x1a8] sm:$0xff]  ;;  %v7640_v32 = vld [vmem:[#allocation2 + $0x1b0] sm:$0xff] }
  0x4b   : > { %v7630_v26 = vld [vmem:[#allocation2 + $0x1c8] sm:$0xff]  ;;  %v7655_v22 = vld [vmem:[#allocation2 + $0x1d0] sm:$0xff] }
  0x4c   : > { %v7638_v21 = vld [vmem:[#allocation2 + $0x1e8] sm:$0xff]  ;;  %v7663_v20 = vld [vmem:[#allocation2 + $0x1f0] sm:$0xff] }
  0x4d   : > { %779 = vrot.lane.b32.xlu1 %v7592_v40, %s7206_s8  ;;  %v7653_v13 = vld [vmem:[#allocation2 + $0x208] sm:$0xff]  ;;  %v7676_v5 = vld [vmem:[#allocation2 + $0x210] sm:$0xff] }
  0x4e   : > { %785 = vrot.lane.b32.xlu0 %v7590_v58, %s7206_s8  ;;  %v7661_v6 = vld [vmem:[#allocation2 + $0x228] sm:$0xff]  ;;  %v7683_v16 = vld [vmem:[#allocation2 + $0x230] sm:$0xff] }
  0x4f   : > { %v500_v27 = vld [vmem:[#allocation2 + $0x49] sm:$0xff]  ;;  %v501_v4 = vld [vmem:[#allocation2 + $0x51] sm:$0xff] }
  0x50   : > { %v7689_v14 = vld [vmem:[#allocation2 + $0x89] sm:$0xff]  ;;  %v7720_v55 = vld [vmem:[#allocation2 + $0xd1] sm:$0xff] }
  0x51   : > { %783 = vrot.lane.b32.xlu1 %v7600_v51, %s7206_s8  ;;  %v7702_v50 = vld [vmem:[#allocation2 + $0xc9] sm:$0xff]  ;;  %v7728_v53 = vld [vmem:[#allocation2 + $0xf1] sm:$0xff] }
  0x52   : > { %789 = vrot.lane.b32.xlu0 %v7598_v60, %s7206_s8  ;;  %v7718_v47 = vld [vmem:[#allocation2 + $0x109] sm:$0xff]  ;;  %v7736_v48 = vld [vmem:[#allocation2 + $0x111] sm:$0xff] }
  0x53   : > { %v7726_v42 = vld [vmem:[#allocation2 + $0x129] sm:$0xff]  ;;  %v7744_v43 = vld [vmem:[#allocation2 + $0x131] sm:$0xff] }
  0x54   : > { %v7734_v37 = vld [vmem:[#allocation2 + $0x149] sm:$0xff]  ;;  %v7752_v41 = vld [vmem:[#allocation2 + $0x151] sm:$0xff] }
  0x55   : > { %787 = vrot.lane.b32.xlu1 %v7608_v46, %s7206_s8  ;;  %v7742_v35 = vld [vmem:[#allocation2 + $0x169] sm:$0xff]  ;;  %v7760_v36 = vld [vmem:[#allocation2 + $0x171] sm:$0xff] }
  0x56   : > { %793 = vrot.lane.b32.xlu0 %v7606_v38, %s7206_s8  ;;  %v7750_v30 = vld [vmem:[#allocation2 + $0x189] sm:$0xff]  ;;  %v7768_v31 = vld [vmem:[#allocation2 + $0x191] sm:$0xff] }
  0x57   : > { %v7758_v25 = vld [vmem:[#allocation2 + $0x1a9] sm:$0xff]  ;;  %v7776_v29 = vld [vmem:[#allocation2 + $0x1b1] sm:$0xff] }
  0x58   : > { %v7766_v23 = vld [vmem:[#allocation2 + $0x1c9] sm:$0xff]  ;;  %v7786_v8 = vld [vmem:[#allocation2 + $0x1d1] sm:$0xff] }
  0x59   : > { %791 = vrot.lane.b32.xlu1 %v7616_v44, %s7206_s8  ;;  %v7774_v18 = vld [vmem:[#allocation2 + $0x1e9] sm:$0xff]  ;;  %12240 = vst [vmem:[#allocation36_spill] sm:$0xff] %v7786_v8  ;;  %v7796_v17 = vld [vmem:[#allocation2 + $0x1f1] sm:$0xff] }
  0x5a   : > { %797 = vrot.lane.b32.xlu0 %v7614_v33, %s7206_s8  ;;  %v7784_v24 = vld [vmem:[#allocation2 + $0x209] sm:$0xff]  ;;  %12243 = vst [vmem:[#allocation39_spill] sm:$0xff] %v7796_v17  ;;  %v7806_v2 = vld [vmem:[#allocation2 + $0x211] sm:$0xff] }
  0x5b   : > { %v7794_v3 = vld [vmem:[#allocation2 + $0x229] sm:$0xff]  ;;  %12246 = vst [vmem:[#allocation42_spill] sm:$0xff] %v7806_v2 }
  0x5c   : > { %12242 = vst [vmem:[#allocation38_spill] sm:$0xff] %v7794_v3 }
  0x5d   : > { %795 = vrot.lane.b32.xlu1 %v7624_v39, %s7206_s8 }
  0x5e   : > { %801 = vrot.lane.b32.xlu0 %v7622_v28, %s7206_s8 }
  0x61   : > { %799 = vrot.lane.b32.xlu1 %v7632_v34, %s7206_s8 }
  0x62   : > { %805 = vrot.lane.b32.xlu0 %v7630_v26, %s7206_s8 }
  0x65   : > { %803 = vrot.lane.b32.xlu1 %v7640_v32, %s7206_s8 }
  0x66   : > { %809 = vrot.lane.b32.xlu0 %v7638_v21, %s7206_s8 }
  0x69   : > { %807 = vrot.lane.b32.xlu1 %v7655_v22, %s7206_s8 }
  0x6a   : > { %813 = vrot.lane.b32.xlu0 %v7653_v13, %s7206_s8 }
  0x6d   : > { %811 = vrot.lane.b32.xlu1 %v7663_v20, %s7206_s8 }
  0x6e   : > { %817 = vrot.lane.b32.xlu0 %v7661_v6, %s7206_s8 }
  0x71   : > { %815 = vrot.lane.b32.xlu1 %v7676_v5, %s7206_s8 }
  0x72   : > { %885 = vrot.lane.b32.xlu0 %v500_v27, %s7207_s9  ;;  %v7694_v27 = vld [vmem:[#allocation2 + $0xa9] sm:$0xff] }
  0x75   : > { %819 = vrot.lane.b32.xlu1 %v7683_v16, %s7206_s8 }
  0x76   : > { %889 = vrot.lane.b32.xlu0 %v7681_v12, %s7207_s9 }
  0x79   : > { %887 = vrot.lane.b32.xlu1 %v501_v4, %s7207_s9  ;;  %v7710_v4 = vld [vmem:[#allocation2 + $0xe9] sm:$0xff] }
  0x7a   : > { %893 = vrot.lane.b32.xlu0 %v7689_v14, %s7207_s9 }
  0x7d   : > { %891 = vrot.lane.b32.xlu1 %v7696_v54, %s7207_s9 }
  0x7e   : > { %897 = vrot.lane.b32.xlu0 %v7694_v27, %s7207_s9 }
  0x81   : > { %895 = vrot.lane.b32.xlu1 %v7704_v49, %s7207_s9 }
  0x82   : > { %901 = vrot.lane.b32.xlu0 %v7702_v50, %s7207_s9 }
  0x85   : > { %899 = vrot.lane.b32.xlu1 %v7712_v63, %s7207_s9 }
  0x86   : > { %905 = vrot.lane.b32.xlu0 %v7710_v4, %s7207_s9 }
  0x88   : > { %v7778_v15 = vpop.permute.xlu0 %757 }
  0x89   : > { %903 = vrot.lane.b32.xlu1 %v7720_v55, %s7207_s9  ;;  %12239 = vst [vmem:[#allocation35_spill] sm:$0xff] %v7778_v15  ;;  %v438_v15 = vld [vmem:[#allocation2 + $0x67] sm:$0xff] }
  0x8a   : > { %909 = vrot.lane.b32.xlu0 %v7718_v47, %s7207_s9 }
  0x8c   : > { %v7788_v19 = vpop.permute.xlu0 %759 }
  0x8d   : > { %907 = vrot.lane.b32.xlu1 %v7728_v53, %s7207_s9  ;;  %12241 = vst [vmem:[#allocation37_spill] sm:$0xff] %v7788_v19 }
  0x8e   : > { %913 = vrot.lane.b32.xlu0 %v7726_v42, %s7207_s9 }
  0x91   : > { %911 = vrot.lane.b32.xlu1 %v7736_v48, %s7207_s9 }
  0x92   : > { %917 = vrot.lane.b32.xlu0 %v7734_v37, %s7207_s9 }
  0x95   : > { %915 = vrot.lane.b32.xlu1 %v7744_v43, %s7207_s9 }
  0x96   : > { %921 = vrot.lane.b32.xlu0 %v7742_v35, %s7207_s9 }
  0x99   : > { %919 = vrot.lane.b32.xlu1 %v7752_v41, %s7207_s9 }
  0x9a   : > { %925 = vrot.lane.b32.xlu0 %v7750_v30, %s7207_s9 }
  0x9d   : > { %923 = vrot.lane.b32.xlu1 %v7760_v36, %s7207_s9 }
  0x9e   : > { %929 = vrot.lane.b32.xlu0 %v7758_v25, %s7207_s9 }
  0xa1   : > { %927 = vrot.lane.b32.xlu1 %v7768_v31, %s7207_s9 }
  0xa2   : > { %933 = vrot.lane.b32.xlu0 %v7766_v23, %s7207_s9 }
  0xa5   : > { %931 = vrot.lane.b32.xlu1 %v7776_v29, %s7207_s9 }
  0xa6   : > { %937 = vrot.lane.b32.xlu0 %v7774_v18, %s7207_s9 }
  0xa7   : > { %v7798_v1 = vpop.permute.xlu0 %765 }
  0xa8   : > { %12244 = vst [vmem:[#allocation40_spill] sm:$0xff] %v7798_v1  ;;  %v7800_v9 = vpop.permute.xlu1 %761  ;;  %v7815_v1 = vld [vmem:[#allocation2 + $0x231] sm:$0xff] }
  0xa9   : > { %935 = vrot.lane.b32.xlu1 %v7786_v8, %s7207_s9  ;;  %12245 = vst [vmem:[#allocation41_spill] sm:$0xff] %v7800_v9  ;;  %v7842_v8 = vld [vmem:[#allocation2 + $0x8f] sm:$0xff] }
  0xaa   : > { %941 = vrot.lane.b32.xlu0 %v7784_v24, %s7207_s9  ;;  %12258 = vst [vmem:[#allocation54_spill] sm:$0xff] %v7842_v8 }
  0xab   : > { %v7808_v7 = vpop.permute.xlu0 %769 }
  0xac   : > { %12247 = vst [vmem:[#allocation43_spill] sm:$0xff] %v7808_v7  ;;  %v7810_v19 = vpop.permute.xlu1 %763  ;;  %v7831_v7 = vld [vmem:[#allocation2 + $0xa7] sm:$0xff] }
  0xad   : > { %939 = vrot.lane.b32.xlu1 %v7796_v17, %s7207_s9  ;;  %12248 = vst [vmem:[#allocation44_spill] sm:$0xff] %v7810_v19  ;;  %v7821_v17 = vld [vmem:[#allocation2 + $0x87] sm:$0xff]  ;;  %12254 = vst [vmem:[#allocation50_spill] sm:$0xff] %v7831_v7 }
  0xae   : > { %945 = vrot.lane.b32.xlu0 %v7794_v3, %s7207_s9  ;;  %12251 = vst [vmem:[#allocation47_spill] sm:$0xff] %v7821_v17 }
  0xaf   : > { %v7817_v9 = vpop.permute.xlu0 %773 }
  0xb0   : > { %12249 = vst [vmem:[#allocation45_spill] sm:$0xff] %v7817_v9  ;;  %v7819_v3 = vpop.permute.xlu1 %767 }
  0xb1   : > { %943 = vrot.lane.b32.xlu1 %v7806_v2, %s7207_s9  ;;  %12250 = vst [vmem:[#allocation46_spill] sm:$0xff] %v7819_v3  ;;  %v439_v2 = vld [vmem:[#allocation2 + $0x6f] sm:$0xff] }
  0xb2   : > { %1013 = vrot.lane.b32.xlu0 %v438_v15, %s7208_s10 }
  0xb5   : > { %947 = vrot.lane.b32.xlu1 %v7815_v1, %s7207_s9 }
  0xb6   : > { %1017 = vrot.lane.b32.xlu0 %v7821_v17, %s7208_s10  ;;  %v7840_v17 = vld [vmem:[#allocation2 + $0xc7] sm:$0xff] }
  0xb7   : > { %v7829_v15 = vpop.permute.xlu1 %771  ;;  %12257 = vst [vmem:[#allocation53_spill] sm:$0xff] %v7840_v17 }
  0xb8   : > { %v7827_v19 = vpop.permute.xlu0 %777  ;;  %12253 = vst [vmem:[#allocation49_spill] sm:$0xff] %v7829_v15 }
  0xb9   : > { %12252 = vst [vmem:[#allocation48_spill] sm:$0xff] %v7827_v19  ;;  %1015 = vrot.lane.b32.xlu1 %v439_v2, %s7208_s10  ;;  %v7854_v2 = vld [vmem:[#allocation2 + $0xaf] sm:$0xff] }
  0xba   : > { %1021 = vrot.lane.b32.xlu0 %v7831_v7, %s7208_s10  ;;  %v7852_v7 = vld [vmem:[#allocation2 + $0xe7] sm:$0xff]  ;;  %12262 = vst [vmem:[#allocation58_spill] sm:$0xff] %v7854_v2 }
  0xbb   : > { %v7838_v9 = vpop.permute.xlu1 %775  ;;  %12261 = vst [vmem:[#allocation57_spill] sm:$0xff] %v7852_v7 }
  0xbc   : > { %v7836_v3 = vpop.permute.xlu0 %781  ;;  %12256 = vst [vmem:[#allocation52_spill] sm:$0xff] %v7838_v9 }
  0xbd   : > { %12255 = vst [vmem:[#allocation51_spill] sm:$0xff] %v7836_v3  ;;  %1019 = vrot.lane.b32.xlu1 %v7842_v8, %s7208_s10  ;;  %v7866_v8 = vld [vmem:[#allocation2 + $0xcf] sm:$0xff] }
  0xbe   : > { %1025 = vrot.lane.b32.xlu0 %v7840_v17, %s7208_s10  ;;  %v7864_v17 = vld [vmem:[#allocation2 + $0x107] sm:$0xff]  ;;  %12266 = vst [vmem:[#allocation62_spill] sm:$0xff] %v7866_v8 }
  0xbf   : > { %v7850_v19 = vpop.permute.xlu1 %779  ;;  %12265 = vst [vmem:[#allocation61_spill] sm:$0xff] %v7864_v17 }
  0xc0   : > { %v7848_v15 = vpop.permute.xlu0 %785  ;;  %12260 = vst [vmem:[#allocation56_spill] sm:$0xff] %v7850_v19 }
  0xc1   : > { %12259 = vst [vmem:[#allocation55_spill] sm:$0xff] %v7848_v15  ;;  %1023 = vrot.lane.b32.xlu1 %v7854_v2, %s7208_s10  ;;  %v7878_v2 = vld [vmem:[#allocation2 + $0xef] sm:$0xff] }
  0xc2   : > { %1029 = vrot.lane.b32.xlu0 %v7852_v7, %s7208_s10  ;;  %v7876_v7 = vld [vmem:[#allocation2 + $0x127] sm:$0xff]  ;;  %12270 = vst [vmem:[#allocation66_spill] sm:$0xff] %v7878_v2 }
  0xc3   : > { %v7862_v3 = vpop.permute.xlu1 %783  ;;  %12269 = vst [vmem:[#allocation65_spill] sm:$0xff] %v7876_v7 }
  0xc4   : > { %v7860_v9 = vpop.permute.xlu0 %789  ;;  %12264 = vst [vmem:[#allocation60_spill] sm:$0xff] %v7862_v3 }
  0xc5   : > { %12263 = vst [vmem:[#allocation59_spill] sm:$0xff] %v7860_v9  ;;  %1027 = vrot.lane.b32.xlu1 %v7866_v8, %s7208_s10  ;;  %v7890_v8 = vld [vmem:[#allocation2 + $0x10f] sm:$0xff] }
  0xc6   : > { %1033 = vrot.lane.b32.xlu0 %v7864_v17, %s7208_s10  ;;  %v7888_v17 = vld [vmem:[#allocation2 + $0x147] sm:$0xff]  ;;  %12274 = vst [vmem:[#allocation70_spill] sm:$0xff] %v7890_v8 }
  0xc7   : > { %v7874_v15 = vpop.permute.xlu1 %787  ;;  %12273 = vst [vmem:[#allocation69_spill] sm:$0xff] %v7888_v17 }
  0xc8   : > { %v7872_v19 = vpop.permute.xlu0 %793  ;;  %12268 = vst [vmem:[#allocation64_spill] sm:$0xff] %v7874_v15 }
  0xc9   : > { %12267 = vst [vmem:[#allocation63_spill] sm:$0xff] %v7872_v19  ;;  %1031 = vrot.lane.b32.xlu1 %v7878_v2, %s7208_s10  ;;  %v7902_v2 = vld [vmem:[#allocation2 + $0x12f] sm:$0xff] }
  0xca   : > { %1037 = vrot.lane.b32.xlu0 %v7876_v7, %s7208_s10  ;;  %v7900_v7 = vld [vmem:[#allocation2 + $0x167] sm:$0xff]  ;;  %12278 = vst [vmem:[#allocation74_spill] sm:$0xff] %v7902_v2 }
  0xcb   : > { %v7886_v9 = vpop.permute.xlu1 %791  ;;  %12277 = vst [vmem:[#allocation73_spill] sm:$0xff] %v7900_v7 }
  0xcc   : > { %v7884_v3 = vpop.permute.xlu0 %797  ;;  %12272 = vst [vmem:[#allocation68_spill] sm:$0xff] %v7886_v9 }
  0xcd   : > { %12271 = vst [vmem:[#allocation67_spill] sm:$0xff] %v7884_v3  ;;  %1035 = vrot.lane.b32.xlu1 %v7890_v8, %s7208_s10  ;;  %v7914_v8 = vld [vmem:[#allocation2 + $0x14f] sm:$0xff] }
  0xce   : > { %1041 = vrot.lane.b32.xlu0 %v7888_v17, %s7208_s10  ;;  %v7912_v17 = vld [vmem:[#allocation2 + $0x187] sm:$0xff]  ;;  %12282 = vst [vmem:[#allocation78_spill] sm:$0xff] %v7914_v8 }
  0xcf   : > { %v7898_v15 = vpop.permute.xlu1 %795  ;;  %12281 = vst [vmem:[#allocation77_spill] sm:$0xff] %v7912_v17 }
  0xd0   : > { %v7896_v19 = vpop.permute.xlu0 %801  ;;  %12276 = vst [vmem:[#allocation72_spill] sm:$0xff] %v7898_v15 }
  0xd1   : > { %12275 = vst [vmem:[#allocation71_spill] sm:$0xff] %v7896_v19  ;;  %1039 = vrot.lane.b32.xlu1 %v7902_v2, %s7208_s10  ;;  %v7926_v2 = vld [vmem:[#allocation2 + $0x16f] sm:$0xff] }
  0xd2   : > { %1045 = vrot.lane.b32.xlu0 %v7900_v7, %s7208_s10  ;;  %v7924_v7 = vld [vmem:[#allocation2 + $0x1a7] sm:$0xff]  ;;  %12286 = vst [vmem:[#allocation82_spill] sm:$0xff] %v7926_v2 }
  0xd3   : > { %v7910_v9 = vpop.permute.xlu1 %799  ;;  %12285 = vst [vmem:[#allocation81_spill] sm:$0xff] %v7924_v7 }
  0xd4   : > { %v7908_v3 = vpop.permute.xlu0 %805  ;;  %12280 = vst [vmem:[#allocation76_spill] sm:$0xff] %v7910_v9 }
  0xd5   : > { %12279 = vst [vmem:[#allocation75_spill] sm:$0xff] %v7908_v3  ;;  %1043 = vrot.lane.b32.xlu1 %v7914_v8, %s7208_s10  ;;  %v7938_v8 = vld [vmem:[#allocation2 + $0x18f] sm:$0xff] }
  0xd6   : > { %1049 = vrot.lane.b32.xlu0 %v7912_v17, %s7208_s10  ;;  %v7936_v17 = vld [vmem:[#allocation2 + $0x1c7] sm:$0xff]  ;;  %12290 = vst [vmem:[#allocation86_spill] sm:$0xff] %v7938_v8 }
  0xd7   : > { %v7922_v15 = vpop.permute.xlu1 %803  ;;  %12289 = vst [vmem:[#allocation85_spill] sm:$0xff] %v7936_v17 }
  0xd8   : > { %v7920_v19 = vpop.permute.xlu0 %809  ;;  %12284 = vst [vmem:[#allocation80_spill] sm:$0xff] %v7922_v15 }
  0xd9   : > { %12283 = vst [vmem:[#allocation79_spill] sm:$0xff] %v7920_v19  ;;  %1047 = vrot.lane.b32.xlu1 %v7926_v2, %s7208_s10  ;;  %v7950_v2 = vld [vmem:[#allocation2 + $0x1af] sm:$0xff] }
  0xda   : > { %1053 = vrot.lane.b32.xlu0 %v7924_v7, %s7208_s10  ;;  %v7948_v7 = vld [vmem:[#allocation2 + $0x1e7] sm:$0xff]  ;;  %12294 = vst [vmem:[#allocation90_spill] sm:$0xff] %v7950_v2 }
  0xdb   : > { %v7934_v9 = vpop.permute.xlu1 %807  ;;  %12293 = vst [vmem:[#allocation89_spill] sm:$0xff] %v7948_v7 }
  0xdc   : > { %v7932_v3 = vpop.permute.xlu0 %813  ;;  %12288 = vst [vmem:[#allocation84_spill] sm:$0xff] %v7934_v9 }
  0xdd   : > { %12287 = vst [vmem:[#allocation83_spill] sm:$0xff] %v7932_v3  ;;  %1051 = vrot.lane.b32.xlu1 %v7938_v8, %s7208_s10  ;;  %v7962_v8 = vld [vmem:[#allocation2 + $0x1cf] sm:$0xff] }
  0xde   : > { %1057 = vrot.lane.b32.xlu0 %v7936_v17, %s7208_s10  ;;  %v7960_v17 = vld [vmem:[#allocation2 + $0x207] sm:$0xff]  ;;  %12298 = vst [vmem:[#allocation94_spill] sm:$0xff] %v7962_v8 }
  0xdf   : > { %v7946_v15 = vpop.permute.xlu1 %811  ;;  %12297 = vst [vmem:[#allocation93_spill] sm:$0xff] %v7960_v17 }
  0xe0   : > { %v7944_v19 = vpop.permute.xlu0 %817  ;;  %12292 = vst [vmem:[#allocation88_spill] sm:$0xff] %v7946_v15 }
  0xe1   : > { %12291 = vst [vmem:[#allocation87_spill] sm:$0xff] %v7944_v19  ;;  %1055 = vrot.lane.b32.xlu1 %v7950_v2, %s7208_s10  ;;  %v7974_v2 = vld [vmem:[#allocation2 + $0x1ef] sm:$0xff] }
  0xe2   : > { %1061 = vrot.lane.b32.xlu0 %v7948_v7, %s7208_s10  ;;  %v7972_v7 = vld [vmem:[#allocation2 + $0x227] sm:$0xff] }
  0xe3   : > { %v7958_v9 = vpop.permute.xlu1 %815  ;;  %12301 = vst [vmem:[#allocation97_spill] sm:$0xff] %v7972_v7 }
  0xe4   : > { %v7956_v3 = vpop.permute.xlu0 %885  ;;  %12296 = vst [vmem:[#allocation92_spill] sm:$0xff] %v7958_v9  ;;  %v7980_v9 = vld [vmem:[#allocation2 + $0x247] sm:$0xff] }
  0xe5   : > { %12295 = vst [vmem:[#allocation91_spill] sm:$0xff] %v7956_v3  ;;  %1059 = vrot.lane.b32.xlu1 %v7962_v8, %s7208_s10  ;;  %12302 = vst [vmem:[#allocation98_spill] sm:$0xff] %v7980_v9  ;;  %v7986_v8 = vld [vmem:[#allocation2 + $0x20f] sm:$0xff] }
  0xe6   : > { %1065 = vrot.lane.b32.xlu0 %v7960_v17, %s7208_s10 }
  0xe7   : > { %v7970_v15 = vpop.permute.xlu1 %819 }
  0xe8   : > { %v7968_v19 = vpop.permute.xlu0 %889  ;;  %12300 = vst [vmem:[#allocation96_spill] sm:$0xff] %v7970_v15 }
  0xe9   : > { %12299 = vst [vmem:[#allocation95_spill] sm:$0xff] %v7968_v19  ;;  %1063 = vrot.lane.b32.xlu1 %v7974_v2, %s7208_s10 }
  0xea   : > { %1069 = vrot.lane.b32.xlu0 %v7972_v7, %s7208_s10  ;;  %v7996_v7 = vld [vmem:[#allocation2 + $0x22f] sm:$0xff] }
  0xeb   : > { %v7984_v17 = vpop.permute.xlu1 %887 }
  0xec   : > { %v7982_v3 = vpop.permute.xlu0 %893  ;;  %12304 = vst [vmem:[#allocation100_spill] sm:$0xff] %v7984_v17 }
  0xed   : > { %12303 = vst [vmem:[#allocation99_spill] sm:$0xff] %v7982_v3  ;;  %1067 = vrot.lane.b32.xlu1 %v7986_v8, %s7208_s10  ;;  %v8002_v3 = vld [vmem:[#allocation2 + $0x24f] sm:$0xff] }
  0xee   : > { %1073 = vrot.lane.b32.xlu0 %v7980_v9, %s7208_s10 }
  0xef   : > { %v7994_v19 = vpop.permute.xlu1 %891 }
  0xf0   : > { %v7992_v15 = vpop.permute.xlu0 %897  ;;  %12306 = vst [vmem:[#allocation102_spill] sm:$0xff] %v7994_v19 }
  0xf1   : > { %12305 = vst [vmem:[#allocation101_spill] sm:$0xff] %v7992_v15  ;;  %1071 = vrot.lane.b32.xlu1 %v7996_v7, %s7208_s10 }
  0xf2   : > { %1141 = vrot.lane.b32.xlu0 %v7508_v57, %s7209_s11 }
  0xf3   : > { %v8006_v9 = vpop.permute.xlu1 %895 }
  0xf4   : > { %v8004_v17 = vpop.permute.xlu0 %901 }
  0xf5   : > { %12307 = vst [vmem:[#allocation103_spill] sm:$0xff] %v8004_v17  ;;  %1075 = vrot.lane.b32.xlu1 %v8002_v3, %s7208_s10 }
  0xf6   : > { %1145 = vrot.lane.b32.xlu0 %v7506_v56, %s7209_s11 }
  0xf7   : > { %v8014_v19 = vpop.permute.xlu1 %899 }
  0xf8   : > { %v8012_v15 = vpop.permute.xlu0 %905 }
  0xf9   : > { %12308 = vst [vmem:[#allocation104_spill] sm:$0xff] %v8012_v15  ;;  %1143 = vrot.lane.b32.xlu1 %v7537_v62, %s7209_s11 }
  0xfa   : > { %1149 = vrot.lane.b32.xlu0 %v7535_v61, %s7209_s11 }
  0xfb   : > { %v8022_v17 = vpop.permute.xlu1 %903 }
  0xfc   : > { %v8020_v57 = vpop.permute.xlu0 %909 }
  0xfd   : > { %12309 = vst [vmem:[#allocation105_spill] sm:$0xff] %v8020_v57  ;;  %1147 = vrot.lane.b32.xlu1 %v7561_v11, %s7209_s11 }
  0xfe   : > { %1153 = vrot.lane.b32.xlu0 %v7559_v10, %s7209_s11 }
  0xff   : > { %v8030_v15 = vpop.permute.xlu1 %907 }
 0x100   : > { %v8028_v56 = vpop.permute.xlu0 %913  ;;  %12311 = vst [vmem:[#allocation107_spill] sm:$0xff] %v8030_v15 }
 0x101   : > { %12310 = vst [vmem:[#allocation106_spill] sm:$0xff] %v8028_v56  ;;  %1151 = vrot.lane.b32.xlu1 %v7569_v52, %s7209_s11 }
 0x102   : > { %1157 = vrot.lane.b32.xlu0 %v7567_v59, %s7209_s11 }
 0x103   : > { %v8038_v62 = vpop.permute.xlu1 %911 }
 0x104   : > { %v8036_v61 = vpop.permute.xlu0 %917  ;;  %12313 = vst [vmem:[#allocation109_spill] sm:$0xff] %v8038_v62 }
 0x105   : > { %12312 = vst [vmem:[#allocation108_spill] sm:$0xff] %v8036_v61  ;;  %1155 = vrot.lane.b32.xlu1 %v7584_v45, %s7209_s11 }
 0x106   : > { %1161 = vrot.lane.b32.xlu0 %v7582_v0, %s7209_s11 }
 0x107   : > { %v8046_v11 = vpop.permute.xlu1 %915 }
 0x108   : > { %v8044_v10 = vpop.permute.xlu0 %921  ;;  %12315 = vst [vmem:[#allocation111_spill] sm:$0xff] %v8046_v11 }
 0x109   : > { %12314 = vst [vmem:[#allocation110_spill] sm:$0xff] %v8044_v10  ;;  %1159 = vrot.lane.b32.xlu1 %v7592_v40, %s7209_s11 }
 0x10a   : > { %1165 = vrot.lane.b32.xlu0 %v7590_v58, %s7209_s11 }
 0x10b   : > { %v8054_v59 = vpop.permute.xlu1 %919 }
 0x10c   : > { %v8052_v52 = vpop.permute.xlu0 %925  ;;  %12317 = vst [vmem:[#allocation113_spill] sm:$0xff] %v8054_v59 }
 0x10d   : > { %12316 = vst [vmem:[#allocation112_spill] sm:$0xff] %v8052_v52  ;;  %1163 = vrot.lane.b32.xlu1 %v7600_v51, %s7209_s11  ;;  %v12377_v52 = vld [vmem:[#allocation73_spill] sm:$0xff] }
 0x10e   : > { %1169 = vrot.lane.b32.xlu0 %v7598_v60, %s7209_s11 }
 0x10f   : > { %v8062_v0 = vpop.permute.xlu1 %923 }
 0x110   : > { %v8060_v45 = vpop.permute.xlu0 %929  ;;  %12319 = vst [vmem:[#allocation115_spill] sm:$0xff] %v8062_v0 }
 0x111   : > { %12318 = vst [vmem:[#allocation114_spill] sm:$0xff] %v8060_v45  ;;  %1167 = vrot.lane.b32.xlu1 %v7608_v46, %s7209_s11  ;;  %v12369_v45 = vld [vmem:[#allocation65_spill] sm:$0xff] }
 0x112   : > { %1173 = vrot.lane.b32.xlu0 %v7606_v38, %s7209_s11 }
 0x113   : > { %v8070_v58 = vpop.permute.xlu1 %927 }
 0x114   : > { %v8068_v40 = vpop.permute.xlu0 %933  ;;  %12321 = vst [vmem:[#allocation117_spill] sm:$0xff] %v8070_v58 }
 0x115   : > { %12320 = vst [vmem:[#allocation116_spill] sm:$0xff] %v8068_v40  ;;  %1171 = vrot.lane.b32.xlu1 %v7616_v44, %s7209_s11 }
 0x116   : > { %1177 = vrot.lane.b32.xlu0 %v7614_v33, %s7209_s11 }
 0x117   : > { %v8078_v60 = vpop.permute.xlu1 %931 }
 0x118   : > { %v8076_v51 = vpop.permute.xlu0 %937  ;;  %12323 = vst [vmem:[#allocation119_spill] sm:$0xff] %v8078_v60 }
 0x119   : > { %12322 = vst [vmem:[#allocation118_spill] sm:$0xff] %v8076_v51  ;;  %1175 = vrot.lane.b32.xlu1 %v7624_v39, %s7209_s11 }
 0x11a   : > { %1181 = vrot.lane.b32.xlu0 %v7622_v28, %s7209_s11 }
 0x11b   : > { %v8086_v46 = vpop.permute.xlu1 %935 }
 0x11c   : > { %v8084_v38 = vpop.permute.xlu0 %941  ;;  %12325 = vst [vmem:[#allocation121_spill] sm:$0xff] %v8086_v46 }
 0x11d   : > { %12324 = vst [vmem:[#allocation120_spill] sm:$0xff] %v8084_v38  ;;  %1179 = vrot.lane.b32.xlu1 %v7632_v34, %s7209_s11 }
 0x11e   : > { %1185 = vrot.lane.b32.xlu0 %v7630_v26, %s7209_s11 }
 0x11f   : > { %v8094_v44 = vpop.permute.xlu1 %939 }
 0x120   : > { %v8092_v33 = vpop.permute.xlu0 %945  ;;  %12327 = vst [vmem:[#allocation123_spill] sm:$0xff] %v8094_v44 }
 0x121   : > { %12326 = vst [vmem:[#allocation122_spill] sm:$0xff] %v8092_v33  ;;  %1183 = vrot.lane.b32.xlu1 %v7640_v32, %s7209_s11 }
 0x122   : > { %1189 = vrot.lane.b32.xlu0 %v7638_v21, %s7209_s11  ;;  %v8116_v21 = vld [vmem:[#allocation2 + $0x248] sm:$0xff] }
 0x123   : > { %v8102_v39 = vpop.permute.xlu1 %943 }
 0x124   : > { %v8100_v28 = vpop.permute.xlu0 %1013  ;;  %12328 = vst [vmem:[#allocation124_spill] sm:$0xff] %v8102_v39 }
 0x125   : > { %1187 = vrot.lane.b32.xlu1 %v7655_v22, %s7209_s11 }
 0x126   : > { %1193 = vrot.lane.b32.xlu0 %v7653_v13, %s7209_s11 }
 0x127   : > { %v8110_v34 = vpop.permute.xlu1 %947 }
 0x128   : > { %v8108_v26 = vpop.permute.xlu0 %1017  ;;  %12329 = vst [vmem:[#allocation125_spill] sm:$0xff] %v8110_v34 }
 0x129   : > { %1191 = vrot.lane.b32.xlu1 %v7663_v20, %s7209_s11 }
 0x12a   : > { %1197 = vrot.lane.b32.xlu0 %v7661_v6, %s7209_s11  ;;  %v8134_v6 = vld [vmem:[#allocation2 + $0x250] sm:$0xff] }
 0x12b   : > { %v8120_v33 = vpop.permute.xlu1 %1015 }
 0x12c   : > { %v8118_v32 = vpop.permute.xlu0 %1021 }
 0x12d   : > { %1195 = vrot.lane.b32.xlu1 %v7676_v5, %s7209_s11 }
 0x12e   : > { %1201 = vrot.lane.b32.xlu0 %v8116_v21, %s7209_s11 }
 0x12f   : > { %v8128_v22 = vpop.permute.xlu1 %1019 }
 0x130   : > { %v8126_v13 = vpop.permute.xlu0 %1025 }
 0x131   : > { %1199 = vrot.lane.b32.xlu1 %v7683_v16, %s7209_s11 }
 0x132   : > { %1269 = vrot.lane.b32.xlu0 %v7681_v12, %s7210_s12 }
 0x133   : > { %v8138_v34 = vpop.permute.xlu1 %1023 }
 0x134   : > { %v8136_v20 = vpop.permute.xlu0 %1029 }
 0x135   : > { %1203 = vrot.lane.b32.xlu1 %v8134_v6, %s7209_s11 }
 0x136   : > { %1273 = vrot.lane.b32.xlu0 %v7689_v14, %s7210_s12 }
 0x137   : > { %v8146_v39 = vpop.permute.xlu1 %1027 }
 0x138   : > { %v8144_v5 = vpop.permute.xlu0 %1033 }
 0x139   : > { %1271 = vrot.lane.b32.xlu1 %v7696_v54, %s7210_s12 }
 0x13a   : > { %1277 = vrot.lane.b32.xlu0 %v7694_v27, %s7210_s12 }
 0x13b   : > { %v8154_v16 = vpop.permute.xlu1 %1031 }
 0x13c   : > { %v8152_v12 = vpop.permute.xlu0 %1037 }
 0x13d   : > { %12330 = vst [vmem:[#allocation126_spill] sm:$0xff] %v8152_v12  ;;  %1275 = vrot.lane.b32.xlu1 %v7704_v49, %s7210_s12 }
 0x13e   : > { %1281 = vrot.lane.b32.xlu0 %v7702_v50, %s7210_s12 }
 0x13f   : > { %v8162_v38 = vpop.permute.xlu1 %1035 }
 0x140   : > { %v8160_v14 = vpop.permute.xlu0 %1041  ;;  %12332 = vst [vmem:[#allocation128_spill] sm:$0xff] %v8162_v38 }
 0x141   : > { %12331 = vst [vmem:[#allocation127_spill] sm:$0xff] %v8160_v14  ;;  %1279 = vrot.lane.b32.xlu1 %v7712_v63, %s7210_s12 }
 0x142   : > { %1285 = vrot.lane.b32.xlu0 %v7710_v4, %s7210_s12 }
 0x143   : > { %v8170_v27 = vpop.permute.xlu1 %1039 }
 0x144   : > { %v8168_v54 = vpop.permute.xlu0 %1045  ;;  %12334 = vst [vmem:[#allocation130_spill] sm:$0xff] %v8170_v27 }
 0x145   : > { %12333 = vst [vmem:[#allocation129_spill] sm:$0xff] %v8168_v54  ;;  %1283 = vrot.lane.b32.xlu1 %v7720_v55, %s7210_s12 }
 0x146   : > { %1289 = vrot.lane.b32.xlu0 %v7718_v47, %s7210_s12 }
 0x147   : > { %v8178_v50 = vpop.permute.xlu1 %1043 }
 0x148   : > { %v8176_v49 = vpop.permute.xlu0 %1049  ;;  %12336 = vst [vmem:[#allocation132_spill] sm:$0xff] %v8178_v50 }
 0x149   : > { %12335 = vst [vmem:[#allocation131_spill] sm:$0xff] %v8176_v49  ;;  %1287 = vrot.lane.b32.xlu1 %v7728_v53, %s7210_s12 }
 0x14a   : > { %1293 = vrot.lane.b32.xlu0 %v7726_v42, %s7210_s12 }
 0x14b   : > { %v8186_v4 = vpop.permute.xlu1 %1047 }
 0x14c   : > { %v8184_v63 = vpop.permute.xlu0 %1053  ;;  %12338 = vst [vmem:[#allocation134_spill] sm:$0xff] %v8186_v4 }
 0x14d   : > { %12337 = vst [vmem:[#allocation133_spill] sm:$0xff] %v8184_v63  ;;  %1291 = vrot.lane.b32.xlu1 %v7736_v48, %s7210_s12  ;;  %v12373_v63 = vld [vmem:[#allocation69_spill] sm:$0xff] }
 0x14e   : > { %1297 = vrot.lane.b32.xlu0 %v7734_v37, %s7210_s12 }
 0x14f   : > { %v8194_v55 = vpop.permute.xlu1 %1051 }
 0x150   : > { %v8192_v47 = vpop.permute.xlu0 %1057  ;;  %12340 = vst [vmem:[#allocation136_spill] sm:$0xff] %v8194_v55 }
 0x151   : > { %12339 = vst [vmem:[#allocation135_spill] sm:$0xff] %v8192_v47  ;;  %1295 = vrot.lane.b32.xlu1 %v7744_v43, %s7210_s12  ;;  %v12365_v47 = vld [vmem:[#allocation61_spill] sm:$0xff] }
 0x152   : > { %1301 = vrot.lane.b32.xlu0 %v7742_v35, %s7210_s12 }
 0x153   : > { %v8202_v53 = vpop.permute.xlu1 %1055 }
 0x154   : > { %v8200_v42 = vpop.permute.xlu0 %1061  ;;  %12342 = vst [vmem:[#allocation138_spill] sm:$0xff] %v8202_v53 }
 0x155   : > { %12341 = vst [vmem:[#allocation137_spill] sm:$0xff] %v8200_v42  ;;  %1299 = vrot.lane.b32.xlu1 %v7752_v41, %s7210_s12 }
 0x156   : > { %1305 = vrot.lane.b32.xlu0 %v7750_v30, %s7210_s12 }
 0x157   : > { %v8210_v48 = vpop.permute.xlu1 %1059 }
 0x158   : > { %v8208_v37 = vpop.permute.xlu0 %1065  ;;  %12344 = vst [vmem:[#allocation140_spill] sm:$0xff] %v8210_v48  ;;  %v12361_v48 = vld [vmem:[#allocation57_spill] sm:$0xff] }
 0x159   : > { %12343 = vst [vmem:[#allocation139_spill] sm:$0xff] %v8208_v37  ;;  %1303 = vrot.lane.b32.xlu1 %v7760_v36, %s7210_s12 }
 0x15a   : > { %1309 = vrot.lane.b32.xlu0 %v7758_v25, %s7210_s12 }
 0x15b   : > { %v8218_v43 = vpop.permute.xlu1 %1063 }
 0x15c   : > { %v8216_v35 = vpop.permute.xlu0 %1069  ;;  %12346 = vst [vmem:[#allocation142_spill] sm:$0xff] %v8218_v43  ;;  %v12356_v43 = vld [vmem:[#allocation50_spill] sm:$0xff] }
 0x15d   : > { %12345 = vst [vmem:[#allocation141_spill] sm:$0xff] %v8216_v35  ;;  %1307 = vrot.lane.b32.xlu1 %v7768_v31, %s7210_s12  ;;  %v12352_v35 = vld [vmem:[#allocation38_spill] sm:$0xff] }
 0x15e   : > { %1313 = vrot.lane.b32.xlu0 %v7766_v23, %s7210_s12  ;;  %v12350_v23 = vld [vmem:[#allocation36_spill] sm:$0xff] }
 0x15f   : > { %v8226_v41 = vpop.permute.xlu1 %1067 }
 0x160   : > { %v8224_v30 = vpop.permute.xlu0 %1073  ;;  %12348 = vst [vmem:[#allocation144_spill] sm:$0xff] %v8226_v41 }
 0x161   : > { %12347 = vst [vmem:[#allocation143_spill] sm:$0xff] %v8224_v30  ;;  %1311 = vrot.lane.b32.xlu1 %v7776_v29, %s7210_s12  ;;  %v8248_v29 = vld [vmem:[#allocation2 + $0x249] sm:$0xff] }
 0x162   : > { %1317 = vrot.lane.b32.xlu0 %v7774_v18, %s7210_s12  ;;  %v12353_v18 = vld [vmem:[#allocation39_spill] sm:$0xff] }
 0x163   : > { %v8234_v36 = vpop.permute.xlu1 %1071 }
 0x164   : > { %v8232_v25 = vpop.permute.xlu0 %1141  ;;  %12349 = vst [vmem:[#allocation145_spill] sm:$0xff] %v8234_v36 }
 0x165   : > { %1315 = vrot.lane.b32.xlu1 %v12350_v23, %s7210_s12 }
 0x166   : > { %1321 = vrot.lane.b32.xlu0 %v7784_v24, %s7210_s12  ;;  %v12354_v24 = vld [vmem:[#allocation42_spill] sm:$0xff] }
 0x167   : > { %v8242_v30 = vpop.permute.xlu1 %1075 }
 0x168   : > { %v8240_v31 = vpop.permute.xlu0 %1145  ;;  %12351 = vst [vmem:[#allocation36_spill] sm:$0xff] %v8242_v30 }
 0x169   : > { %1319 = vrot.lane.b32.xlu1 %v12353_v18, %s7210_s12  ;;  %v8266_v18 = vld [vmem:[#allocation2 + $0x251] sm:$0xff] }
 0x16a   : > { %1325 = vrot.lane.b32.xlu0 %v12352_v35, %s7210_s12  ;;  %v12355_v35 = vld [vmem:[#allocation47_spill] sm:$0xff] }
 0x16b   : > { %v8252_v36 = vpop.permute.xlu1 %1143 }
 0x16c   : > { %v8250_v41 = vpop.permute.xlu0 %1149 }
 0x16d   : > { %1323 = vrot.lane.b32.xlu1 %v12354_v24, %s7210_s12 }
 0x16e   : > { %1329 = vrot.lane.b32.xlu0 %v8248_v29, %s7210_s12 }
 0x16f   : > { %v8260_v30 = vpop.permute.xlu1 %1147 }
 0x170   : > { %v8258_v23 = vpop.permute.xlu0 %1153 }
 0x171   : > { %1327 = vrot.lane.b32.xlu1 %v7815_v1, %s7210_s12  ;;  %v12359_v1 = vld [vmem:[#allocation54_spill] sm:$0xff] }
 0x172   : > { %1397 = vrot.lane.b32.xlu0 %v12355_v35, %s7211_s13  ;;  %v12358_v35 = vld [vmem:[#allocation53_spill] sm:$0xff] }
 0x173   : > { %v8270_v37 = vpop.permute.xlu1 %1151 }
 0x174   : > { %v8268_v44 = vpop.permute.xlu0 %1157 }
 0x175   : > { %1331 = vrot.lane.b32.xlu1 %v8266_v18, %s7210_s12 }
 0x176   : > { %1401 = vrot.lane.b32.xlu0 %v12356_v43, %s7211_s13  ;;  %v12362_v43 = vld [vmem:[#allocation58_spill] sm:$0xff] }
 0x177   : > { %v8278_v51 = vpop.permute.xlu1 %1155 }
 0x178   : > { %v8276_v24 = vpop.permute.xlu0 %1161 }
 0x179   : > { %12357 = vst [vmem:[#allocation38_spill] sm:$0xff] %v8276_v24  ;;  %1399 = vrot.lane.b32.xlu1 %v12359_v1, %s7211_s13  ;;  %v12481_v24 = vld [vmem:[#allocation45_spill] sm:$0xff] }
 0x17a   : > { %1405 = vrot.lane.b32.xlu0 %v12358_v35, %s7211_s13  ;;  %v12366_v35 = vld [vmem:[#allocation62_spill] sm:$0xff] }
 0x17b   : > { %v8286_v42 = vpop.permute.xlu1 %1159 }
 0x17c   : > { %v8284_v46 = vpop.permute.xlu0 %1165 }
 0x17d   : > { %12360 = vst [vmem:[#allocation39_spill] sm:$0xff] %v8284_v46  ;;  %1403 = vrot.lane.b32.xlu1 %v12362_v43, %s7211_s13 }
 0x17e   : > { %1409 = vrot.lane.b32.xlu0 %v12361_v48, %s7211_s13  ;;  %v12370_v48 = vld [vmem:[#allocation66_spill] sm:$0xff] }
 0x17f   : > { %v8294_v60 = vpop.permute.xlu1 %1163 }
 0x180   : > { %v8292_v40 = vpop.permute.xlu0 %1169  ;;  %12364 = vst [vmem:[#allocation47_spill] sm:$0xff] %v8294_v60 }
 0x181   : > { %12363 = vst [vmem:[#allocation42_spill] sm:$0xff] %v8292_v40  ;;  %1407 = vrot.lane.b32.xlu1 %v12366_v35, %s7211_s13 }
 0x182   : > { %1413 = vrot.lane.b32.xlu0 %v12365_v47, %s7211_s13  ;;  %v12374_v47 = vld [vmem:[#allocation70_spill] sm:$0xff] }
 0x183   : > { %v8302_v53 = vpop.permute.xlu1 %1167 }
 0x184   : > { %v8300_v1 = vpop.permute.xlu0 %1173  ;;  %12368 = vst [vmem:[#allocation53_spill] sm:$0xff] %v8302_v53 }
 0x185   : > { %12367 = vst [vmem:[#allocation50_spill] sm:$0xff] %v8300_v1  ;;  %1411 = vrot.lane.b32.xlu1 %v12370_v48, %s7211_s13 }
 0x186   : > { %1417 = vrot.lane.b32.xlu0 %v12369_v45, %s7211_s13  ;;  %v12378_v45 = vld [vmem:[#allocation74_spill] sm:$0xff] }
 0x187   : > { %v8310_v58 = vpop.permute.xlu1 %1171 }
 0x188   : > { %v8308_v43 = vpop.permute.xlu0 %1177  ;;  %12372 = vst [vmem:[#allocation57_spill] sm:$0xff] %v8310_v58 }
 0x189   : > { %12371 = vst [vmem:[#allocation54_spill] sm:$0xff] %v8308_v43  ;;  %1415 = vrot.lane.b32.xlu1 %v12374_v47, %s7211_s13  ;;  %v12381_v43 = vld [vmem:[#allocation77_spill] sm:$0xff] }
 0x18a   : > { %1421 = vrot.lane.b32.xlu0 %v12373_v63, %s7211_s13  ;;  %v12382_v63 = vld [vmem:[#allocation78_spill] sm:$0xff] }
 0x18b   : > { %v8318_v55 = vpop.permute.xlu1 %1175 }
 0x18c   : > { %v8316_v35 = vpop.permute.xlu0 %1181  ;;  %12376 = vst [vmem:[#allocation61_spill] sm:$0xff] %v8318_v55  ;;  %v12385_v55 = vld [vmem:[#allocation81_spill] sm:$0xff] }
 0x18d   : > { %12375 = vst [vmem:[#allocation58_spill] sm:$0xff] %v8316_v35  ;;  %1419 = vrot.lane.b32.xlu1 %v12378_v45, %s7211_s13 }
 0x18e   : > { %1425 = vrot.lane.b32.xlu0 %v12377_v52, %s7211_s13  ;;  %v12386_v52 = vld [vmem:[#allocation82_spill] sm:$0xff] }
 0x18f   : > { %v8326_v0 = vpop.permute.xlu1 %1179 }
 0x190   : > { %v8324_v48 = vpop.permute.xlu0 %1185  ;;  %12380 = vst [vmem:[#allocation65_spill] sm:$0xff] %v8326_v0  ;;  %v12389_v0 = vld [vmem:[#allocation85_spill] sm:$0xff] }
 0x191   : > { %12379 = vst [vmem:[#allocation62_spill] sm:$0xff] %v8324_v48  ;;  %1423 = vrot.lane.b32.xlu1 %v12382_v63, %s7211_s13 }
 0x192   : > { %1429 = vrot.lane.b32.xlu0 %v12381_v43, %s7211_s13  ;;  %v12390_v43 = vld [vmem:[#allocation86_spill] sm:$0xff] }
 0x193   : > { %v8334_v35 = vpop.permute.xlu1 %1183 }
 0x194   : > { %v8332_v47 = vpop.permute.xlu0 %1189  ;;  %12384 = vst [vmem:[#allocation69_spill] sm:$0xff] %v8334_v35  ;;  %v12393_v35 = vld [vmem:[#allocation89_spill] sm:$0xff] }
 0x195   : > { %12383 = vst [vmem:[#allocation66_spill] sm:$0xff] %v8332_v47  ;;  %1427 = vrot.lane.b32.xlu1 %v12386_v52, %s7211_s13 }
 0x196   : > { %1433 = vrot.lane.b32.xlu0 %v12385_v55, %s7211_s13  ;;  %v12394_v55 = vld [vmem:[#allocation90_spill] sm:$0xff] }
 0x197   : > { %v8342_v48 = vpop.permute.xlu1 %1187 }
 0x198   : > { %v8340_v45 = vpop.permute.xlu0 %1193  ;;  %12388 = vst [vmem:[#allocation73_spill] sm:$0xff] %v8342_v48  ;;  %v12397_v48 = vld [vmem:[#allocation93_spill] sm:$0xff] }
 0x199   : > { %12387 = vst [vmem:[#allocation70_spill] sm:$0xff] %v8340_v45  ;;  %1431 = vrot.lane.b32.xlu1 %v12390_v43, %s7211_s13 }
 0x19a   : > { %1437 = vrot.lane.b32.xlu0 %v12389_v0, %s7211_s13  ;;  %v12398_v0 = vld [vmem:[#allocation94_spill] sm:$0xff] }
 0x19b   : > { %v8350_v47 = vpop.permute.xlu1 %1191 }
 0x19c   : > { %v8348_v63 = vpop.permute.xlu0 %1197  ;;  %12392 = vst [vmem:[#allocation77_spill] sm:$0xff] %v8350_v47  ;;  %v12400_v47 = vld [vmem:[#allocation97_spill] sm:$0xff] }
 0x19d   : > { %12391 = vst [vmem:[#allocation74_spill] sm:$0xff] %v8348_v63  ;;  %1435 = vrot.lane.b32.xlu1 %v12394_v55, %s7211_s13 }
 0x19e   : > { %1441 = vrot.lane.b32.xlu0 %v12393_v35, %s7211_s13 }
 0x19f   : > { %v8358_v45 = vpop.permute.xlu1 %1195 }
 0x1a0   : > { %v8356_v52 = vpop.permute.xlu0 %1201  ;;  %12396 = vst [vmem:[#allocation81_spill] sm:$0xff] %v8358_v45 }
 0x1a1   : > { %12395 = vst [vmem:[#allocation78_spill] sm:$0xff] %v8356_v52  ;;  %1439 = vrot.lane.b32.xlu1 %v12398_v0, %s7211_s13  ;;  %v12402_v52 = vld [vmem:[#allocation98_spill] sm:$0xff] }
 0x1a2   : > { %1445 = vrot.lane.b32.xlu0 %v12397_v48, %s7211_s13  ;;  %v659_v48 = vld [vmem:[#allocation2 + $0x267] sm:$0xff] }
 0x1a3   : > { %v8366_v63 = vpop.permute.xlu1 %1199 }
 0x1a4   : > { %v8364_v43 = vpop.permute.xlu0 %1269  ;;  %12399 = vst [vmem:[#allocation82_spill] sm:$0xff] %v8366_v63 }
 0x1a5   : > { %1443 = vrot.lane.b32.xlu1 %v7974_v2, %s7211_s13  ;;  %v661_v2 = vld [vmem:[#allocation2 + $0x88] sm:$0xff] }
 0x1a6   : > { %1449 = vrot.lane.b32.xlu0 %v12400_v47, %s7211_s13 }
 0x1a7   : > { %v8374_v55 = vpop.permute.xlu1 %1203 }
 0x1a8   : > { %v8372_v35 = vpop.permute.xlu0 %1273  ;;  %12401 = vst [vmem:[#allocation85_spill] sm:$0xff] %v8374_v55 }
 0x1a9   : > { %1447 = vrot.lane.b32.xlu1 %v7986_v8, %s7211_s13  ;;  %v663_v8 = vld [vmem:[#allocation2 + $0xa8] sm:$0xff] }
 0x1aa   : > { %1453 = vrot.lane.b32.xlu0 %v12402_v52, %s7211_s13  ;;  %v660_v52 = vld [vmem:[#allocation2 + $0x26f] sm:$0xff] }
 0x1ab   : > { %v8382_v63 = vpop.permute.xlu1 %1271 }
 0x1ac   : > { %v8380_v0 = vpop.permute.xlu0 %1277 }
 0x1ad   : > { %1451 = vrot.lane.b32.xlu1 %v7996_v7, %s7211_s13  ;;  %v665_v7 = vld [vmem:[#allocation2 + $0xc8] sm:$0xff] }
 0x1ae   : > { %1457 = vrot.lane.b32.xlu0 %v659_v48, %s7211_s13  ;;  %v662_v48 = vld [vmem:[#allocation2 + $0x90] sm:$0xff] }
 0x1af   : > { %v8389_v55 = vpop.permute.xlu1 %1275 }
 0x1b0   : > { %v8387_v47 = vpop.permute.xlu0 %1281 }
 0x1b1   : > { %1455 = vrot.lane.b32.xlu1 %v8002_v3, %s7211_s13  ;;  %v667_v3 = vld [vmem:[#allocation2 + $0xe8] sm:$0xff] }
 0x1b2   : > { %1525 = vrot.lane.b32.xlu0 %v661_v2, %s7212_s14  ;;  %v664_v2 = vld [vmem:[#allocation2 + $0xb0] sm:$0xff] }
 0x1b3   : > { %v8396_v49 = vpop.permute.xlu1 %1279 }
 0x1b4   : > { %v8394_v45 = vpop.permute.xlu0 %1285 }
 0x1b5   : > { %1459 = vrot.lane.b32.xlu1 %v660_v52, %s7211_s13  ;;  %v666_v52 = vld [vmem:[#allocation2 + $0xd0] sm:$0xff] }
 0x1b6   : > { %1529 = vrot.lane.b32.xlu0 %v663_v8, %s7212_s14  ;;  %v669_v8 = vld [vmem:[#allocation2 + $0x108] sm:$0xff] }
 0x1b7   : > { %v8402_v10 = vpop.permute.xlu1 %1283 }
 0x1b8   : > { %v8400_v4 = vpop.permute.xlu0 %1289 }
 0x1b9   : > { %12403 = vst [vmem:[#allocation86_spill] sm:$0xff] %v8400_v4  ;;  %1527 = vrot.lane.b32.xlu1 %v662_v48, %s7212_s14  ;;  %v668_v48 = vld [vmem:[#allocation2 + $0xf0] sm:$0xff] }
 0x1ba   : > { %1533 = vrot.lane.b32.xlu0 %v665_v7, %s7212_s14  ;;  %v671_v7 = vld [vmem:[#allocation2 + $0x128] sm:$0xff] }
 0x1bb   : > { %v8408_v58 = vpop.permute.xlu1 %1287 }
 0x1bc   : > { %v8406_v59 = vpop.permute.xlu0 %1293  ;;  %12405 = vst [vmem:[#allocation90_spill] sm:$0xff] %v8408_v58 }
 0x1bd   : > { %12404 = vst [vmem:[#allocation89_spill] sm:$0xff] %v8406_v59  ;;  %1531 = vrot.lane.b32.xlu1 %v664_v2, %s7212_s14  ;;  %v670_v2 = vld [vmem:[#allocation2 + $0x110] sm:$0xff] }
 0x1be   : > { %1537 = vrot.lane.b32.xlu0 %v667_v3, %s7212_s14  ;;  %v673_v3 = vld [vmem:[#allocation2 + $0x148] sm:$0xff] }
 0x1bf   : > { %v8414_v11 = vpop.permute.xlu1 %1291 }
 0x1c0   : > { %v8412_v50 = vpop.permute.xlu0 %1297  ;;  %12407 = vst [vmem:[#allocation94_spill] sm:$0xff] %v8414_v11 }
 0x1c1   : > { %12406 = vst [vmem:[#allocation93_spill] sm:$0xff] %v8412_v50  ;;  %1535 = vrot.lane.b32.xlu1 %v666_v52, %s7212_s14  ;;  %v672_v52 = vld [vmem:[#allocation2 + $0x130] sm:$0xff] }
 0x1c2   : > { %1541 = vrot.lane.b32.xlu0 %v669_v8, %s7212_s14  ;;  %v675_v8 = vld [vmem:[#allocation2 + $0x168] sm:$0xff] }
 0x1c3   : > { %v8420_v53 = vpop.permute.xlu1 %1295 }
 0x1c4   : > { %v8418_v40 = vpop.permute.xlu0 %1301  ;;  %12409 = vst [vmem:[#allocation98_spill] sm:$0xff] %v8420_v53 }
 0x1c5   : > { %12408 = vst [vmem:[#allocation97_spill] sm:$0xff] %v8418_v40  ;;  %1539 = vrot.lane.b32.xlu1 %v668_v48, %s7212_s14  ;;  %v674_v48 = vld [vmem:[#allocation2 + $0x150] sm:$0xff] }
 0x1c6   : > { %1545 = vrot.lane.b32.xlu0 %v671_v7, %s7212_s14  ;;  %v677_v7 = vld [vmem:[#allocation2 + $0x188] sm:$0xff] }
 0x1c7   : > { %v8426_v50 = vpop.permute.xlu1 %1299 }
 0x1c8   : > { %v8424_v1 = vpop.permute.xlu0 %1305  ;;  %12411 = vst [vmem:[#allocation147_spill] sm:$0xff] %v8426_v50 }
 0x1c9   : > { %12410 = vst [vmem:[#allocation146_spill] sm:$0xff] %v8424_v1  ;;  %1543 = vrot.lane.b32.xlu1 %v670_v2, %s7212_s14  ;;  %v676_v2 = vld [vmem:[#allocation2 + $0x170] sm:$0xff] }
 0x1ca   : > { %1549 = vrot.lane.b32.xlu0 %v673_v3, %s7212_s14  ;;  %v679_v3 = vld [vmem:[#allocation2 + $0x1a8] sm:$0xff] }
 0x1cb   : > { %v8432_v40 = vpop.permute.xlu1 %1303 }
 0x1cc   : > { %v8430_v27 = vpop.permute.xlu0 %1309  ;;  %12413 = vst [vmem:[#allocation149_spill] sm:$0xff] %v8432_v40 }
 0x1cd   : > { %12412 = vst [vmem:[#allocation148_spill] sm:$0xff] %v8430_v27  ;;  %1547 = vrot.lane.b32.xlu1 %v672_v52, %s7212_s14  ;;  %v678_v52 = vld [vmem:[#allocation2 + $0x190] sm:$0xff] }
 0x1ce   : > { %1553 = vrot.lane.b32.xlu0 %v675_v8, %s7212_s14  ;;  %v681_v8 = vld [vmem:[#allocation2 + $0x1c8] sm:$0xff] }
 0x1cf   : > { %v8438_v1 = vpop.permute.xlu1 %1307 }
 0x1d0   : > { %v8436_v53 = vpop.permute.xlu0 %1313  ;;  %12415 = vst [vmem:[#allocation151_spill] sm:$0xff] %v8438_v1 }
 0x1d1   : > { %12414 = vst [vmem:[#allocation150_spill] sm:$0xff] %v8436_v53  ;;  %1551 = vrot.lane.b32.xlu1 %v674_v48, %s7212_s14  ;;  %v680_v48 = vld [vmem:[#allocation2 + $0x1b0] sm:$0xff] }
 0x1d2   : > { %1557 = vrot.lane.b32.xlu0 %v677_v7, %s7212_s14  ;;  %v683_v7 = vld [vmem:[#allocation2 + $0x1e8] sm:$0xff] }
 0x1d3   : > { %v8444_v27 = vpop.permute.xlu1 %1311 }
 0x1d4   : > { %v8442_v50 = vpop.permute.xlu0 %1317  ;;  %12417 = vst [vmem:[#allocation153_spill] sm:$0xff] %v8444_v27 }
 0x1d5   : > { %12416 = vst [vmem:[#allocation152_spill] sm:$0xff] %v8442_v50  ;;  %1555 = vrot.lane.b32.xlu1 %v676_v2, %s7212_s14  ;;  %v682_v2 = vld [vmem:[#allocation2 + $0x1d0] sm:$0xff] }
 0x1d6   : > { %1561 = vrot.lane.b32.xlu0 %v679_v3, %s7212_s14  ;;  %v685_v3 = vld [vmem:[#allocation2 + $0x208] sm:$0xff] }
 0x1d7   : > { %v8450_v53 = vpop.permute.xlu1 %1315 }
 0x1d8   : > { %v8448_v40 = vpop.permute.xlu0 %1321  ;;  %12419 = vst [vmem:[#allocation155_spill] sm:$0xff] %v8450_v53  ;;  %v2016_v53 = vld [vmem:[%s12081_s1 + $0x20] sm:$0xf] }
 0x1d9   : > { %12418 = vst [vmem:[#allocation154_spill] sm:$0xff] %v8448_v40  ;;  %1559 = vrot.lane.b32.xlu1 %v678_v52, %s7212_s14  ;;  %v2013_v52 = vld [vmem:[%s12081_s1 + $0x8] sm:$0xff] }
 0x1da   : > { %1565 = vrot.lane.b32.xlu0 %v681_v8, %s7212_s14  ;;  %v2012_v8 = vld [vmem:[%s12081_s1] sm:$0xff] }
 0x1db   : > { %v8456_v50 = vpop.permute.xlu1 %1319 }
 0x1dc   : > { %v8454_v1 = vpop.permute.xlu0 %1325  ;;  %12421 = vst [vmem:[#allocation157_spill] sm:$0xff] %v8456_v50 }
 0x1dd   : > { %12420 = vst [vmem:[#allocation156_spill] sm:$0xff] %v8454_v1  ;;  %1563 = vrot.lane.b32.xlu1 %v680_v48, %s7212_s14  ;;  %v687_v48 = vld [vmem:[#allocation2 + $0x228] sm:$0xff]  ;;  %v684_v1 = vld [vmem:[#allocation2 + $0x1f0] sm:$0xff] }
 0x1de   : > { %1569 = vrot.lane.b32.xlu0 %v683_v7, %s7212_s14  ;;  %v6966_v7 = vpack.c.bf16 %v2013_v52, %v2012_v8  ;;  %v686_v8 = vld [vmem:[#allocation2 + $0x210] sm:$0xff] }
 0x1df   : > { %v8462_v40 = vpop.permute.xlu1 %1323 }
 0x1e0   : > { %v8460_v27 = vpop.permute.xlu0 %1329  ;;  %12423 = vst [vmem:[#allocation159_spill] sm:$0xff] %v8462_v40  ;;  %6967 = vmatprep.subr.bf16.mxu0 %v6966_v7  ;;  %6990 = vmatprep.subr.bf16.mxu1 %v6966_v7  ;;  %v2014_v40 = vld [vmem:[%s12081_s1 + $0x10] sm:$0xff] }
 0x1e1   : > { %12422 = vst [vmem:[#allocation158_spill] sm:$0xff] %v8460_v27  ;;  %1567 = vrot.lane.b32.xlu1 %v682_v2, %s7212_s14  ;;  %6969 = vmatpush3.bf16.msra.mxu0 %v6966_v7 }
 0x1e2   : > { %1573 = vrot.lane.b32.xlu0 %v685_v3, %s7212_s14  ;;  %v2015_v3 = vld [vmem:[%s12081_s1 + $0x18] sm:$0xff]  ;;  %6993 = vmatpush3.bf16.msra.mxu1 %v6966_v7 }
 0x1e3   : > { %v8474_v27 = vpop.permute.xlu1 %1327  ;;  %v6970_v2 = vpack.c.bf16 %v2015_v3, %v2014_v40  ;;  %v691_v40 = vld [vmem:[#allocation2 + $0x268] sm:$0xff] }
 0x1e4   : > { %v8472_v50 = vpop.permute.xlu0 %1397  ;;  %12424 = vst [vmem:[#allocation160_spill] sm:$0xff] %v8474_v27 }
 0x1e5   : > { %1571 = vrot.lane.b32.xlu1 %v684_v1, %s7212_s14  ;;  %6971 = vmatprep.subr.bf16.mxu0 %v6970_v2  ;;  %v688_v1 = vld [vmem:[#allocation2 + $0x230] sm:$0xff] }
 0x1e6   : > { %1577 = vrot.lane.b32.xlu0 %v687_v48, %s7212_s14  ;;  %6991 = vmatprep.subr.bf16.mxu1 %v6970_v2 }
 0x1e7   : > { %v8486_v27 = vpop.permute.xlu1 %1331  ;;  %6973 = vmatpush3.bf16.msra.mxu0 %v6970_v2  ;;  %6994 = vmatpush3.bf16.msra.mxu1 %v6970_v2 }
 0x1e8   : > { %v8484_v52 = vpop.permute.xlu0 %1401  ;;  %12425 = vst [vmem:[#allocation161_spill] sm:$0xff] %v8486_v27  ;;  %6800 = vmatprep.subr.msk.mxu0 %vm2121_vm2, %v2016_v53  ;;  %6992 = vmatprep.subr.msk.mxu1 %vm2121_vm2, %v2016_v53  ;;  %v692_v27 = vld [vmem:[#allocation2 + $0x270] sm:$0xff] }
 0x1e9   : > { %1575 = vrot.lane.b32.xlu1 %v686_v8, %s7212_s14  ;;  %v695_v8 = vld [vmem:[#allocation2 + $0xa9] sm:$0xff] }
 0x1ea   : > { %1581 = vrot.lane.b32.xlu0 %v8116_v21, %s7212_s14  ;;  %v693_v21 = vld [vmem:[#allocation2 + $0x89] sm:$0xff] }
 0x1eb   : > { %v8498_v48 = vpop.permute.xlu1 %1399  ;;  %6801 = vmatpush3.msk.msra.mxu0 %vm2121_vm2, %v2016_v53  ;;  %6995 = vmatpush3.msk.msra.mxu1 %vm2121_vm2, %v2016_v53 }
 0x1ec   : > { %v8496_v7 = vpop.permute.xlu0 %1405 }
 0x1ed   : > { %1579 = vrot.lane.b32.xlu1 %v688_v1, %s7212_s14  ;;  %v694_v1 = vld [vmem:[#allocation2 + $0x91] sm:$0xff] }
 0x1ee   : > { %1585 = vrot.lane.b32.xlu0 %v691_v40, %s7212_s14  ;;  %v697_v40 = vld [vmem:[#allocation2 + $0xc9] sm:$0xff] }
 0x1ef   : > { %v8506_v2 = vpop.permute.xlu1 %1403 }
 0x1f0   : > { %v8504_v3 = vpop.permute.xlu0 %1409 }
 0x1f1   : > { %1583 = vrot.lane.b32.xlu1 %v8134_v6, %s7212_s14  ;;  %v699_v6 = vld [vmem:[#allocation2 + $0xe9] sm:$0xff] }
 0x1f2   : > { %1653 = vrot.lane.b32.xlu0 %v693_v21, %s7213_s28  ;;  %v696_v21 = vld [vmem:[#allocation2 + $0xb1] sm:$0xff] }
 0x1f3   : > { %v8513_v53 = vpop.permute.xlu1 %1407 }
 0x1f4   : > { %v8511_v54 = vpop.permute.xlu0 %1413 }
 0x1f5   : > { %1587 = vrot.lane.b32.xlu1 %v692_v27, %s7212_s14  ;;  %v701_v27 = vld [vmem:[#allocation2 + $0x109] sm:$0xff] }
 0x1f6   : > { %1657 = vrot.lane.b32.xlu0 %v695_v8, %s7213_s28  ;;  %v698_v8 = vld [vmem:[#allocation2 + $0xd1] sm:$0xff] }
 0x1f7   : > { %v8519_v14 = vpop.permute.xlu1 %1411 }
 0x1f8   : > { %v8517_v59 = vpop.permute.xlu0 %1417 }
 0x1f9   : > { %12426 = vst [vmem:[#allocation162_spill] sm:$0xff] %v8517_v59  ;;  %1655 = vrot.lane.b32.xlu1 %v694_v1, %s7213_s28  ;;  %v700_v1 = vld [vmem:[#allocation2 + $0xf1] sm:$0xff] }
 0x1fa   : > { %1661 = vrot.lane.b32.xlu0 %v697_v40, %s7213_s28  ;;  %v703_v40 = vld [vmem:[#allocation2 + $0x129] sm:$0xff] }
 0x1fb   : > { %v8525_v11 = vpop.permute.xlu1 %1415 }
 0x1fc   : > { %v8523_v62 = vpop.permute.xlu0 %1421  ;;  %12428 = vst [vmem:[#allocation164_spill] sm:$0xff] %v8525_v11 }
 0x1fd   : > { %12427 = vst [vmem:[#allocation163_spill] sm:$0xff] %v8523_v62  ;;  %1659 = vrot.lane.b32.xlu1 %v696_v21, %s7213_s28  ;;  %v702_v21 = vld [vmem:[#allocation2 + $0x111] sm:$0xff] }
 0x1fe   : > { %1665 = vrot.lane.b32.xlu0 %v699_v6, %s7213_s28  ;;  %v705_v6 = vld [vmem:[#allocation2 + $0x149] sm:$0xff] }
 0x1ff   : > { %v8531_v61 = vpop.permute.xlu1 %1419 }
 0x200   : > { %v8529_v46 = vpop.permute.xlu0 %1425  ;;  %12430 = vst [vmem:[#allocation166_spill] sm:$0xff] %v8531_v61 }
 0x201   : > { %12429 = vst [vmem:[#allocation165_spill] sm:$0xff] %v8529_v46  ;;  %1663 = vrot.lane.b32.xlu1 %v698_v8, %s7213_s28  ;;  %v704_v8 = vld [vmem:[#allocation2 + $0x131] sm:$0xff] }
 0x202   : > { %1669 = vrot.lane.b32.xlu0 %v701_v27, %s7213_s28  ;;  %v707_v27 = vld [vmem:[#allocation2 + $0x169] sm:$0xff] }
 0x203   : > { %v8537_v62 = vpop.permute.xlu1 %1423 }
 0x204   : > { %v8535_v60 = vpop.permute.xlu0 %1429  ;;  %12432 = vst [vmem:[#allocation168_spill] sm:$0xff] %v8537_v62 }
 0x205   : > { %12431 = vst [vmem:[#allocation167_spill] sm:$0xff] %v8535_v60  ;;  %1667 = vrot.lane.b32.xlu1 %v700_v1, %s7213_s28  ;;  %v706_v1 = vld [vmem:[#allocation2 + $0x151] sm:$0xff] }
 0x206   : > { %1673 = vrot.lane.b32.xlu0 %v703_v40, %s7213_s28  ;;  %v709_v40 = vld [vmem:[#allocation2 + $0x189] sm:$0xff] }
 0x207   : > { %v8543_v46 = vpop.permute.xlu1 %1427 }
 0x208   : > { %v8541_v12 = vpop.permute.xlu0 %1433  ;;  %12434 = vst [vmem:[#allocation170_spill] sm:$0xff] %v8543_v46 }
 0x209   : > { %12433 = vst [vmem:[#allocation169_spill] sm:$0xff] %v8541_v12  ;;  %1671 = vrot.lane.b32.xlu1 %v702_v21, %s7213_s28  ;;  %v708_v21 = vld [vmem:[#allocation2 + $0x171] sm:$0xff] }
 0x20a   : > { %1677 = vrot.lane.b32.xlu0 %v705_v6, %s7213_s28  ;;  %v711_v6 = vld [vmem:[#allocation2 + $0x1a9] sm:$0xff] }
 0x20b   : > { %v8549_v60 = vpop.permute.xlu1 %1431 }
 0x20c   : > { %v8547_v61 = vpop.permute.xlu0 %1437  ;;  %12436 = vst [vmem:[#allocation172_spill] sm:$0xff] %v8549_v60 }
 0x20d   : > { %12435 = vst [vmem:[#allocation171_spill] sm:$0xff] %v8547_v61  ;;  %1675 = vrot.lane.b32.xlu1 %v704_v8, %s7213_s28  ;;  %v710_v8 = vld [vmem:[#allocation2 + $0x191] sm:$0xff] }
 0x20e   : > { %1681 = vrot.lane.b32.xlu0 %v707_v27, %s7213_s28  ;;  %v713_v27 = vld [vmem:[#allocation2 + $0x1c9] sm:$0xff] }
 0x20f   : > { %v8555_v12 = vpop.permute.xlu1 %1435 }
 0x210   : > { %v8553_v62 = vpop.permute.xlu0 %1441  ;;  %12438 = vst [vmem:[#allocation174_spill] sm:$0xff] %v8555_v12 }
 0x211   : > { %12437 = vst [vmem:[#allocation173_spill] sm:$0xff] %v8553_v62  ;;  %1679 = vrot.lane.b32.xlu1 %v706_v1, %s7213_s28  ;;  %v712_v1 = vld [vmem:[#allocation2 + $0x1b1] sm:$0xff] }
 0x212   : > { %1685 = vrot.lane.b32.xlu0 %v709_v40, %s7213_s28  ;;  %v715_v40 = vld [vmem:[#allocation2 + $0x1e9] sm:$0xff] }
 0x213   : > { %v8561_v61 = vpop.permute.xlu1 %1439 }
 0x214   : > { %v8559_v46 = vpop.permute.xlu0 %1445  ;;  %12440 = vst [vmem:[#allocation176_spill] sm:$0xff] %v8561_v61 }
 0x215   : > { %12439 = vst [vmem:[#allocation175_spill] sm:$0xff] %v8559_v46  ;;  %1683 = vrot.lane.b32.xlu1 %v708_v21, %s7213_s28  ;;  %v714_v21 = vld [vmem:[#allocation2 + $0x1d1] sm:$0xff] }
 0x216   : > { %1689 = vrot.lane.b32.xlu0 %v711_v6, %s7213_s28  ;;  %v717_v6 = vld [vmem:[#allocation2 + $0x209] sm:$0xff] }
 0x217   : > { %v8567_v62 = vpop.permute.xlu1 %1443 }
 0x218   : > { %v8565_v60 = vpop.permute.xlu0 %1449  ;;  %12442 = vst [vmem:[#allocation178_spill] sm:$0xff] %v8567_v62 }
 0x219   : > { %12441 = vst [vmem:[#allocation177_spill] sm:$0xff] %v8565_v60  ;;  %1687 = vrot.lane.b32.xlu1 %v710_v8, %s7213_s28  ;;  %v716_v8 = vld [vmem:[#allocation2 + $0x1f1] sm:$0xff] }
 0x21a   : > { %1693 = vrot.lane.b32.xlu0 %v713_v27, %s7213_s28  ;;  %v719_v27 = vld [vmem:[#allocation2 + $0x229] sm:$0xff] }
 0x21b   : > { %v8573_v46 = vpop.permute.xlu1 %1447 }
 0x21c   : > { %v8571_v12 = vpop.permute.xlu0 %1453  ;;  %12444 = vst [vmem:[#allocation180_spill] sm:$0xff] %v8573_v46 }
 0x21d   : > { %12443 = vst [vmem:[#allocation179_spill] sm:$0xff] %v8571_v12  ;;  %1691 = vrot.lane.b32.xlu1 %v712_v1, %s7213_s28 }
 0x21e   : > { %1697 = vrot.lane.b32.xlu0 %v715_v40, %s7213_s28  ;;  %v718_v40 = vld [vmem:[#allocation2 + $0x211] sm:$0xff] }
 0x21f   : > { %v8579_v60 = vpop.permute.xlu1 %1451 }
 0x220   : > { %v8577_v61 = vpop.permute.xlu0 %1457  ;;  %12446 = vst [vmem:[#allocation182_spill] sm:$0xff] %v8579_v60 }
 0x221   : > { %12445 = vst [vmem:[#allocation181_spill] sm:$0xff] %v8577_v61  ;;  %1695 = vrot.lane.b32.xlu1 %v714_v21, %s7213_s28  ;;  %v720_v21 = vld [vmem:[#allocation2 + $0x231] sm:$0xff] }
 0x222   : > { %1701 = vrot.lane.b32.xlu0 %v717_v6, %s7213_s28  ;;  %v723_v6 = vld [vmem:[#allocation2 + $0x269] sm:$0xff] }
 0x223   : > { %v8585_v12 = vpop.permute.xlu1 %1455 }
 0x224   : > { %v8583_v62 = vpop.permute.xlu0 %1525  ;;  %12447 = vst [vmem:[#allocation183_spill] sm:$0xff] %v8585_v12 }
 0x225   : > { %1699 = vrot.lane.b32.xlu1 %v716_v8, %s7213_s28 }
 0x226   : > { %1705 = vrot.lane.b32.xlu0 %v719_v27, %s7213_s28  ;;  %v2414_v27 = vld [vmem:[#allocation2 + $0x8] sm:$0xff] }
 0x227   : > { %v8591_v61 = vpop.permute.xlu1 %1459 }
 0x228   : > { %v8589_v1 = vpop.permute.xlu0 %1529  ;;  %12448 = vst [vmem:[#allocation184_spill] sm:$0xff] %v8591_v61 }
 0x229   : > { %1703 = vrot.lane.b32.xlu1 %v718_v40, %s7213_s28 }
 0x22a   : > { %1709 = vrot.lane.b32.xlu0 %v8248_v29, %s7213_s28  ;;  %v724_v29 = vld [vmem:[#allocation2 + $0x271] sm:$0xff] }
 0x22b   : > { %v8598_v46 = vpop.permute.xlu1 %1527 }
 0x22c   : > { %v8596_v60 = vpop.permute.xlu0 %1533 }
 0x22d   : > { %1707 = vrot.lane.b32.xlu1 %v720_v21, %s7213_s28 }
 0x22e   : > { %1713 = vrot.lane.b32.xlu0 %v723_v6, %s7213_s28  ;;  %v2415_v6 = vld [vmem:[#allocation2 + $0x10] sm:$0xff] }
 0x22f   : > { %v8604_v12 = vpop.permute.xlu1 %1531 }
 0x230   : > { %v8602_v8 = vpop.permute.xlu0 %1537 }
 0x231   : > { %1711 = vrot.lane.b32.xlu1 %v8266_v18, %s7213_s28 }
 0x232   : > { %2703 = vrot.lane.b32.xlu0 %v2414_v27, %s7206_s8 }
 0x233   : > { %v8611_v61 = vpop.permute.xlu1 %1535 }
 0x234   : > { %v8609_v40 = vpop.permute.xlu0 %1541 }
 0x235   : > { %1715 = vrot.lane.b32.xlu1 %v724_v29, %s7213_s28 }
 0x237   : > { %v8616_v21 = vpop.permute.xlu1 %1539 }
 0x238   : > { %v8614_v59 = vpop.permute.xlu0 %1545 }
 0x239   : > { %12449 = vst [vmem:[#allocation185_spill] sm:$0xff] %v8614_v59  ;;  %2705 = vrot.lane.b32.xlu1 %v2415_v6, %s7206_s8 }
 0x23b   : > { %v8621_v56 = vpop.permute.xlu1 %1543 }
 0x23c   : > { %v8619_v38 = vpop.permute.xlu0 %1549  ;;  %12451 = vst [vmem:[#allocation187_spill] sm:$0xff] %v8621_v56 }
 0x23d   : > { %12450 = vst [vmem:[#allocation186_spill] sm:$0xff] %v8619_v38 }
 0x23f   : > { %v8625_v27 = vpop.permute.xlu1 %1547 }
 0x240   : > { %v8623_v18 = vpop.permute.xlu0 %1553  ;;  %12453 = vst [vmem:[#allocation189_spill] sm:$0xff] %v8625_v27 }
 0x241   : > { %12452 = vst [vmem:[#allocation188_spill] sm:$0xff] %v8623_v18 }
 0x243   : > { %v8629_v4 = vpop.permute.xlu1 %1551 }
 0x244   : > { %v8627_v11 = vpop.permute.xlu0 %1557  ;;  %12455 = vst [vmem:[#allocation191_spill] sm:$0xff] %v8629_v4  ;;  %v436_v4 = vld [vmem:[#allocation2 + $0x47] sm:$0xff] }
 0x245   : > { %12454 = vst [vmem:[#allocation190_spill] sm:$0xff] %v8627_v11 }
 0x247   : > { %v8633_v15 = vpop.permute.xlu1 %1555 }
 0x248   : > { %v8631_v29 = vpop.permute.xlu0 %1561  ;;  %12457 = vst [vmem:[#allocation193_spill] sm:$0xff] %v8633_v15 }
 0x249   : > { %12456 = vst [vmem:[#allocation192_spill] sm:$0xff] %v8631_v29 }
 0x24b   : > { %v8637_v57 = vpop.permute.xlu1 %1559 }
 0x24c   : > { %v8635_v59 = vpop.permute.xlu0 %1565  ;;  %12459 = vst [vmem:[#allocation195_spill] sm:$0xff] %v8637_v57  ;;  %v12476_v57 = vld [vmem:[#allocation40_spill] sm:$0xff] }
 0x24d   : > { %12458 = vst [vmem:[#allocation194_spill] sm:$0xff] %v8635_v59  ;;  %v12468_v59 = vld [vmem:[#allocation35_spill] sm:$0xff] }
 0x24f   : > { %v8641_v38 = vpop.permute.xlu1 %1563 }
 0x250   : > { %v8639_v6 = vpop.permute.xlu0 %1569  ;;  %12461 = vst [vmem:[#allocation197_spill] sm:$0xff] %v8641_v38  ;;  %v12469_v38 = vld [vmem:[#allocation91_spill] sm:$0xff] }
 0x251   : > { %12460 = vst [vmem:[#allocation196_spill] sm:$0xff] %v8639_v6  ;;  %v1749_v6 = vsel %vm279_vm0, %v436_v4, %v12468_v59  ;;  %v437_v4 = vld [vmem:[#allocation2 + $0x4f] sm:$0xff] }
 0x253   : > { %v8645_v18 = vpop.permute.xlu1 %1567 }
 0x254   : > { %v8643_v56 = vpop.permute.xlu0 %1573  ;;  %12463 = vst [vmem:[#allocation199_spill] sm:$0xff] %v8645_v18 }
 0x255   : > { %12462 = vst [vmem:[#allocation198_spill] sm:$0xff] %v8643_v56  ;;  %v1782_v56 = vsel %vm1781_vm3, %v1749_v6, %v12469_v38 }
 0x257   : > { %v8649_v11 = vpop.permute.xlu1 %1571 }
 0x258   : > { %v8647_v27 = vpop.permute.xlu0 %1577  ;;  %12465 = vst [vmem:[#allocation201_spill] sm:$0xff] %v8649_v11 }
 0x259   : > { %12464 = vst [vmem:[#allocation200_spill] sm:$0xff] %v8647_v27  ;;  %v1815_v27 = vsel %vm1814_vm4, %v1782_v56, %v8100_v28 }
 0x25b   : > { %v8653_v15 = vpop.permute.xlu1 %1575 }
 0x25c   : > { %v8651_v29 = vpop.permute.xlu0 %1581  ;;  %12467 = vst [vmem:[#allocation203_spill] sm:$0xff] %v8653_v15  ;;  %v12475_v15 = vld [vmem:[#allocation100_spill] sm:$0xff] }
 0x25d   : > { %12466 = vst [vmem:[#allocation202_spill] sm:$0xff] %v8651_v29  ;;  %v1848_v29 = vsel %vm1847_vm5, %v1815_v27, %v8232_v25  ;;  %v12474_v27 = vld [vmem:[#allocation41_spill] sm:$0xff] }
 0x25e   : > { %v1881_v59 = vsel %vm1880_vm6, %v1848_v29, %v8364_v43  ;;  %v7141_v43 = vld [vmem:[#allocation2 + $0x67] sm:$0xff] }
 0x25f   : > { %v8663_v18 = vpop.permute.xlu1 %1579  ;;  %v1914_v38 = vsel %vm1913_vm7, %v1881_v59, %v8472_v50  ;;  %v1751_v29 = vsel %vm279_vm0, %v7141_v43, %v12474_v27  ;;  %v7142_v59 = vld [vmem:[#allocation2 + $0x87] sm:$0xff]  ;;  %v7144_v43 = vld [vmem:[#allocation2 + $0x6f] sm:$0xff] }
 0x260   : > { %v8661_v11 = vpop.permute.xlu0 %1585  ;;  %12471 = vst [vmem:[#allocation91_spill] sm:$0xff] %v8663_v18  ;;  %v1947_v56 = vsel %vm1946_vm8, %v1914_v38, %v8583_v62  ;;  %v12473_v18 = vld [vmem:[#allocation37_spill] sm:$0xff]  ;;  %v1753_v62 = vsel %vm279_vm0, %v7142_v59, %v12476_v57  ;;  %v7143_v38 = vld [vmem:[#allocation2 + $0xa7] sm:$0xff] }
 0x261   : > { %12470 = vst [vmem:[#allocation35_spill] sm:$0xff] %v8661_v11  ;;  %v1750_v25 = vsel %vm279_vm0, %v437_v4, %v12473_v18  ;;  %v12480_v27 = vld [vmem:[#allocation44_spill] sm:$0xff] }
 0x262   : > { %v1783_v50 = vsel %vm1781_vm3, %v1750_v25, %v12475_v15  ;;  %v1752_v15 = vsel %vm279_vm0, %v7144_v43, %v12480_v27  ;;  %v7145_v25 = vld [vmem:[#allocation2 + $0xc7] sm:$0xff]  ;;  %v7146_v59 = vld [vmem:[#allocation2 + $0x8f] sm:$0xff] }
 0x263   : > { %v8673_v6 = vpop.permute.xlu1 %1583  ;;  %v1757_v57 = vsel %vm279_vm0, %v7145_v25, %v12481_v24  ;;  %v7148_v27 = vld [vmem:[#allocation2 + $0xaf] sm:$0xff] }
 0x264   : > { %v1654_v28 = vpop.permute.xlu0 %1653  ;;  %12472 = vst [vmem:[#allocation204_spill] sm:$0xff] %v8673_v6  ;;  %v12477_v6 = vld [vmem:[#allocation43_spill] sm:$0xff] }
 0x265   : > { %v1980_v11 = vsel %vm1979_vm9, %v1947_v56, %v1654_v28  ;;  %v1755_v56 = vsel %vm279_vm0, %v7143_v38, %v12477_v6  ;;  %v12478_v28 = vld [vmem:[#allocation95_spill] sm:$0xff]  ;;  %v12482_v38 = vld [vmem:[#allocation46_spill] sm:$0xff] }
 0x266   : > { %6802 = vmatprep.mubr.msk.f32.mxu0 %vm2024_vm10, %v1980_v11  ;;  %v1784_v18 = vsel %vm1781_vm3, %v1751_v29, %v12478_v28  ;;  %v1816_v11 = vsel %vm1814_vm4, %v1783_v50, %v8120_v33  ;;  %v1754_v33 = vsel %vm279_vm0, %v7146_v59, %v12482_v38  ;;  %v7147_v50 = vld [vmem:[#allocation2 + $0xe7] sm:$0xff] }
 0x267   : > { %v8691_v58 = vpop.permute.xlu1 %1587  ;;  %v1817_v6 = vsel %vm1814_vm4, %v1784_v18, %v8108_v26  ;;  %v1849_v29 = vsel %vm1847_vm5, %v1816_v11, %v8252_v36  ;;  %v12483_v28 = vld [vmem:[#allocation48_spill] sm:$0xff]  ;;  %v12484_v26 = vld [vmem:[#allocation49_spill] sm:$0xff]  ;;  %v12485_v36 = vld [vmem:[#allocation102_spill] sm:$0xff] }
 0x268   : > { %v1658_v4 = vpop.permute.xlu0 %1657  ;;  %12479 = vst [vmem:[#allocation37_spill] sm:$0xff] %v8691_v58  ;;  %v8705_v58 = vsel %vm279_vm0, %v7147_v50, %v12483_v28  ;;  %v1850_v43 = vsel %vm1847_vm5, %v1817_v6, %v8240_v31  ;;  %v1882_v24 = vsel %vm1880_vm6, %v1849_v29, %v8382_v63  ;;  %v1756_v18 = vsel %vm279_vm0, %v7148_v27, %v12484_v26  ;;  %v12486_v38 = vld [vmem:[#allocation99_spill] sm:$0xff]  ;;  %v12488_v27 = vld [vmem:[#allocation52_spill] sm:$0xff] }
 0x269   : > { %v1785_v11 = vsel %vm1781_vm3, %v1752_v15, %v12485_v36  ;;  %v1883_v25 = vsel %vm1880_vm6, %v1850_v43, %v8372_v35  ;;  %v1915_v59 = vsel %vm1913_vm7, %v1882_v24, %v8498_v48  ;;  %v1786_v50 = vsel %vm1781_vm3, %v1753_v62, %v12486_v38  ;;  %v12487_v43 = vld [vmem:[#allocation51_spill] sm:$0xff] }
 0x26a   : > { %v1818_v31 = vsel %vm1814_vm4, %v1785_v11, %v8128_v22  ;;  %v1916_v63 = vsel %vm1913_vm7, %v1883_v25, %v8484_v52  ;;  %v1948_v6 = vsel %vm1946_vm8, %v1915_v59, %v8598_v46  ;;  %v1819_v35 = vsel %vm1814_vm4, %v1786_v50, %v8118_v32  ;;  %v7149_v22 = vld [vmem:[#allocation2 + $0x107] sm:$0xff] }
 0x26b   : > { %v1656_v15 = vpop.permute.xlu1 %1655  ;;  %v1851_v48 = vsel %vm1847_vm5, %v1818_v31, %v8260_v30  ;;  %v1949_v62 = vsel %vm1946_vm8, %v1916_v63, %v8589_v1  ;;  %v8736_v52 = vsel %vm279_vm0, %v7149_v22, %v12487_v43  ;;  %v1852_v46 = vsel %vm1847_vm5, %v1819_v35, %v8250_v41  ;;  %v7150_v30 = vld [vmem:[#allocation2 + $0xcf] sm:$0xff]  ;;  %v12490_v50 = vld [vmem:[#allocation55_spill] sm:$0xff] }
 0x26c   : > { %v1662_v29 = vpop.permute.xlu0 %1661  ;;  %v1981_v28 = vsel %vm1979_vm9, %v1948_v6, %v1656_v15  ;;  %v1884_v24 = vsel %vm1880_vm6, %v1851_v48, %v8389_v55  ;;  %v1982_v32 = vsel %vm1979_vm9, %v1949_v62, %v1658_v4  ;;  %v1758_v1 = vsel %vm279_vm0, %v7150_v30, %v12488_v27  ;;  %v12489_v55 = vld [vmem:[#allocation101_spill] sm:$0xff]  ;;  %v12491_v63 = vld [vmem:[#allocation56_spill] sm:$0xff]  ;;  %v12493_v22 = vld [vmem:[#allocation59_spill] sm:$0xff] }
 0x26d   : > { %6803 = vmatmul.mubr.msk.f32.vlgmr.msra.gmra.mrb[0].mxu0 %vm2024_vm10, %v1981_v28  ;;  %v1787_v26 = vsel %vm1781_vm3, %v1754_v33, %v8006_v9  ;;  %v1885_v36 = vsel %vm1880_vm6, %v1852_v46, %v8380_v0  ;;  %v1917_v41 = vsel %vm1913_vm7, %v1884_v24, %v8506_v2  ;;  %v1788_v4 = vsel %vm1781_vm3, %v1755_v56, %v12489_v55  ;;  %v12494_v46 = vld [vmem:[#allocation60_spill] sm:$0xff] }
 0x26e   : > { %6805 = vmatprep.mubr.msk.f32.mxu0 %vm2024_vm10, %v1982_v32  ;;  %v1820_v11 = vsel %vm1814_vm4, %v1787_v26, %v8138_v34  ;;  %v1918_v25 = vsel %vm1913_vm7, %v1885_v36, %v8496_v7  ;;  %v1950_v9 = vsel %vm1946_vm8, %v1917_v41, %v8604_v12  ;;  %v1821_v0 = vsel %vm1814_vm4, %v1788_v4, %v8126_v13  ;;  %v7151_v34 = vld [vmem:[#allocation2 + $0x127] sm:$0xff]  ;;  %v12497_v4 = vld [vmem:[#allocation38_spill] sm:$0xff] }
 0x26f   : > { %v1660_v59 = vpop.permute.xlu1 %1659  ;;  %v1853_v2 = vsel %vm1847_vm5, %v1820_v11, %v8270_v37  ;;  %v1951_v56 = vsel %vm1946_vm8, %v1918_v25, %v8596_v60  ;;  %v1763_v7 = vsel %vm279_vm0, %v7151_v34, %v12490_v50  ;;  %v1854_v12 = vsel %vm1847_vm5, %v1821_v0, %v8258_v23  ;;  %v7152_v37 = vld [vmem:[#allocation2 + $0xef] sm:$0xff]  ;;  %v12498_v11 = vld [vmem:[#allocation90_spill] sm:$0xff] }
 0x270   : > { %v1666_v33 = vpop.permute.xlu0 %1665  ;;  %v1983_v38 = vsel %vm1979_vm9, %v1950_v9, %v1660_v59  ;;  %v1886_v31 = vsel %vm1880_vm6, %v1853_v2, %v8396_v49  ;;  %v1984_v13 = vsel %vm1979_vm9, %v1951_v56, %v1662_v29  ;;  %v1760_v60 = vsel %vm279_vm0, %v7152_v37, %v12491_v63  ;;  %v12492_v49 = vld [vmem:[#allocation103_spill] sm:$0xff]  ;;  %v12496_v55 = vld [vmem:[#allocation64_spill] sm:$0xff]  ;;  %v12501_v59 = vld [vmem:[#allocation86_spill] sm:$0xff] }
 0x271   : > { %6806 = vmatmul.mubr.msk.f32.gmra.mrb[2].mxu0 %vm2024_vm10, %v1983_v38  ;;  %v1789_v6 = vsel %vm1781_vm3, %v1756_v18, %v8014_v19  ;;  %v1887_v15 = vsel %vm1880_vm6, %v1854_v12, %v8387_v47  ;;  %v1919_v23 = vsel %vm1913_vm7, %v1886_v31, %v8513_v53  ;;  %v1790_v29 = vsel %vm1781_vm3, %v1757_v57, %v12492_v49  ;;  %v12500_v9 = vld [vmem:[#allocation107_spill] sm:$0xff]  ;;  %v12502_v2 = vld [vmem:[#allocation164_spill] sm:$0xff]  ;;  %v12503_v38 = vld [vmem:[#allocation106_spill] sm:$0xff] }
 0x272   : > { %6808 = vmatprep.mubr.msk.f32.mxu0 %vm2024_vm10, %v1984_v13  ;;  %v1822_v35 = vsel %vm1814_vm4, %v1789_v6, %v8146_v39  ;;  %v1920_v48 = vsel %vm1913_vm7, %v1887_v15, %v8504_v3  ;;  %v1952_v19 = vsel %vm1946_vm8, %v1919_v23, %v8611_v61  ;;  %v1823_v47 = vsel %vm1814_vm4, %v1790_v29, %v8136_v20  ;;  %v7153_v39 = vld [vmem:[#allocation2 + $0x147] sm:$0xff]  ;;  %v12505_v31 = vld [vmem:[#allocation162_spill] sm:$0xff]  ;;  %v12509_v29 = vld [vmem:[#allocation185_spill] sm:$0xff] }
 0x273   : > { %v1664_v62 = vpop.permute.xlu1 %1663  ;;  %v1855_v53 = vsel %vm1847_vm5, %v1822_v35, %v8278_v51  ;;  %v1953_v57 = vsel %vm1946_vm8, %v1920_v48, %v8602_v8  ;;  %v1765_v3 = vsel %vm279_vm0, %v7153_v39, %v12493_v22  ;;  %v1856_v61 = vsel %vm1847_vm5, %v1823_v47, %v8268_v44  ;;  %v7154_v51 = vld [vmem:[#allocation2 + $0x10f] sm:$0xff]  ;;  %v12506_v13 = vld [vmem:[#allocation187_spill] sm:$0xff]  ;;  %v12507_v6 = vld [vmem:[#allocation126_spill] sm:$0xff] }
 0x274   : > { %v1670_v18 = vpop.permute.xlu0 %1669  ;;  %v1985_v28 = vsel %vm1979_vm9, %v1952_v19, %v1664_v62  ;;  %v1888_v43 = vsel %vm1880_vm6, %v1855_v53, %v8402_v10  ;;  %v1986_v20 = vsel %vm1979_vm9, %v1953_v57, %v1666_v33  ;;  %v1762_v8 = vsel %vm279_vm0, %v7154_v51, %v12494_v46  ;;  %v12495_v10 = vld [vmem:[#allocation104_spill] sm:$0xff]  ;;  %v12508_v23 = vld [vmem:[#allocation47_spill] sm:$0xff]  ;;  %v12512_v47 = vld [vmem:[#allocation94_spill] sm:$0xff] }
 0x275   : > { %6809 = vmatmul.mubr.msk.f32.gmra.mrb[4].mxu0 %vm2024_vm10, %v1985_v28  ;;  %v1791_v24 = vsel %vm1781_vm3, %v1758_v1, %v8022_v17  ;;  %v1889_v32 = vsel %vm1880_vm6, %v1856_v61, %v8394_v45  ;;  %v1921_v44 = vsel %vm1913_vm7, %v1888_v43, %v8519_v14  ;;  %v1792_v30 = vsel %vm1781_vm3, %v8705_v58, %v12495_v10  ;;  %v12504_v50 = vld [vmem:[#allocation128_spill] sm:$0xff]  ;;  %v12513_v28 = vld [vmem:[#allocation109_spill] sm:$0xff]  ;;  %v12514_v22 = vld [vmem:[#allocation127_spill] sm:$0xff] }
 0x276   : > { %6811 = vmatprep.mubr.msk.f32.mxu0 %vm2024_vm10, %v1986_v20  ;;  %v1824_v27 = vsel %vm1814_vm4, %v1791_v24, %v8154_v16  ;;  %v1922_v26 = vsel %vm1913_vm7, %v1889_v32, %v8511_v54  ;;  %v1954_v17 = vsel %vm1946_vm8, %v1921_v44, %v8616_v21  ;;  %v1825_v14 = vsel %vm1814_vm4, %v1792_v30, %v8144_v5  ;;  %v7155_v16 = vld [vmem:[#allocation2 + $0x12f] sm:$0xff]  ;;  %v12518_v32 = vld [vmem:[#allocation130_spill] sm:$0xff]  ;;  %v12519_v10 = vld [vmem:[#allocation163_spill] sm:$0xff] }
 0x277   : > { %v1668_v45 = vpop.permute.xlu1 %1667  ;;  %v1857_v36 = vsel %vm1847_vm5, %v1824_v27, %v8286_v42  ;;  %v1955_v58 = vsel %vm1946_vm8, %v1922_v26, %v8609_v40  ;;  %v1764_v54 = vsel %vm279_vm0, %v7155_v16, %v12496_v55  ;;  %v1858_v21 = vsel %vm1847_vm5, %v1825_v14, %v12497_v4  ;;  %v12499_v42 = vld [vmem:[#allocation105_spill] sm:$0xff]  ;;  %v12510_v48 = vld [vmem:[#allocation108_spill] sm:$0xff]  ;;  %v12524_v55 = vld [vmem:[#allocation42_spill] sm:$0xff] }
 0x278   : > { %v1674_v1 = vpop.permute.xlu0 %1673  ;;  %v1987_v41 = vsel %vm1979_vm9, %v1954_v17, %v1668_v45  ;;  %v1890_v25 = vsel %vm1880_vm6, %v1857_v36, %v12498_v11  ;;  %v1988_v5 = vsel %vm1979_vm9, %v1955_v58, %v1670_v18  ;;  %v1794_v40 = vsel %vm1781_vm3, %v8736_v52, %v12499_v42  ;;  %v12511_v18 = vld [vmem:[#allocation39_spill] sm:$0xff]  ;;  %v12515_v43 = vld [vmem:[#allocation89_spill] sm:$0xff]  ;;  %v12523_v58 = vld [vmem:[#allocation186_spill] sm:$0xff] }
 0x279   : > { %6812 = vmatmul.mubr.msk.f32.gmra.mrb[6].mxu0 %vm2024_vm10, %v1987_v41  ;;  %v1793_v33 = vsel %vm1781_vm3, %v1760_v60, %v12500_v9  ;;  %v1891_v0 = vsel %vm1880_vm6, %v1858_v21, %v12501_v59  ;;  %v1923_v56 = vsel %vm1913_vm7, %v1890_v25, %v12502_v2  ;;  %v1796_v34 = vsel %vm1781_vm3, %v1763_v7, %v12503_v38  ;;  %v12517_v46 = vld [vmem:[#allocation129_spill] sm:$0xff]  ;;  %v12526_v25 = vld [vmem:[#allocation98_spill] sm:$0xff] }
 0x27a   : > { %6814 = vmatprep.mubr.msk.f32.mxu0 %vm2024_vm10, %v1988_v5  ;;  %v1826_v12 = vsel %vm1814_vm4, %v1793_v33, %v12504_v50  ;;  %v1924_v52 = vsel %vm1913_vm7, %v1891_v0, %v12505_v31  ;;  %v1956_v37 = vsel %vm1946_vm8, %v1923_v56, %v12506_v13  ;;  %v1827_v15 = vsel %vm1814_vm4, %v1794_v40, %v12507_v6  ;;  %v12520_v30 = vld [vmem:[#allocation189_spill] sm:$0xff]  ;;  %v12527_v40 = vld [vmem:[#allocation111_spill] sm:$0xff]  ;;  %v12530_v56 = vld [vmem:[#allocation168_spill] sm:$0xff] }
 0x27b   : > { %v1672_v60 = vpop.permute.xlu1 %1671  ;;  %v1859_v49 = vsel %vm1847_vm5, %v1826_v12, %v12508_v23  ;;  %v1957_v7 = vsel %vm1946_vm8, %v1924_v52, %v12509_v29  ;;  %v1798_v19 = vsel %vm1781_vm3, %v1765_v3, %v12510_v48  ;;  %v1860_v62 = vsel %vm1847_vm5, %v1827_v15, %v12511_v18  ;;  %v12516_v3 = vld [vmem:[#allocation166_spill] sm:$0xff]  ;;  %v12522_v14 = vld [vmem:[#allocation53_spill] sm:$0xff]  ;;  %v12529_v0 = vld [vmem:[#allocation167_spill] sm:$0xff] }
 0x27c   : > { %v1678_v63 = vpop.permute.xlu0 %1677  ;;  %v1989_v35 = vsel %vm1979_vm9, %v1956_v37, %v1672_v60  ;;  %v1892_v53 = vsel %vm1880_vm6, %v1859_v49, %v12512_v47  ;;  %v1990_v57 = vsel %vm1979_vm9, %v1957_v7, %v1674_v1  ;;  %v1795_v39 = vsel %vm1781_vm3, %v1762_v8, %v12513_v28  ;;  %v12521_v1 = vld [vmem:[#allocation50_spill] sm:$0xff]  ;;  %v12525_v21 = vld [vmem:[#allocation97_spill] sm:$0xff]  ;;  %v12534_v13 = vld [vmem:[#allocation191_spill] sm:$0xff] }
 0x27d   : > { %6815 = vmatmul.mubr.msk.f32.gmra.mrb[8].mxu0 %vm2024_vm10, %v1989_v35  ;;  %v1829_v61 = vsel %vm1814_vm4, %v1796_v34, %v12514_v22  ;;  %v1893_v20 = vsel %vm1880_vm6, %v1860_v62, %v12515_v43  ;;  %v1925_v51 = vsel %vm1913_vm7, %v1892_v53, %v12516_v3  ;;  %v1831_v24 = vsel %vm1814_vm4, %v1798_v19, %v12517_v46  ;;  %v12528_v33 = vld [vmem:[#allocation93_spill] sm:$0xff]  ;;  %v12531_v34 = vld [vmem:[#allocation132_spill] sm:$0xff]  ;;  %v12533_v52 = vld [vmem:[#allocation190_spill] sm:$0xff] }
 0x27e   : > { %6817 = vmatprep.mubr.msk.f32.mxu0 %vm2024_vm10, %v1990_v57  ;;  %v1828_v44 = vsel %vm1814_vm4, %v1795_v39, %v12518_v32  ;;  %v1926_v8 = vsel %vm1913_vm7, %v1893_v20, %v12519_v10  ;;  %v1958_v27 = vsel %vm1946_vm8, %v1925_v51, %v12520_v30  ;;  %v1864_v45 = vsel %vm1847_vm5, %v1831_v24, %v12521_v1  ;;  %v12532_v12 = vld [vmem:[#allocation165_spill] sm:$0xff]  ;;  %v12536_v23 = vld [vmem:[#allocation188_spill] sm:$0xff]  ;;  %v12538_v18 = vld [vmem:[#allocation147_spill] sm:$0xff] }
 0x27f   : > { %v1676_v17 = vpop.permute.xlu1 %1675  ;;  %v1861_v36 = vsel %vm1847_vm5, %v1828_v44, %v12522_v14  ;;  %v1959_v41 = vsel %vm1946_vm8, %v1926_v8, %v12523_v58  ;;  %v1862_v4 = vsel %vm1847_vm5, %v1829_v61, %v12524_v55  ;;  %v1897_v11 = vsel %vm1880_vm6, %v1864_v45, %v12525_v21  ;;  %v12535_v6 = vld [vmem:[#allocation57_spill] sm:$0xff]  ;;  %v12537_v48 = vld [vmem:[#allocation68_spill] sm:$0xff]  ;;  %v12539_v57 = vld [vmem:[#allocation63_spill] sm:$0xff] }
 0x280   : > { %v1682_v26 = vpop.permute.xlu0 %1681  ;;  %v1991_v16 = vsel %vm1979_vm9, %v1958_v27, %v1676_v17  ;;  %v1894_v5 = vsel %vm1880_vm6, %v1861_v36, %v12526_v25  ;;  %v1992_v42 = vsel %vm1979_vm9, %v1959_v41, %v1678_v63  ;;  %v1797_v9 = vsel %vm1781_vm3, %v1764_v54, %v12527_v40  ;;  %v7156_v35 = vld [vmem:[#allocation2 + $0x14f] sm:$0xff]  ;;  %v7157_v53 = vld [vmem:[#allocation2 + $0x167] sm:$0xff]  ;;  %v12541_v61 = vld [vmem:[#allocation170_spill] sm:$0xff] }
 0x281   : > { %6818 = vmatmul.mubr.msk.f32.gmra.mrb[10].mxu0 %vm2024_vm10, %v1991_v16  ;;  %v1895_v59 = vsel %vm1880_vm6, %v1862_v4, %v12528_v33  ;;  %v1930_v2 = vsel %vm1913_vm7, %v1897_v11, %v12529_v0  ;;  %v1927_v38 = vsel %vm1913_vm7, %v1894_v5, %v12530_v56  ;;  %v1830_v50 = vsel %vm1814_vm4, %v1797_v9, %v12531_v34  ;;  %v12540_v39 = vld [vmem:[#allocation113_spill] sm:$0xff]  ;;  %v12542_v20 = vld [vmem:[#allocation110_spill] sm:$0xff]  ;;  %v12545_v8 = vld [vmem:[#allocation131_spill] sm:$0xff] }
 0x282   : > { %6820 = vmatprep.mubr.msk.f32.mxu0 %vm2024_vm10, %v1992_v42  ;;  %v1928_v31 = vsel %vm1913_vm7, %v1895_v59, %v12532_v12  ;;  %v1963_v54 = vsel %vm1946_vm8, %v1930_v2, %v12533_v52  ;;  %v1960_v37 = vsel %vm1946_vm8, %v1927_v38, %v12534_v13  ;;  %v1863_v15 = vsel %vm1847_vm5, %v1830_v50, %v12535_v6  ;;  %v12543_v51 = vld [vmem:[#allocation134_spill] sm:$0xff]  ;;  %v12544_v24 = vld [vmem:[#allocation193_spill] sm:$0xff]  ;;  %v12547_v45 = vld [vmem:[#allocation72_spill] sm:$0xff] }
 0x283   : > { %v1680_v60 = vpop.permute.xlu1 %1679  ;;  %v1961_v49 = vsel %vm1946_vm8, %v1928_v31, %v12536_v23  ;;  %v1766_v19 = vsel %vm279_vm0, %v7156_v35, %v12537_v48  ;;  %v1896_v62 = vsel %vm1880_vm6, %v1863_v15, %v12538_v18  ;;  %v1767_v28 = vsel %vm279_vm0, %v7157_v53, %v12539_v57  ;;  %v12546_v27 = vld [vmem:[#allocation61_spill] sm:$0xff]  ;;  %v12548_v36 = vld [vmem:[#allocation54_spill] sm:$0xff]  ;;  %v7159_v55 = vld [vmem:[#allocation2 + $0x187] sm:$0xff] }
 0x284   : > { %v1686_v63 = vpop.permute.xlu0 %1685  ;;  %v1993_v29 = vsel %vm1979_vm9, %v1960_v37, %v1680_v60  ;;  %v1994_v47 = vsel %vm1979_vm9, %v1961_v49, %v1682_v26  ;;  %v1799_v22 = vsel %vm1781_vm3, %v1766_v19, %v12540_v39  ;;  %v1929_v43 = vsel %vm1913_vm7, %v1896_v62, %v12541_v61  ;;  %v7158_v1 = vld [vmem:[#allocation2 + $0x16f] sm:$0xff]  ;;  %v12550_v4 = vld [vmem:[#allocation67_spill] sm:$0xff]  ;;  %v12552_v5 = vld [vmem:[#allocation146_spill] sm:$0xff] }
 0x285   : > { %v1996_v7 = vsel %vm1979_vm9, %v1963_v54, %v1686_v63  ;;  %6821 = vmatmul.mubr.msk.f32.gmra.mrb[12].mxu0 %vm2024_vm10, %v1993_v29  ;;  %v1800_v3 = vsel %vm1781_vm3, %v1767_v28, %v12542_v20  ;;  %v1832_v46 = vsel %vm1814_vm4, %v1799_v22, %v12543_v51  ;;  %v1962_v32 = vsel %vm1946_vm8, %v1929_v43, %v12544_v24  ;;  %v12549_v41 = vld [vmem:[#allocation149_spill] sm:$0xff]  ;;  %v12551_v11 = vld [vmem:[#allocation115_spill] sm:$0xff]  ;;  %v12553_v40 = vld [vmem:[#allocation172_spill] sm:$0xff] }
 0x286   : > { %6826 = vmatprep.mubr.msk.f32.mxu1 %vm2024_vm10, %v1996_v7  ;;  %6823 = vmatprep.mubr.msk.f32.mxu0 %vm2024_vm10, %v1994_v47  ;;  %v1833_v30 = vsel %vm1814_vm4, %v1800_v3, %v12545_v8  ;;  %v1865_v26 = vsel %vm1847_vm5, %v1832_v46, %v12546_v27  ;;  %v1768_v14 = vsel %vm279_vm0, %v7158_v1, %v12547_v45  ;;  %v12554_v33 = vld [vmem:[#allocation112_spill] sm:$0xff]  ;;  %v12556_v56 = vld [vmem:[#allocation169_spill] sm:$0xff]  ;;  %v12557_v34 = vld [vmem:[#allocation195_spill] sm:$0xff] }
 0x287   : > { %v1684_v10 = vpop.permute.xlu1 %1683  ;;  %v1866_v58 = vsel %vm1847_vm5, %v1833_v30, %v12548_v36  ;;  %v1898_v16 = vsel %vm1880_vm6, %v1865_v26, %v12549_v41  ;;  %v1769_v21 = vsel %vm279_vm0, %v7159_v55, %v12550_v4  ;;  %v1801_v25 = vsel %vm1781_vm3, %v1768_v14, %v12551_v11  ;;  %v12555_v0 = vld [vmem:[#allocation136_spill] sm:$0xff]  ;;  %v12558_v52 = vld [vmem:[#allocation133_spill] sm:$0xff]  ;;  %v12562_v29 = vld [vmem:[#allocation58_spill] sm:$0xff] }
 0x288   : > { %v1690_v44 = vpop.permute.xlu0 %1689  ;;  %v1995_v17 = vsel %vm1979_vm9, %v1962_v32, %v1684_v10  ;;  %v1899_v42 = vsel %vm1880_vm6, %v1866_v58, %v12552_v5  ;;  %v1931_v9 = vsel %vm1913_vm7, %v1898_v16, %v12553_v40  ;;  %v1802_v59 = vsel %vm1781_vm3, %v1769_v21, %v12554_v33  ;;  %v12559_v13 = vld [vmem:[#allocation65_spill] sm:$0xff]  ;;  %v12560_v63 = vld [vmem:[#allocation192_spill] sm:$0xff]  ;;  %v12563_v35 = vld [vmem:[#allocation151_spill] sm:$0xff] }
 0x289   : > { %6824 = vmatmul.mubr.msk.f32.gmra.mrb[14].mxu0 %vm2024_vm10, %v1995_v17  ;;  %v1834_v2 = vsel %vm1814_vm4, %v1801_v25, %v12555_v0  ;;  %v1932_v38 = vsel %vm1913_vm7, %v1899_v42, %v12556_v56  ;;  %v1964_v50 = vsel %vm1946_vm8, %v1931_v9, %v12557_v34  ;;  %v1835_v54 = vsel %vm1814_vm4, %v1802_v59, %v12558_v52  ;;  %v7160_v15 = vld [vmem:[#allocation2 + $0x18f] sm:$0xff]  ;;  %v7161_v18 = vld [vmem:[#allocation2 + $0x1a7] sm:$0xff]  ;;  %v12567_v22 = vld [vmem:[#allocation174_spill] sm:$0xff] }
 0x28a   : > { %v1867_v37 = vsel %vm1847_vm5, %v1834_v2, %v12559_v13  ;;  %v1965_v60 = vsel %vm1946_vm8, %v1932_v38, %v12560_v63  ;;  %v12561_v23 = vld [vmem:[#allocation76_spill] sm:$0xff]  ;;  %v1868_v7 = vsel %vm1847_vm5, %v1835_v54, %v12562_v29  ;;  %v12564_v62 = vld [vmem:[#allocation71_spill] sm:$0xff]  ;;  %v12565_v53 = vld [vmem:[#allocation117_spill] sm:$0xff] }
 0x28b   : > { %v1688_v31 = vpop.permute.xlu1 %1687  ;;  %v1770_v49 = vsel %vm279_vm0, %v7160_v15, %v12561_v23  ;;  %v1900_v48 = vsel %vm1880_vm6, %v1867_v37, %v12563_v35  ;;  %v1998_v19 = vsel %vm1979_vm9, %v1965_v60, %v1690_v44  ;;  %v1771_v47 = vsel %vm279_vm0, %v7161_v18, %v12564_v62  ;;  %v12566_v28 = vld [vmem:[#allocation148_spill] sm:$0xff]  ;;  %v12568_v43 = vld [vmem:[#allocation114_spill] sm:$0xff]  ;;  %v12570_v46 = vld [vmem:[#allocation171_spill] sm:$0xff] }
 0x28c   : > { %v1694_v12 = vpop.permute.xlu0 %1693  ;;  %v1997_v6 = vsel %vm1979_vm9, %v1964_v50, %v1688_v31  ;;  %v1803_v57 = vsel %vm1781_vm3, %v1770_v49, %v12565_v53  ;;  %v1901_v39 = vsel %vm1880_vm6, %v1868_v7, %v12566_v28  ;;  %v1933_v61 = vsel %vm1913_vm7, %v1900_v48, %v12567_v22  ;;  %v12569_v3 = vld [vmem:[#allocation138_spill] sm:$0xff]  ;;  %v12571_v32 = vld [vmem:[#allocation197_spill] sm:$0xff]  ;;  %v12572_v30 = vld [vmem:[#allocation135_spill] sm:$0xff] }
 0x28d   : > { %6827 = vmatmul.mubr.msk.f32.vlgmr.msra.gmra.mrb[0].mxu1 %vm2024_vm10, %v1997_v6  ;;  %v1804_v20 = vsel %vm1781_vm3, %v1771_v47, %v12568_v43  ;;  %v1836_v51 = vsel %vm1814_vm4, %v1803_v57, %v12569_v3  ;;  %v1934_v24 = vsel %vm1913_vm7, %v1901_v39, %v12570_v46  ;;  %v1966_v44 = vsel %vm1946_vm8, %v1933_v61, %v12571_v32  ;;  %v12573_v26 = vld [vmem:[#allocation69_spill] sm:$0xff]  ;;  %v12574_v1 = vld [vmem:[#allocation194_spill] sm:$0xff]  ;;  %v12575_v58 = vld [vmem:[#allocation80_spill] sm:$0xff] }
 0x28e   : > { %6829 = vmatprep.mubr.msk.f32.mxu1 %vm2024_vm10, %v1998_v19  ;;  %v1837_v27 = vsel %vm1814_vm4, %v1804_v20, %v12572_v30  ;;  %v1869_v17 = vsel %vm1847_vm5, %v1836_v51, %v12573_v26  ;;  %v1967_v45 = vsel %vm1946_vm8, %v1934_v24, %v12574_v1  ;;  %v7162_v36 = vld [vmem:[#allocation2 + $0x1af] sm:$0xff]  ;;  %v12576_v16 = vld [vmem:[#allocation62_spill] sm:$0xff]  ;;  %v7163_v25 = vld [vmem:[#allocation2 + $0x1c7] sm:$0xff] }
 0x28f   : > { %v1692_v8 = vpop.permute.xlu1 %1691  ;;  %v1772_v41 = vsel %vm279_vm0, %v7162_v36, %v12575_v58  ;;  %v1870_v55 = vsel %vm1847_vm5, %v1837_v27, %v12576_v16  ;;  %v12577_v4 = vld [vmem:[#allocation153_spill] sm:$0xff]  ;;  %v2000_v11 = vsel %vm1979_vm9, %v1967_v45, %v1694_v12  ;;  %v12578_v5 = vld [vmem:[#allocation75_spill] sm:$0xff]  ;;  %v12580_v33 = vld [vmem:[#allocation150_spill] sm:$0xff] }
 0x290   : > { %v1698_v10 = vpop.permute.xlu0 %1697  ;;  %v1999_v14 = vsel %vm1979_vm9, %v1966_v44, %v1692_v8  ;;  %v1902_v21 = vsel %vm1880_vm6, %v1869_v17, %v12577_v4  ;;  %v1773_v42 = vsel %vm279_vm0, %v7163_v25, %v12578_v5  ;;  %v12579_v40 = vld [vmem:[#allocation119_spill] sm:$0xff]  ;;  %v1903_v59 = vsel %vm1880_vm6, %v1870_v55, %v12580_v33  ;;  %v12581_v0 = vld [vmem:[#allocation176_spill] sm:$0xff]  ;;  %v12584_v12 = vld [vmem:[#allocation173_spill] sm:$0xff] }
 0x291   : > { %6830 = vmatmul.mubr.msk.f32.gmra.mrb[2].mxu1 %vm2024_vm10, %v1999_v14  ;;  %v1805_v9 = vsel %vm1781_vm3, %v1772_v41, %v12579_v40  ;;  %v1935_v2 = vsel %vm1913_vm7, %v1902_v21, %v12581_v0  ;;  %v12582_v56 = vld [vmem:[#allocation116_spill] sm:$0xff]  ;;  %v1936_v31 = vsel %vm1913_vm7, %v1903_v59, %v12584_v12  ;;  %v12585_v52 = vld [vmem:[#allocation199_spill] sm:$0xff]  ;;  %v12586_v63 = vld [vmem:[#allocation137_spill] sm:$0xff] }
 0x292   : > { %6832 = vmatprep.mubr.msk.f32.mxu1 %vm2024_vm10, %v2000_v11  ;;  %v1806_v38 = vsel %vm1781_vm3, %v1773_v42, %v12582_v56  ;;  %v12583_v34 = vld [vmem:[#allocation140_spill] sm:$0xff]  ;;  %v1968_v54 = vsel %vm1946_vm8, %v1935_v2, %v12585_v52  ;;  %v12587_v6 = vld [vmem:[#allocation73_spill] sm:$0xff]  ;;  %v12590_v19 = vld [vmem:[#allocation66_spill] sm:$0xff] }
 0x293   : > { %v1838_v50 = vsel %vm1814_vm4, %v1805_v9, %v12583_v34  ;;  %v1696_v37 = vpop.permute.xlu1 %1695  ;;  %v1839_v60 = vsel %vm1814_vm4, %v1806_v38, %v12586_v63  ;;  %v12588_v23 = vld [vmem:[#allocation196_spill] sm:$0xff]  ;;  %v12591_v62 = vld [vmem:[#allocation155_spill] sm:$0xff]  ;;  %v12593_v22 = vld [vmem:[#allocation121_spill] sm:$0xff] }
 0x294   : > { %v1702_v13 = vpop.permute.xlu0 %1701  ;;  %v1871_v15 = vsel %vm1847_vm5, %v1838_v50, %v12587_v6  ;;  %v1969_v49 = vsel %vm1946_vm8, %v1936_v31, %v12588_v23  ;;  %v2001_v29 = vsel %vm1979_vm9, %v1968_v54, %v1696_v37  ;;  %v7164_v7 = vld [vmem:[#allocation2 + $0x1cf] sm:$0xff]  ;;  %v1872_v18 = vsel %vm1847_vm5, %v1839_v60, %v12590_v19  ;;  %v7165_v57 = vld [vmem:[#allocation2 + $0x1e7] sm:$0xff]  ;;  %v12595_v3 = vld [vmem:[#allocation178_spill] sm:$0xff] }
 0x295   : > { %v12589_v35 = vld [vmem:[#allocation84_spill] sm:$0xff]  ;;  %v1904_v47 = vsel %vm1880_vm6, %v1871_v15, %v12591_v62  ;;  %v2002_v53 = vsel %vm1979_vm9, %v1969_v49, %v1698_v10  ;;  %6833 = vmatmul.mubr.msk.f32.gmra.mrb[4].mxu1 %vm2024_vm10, %v2001_v29  ;;  %v12592_v28 = vld [vmem:[#allocation79_spill] sm:$0xff]  ;;  %v12596_v46 = vld [vmem:[#allocation118_spill] sm:$0xff] }
 0x296   : > { %v1774_v48 = vsel %vm279_vm0, %v7164_v7, %v12589_v35  ;;  %v1775_v39 = vsel %vm279_vm0, %v7165_v57, %v12592_v28  ;;  %v12594_v43 = vld [vmem:[#allocation152_spill] sm:$0xff]  ;;  %v1937_v51 = vsel %vm1913_vm7, %v1904_v47, %v12595_v3  ;;  %6835 = vmatprep.mubr.msk.f32.mxu1 %vm2024_vm10, %v2002_v53  ;;  %v12597_v32 = vld [vmem:[#allocation142_spill] sm:$0xff]  ;;  %v12598_v10 = vld [vmem:[#allocation175_spill] sm:$0xff] }
 0x297   : > { %v1807_v61 = vsel %vm1781_vm3, %v1774_v48, %v12593_v22  ;;  %v1905_v20 = vsel %vm1880_vm6, %v1872_v18, %v12594_v43  ;;  %v1808_v24 = vsel %vm1781_vm3, %v1775_v39, %v12596_v46  ;;  %v12599_v30 = vld [vmem:[#allocation201_spill] sm:$0xff]  ;;  %v1700_v17 = vpop.permute.xlu1 %1699  ;;  %v12600_v1 = vld [vmem:[#allocation139_spill] sm:$0xff]  ;;  %v12602_v58 = vld [vmem:[#allocation198_spill] sm:$0xff] }
 0x298   : > { %v1840_v44 = vsel %vm1814_vm4, %v1807_v61, %v12597_v32  ;;  %v1938_v8 = vsel %vm1913_vm7, %v1905_v20, %v12598_v10  ;;  %v1970_v27 = vsel %vm1946_vm8, %v1937_v51, %v12599_v30  ;;  %v1706_v26 = vpop.permute.xlu0 %1705  ;;  %v1841_v45 = vsel %vm1814_vm4, %v1808_v24, %v12600_v1  ;;  %v12601_v14 = vld [vmem:[#allocation77_spill] sm:$0xff]  ;;  %v12603_v4 = vld [vmem:[#allocation88_spill] sm:$0xff]  ;;  %v12604_v11 = vld [vmem:[#allocation70_spill] sm:$0xff] }
 0x299   : > { %v1873_v36 = vsel %vm1847_vm5, %v1840_v44, %v12601_v14  ;;  %v1971_v41 = vsel %vm1946_vm8, %v1938_v8, %v12602_v58  ;;  %v2003_v16 = vsel %vm1979_vm9, %v1970_v27, %v1700_v17  ;;  %v7166_v55 = vld [vmem:[#allocation2 + $0x1ef] sm:$0xff]  ;;  %v1874_v25 = vsel %vm1847_vm5, %v1841_v45, %v12604_v11  ;;  %v7167_v9 = vld [vmem:[#allocation2 + $0x207] sm:$0xff]  ;;  %v12608_v56 = vld [vmem:[#allocation154_spill] sm:$0xff] }
 0x29a   : > { %v1776_v21 = vsel %vm279_vm0, %v7166_v55, %v12603_v4  ;;  %v12605_v5 = vld [vmem:[#allocation157_spill] sm:$0xff]  ;;  %v2004_v40 = vsel %vm1979_vm9, %v1971_v41, %v1702_v13  ;;  %6836 = vmatmul.mubr.msk.f32.gmra.mrb[6].mxu1 %vm2024_vm10, %v2003_v16  ;;  %v12606_v33 = vld [vmem:[#allocation83_spill] sm:$0xff]  ;;  %v1907_v38 = vsel %vm1880_vm6, %v1874_v25, %v12608_v56  ;;  %v12609_v34 = vld [vmem:[#allocation180_spill] sm:$0xff] }
 0x29b   : > { %v1906_v42 = vsel %vm1880_vm6, %v1873_v36, %v12605_v5  ;;  %v1777_v59 = vsel %vm279_vm0, %v7167_v9, %v12606_v33  ;;  %v12607_v0 = vld [vmem:[#allocation123_spill] sm:$0xff]  ;;  %6838 = vmatprep.mubr.msk.f32.mxu1 %vm2024_vm10, %v2004_v40  ;;  %v12610_v12 = vld [vmem:[#allocation120_spill] sm:$0xff]  ;;  %v12612_v13 = vld [vmem:[#allocation177_spill] sm:$0xff]  ;;  %v1704_v6 = vpop.permute.xlu1 %1703 }
 0x29c   : > { %v1809_v2 = vsel %vm1781_vm3, %v1776_v21, %v12607_v0  ;;  %v1939_v50 = vsel %vm1913_vm7, %v1906_v42, %v12609_v34  ;;  %v1810_v31 = vsel %vm1781_vm3, %v1777_v59, %v12610_v12  ;;  %v12611_v52 = vld [vmem:[#allocation144_spill] sm:$0xff]  ;;  %v1940_v37 = vsel %vm1913_vm7, %v1907_v38, %v12612_v13  ;;  %v12613_v63 = vld [vmem:[#allocation203_spill] sm:$0xff]  ;;  %v12614_v15 = vld [vmem:[#allocation141_spill] sm:$0xff]  ;;  %v1710_v48 = vpop.permute.xlu0 %1709 }
 0x29d   : > { %v1842_v54 = vsel %vm1814_vm4, %v1809_v2, %v12611_v52  ;;  %v1972_v60 = vsel %vm1946_vm8, %v1939_v50, %v12613_v63  ;;  %v1843_v23 = vsel %vm1814_vm4, %v1810_v31, %v12614_v15  ;;  %v12615_v49 = vld [vmem:[#allocation81_spill] sm:$0xff]  ;;  %v12616_v7 = vld [vmem:[#allocation200_spill] sm:$0xff]  ;;  %v12618_v53 = vld [vmem:[#allocation74_spill] sm:$0xff] }
 0x29e   : > { %v1875_v29 = vsel %vm1847_vm5, %v1842_v54, %v12615_v49  ;;  %v1973_v35 = vsel %vm1946_vm8, %v1940_v37, %v12616_v7  ;;  %v2005_v19 = vsel %vm1979_vm9, %v1972_v60, %v1704_v6  ;;  %v7168_v18 = vld [vmem:[#allocation2 + $0x20f] sm:$0xff]  ;;  %v1876_v57 = vsel %vm1847_vm5, %v1843_v23, %v12618_v53  ;;  %v12619_v28 = vld [vmem:[#allocation159_spill] sm:$0xff]  ;;  %v12623_v32 = vld [vmem:[#allocation182_spill] sm:$0xff] }
 0x29f   : > { %v12617_v62 = vld [vmem:[#allocation92_spill] sm:$0xff]  ;;  %v1908_v39 = vsel %vm1880_vm6, %v1875_v29, %v12619_v28  ;;  %v2006_v22 = vsel %vm1979_vm9, %v1973_v35, %v1706_v26  ;;  %6839 = vmatmul.mubr.msk.f32.gmra.mrb[8].mxu1 %vm2024_vm10, %v2005_v19  ;;  %v12620_v43 = vld [vmem:[#allocation87_spill] sm:$0xff]  ;;  %v12624_v10 = vld [vmem:[#allocation122_spill] sm:$0xff]  ;;  %v1708_v14 = vpop.permute.xlu1 %1707 }
 0x2a0   : > { %v1778_v47 = vsel %vm279_vm0, %v7168_v18, %v12617_v62  ;;  %v7169_v61 = vld [vmem:[#allocation2 + $0x227] sm:$0xff]  ;;  %v1941_v44 = vsel %vm1913_vm7, %v1908_v39, %v12623_v32  ;;  %6841 = vmatprep.mubr.msk.f32.mxu1 %vm2024_vm10, %v2006_v22  ;;  %v12625_v30 = vld [vmem:[#allocation145_spill] sm:$0xff]  ;;  %v12629_v41 = vld [vmem:[#allocation82_spill] sm:$0xff]  ;;  %v1714_v12 = vpop.permute.xlu0 %1713 }
 0x2a1   : > { %v1779_v20 = vsel %vm279_vm0, %v7169_v61, %v12620_v43  ;;  %v12621_v3 = vld [vmem:[#allocation124_spill] sm:$0xff]  ;;  %v12626_v26 = vld [vmem:[#allocation179_spill] sm:$0xff]  ;;  %v12630_v55 = vld [vmem:[#allocation202_spill] sm:$0xff] }
 0x2a2   : > { %v1811_v51 = vsel %vm1781_vm3, %v1778_v47, %v12621_v3  ;;  %v12622_v46 = vld [vmem:[#allocation156_spill] sm:$0xff]  ;;  %v1812_v8 = vsel %vm1781_vm3, %v1779_v20, %v12624_v10  ;;  %v12627_v1 = vld [vmem:[#allocation91_spill] sm:$0xff]  ;;  %v12632_v42 = vld [vmem:[#allocation78_spill] sm:$0xff] }
 0x2a3   : > { %v1909_v24 = vsel %vm1880_vm6, %v1876_v57, %v12622_v46  ;;  %v1844_v27 = vsel %vm1814_vm4, %v1811_v51, %v12625_v30  ;;  %v1974_v45 = vsel %vm1946_vm8, %v1941_v44, %v12627_v1  ;;  %v12628_v36 = vld [vmem:[#allocation143_spill] sm:$0xff]  ;;  %v7170_v11 = vld [vmem:[#allocation2 + $0x22f] sm:$0xff]  ;;  %v12635_v56 = vld [vmem:[#allocation158_spill] sm:$0xff]  ;;  %v1712_v60 = vpop.permute.xlu1 %1711 }
 0x2a4   : > { %v1942_v17 = vsel %vm1913_vm7, %v1909_v24, %v12626_v26  ;;  %v1845_v58 = vsel %vm1814_vm4, %v1812_v8, %v12628_v36  ;;  %v1877_v16 = vsel %vm1847_vm5, %v1844_v27, %v12629_v41  ;;  %v2007_v21 = vsel %vm1979_vm9, %v1974_v45, %v1708_v14  ;;  %v12631_v25 = vld [vmem:[#allocation96_spill] sm:$0xff]  ;;  %v12634_v0 = vld [vmem:[#allocation125_spill] sm:$0xff]  ;;  %v12636_v34 = vld [vmem:[#allocation183_spill] sm:$0xff] }
 0x2a5   : > { %v1975_v4 = vsel %vm1946_vm8, %v1942_v17, %v12630_v55  ;;  %v1780_v5 = vsel %vm279_vm0, %v7170_v11, %v12631_v25  ;;  %v1878_v40 = vsel %vm1847_vm5, %v1845_v58, %v12632_v42  ;;  %v12633_v9 = vld [vmem:[#allocation160_spill] sm:$0xff]  ;;  %6842 = vmatmul.mubr.msk.f32.gmra.mrb[10].mxu1 %vm2024_vm10, %v2007_v21  ;;  %v12638_v54 = vld [vmem:[#allocation181_spill] sm:$0xff]  ;;  %v12641_v23 = vld [vmem:[#allocation35_spill] sm:$0xff] }
 0x2a6   : > { %v1910_v33 = vsel %vm1880_vm6, %v1877_v16, %v12633_v9  ;;  %v2008_v59 = vsel %vm1979_vm9, %v1975_v4, %v1710_v48  ;;  %v1813_v2 = vsel %vm1781_vm3, %v1780_v5, %v12634_v0  ;;  %v1911_v38 = vsel %vm1880_vm6, %v1878_v40, %v12635_v56  ;;  %v12637_v31 = vld [vmem:[#allocation36_spill] sm:$0xff]  ;;  %v12640_v6 = vld [vmem:[#allocation85_spill] sm:$0xff]  ;;  %v9188_v43 = vld [vmem:[%s12082_s2] ss:$0 sm:$0xff] }
 0x2a7   : > { %v1943_v50 = vsel %vm1913_vm7, %v1910_v33, %v12636_v34  ;;  %6844 = vmatprep.mubr.msk.f32.mxu1 %vm2024_vm10, %v2008_v59  ;;  %v1846_v52 = vsel %vm1814_vm4, %v1813_v2, %v12637_v31  ;;  %v1944_v13 = vsel %vm1913_vm7, %v1911_v38, %v12638_v54  ;;  %v12639_v37 = vld [vmem:[#allocation204_spill] sm:$0xff]  ;;  %v12642_v7 = vld [vmem:[#allocation161_spill] sm:$0xff]  ;;  %v1716_v53 = vpop.permute.xlu1 %1715 }
 0x2a8   : > { %v1976_v63 = vsel %vm1946_vm8, %v1943_v50, %v12639_v37  ;;  %v1879_v15 = vsel %vm1847_vm5, %v1846_v52, %v12640_v6  ;;  %v1977_v49 = vsel %vm1946_vm8, %v1944_v13, %v12641_v23  ;;  %v12643_v19 = vld [vmem:[#allocation184_spill] sm:$0xff]  ;;  %v12644_v62 = vld [vmem:[#allocation37_spill] sm:$0xff] }
 0x2a9   : > { %v2009_v29 = vsel %vm1979_vm9, %v1976_v63, %v1712_v60  ;;  %v1912_v35 = vsel %vm1880_vm6, %v1879_v15, %v12642_v7  ;;  %v2010_v48 = vsel %vm1979_vm9, %v1977_v49, %v1714_v12  ;;  %v2417_v28 = vld [vmem:[#allocation2 + $0x30] sm:$0xff]  ;;  %v2416_v39 = vld [vmem:[#allocation2 + $0x28] sm:$0xff] }
 0x2aa   : > { %6845 = vmatmul.mubr.msk.f32.gmra.mrb[12].mxu1 %vm2024_vm10, %v2009_v29  ;;  %v1945_v18 = vsel %vm1913_vm7, %v1912_v35, %v12643_v19  ;;  %2709 = vrot.lane.b32.xlu1 %v2417_v28, %s7206_s8  ;;  %v2419_v22 = vld [vmem:[#allocation2 + $0x50] sm:$0xff]  ;;  %v2418_v61 = vld [vmem:[#allocation2 + $0x48] sm:$0xff] }
 0x2ab   : > { %6847 = vmatprep.mubr.msk.f32.mxu1 %vm2024_vm10, %v2010_v48  ;;  %v1978_v47 = vsel %vm1946_vm8, %v1945_v18, %v12644_v62  ;;  %2707 = vrot.lane.b32.xlu0 %v2416_v39, %s7206_s8 }
 0x2ac   : > { %v2011_v57 = vsel %vm1979_vm9, %v1978_v47, %v1716_v53 }
 0x2ae   : > { %6848 = vmatmul.mubr.msk.f32.gmra.mrb[14].mxu1 %vm2024_vm10, %v2011_v57  ;;  %2713 = vrot.lane.b32.xlu1 %v2419_v22, %s7206_s8 }
 0x2af   : > { %2711 = vrot.lane.b32.xlu0 %v2418_v61, %s7206_s8 }
 0x340   : > { %v6804_v20 = vpop.f32.mrb[0].mxu0 }
 0x341   : > { %v2197_v3 = vadd.f32 %v6804_v20, %v9188_v43  ;;  %v2191_v51 = vpop.f32.mrb[1].mxu0 }
 0x342   : > { %v2192_v46 = vadd.f32 %v9188_v43, %v2191_v51 }
 0x343   : > { %2351 = vst.msk [vmem:[#allocation2 + $0x70] sm:$0xff] %vm279_vm0, %v2197_v3 }
 0x344   : > { %2350 = vst.msk [vmem:[#allocation2 + $0x68] sm:$0xff] %vm279_vm0, %v2192_v46  ;;  %v6807_v24 = vpop.f32.mrb[2].mxu0 }
 0x345   : > { %v2207_v32 = vadd.f32 %v6807_v24, %v9188_v43  ;;  %v2201_v44 = vpop.f32.mrb[3].mxu0 }
 0x346   : > { %v2202_v10 = vadd.f32 %v9188_v43, %v2201_v44 }
 0x347   : > { %2353 = vst.msk [vmem:[#allocation2 + $0x90] sm:$0xff] %vm279_vm0, %v2207_v32 }
 0x348   : > { %2352 = vst.msk [vmem:[#allocation2 + $0x88] sm:$0xff] %vm279_vm0, %v2202_v10  ;;  %v6810_v8 = vpop.f32.mrb[4].mxu0 }
 0x349   : > { %v2217_v30 = vadd.f32 %v6810_v8, %v9188_v43  ;;  %v2211_v27 = vpop.f32.mrb[5].mxu0 }
 0x34a   : > { %v2212_v26 = vadd.f32 %v9188_v43, %v2211_v27  ;;  %v9200_v17 = vld [vmem:[#allocation2 + $0x70] sm:$0xff] }
 0x34b   : > { %2355 = vst.msk [vmem:[#allocation2 + $0xb0] sm:$0xff] %vm279_vm0, %v2217_v30  ;;  %2717 = vrot.lane.b32.xlu1 %v9200_v17, %s7206_s8  ;;  %v9205_v1 = vld [vmem:[#allocation2 + $0x68] sm:$0xff] }
 0x34c   : > { %2354 = vst.msk [vmem:[#allocation2 + $0xa8] sm:$0xff] %vm279_vm0, %v2212_v26  ;;  %2715 = vrot.lane.b32.xlu0 %v9205_v1, %s7206_s8  ;;  %v6813_v45 = vpop.f32.mrb[6].mxu0 }
 0x34d   : > { %v2227_v14 = vadd.f32 %v6813_v45, %v9188_v43  ;;  %v2221_v36 = vpop.f32.mrb[7].mxu0 }
 0x34e   : > { %v2222_v58 = vadd.f32 %v9188_v43, %v2221_v36  ;;  %v9212_v41 = vld [vmem:[#allocation2 + $0x90] sm:$0xff] }
 0x34f   : > { %2357 = vst.msk [vmem:[#allocation2 + $0xd0] sm:$0xff] %vm279_vm0, %v2227_v14  ;;  %2721 = vrot.lane.b32.xlu1 %v9212_v41, %s7206_s8  ;;  %v9217_v16 = vld [vmem:[#allocation2 + $0x88] sm:$0xff] }
 0x350   : > { %2356 = vst.msk [vmem:[#allocation2 + $0xc8] sm:$0xff] %vm279_vm0, %v2222_v58  ;;  %v6816_v55 = vpop.f32.mrb[8].mxu0  ;;  %2719 = vrot.lane.b32.xlu0 %v9217_v16, %s7206_s8 }
 0x351   : > { %v2237_v4 = vadd.f32 %v6816_v55, %v9188_v43  ;;  %v2231_v21 = vpop.f32.mrb[9].mxu0 }
 0x352   : > { %v2232_v11 = vadd.f32 %v9188_v43, %v2231_v21  ;;  %v9224_v25 = vld [vmem:[#allocation2 + $0xb0] sm:$0xff] }
 0x353   : > { %2359 = vst.msk [vmem:[#allocation2 + $0xf0] sm:$0xff] %vm279_vm0, %v2237_v4  ;;  %2725 = vrot.lane.b32.xlu1 %v9224_v25, %s7206_s8  ;;  %v9229_v5 = vld [vmem:[#allocation2 + $0xa8] sm:$0xff] }
 0x354   : > { %2358 = vst.msk [vmem:[#allocation2 + $0xe8] sm:$0xff] %vm279_vm0, %v2232_v11  ;;  %v6819_v42 = vpop.f32.mrb[10].mxu0  ;;  %2723 = vrot.lane.b32.xlu0 %v9229_v5, %s7206_s8 }
 0x355   : > { %v2247_v40 = vadd.f32 %v6819_v42, %v9188_v43  ;;  %v2241_v9 = vpop.f32.mrb[11].mxu0 }
 0x356   : > { %v2242_v33 = vadd.f32 %v9188_v43, %v2241_v9  ;;  %v9236_v59 = vld [vmem:[#allocation2 + $0xd0] sm:$0xff] }
 0x357   : > { %2361 = vst.msk [vmem:[#allocation2 + $0x110] sm:$0xff] %vm279_vm0, %v2247_v40  ;;  %2729 = vrot.lane.b32.xlu1 %v9236_v59, %s7206_s8  ;;  %v9241_v0 = vld [vmem:[#allocation2 + $0xc8] sm:$0xff] }
 0x358   : > { %2360 = vst.msk [vmem:[#allocation2 + $0x108] sm:$0xff] %vm279_vm0, %v2242_v33  ;;  %v6822_v2 = vpop.f32.mrb[12].mxu0  ;;  %2727 = vrot.lane.b32.xlu0 %v9241_v0, %s7206_s8 }
 0x359   : > { %v2257_v56 = vadd.f32 %v6822_v2, %v9188_v43  ;;  %v2251_v38 = vpop.f32.mrb[13].mxu0  ;;  %v2447_v2 = vld [vmem:[#allocation2 + $0x13] sm:$0xff] }
 0x35a   : > { %v2252_v34 = vadd.f32 %v9188_v43, %v2251_v38  ;;  %v9248_v50 = vld [vmem:[#allocation2 + $0xf0] sm:$0xff] }
 0x35b   : > { %2363 = vst.msk [vmem:[#allocation2 + $0x130] sm:$0xff] %vm279_vm0, %v2257_v56  ;;  %2733 = vrot.lane.b32.xlu1 %v9248_v50, %s7206_s8  ;;  %v9253_v12 = vld [vmem:[#allocation2 + $0xe8] sm:$0xff] }
 0x35c   : > { %2362 = vst.msk [vmem:[#allocation2 + $0x128] sm:$0xff] %vm279_vm0, %v2252_v34  ;;  %v6825_v31 = vpop.f32.mrb[14].mxu0  ;;  %2731 = vrot.lane.b32.xlu0 %v9253_v12, %s7206_s8  ;;  %v2446_v34 = vld [vmem:[#allocation2 + $0xb] sm:$0xff] }
 0x35d   : > { %v2267_v52 = vadd.f32 %v6825_v31, %v9188_v43  ;;  %v2261_v54 = vpop.f32.mrb[15].mxu0 }
 0x35e   : > { %v2262_v13 = vadd.f32 %v9188_v43, %v2261_v54  ;;  %v9260_v37 = vld [vmem:[#allocation2 + $0x110] sm:$0xff] }
 0x35f   : > { %2365 = vst.msk [vmem:[#allocation2 + $0x150] sm:$0xff] %vm279_vm0, %v2267_v52  ;;  %2737 = vrot.lane.b32.xlu1 %v9260_v37, %s7206_s8  ;;  %v9265_v63 = vld [vmem:[#allocation2 + $0x108] sm:$0xff]  ;;  %v2449_v52 = vld [vmem:[#allocation2 + $0x33] sm:$0xff] }
 0x360   : > { %2364 = vst.msk [vmem:[#allocation2 + $0x148] sm:$0xff] %vm279_vm0, %v2262_v13  ;;  %v6828_v60 = vpop.f32.mrb[0].mxu1  ;;  %2735 = vrot.lane.b32.xlu0 %v9265_v63, %s7206_s8  ;;  %v2448_v54 = vld [vmem:[#allocation2 + $0x2b] sm:$0xff]  ;;  %v2451_v13 = vld [vmem:[#allocation2 + $0x53] sm:$0xff] }
 0x361   : > { %v2277_v6 = vadd.f32 %v6828_v60, %v9188_v43  ;;  %v2271_v15 = vpop.f32.mrb[1].mxu1  ;;  %v2450_v60 = vld [vmem:[#allocation2 + $0x4b] sm:$0xff] }
 0x362   : > { %v2272_v23 = vadd.f32 %v9188_v43, %v2271_v15  ;;  %v9272_v49 = vld [vmem:[#allocation2 + $0x130] sm:$0xff] }
 0x363   : > { %2367 = vst.msk [vmem:[#allocation2 + $0x170] sm:$0xff] %vm279_vm0, %v2277_v6  ;;  %2741 = vrot.lane.b32.xlu1 %v9272_v49, %s7206_s8  ;;  %v9277_v29 = vld [vmem:[#allocation2 + $0x128] sm:$0xff]  ;;  %v9372_v15 = vld [vmem:[#allocation2 + $0x93] sm:$0xff] }
 0x364   : > { %2366 = vst.msk [vmem:[#allocation2 + $0x168] sm:$0xff] %vm279_vm0, %v2272_v23  ;;  %v6831_v7 = vpop.f32.mrb[2].mxu1  ;;  %2739 = vrot.lane.b32.xlu0 %v9277_v29, %s7206_s8  ;;  %v9368_v6 = vld [vmem:[#allocation2 + $0x6b] sm:$0xff] }
 0x365   : > { %v2287_v35 = vadd.f32 %v6831_v7, %v9188_v43  ;;  %v2281_v48 = vpop.f32.mrb[3].mxu1  ;;  %v9376_v23 = vld [vmem:[#allocation2 + $0x8b] sm:$0xff]  ;;  %v9380_v7 = vld [vmem:[#allocation2 + $0xb3] sm:$0xff] }
 0x366   : > { %v2282_v19 = vadd.f32 %v9188_v43, %v2281_v48  ;;  %v9284_v18 = vld [vmem:[#allocation2 + $0x150] sm:$0xff] }
 0x367   : > { %2369 = vst.msk [vmem:[#allocation2 + $0x190] sm:$0xff] %vm279_vm0, %v2287_v35  ;;  %2745 = vrot.lane.b32.xlu1 %v9284_v18, %s7206_s8  ;;  %v9289_v62 = vld [vmem:[#allocation2 + $0x148] sm:$0xff]  ;;  %v9388_v48 = vld [vmem:[#allocation2 + $0xd3] sm:$0xff] }
 0x368   : > { %2368 = vst.msk [vmem:[#allocation2 + $0x188] sm:$0xff] %vm279_vm0, %v2282_v19  ;;  %v6834_v47 = vpop.f32.mrb[4].mxu1  ;;  %2743 = vrot.lane.b32.xlu0 %v9289_v62, %s7206_s8  ;;  %v9384_v35 = vld [vmem:[#allocation2 + $0xab] sm:$0xff] }
 0x369   : > { %v2297_v53 = vadd.f32 %v6834_v47, %v9188_v43  ;;  %v2291_v57 = vpop.f32.mrb[5].mxu1  ;;  %v9392_v19 = vld [vmem:[#allocation2 + $0xcb] sm:$0xff]  ;;  %v9396_v47 = vld [vmem:[#allocation2 + $0xf3] sm:$0xff] }
 0x36a   : > { %v2292_v28 = vadd.f32 %v9188_v43, %v2291_v57  ;;  %v9296_v39 = vld [vmem:[#allocation2 + $0x170] sm:$0xff] }
 0x36b   : > { %2371 = vst.msk [vmem:[#allocation2 + $0x1b0] sm:$0xff] %vm279_vm0, %v2297_v53  ;;  %2749 = vrot.lane.b32.xlu1 %v9296_v39, %s7206_s8  ;;  %v9301_v22 = vld [vmem:[#allocation2 + $0x168] sm:$0xff]  ;;  %v9404_v57 = vld [vmem:[#allocation2 + $0x113] sm:$0xff] }
 0x36c   : > { %2370 = vst.msk [vmem:[#allocation2 + $0x1a8] sm:$0xff] %vm279_vm0, %v2292_v28  ;;  %2747 = vrot.lane.b32.xlu0 %v9301_v22, %s7206_s8  ;;  %v9400_v53 = vld [vmem:[#allocation2 + $0xeb] sm:$0xff] }
 0x36d   : > { %v6837_v61 = vpop.f32.mrb[6].mxu1  ;;  %v9408_v28 = vld [vmem:[#allocation2 + $0x10b] sm:$0xff] }
 0x36e   : > { %v2307_v20 = vadd.f32 %v6837_v61, %v9188_v43  ;;  %v2301_v3 = vpop.f32.mrb[7].mxu1  ;;  %v9308_v46 = vld [vmem:[#allocation2 + $0x190] sm:$0xff] }
 0x36f   : > { %v2302_v51 = vadd.f32 %v9188_v43, %v2301_v3  ;;  %2753 = vrot.lane.b32.xlu1 %v9308_v46, %s7206_s8  ;;  %v9313_v24 = vld [vmem:[#allocation2 + $0x188] sm:$0xff]  ;;  %v9412_v61 = vld [vmem:[#allocation2 + $0x133] sm:$0xff] }
 0x370   : > { %2373 = vst.msk [vmem:[#allocation2 + $0x1d0] sm:$0xff] %vm279_vm0, %v2307_v20  ;;  %2751 = vrot.lane.b32.xlu0 %v9313_v24, %s7206_s8  ;;  %v9416_v20 = vld [vmem:[#allocation2 + $0x12b] sm:$0xff]  ;;  %v9420_v3 = vld [vmem:[#allocation2 + $0x153] sm:$0xff] }
 0x371   : > { %2372 = vst.msk [vmem:[#allocation2 + $0x1c8] sm:$0xff] %vm279_vm0, %v2302_v51  ;;  %v9424_v51 = vld [vmem:[#allocation2 + $0x14b] sm:$0xff] }
 0x372   : > { %v6840_v32 = vpop.f32.mrb[8].mxu1  ;;  %v9320_v30 = vld [vmem:[#allocation2 + $0x1b0] sm:$0xff] }
 0x373   : > { %v2317_v44 = vadd.f32 %v6840_v32, %v9188_v43  ;;  %v2311_v10 = vpop.f32.mrb[9].mxu1  ;;  %2757 = vrot.lane.b32.xlu1 %v9320_v30, %s7206_s8  ;;  %v9325_v27 = vld [vmem:[#allocation2 + $0x1a8] sm:$0xff]  ;;  %v9428_v32 = vld [vmem:[#allocation2 + $0x173] sm:$0xff] }
 0x374   : > { %v2312_v8 = vadd.f32 %v9188_v43, %v2311_v10  ;;  %2755 = vrot.lane.b32.xlu0 %v9325_v27, %s7206_s8  ;;  %v9434_v10 = vpop.permute.xlu1 %2705 }
 0x375   : > { %2375 = vst.msk [vmem:[#allocation2 + $0x1f0] sm:$0xff] %vm279_vm0, %v2317_v44  ;;  %v9432_v44 = vld [vmem:[#allocation2 + $0x16b] sm:$0xff]  ;;  %12645 = vst [vmem:[#allocation41_spill] sm:$0xff] %v9434_v10 }
 0x376   : > { %2374 = vst.msk [vmem:[#allocation2 + $0x1e8] sm:$0xff] %vm279_vm0, %v2312_v8  ;;  %v9438_v8 = vpop.permute.xlu0 %2703 }
 0x377   : > { %v9332_v58 = vld [vmem:[#allocation2 + $0x1d0] sm:$0xff]  ;;  %12646 = vst [vmem:[#allocation100_spill] sm:$0xff] %v9438_v8  ;;  %v9540_v8 = vld [vmem:[#allocation2 + $0x125] sm:$0xff] }
 0x378   : > { %v6843_v26 = vpop.f32.mrb[10].mxu1  ;;  %2761 = vrot.lane.b32.xlu1 %v9332_v58, %s7206_s8  ;;  %v9337_v55 = vld [vmem:[#allocation2 + $0x1c8] sm:$0xff]  ;;  %12668 = vst [vmem:[#allocation90_spill] sm:$0xff] %v9540_v8 }
 0x379   : > { %v2327_v45 = vadd.f32 %v6843_v26, %v9188_v43  ;;  %v2321_v14 = vpop.f32.mrb[11].mxu1  ;;  %2759 = vrot.lane.b32.xlu0 %v9337_v55, %s7206_s8  ;;  %v9440_v26 = vld [vmem:[#allocation2 + $0x193] sm:$0xff] }
 0x37a   : > { %v2322_v36 = vadd.f32 %v9188_v43, %v2321_v14  ;;  %v9448_v14 = vpop.permute.xlu1 %2709 }
 0x37b   : > { %2377 = vst.msk [vmem:[#allocation2 + $0x210] sm:$0xff] %vm279_vm0, %v2327_v45  ;;  %v9444_v45 = vld [vmem:[#allocation2 + $0x18b] sm:$0xff]  ;;  %12647 = vst [vmem:[#allocation40_spill] sm:$0xff] %v9448_v14 }
 0x37c   : > { %2376 = vst.msk [vmem:[#allocation2 + $0x208] sm:$0xff] %vm279_vm0, %v2322_v36  ;;  %v9344_v40 = vld [vmem:[#allocation2 + $0x1f0] sm:$0xff] }
 0x37d   : > { %v6846_v4 = vpop.f32.mrb[12].mxu1  ;;  %2765 = vrot.lane.b32.xlu1 %v9344_v40, %s7206_s8  ;;  %v9349_v9 = vld [vmem:[#allocation2 + $0x1e8] sm:$0xff]  ;;  %v9450_v36 = vld [vmem:[#allocation2 + $0x1b3] sm:$0xff] }
 0x37e   : > { %v2337_v21 = vadd.f32 %v6846_v4, %v9188_v43  ;;  %v2331_v11 = vpop.f32.mrb[13].mxu1  ;;  %2763 = vrot.lane.b32.xlu0 %v9349_v9, %s7206_s8  ;;  %v9452_v4 = vpop.permute.xlu0 %2707 }
 0x37f   : > { %v2332_v42 = vadd.f32 %v9188_v43, %v2331_v11  ;;  %12648 = vst [vmem:[#allocation43_spill] sm:$0xff] %v9452_v4  ;;  %v9460_v11 = vld [vmem:[#allocation2 + $0x1d3] sm:$0xff] }
 0x380   : > { %2379 = vst.msk [vmem:[#allocation2 + $0x230] sm:$0xff] %vm279_vm0, %v2337_v21  ;;  %v9456_v21 = vld [vmem:[#allocation2 + $0x1ab] sm:$0xff] }
 0x381   : > { %2378 = vst.msk [vmem:[#allocation2 + $0x228] sm:$0xff] %vm279_vm0, %v2332_v42  ;;  %v6849_v33 = vpop.f32.mrb[14].mxu1  ;;  %2833 = vrot.lane.b32.xlu1 %v2447_v2, %s7207_s9  ;;  %v9464_v42 = vld [vmem:[#allocation2 + $0x1cb] sm:$0xff] }
 0x382   : > { %v2347_v56 = vadd.f32 %v6849_v33, %v9188_v43  ;;  %v2341_v38 = vpop.f32.mrb[15].mxu1  ;;  %2831 = vrot.lane.b32.xlu0 %v2446_v34, %s7207_s9  ;;  %v9466_v33 = vpop.permute.xlu1 %2713 }
 0x383   : > { %v2342_v31 = vadd.f32 %v9188_v43, %v2341_v38  ;;  %v9364_v43 = vld [vmem:[#allocation2 + $0x73] sm:$0xff]  ;;  %12649 = vst [vmem:[#allocation95_spill] sm:$0xff] %v9466_v33  ;;  %v9470_v2 = vpop.permute.xlu0 %2711  ;;  %v9476_v38 = vld [vmem:[#allocation2 + $0x1eb] sm:$0xff] }
 0x384   : > { %2381 = vst.msk [vmem:[#allocation2 + $0x250] sm:$0xff] %vm279_vm0, %v2347_v56  ;;  %12650 = vst [vmem:[#allocation44_spill] sm:$0xff] %v9470_v2  ;;  %v9472_v56 = vld [vmem:[#allocation2 + $0x1f3] sm:$0xff]  ;;  %v2390_v2 = vld [vmem:[#allocation2 + $0x85] sm:$0xff] }
 0x385   : > { %2380 = vst.msk [vmem:[#allocation2 + $0x248] sm:$0xff] %vm279_vm0, %v2342_v31  ;;  %2837 = vrot.lane.b32.xlu1 %v2449_v52, %s7207_s9  ;;  %v2389_v31 = vld [vmem:[#allocation2 + $0x6d] sm:$0xff] }
 0x386   : > { %2835 = vrot.lane.b32.xlu0 %v2448_v54, %s7207_s9  ;;  %v2388_v54 = vld [vmem:[#allocation2 + $0x65] sm:$0xff] }
 0x389   : > { %2841 = vrot.lane.b32.xlu1 %v2451_v13, %s7207_s9 }
 0x38a   : > { %2839 = vrot.lane.b32.xlu0 %v2450_v60, %s7207_s9  ;;  %v2391_v60 = vld [vmem:[#allocation2 + $0x8d] sm:$0xff] }
 0x38d   : > { %2845 = vrot.lane.b32.xlu1 %v9364_v43, %s7207_s9 }
 0x38e   : > { %2843 = vrot.lane.b32.xlu0 %v9368_v6, %s7207_s9 }
 0x391   : > { %2849 = vrot.lane.b32.xlu1 %v9372_v15, %s7207_s9 }
 0x392   : > { %2847 = vrot.lane.b32.xlu0 %v9376_v23, %s7207_s9 }
 0x395   : > { %2853 = vrot.lane.b32.xlu1 %v9380_v7, %s7207_s9 }
 0x396   : > { %2851 = vrot.lane.b32.xlu0 %v9384_v35, %s7207_s9 }
 0x399   : > { %2857 = vrot.lane.b32.xlu1 %v9388_v48, %s7207_s9 }
 0x39a   : > { %2855 = vrot.lane.b32.xlu0 %v9392_v19, %s7207_s9 }
 0x39d   : > { %2861 = vrot.lane.b32.xlu1 %v9396_v47, %s7207_s9 }
 0x39e   : > { %2859 = vrot.lane.b32.xlu0 %v9400_v53, %s7207_s9 }
 0x3a1   : > { %2865 = vrot.lane.b32.xlu1 %v9404_v57, %s7207_s9 }
 0x3a2   : > { %2863 = vrot.lane.b32.xlu0 %v9408_v28, %s7207_s9 }
 0x3a5   : > { %2869 = vrot.lane.b32.xlu1 %v9412_v61, %s7207_s9 }
 0x3a6   : > { %2867 = vrot.lane.b32.xlu0 %v9416_v20, %s7207_s9 }
 0x3a9   : > { %2873 = vrot.lane.b32.xlu1 %v9420_v3, %s7207_s9 }
 0x3aa   : > { %2871 = vrot.lane.b32.xlu0 %v9424_v51, %s7207_s9 }
 0x3ad   : > { %2877 = vrot.lane.b32.xlu1 %v9428_v32, %s7207_s9 }
 0x3ae   : > { %2875 = vrot.lane.b32.xlu0 %v9432_v44, %s7207_s9 }
 0x3b1   : > { %2881 = vrot.lane.b32.xlu1 %v9440_v26, %s7207_s9 }
 0x3b2   : > { %2879 = vrot.lane.b32.xlu0 %v9444_v45, %s7207_s9 }
 0x3b5   : > { %2885 = vrot.lane.b32.xlu1 %v9450_v36, %s7207_s9 }
 0x3b6   : > { %2883 = vrot.lane.b32.xlu0 %v9456_v21, %s7207_s9 }
 0x3b9   : > { %2889 = vrot.lane.b32.xlu1 %v9460_v11, %s7207_s9 }
 0x3ba   : > { %2887 = vrot.lane.b32.xlu0 %v9464_v42, %s7207_s9 }
 0x3bd   : > { %2893 = vrot.lane.b32.xlu1 %v9472_v56, %s7207_s9  ;;  %v9480_v34 = vpop.permute.xlu1 %2717 }
 0x3be   : > { %2891 = vrot.lane.b32.xlu0 %v9476_v38, %s7207_s9  ;;  %12651 = vst [vmem:[#allocation45_spill] sm:$0xff] %v9480_v34  ;;  %v9482_v52 = vpop.permute.xlu0 %2715  ;;  %v2393_v34 = vld [vmem:[#allocation2 + $0xad] sm:$0xff] }
 0x3bf   : > { %12652 = vst [vmem:[#allocation46_spill] sm:$0xff] %v9482_v52  ;;  %v2392_v52 = vld [vmem:[#allocation2 + $0xa5] sm:$0xff] }
 0x3c1   : > { %2961 = vrot.lane.b32.xlu1 %v2389_v31, %s7208_s10  ;;  %v9486_v13 = vpop.permute.xlu1 %2721 }
 0x3c2   : > { %2959 = vrot.lane.b32.xlu0 %v2388_v54, %s7208_s10  ;;  %12653 = vst [vmem:[#allocation48_spill] sm:$0xff] %v9486_v13  ;;  %v9488_v33 = vpop.permute.xlu0 %2719  ;;  %v9500_v54 = vld [vmem:[#allocation2 + $0xcd] sm:$0xff] }
 0x3c3   : > { %12654 = vst [vmem:[#allocation49_spill] sm:$0xff] %v9488_v33  ;;  %v9504_v33 = vld [vmem:[#allocation2 + $0xc5] sm:$0xff] }
 0x3c5   : > { %2965 = vrot.lane.b32.xlu1 %v2391_v60, %s7208_s10  ;;  %v9492_v14 = vpop.permute.xlu1 %2725  ;;  %v9512_v60 = vld [vmem:[#allocation2 + $0xed] sm:$0xff] }
 0x3c6   : > { %2963 = vrot.lane.b32.xlu0 %v2390_v2, %s7208_s10  ;;  %12655 = vst [vmem:[#allocation102_spill] sm:$0xff] %v9492_v14  ;;  %v9494_v4 = vpop.permute.xlu0 %2723 }
 0x3c7   : > { %12656 = vst [vmem:[#allocation99_spill] sm:$0xff] %v9494_v4  ;;  %v9528_v4 = vld [vmem:[#allocation2 + $0x105] sm:$0xff] }
 0x3c8   : > { %12664 = vst [vmem:[#allocation60_spill] sm:$0xff] %v9528_v4 }
 0x3c9   : > { %2969 = vrot.lane.b32.xlu1 %v2393_v34, %s7208_s10  ;;  %v9498_v31 = vpop.permute.xlu1 %2729 }
 0x3ca   : > { %2967 = vrot.lane.b32.xlu0 %v2392_v52, %s7208_s10  ;;  %12657 = vst [vmem:[#allocation51_spill] sm:$0xff] %v9498_v31  ;;  %v9502_v13 = vpop.permute.xlu0 %2727  ;;  %v9516_v52 = vld [vmem:[#allocation2 + $0xe5] sm:$0xff] }
 0x3cb   : > { %12658 = vst [vmem:[#allocation52_spill] sm:$0xff] %v9502_v13  ;;  %v9524_v13 = vld [vmem:[#allocation2 + $0x10d] sm:$0xff] }
 0x3cc   : > { %12662 = vst [vmem:[#allocation103_spill] sm:$0xff] %v9524_v13 }
 0x3cd   : > { %2973 = vrot.lane.b32.xlu1 %v9500_v54, %s7208_s10  ;;  %v9510_v2 = vpop.permute.xlu1 %2733 }
 0x3ce   : > { %2971 = vrot.lane.b32.xlu0 %v9504_v33, %s7208_s10  ;;  %12659 = vst [vmem:[#allocation101_spill] sm:$0xff] %v9510_v2  ;;  %v9514_v34 = vpop.permute.xlu0 %2731 }
 0x3cf   : > { %12660 = vst [vmem:[#allocation55_spill] sm:$0xff] %v9514_v34  ;;  %v9536_v34 = vld [vmem:[#allocation2 + $0x12d] sm:$0xff] }
 0x3d0   : > { %12666 = vst [vmem:[#allocation64_spill] sm:$0xff] %v9536_v34 }
 0x3d1   : > { %2977 = vrot.lane.b32.xlu1 %v9512_v60, %s7208_s10  ;;  %v9522_v31 = vpop.permute.xlu1 %2737 }
 0x3d2   : > { %2975 = vrot.lane.b32.xlu0 %v9516_v52, %s7208_s10  ;;  %12661 = vst [vmem:[#allocation56_spill] sm:$0xff] %v9522_v31  ;;  %v9526_v14 = vpop.permute.xlu0 %2735 }
 0x3d3   : > { %12663 = vst [vmem:[#allocation59_spill] sm:$0xff] %v9526_v14  ;;  %v9548_v14 = vld [vmem:[#allocation2 + $0x14d] sm:$0xff] }
 0x3d4   : > { %12670 = vst [vmem:[#allocation107_spill] sm:$0xff] %v9548_v14 }
 0x3d5   : > { %2981 = vrot.lane.b32.xlu1 %v9524_v13, %s7208_s10  ;;  %v9534_v2 = vpop.permute.xlu1 %2741 }
 0x3d6   : > { %2979 = vrot.lane.b32.xlu0 %v9528_v4, %s7208_s10  ;;  %12665 = vst [vmem:[#allocation104_spill] sm:$0xff] %v9534_v2  ;;  %v9538_v10 = vpop.permute.xlu0 %2739  ;;  %v9552_v4 = vld [vmem:[#allocation2 + $0x145] sm:$0xff] }
 0x3d7   : > { %12667 = vst [vmem:[#allocation38_spill] sm:$0xff] %v9538_v10  ;;  %12672 = vst [vmem:[#allocation164_spill] sm:$0xff] %v9552_v4  ;;  %v9560_v10 = vld [vmem:[#allocation2 + $0x16d] sm:$0xff] }
 0x3d8   : > { %12674 = vst [vmem:[#allocation128_spill] sm:$0xff] %v9560_v10 }
 0x3d9   : > { %2985 = vrot.lane.b32.xlu1 %v9536_v34, %s7208_s10  ;;  %v9546_v31 = vpop.permute.xlu1 %2745 }
 0x3da   : > { %2983 = vrot.lane.b32.xlu0 %v9540_v8, %s7208_s10  ;;  %12669 = vst [vmem:[#allocation105_spill] sm:$0xff] %v9546_v31  ;;  %v9550_v13 = vpop.permute.xlu0 %2743  ;;  %v9564_v8 = vld [vmem:[#allocation2 + $0x165] sm:$0xff] }
 0x3db   : > { %12671 = vst [vmem:[#allocation86_spill] sm:$0xff] %v9550_v13  ;;  %12676 = vst [vmem:[#allocation187_spill] sm:$0xff] %v9564_v8  ;;  %v9572_v13 = vld [vmem:[#allocation2 + $0x18d] sm:$0xff] }
 0x3dc   : > { %12678 = vst [vmem:[#allocation47_spill] sm:$0xff] %v9572_v13 }
 0x3dd   : > { %2989 = vrot.lane.b32.xlu1 %v9548_v14, %s7208_s10  ;;  %v9558_v2 = vpop.permute.xlu1 %2749 }
 0x3de   : > { %2987 = vrot.lane.b32.xlu0 %v9552_v4, %s7208_s10  ;;  %12673 = vst [vmem:[#allocation106_spill] sm:$0xff] %v9558_v2  ;;  %v9562_v34 = vpop.permute.xlu0 %2747  ;;  %v9576_v4 = vld [vmem:[#allocation2 + $0x185] sm:$0xff] }
 0x3df   : > { %12675 = vst [vmem:[#allocation162_spill] sm:$0xff] %v9562_v34  ;;  %12680 = vst [vmem:[#allocation108_spill] sm:$0xff] %v9576_v4  ;;  %v9584_v34 = vld [vmem:[#allocation2 + $0x1ad] sm:$0xff] }
 0x3e0   : > { %12682 = vst [vmem:[#allocation94_spill] sm:$0xff] %v9584_v34 }
 0x3e1   : > { %2993 = vrot.lane.b32.xlu1 %v9560_v10, %s7208_s10  ;;  %v9570_v31 = vpop.permute.xlu1 %2753 }
 0x3e2   : > { %2991 = vrot.lane.b32.xlu0 %v9564_v8, %s7208_s10  ;;  %12677 = vst [vmem:[#allocation126_spill] sm:$0xff] %v9570_v31  ;;  %v9574_v14 = vpop.permute.xlu0 %2751  ;;  %v9588_v8 = vld [vmem:[#allocation2 + $0x1a5] sm:$0xff] }
 0x3e3   : > { %12679 = vst [vmem:[#allocation185_spill] sm:$0xff] %v9574_v14  ;;  %12684 = vst [vmem:[#allocation127_spill] sm:$0xff] %v9588_v8  ;;  %v9596_v14 = vld [vmem:[#allocation2 + $0x1cd] sm:$0xff] }
 0x3e4   : > { %12686 = vst [vmem:[#allocation166_spill] sm:$0xff] %v9596_v14 }
 0x3e5   : > { %2997 = vrot.lane.b32.xlu1 %v9572_v13, %s7208_s10  ;;  %v9582_v2 = vpop.permute.xlu1 %2757 }
 0x3e6   : > { %2995 = vrot.lane.b32.xlu0 %v9576_v4, %s7208_s10  ;;  %12681 = vst [vmem:[#allocation39_spill] sm:$0xff] %v9582_v2  ;;  %v9586_v10 = vpop.permute.xlu0 %2755  ;;  %v9600_v4 = vld [vmem:[#allocation2 + $0x1c5] sm:$0xff] }
 0x3e7   : > { %12683 = vst [vmem:[#allocation109_spill] sm:$0xff] %v9586_v10  ;;  %12688 = vst [vmem:[#allocation130_spill] sm:$0xff] %v9600_v4  ;;  %v9608_v10 = vld [vmem:[#allocation2 + $0x1ed] sm:$0xff] }
 0x3e8   : > { %12690 = vst [vmem:[#allocation189_spill] sm:$0xff] %v9608_v10 }
 0x3e9   : > { %3001 = vrot.lane.b32.xlu1 %v9584_v34, %s7208_s10 }
 0x3ea   : > { %2999 = vrot.lane.b32.xlu0 %v9588_v8, %s7208_s10  ;;  %v9594_v31 = vpop.permute.xlu1 %2761  ;;  %v9612_v8 = vld [vmem:[#allocation2 + $0x1e5] sm:$0xff] }
 0x3eb   : > { %12685 = vst [vmem:[#allocation89_spill] sm:$0xff] %v9594_v31  ;;  %v9598_v13 = vpop.permute.xlu0 %2759  ;;  %12692 = vst [vmem:[#allocation53_spill] sm:$0xff] %v9612_v8 }
 0x3ec   : > { %12687 = vst [vmem:[#allocation129_spill] sm:$0xff] %v9598_v13 }
 0x3ed   : > { %3005 = vrot.lane.b32.xlu1 %v9596_v14, %s7208_s10  ;;  %v9622_v14 = vld [vmem:[#allocation2 + $0x20d] sm:$0xff] }
 0x3ee   : > { %3003 = vrot.lane.b32.xlu0 %v9600_v4, %s7208_s10  ;;  %12695 = vst [vmem:[#allocation97_spill] sm:$0xff] %v9622_v14  ;;  %v9634_v4 = vld [vmem:[#allocation2 + $0x22d] sm:$0xff] }
 0x3ef   : > { %v9606_v2 = vpop.permute.xlu1 %2765  ;;  %12698 = vst [vmem:[#allocation93_spill] sm:$0xff] %v9634_v4 }
 0x3f0   : > { %12689 = vst [vmem:[#allocation163_spill] sm:$0xff] %v9606_v2  ;;  %v9610_v34 = vpop.permute.xlu0 %2763  ;;  %v9626_v2 = vld [vmem:[#allocation2 + $0x205] sm:$0xff] }
 0x3f1   : > { %12691 = vst [vmem:[#allocation50_spill] sm:$0xff] %v9610_v34  ;;  %3009 = vrot.lane.b32.xlu1 %v9608_v10, %s7208_s10 }
 0x3f2   : > { %3007 = vrot.lane.b32.xlu0 %v9612_v8, %s7208_s10  ;;  %v9646_v8 = vld [vmem:[#allocation2 + $0x24d] sm:$0xff] }
 0x3f3   : > { %v9618_v31 = vpop.permute.xlu1 %2833 }
 0x3f4   : > { %12693 = vst [vmem:[#allocation186_spill] sm:$0xff] %v9618_v31  ;;  %v9620_v13 = vpop.permute.xlu0 %2831  ;;  %v9638_v31 = vld [vmem:[#allocation2 + $0x225] sm:$0xff] }
 0x3f5   : > { %12694 = vst [vmem:[#allocation42_spill] sm:$0xff] %v9620_v13  ;;  %3013 = vrot.lane.b32.xlu1 %v9622_v14, %s7208_s10 }
 0x3f6   : > { %3011 = vrot.lane.b32.xlu0 %v9626_v2, %s7208_s10 }
 0x3f7   : > { %v9630_v34 = vpop.permute.xlu1 %2837 }
 0x3f8   : > { %12696 = vst [vmem:[#allocation98_spill] sm:$0xff] %v9630_v34  ;;  %v9632_v10 = vpop.permute.xlu0 %2835  ;;  %v9650_v34 = vld [vmem:[#allocation2 + $0x245] sm:$0xff] }
 0x3f9   : > { %12697 = vst [vmem:[#allocation111_spill] sm:$0xff] %v9632_v10  ;;  %3017 = vrot.lane.b32.xlu1 %v9634_v4, %s7208_s10  ;;  %12701 = vst [vmem:[#allocation132_spill] sm:$0xff] %v9650_v34 }
 0x3fa   : > { %3015 = vrot.lane.b32.xlu0 %v9638_v31, %s7208_s10 }
 0x3fb   : > { %v9642_v13 = vpop.permute.xlu1 %2841 }
 0x3fc   : > { %12699 = vst [vmem:[#allocation167_spill] sm:$0xff] %v9642_v13  ;;  %v9644_v14 = vpop.permute.xlu0 %2839 }
 0x3fd   : > { %12700 = vst [vmem:[#allocation168_spill] sm:$0xff] %v9644_v14  ;;  %3021 = vrot.lane.b32.xlu1 %v9646_v8, %s7208_s10 }
 0x3fe   : > { %3019 = vrot.lane.b32.xlu0 %v9650_v34, %s7208_s10 }
 0x3ff   : > { %v9654_v10 = vpop.permute.xlu1 %2845 }
 0x400   : > { %12702 = vst [vmem:[#allocation165_spill] sm:$0xff] %v9654_v10  ;;  %v9656_v4 = vpop.permute.xlu0 %2843 }
 0x401   : > { %3089 = vrot.lane.b32.xlu1 %v9200_v17, %s7209_s11 }
 0x402   : > { %3087 = vrot.lane.b32.xlu0 %v9205_v1, %s7209_s11 }
 0x403   : > { %v9662_v13 = vpop.permute.xlu1 %2849 }
 0x404   : > { %v9664_v14 = vpop.permute.xlu0 %2847 }
 0x405   : > { %3093 = vrot.lane.b32.xlu1 %v9212_v41, %s7209_s11 }
 0x406   : > { %3091 = vrot.lane.b32.xlu0 %v9217_v16, %s7209_s11 }
 0x407   : > { %v9670_v34 = vpop.permute.xlu1 %2853 }
 0x408   : > { %v9672_v10 = vpop.permute.xlu0 %2851 }
 0x409   : > { %3097 = vrot.lane.b32.xlu1 %v9224_v25, %s7209_s11 }
 0x40a   : > { %3095 = vrot.lane.b32.xlu0 %v9229_v5, %s7209_s11 }
 0x40b   : > { %v9678_v17 = vpop.permute.xlu1 %2857 }
 0x40c   : > { %12703 = vst [vmem:[#allocation190_spill] sm:$0xff] %v9678_v17  ;;  %v9680_v1 = vpop.permute.xlu0 %2855 }
 0x40d   : > { %12704 = vst [vmem:[#allocation191_spill] sm:$0xff] %v9680_v1  ;;  %3101 = vrot.lane.b32.xlu1 %v9236_v59, %s7209_s11  ;;  %v2626_v1 = vld [vmem:[#allocation2 + $0x1f0] sm:$0xff] }
 0x40e   : > { %3099 = vrot.lane.b32.xlu0 %v9241_v0, %s7209_s11 }
 0x40f   : > { %v9686_v41 = vpop.permute.xlu1 %2861 }
 0x410   : > { %12705 = vst [vmem:[#allocation57_spill] sm:$0xff] %v9686_v41  ;;  %v9688_v16 = vpop.permute.xlu0 %2859 }
 0x411   : > { %12706 = vst [vmem:[#allocation188_spill] sm:$0xff] %v9688_v16  ;;  %3105 = vrot.lane.b32.xlu1 %v9248_v50, %s7209_s11  ;;  %v2644_v16 = vld [vmem:[#allocation2 + $0x113] sm:$0xff] }
 0x412   : > { %3103 = vrot.lane.b32.xlu0 %v9253_v12, %s7209_s11 }
 0x413   : > { %v9694_v25 = vpop.permute.xlu1 %2865 }
 0x414   : > { %12707 = vst [vmem:[#allocation68_spill] sm:$0xff] %v9694_v25  ;;  %v9696_v5 = vpop.permute.xlu0 %2863  ;;  %v12756_v25 = vld [vmem:[#allocation128_spill] sm:$0xff] }
 0x415   : > { %12708 = vst [vmem:[#allocation147_spill] sm:$0xff] %v9696_v5  ;;  %3109 = vrot.lane.b32.xlu1 %v9260_v37, %s7209_s11 }
 0x416   : > { %3107 = vrot.lane.b32.xlu0 %v9265_v63, %s7209_s11 }
 0x417   : > { %v9702_v59 = vpop.permute.xlu1 %2869 }
 0x418   : > { %12709 = vst [vmem:[#allocation63_spill] sm:$0xff] %v9702_v59  ;;  %v9704_v0 = vpop.permute.xlu0 %2867  ;;  %v12748_v59 = vld [vmem:[#allocation64_spill] sm:$0xff] }
 0x419   : > { %12710 = vst [vmem:[#allocation113_spill] sm:$0xff] %v9704_v0  ;;  %3113 = vrot.lane.b32.xlu1 %v9272_v49, %s7209_s11 }
 0x41a   : > { %3111 = vrot.lane.b32.xlu0 %v9277_v29, %s7209_s11 }
 0x41b   : > { %v9710_v50 = vpop.permute.xlu1 %2873 }
 0x41c   : > { %12711 = vst [vmem:[#allocation170_spill] sm:$0xff] %v9710_v50  ;;  %v9712_v12 = vpop.permute.xlu0 %2871 }
 0x41d   : > { %12712 = vst [vmem:[#allocation110_spill] sm:$0xff] %v9712_v12  ;;  %3117 = vrot.lane.b32.xlu1 %v9284_v18, %s7209_s11 }
 0x41e   : > { %3115 = vrot.lane.b32.xlu0 %v9289_v62, %s7209_s11 }
 0x41f   : > { %v9718_v37 = vpop.permute.xlu1 %2877 }
 0x420   : > { %12713 = vst [vmem:[#allocation134_spill] sm:$0xff] %v9718_v37  ;;  %v9720_v63 = vpop.permute.xlu0 %2875 }
 0x421   : > { %12714 = vst [vmem:[#allocation193_spill] sm:$0xff] %v9720_v63  ;;  %3121 = vrot.lane.b32.xlu1 %v9296_v39, %s7209_s11 }
 0x422   : > { %3119 = vrot.lane.b32.xlu0 %v9301_v22, %s7209_s11 }
 0x423   : > { %v9726_v49 = vpop.permute.xlu1 %2881 }
 0x424   : > { %12715 = vst [vmem:[#allocation131_spill] sm:$0xff] %v9726_v49  ;;  %v9728_v29 = vpop.permute.xlu0 %2879 }
 0x425   : > { %12716 = vst [vmem:[#allocation61_spill] sm:$0xff] %v9728_v29  ;;  %3125 = vrot.lane.b32.xlu1 %v9308_v46, %s7209_s11 }
 0x426   : > { %3123 = vrot.lane.b32.xlu0 %v9313_v24, %s7209_s11 }
 0x427   : > { %v9734_v18 = vpop.permute.xlu1 %2885 }
 0x428   : > { %12717 = vst [vmem:[#allocation72_spill] sm:$0xff] %v9734_v18  ;;  %v9736_v62 = vpop.permute.xlu0 %2883  ;;  %v9786_v18 = vld [vmem:[#allocation2 + $0x250] sm:$0xff] }
 0x429   : > { %12718 = vst [vmem:[#allocation54_spill] sm:$0xff] %v9736_v62  ;;  %3129 = vrot.lane.b32.xlu1 %v9320_v30, %s7209_s11  ;;  %v9790_v62 = vld [vmem:[#allocation2 + $0x248] sm:$0xff] }
 0x42a   : > { %3127 = vrot.lane.b32.xlu0 %v9325_v27, %s7209_s11 }
 0x42b   : > { %v9742_v39 = vpop.permute.xlu1 %2889 }
 0x42c   : > { %12719 = vst [vmem:[#allocation149_spill] sm:$0xff] %v9742_v39  ;;  %v9744_v22 = vpop.permute.xlu0 %2887  ;;  %v9762_v39 = vld [vmem:[#allocation2 + $0x210] sm:$0xff] }
 0x42d   : > { %12720 = vst [vmem:[#allocation67_spill] sm:$0xff] %v9744_v22  ;;  %3133 = vrot.lane.b32.xlu1 %v9332_v58, %s7209_s11  ;;  %v9766_v58 = vld [vmem:[#allocation2 + $0x208] sm:$0xff] }
 0x42e   : > { %3131 = vrot.lane.b32.xlu0 %v9337_v55, %s7209_s11 }
 0x42f   : > { %v9750_v46 = vpop.permute.xlu1 %2893 }
 0x430   : > { %12721 = vst [vmem:[#allocation115_spill] sm:$0xff] %v9750_v46  ;;  %v9752_v24 = vpop.permute.xlu0 %2891  ;;  %v9774_v46 = vld [vmem:[#allocation2 + $0x230] sm:$0xff] }
 0x431   : > { %12722 = vst [vmem:[#allocation146_spill] sm:$0xff] %v9752_v24  ;;  %3137 = vrot.lane.b32.xlu1 %v9344_v40, %s7209_s11 }
 0x432   : > { %3135 = vrot.lane.b32.xlu0 %v9349_v9, %s7209_s11  ;;  %v9778_v9 = vld [vmem:[#allocation2 + $0x228] sm:$0xff] }
 0x433   : > { %v9758_v30 = vpop.permute.xlu1 %2961 }
 0x434   : > { %v9760_v27 = vpop.permute.xlu0 %2959 }
 0x435   : > { %3141 = vrot.lane.b32.xlu1 %v9762_v39, %s7209_s11 }
 0x436   : > { %3139 = vrot.lane.b32.xlu0 %v9766_v58, %s7209_s11 }
 0x437   : > { %v9770_v55 = vpop.permute.xlu1 %2965 }
 0x438   : > { %v9772_v40 = vpop.permute.xlu0 %2963 }
 0x439   : > { %3145 = vrot.lane.b32.xlu1 %v9774_v46, %s7209_s11 }
 0x43a   : > { %3143 = vrot.lane.b32.xlu0 %v9778_v9, %s7209_s11 }
 0x43b   : > { %v9782_v24 = vpop.permute.xlu1 %2969 }
 0x43c   : > { %v9784_v22 = vpop.permute.xlu0 %2967 }
 0x43d   : > { %3149 = vrot.lane.b32.xlu1 %v9786_v18, %s7209_s11 }
 0x43e   : > { %3147 = vrot.lane.b32.xlu0 %v9790_v62, %s7209_s11 }
 0x43f   : > { %v9794_v49 = vpop.permute.xlu1 %2973 }
 0x440   : > { %v9796_v29 = vpop.permute.xlu0 %2971 }
 0x441   : > { %3217 = vrot.lane.b32.xlu1 %v9364_v43, %s7210_s12 }
 0x442   : > { %3215 = vrot.lane.b32.xlu0 %v9368_v6, %s7210_s12 }
 0x443   : > { %v9802_v37 = vpop.permute.xlu1 %2977 }
 0x444   : > { %v9804_v63 = vpop.permute.xlu0 %2975 }
 0x445   : > { %3221 = vrot.lane.b32.xlu1 %v9372_v15, %s7210_s12 }
 0x446   : > { %3219 = vrot.lane.b32.xlu0 %v9376_v23, %s7210_s12 }
 0x447   : > { %v9810_v50 = vpop.permute.xlu1 %2981 }
 0x448   : > { %v9812_v12 = vpop.permute.xlu0 %2979 }
 0x449   : > { %3225 = vrot.lane.b32.xlu1 %v9380_v7, %s7210_s12 }
 0x44a   : > { %3223 = vrot.lane.b32.xlu0 %v9384_v35, %s7210_s12 }
 0x44b   : > { %v9818_v43 = vpop.permute.xlu1 %2985 }
 0x44c   : > { %12723 = vst [vmem:[#allocation172_spill] sm:$0xff] %v9818_v43  ;;  %v9820_v6 = vpop.permute.xlu0 %2983 }
 0x44d   : > { %12724 = vst [vmem:[#allocation112_spill] sm:$0xff] %v9820_v6  ;;  %3229 = vrot.lane.b32.xlu1 %v9388_v48, %s7210_s12  ;;  %v2646_v6 = vld [vmem:[#allocation2 + $0x133] sm:$0xff] }
 0x44e   : > { %3227 = vrot.lane.b32.xlu0 %v9392_v19, %s7210_s12 }
 0x44f   : > { %v9826_v15 = vpop.permute.xlu1 %2989 }
 0x450   : > { %12725 = vst [vmem:[#allocation136_spill] sm:$0xff] %v9826_v15  ;;  %v9828_v23 = vpop.permute.xlu0 %2987 }
 0x451   : > { %12726 = vst [vmem:[#allocation169_spill] sm:$0xff] %v9828_v23  ;;  %3233 = vrot.lane.b32.xlu1 %v9396_v47, %s7210_s12  ;;  %v2612_v23 = vld [vmem:[#allocation2 + $0x110] sm:$0xff] }
 0x452   : > { %3231 = vrot.lane.b32.xlu0 %v9400_v53, %s7210_s12 }
 0x453   : > { %v9834_v7 = vpop.permute.xlu1 %2993 }
 0x454   : > { %12727 = vst [vmem:[#allocation195_spill] sm:$0xff] %v9834_v7  ;;  %v9836_v35 = vpop.permute.xlu0 %2991  ;;  %v12752_v7 = vld [vmem:[#allocation107_spill] sm:$0xff] }
 0x455   : > { %12728 = vst [vmem:[#allocation133_spill] sm:$0xff] %v9836_v35  ;;  %3237 = vrot.lane.b32.xlu1 %v9404_v57, %s7210_s12 }
 0x456   : > { %3235 = vrot.lane.b32.xlu0 %v9408_v28, %s7210_s12 }
 0x457   : > { %v9842_v48 = vpop.permute.xlu1 %2997 }
 0x458   : > { %12729 = vst [vmem:[#allocation65_spill] sm:$0xff] %v9842_v48  ;;  %v9844_v19 = vpop.permute.xlu0 %2995  ;;  %v12744_v48 = vld [vmem:[#allocation103_spill] sm:$0xff] }
 0x459   : > { %12730 = vst [vmem:[#allocation192_spill] sm:$0xff] %v9844_v19  ;;  %3241 = vrot.lane.b32.xlu1 %v9412_v61, %s7210_s12 }
 0x45a   : > { %3239 = vrot.lane.b32.xlu0 %v9416_v20, %s7210_s12 }
 0x45b   : > { %v9850_v47 = vpop.permute.xlu1 %3001 }
 0x45c   : > { %12731 = vst [vmem:[#allocation76_spill] sm:$0xff] %v9850_v47  ;;  %v9852_v53 = vpop.permute.xlu0 %2999 }
 0x45d   : > { %12732 = vst [vmem:[#allocation58_spill] sm:$0xff] %v9852_v53  ;;  %3245 = vrot.lane.b32.xlu1 %v9420_v3, %s7210_s12 }
 0x45e   : > { %3243 = vrot.lane.b32.xlu0 %v9424_v51, %s7210_s12 }
 0x45f   : > { %v9858_v57 = vpop.permute.xlu1 %3005 }
 0x460   : > { %12733 = vst [vmem:[#allocation151_spill] sm:$0xff] %v9858_v57  ;;  %v9860_v28 = vpop.permute.xlu0 %3003 }
 0x461   : > { %12734 = vst [vmem:[#allocation71_spill] sm:$0xff] %v9860_v28  ;;  %3249 = vrot.lane.b32.xlu1 %v9428_v32, %s7210_s12 }
 0x462   : > { %3247 = vrot.lane.b32.xlu0 %v9432_v44, %s7210_s12 }
 0x463   : > { %v9866_v61 = vpop.permute.xlu1 %3009 }
 0x464   : > { %12735 = vst [vmem:[#allocation117_spill] sm:$0xff] %v9866_v61  ;;  %v9868_v20 = vpop.permute.xlu0 %3007 }
 0x465   : > { %12736 = vst [vmem:[#allocation148_spill] sm:$0xff] %v9868_v20  ;;  %3253 = vrot.lane.b32.xlu1 %v9440_v26, %s7210_s12 }
 0x466   : > { %3251 = vrot.lane.b32.xlu0 %v9444_v45, %s7210_s12 }
 0x467   : > { %v9874_v3 = vpop.permute.xlu1 %3013 }
 0x468   : > { %12737 = vst [vmem:[#allocation174_spill] sm:$0xff] %v9874_v3  ;;  %v9876_v51 = vpop.permute.xlu0 %3011  ;;  %v9926_v3 = vld [vmem:[#allocation2 + $0x253] sm:$0xff] }
 0x469   : > { %12738 = vst [vmem:[#allocation114_spill] sm:$0xff] %v9876_v51  ;;  %3257 = vrot.lane.b32.xlu1 %v9450_v36, %s7210_s12  ;;  %v9930_v51 = vld [vmem:[#allocation2 + $0x24b] sm:$0xff] }
 0x46a   : > { %3255 = vrot.lane.b32.xlu0 %v9456_v21, %s7210_s12 }
 0x46b   : > { %v9882_v32 = vpop.permute.xlu1 %3017 }
 0x46c   : > { %12739 = vst [vmem:[#allocation138_spill] sm:$0xff] %v9882_v32  ;;  %v9884_v44 = vpop.permute.xlu0 %3015  ;;  %v9902_v32 = vld [vmem:[#allocation2 + $0x213] sm:$0xff] }
 0x46d   : > { %12740 = vst [vmem:[#allocation171_spill] sm:$0xff] %v9884_v44  ;;  %3261 = vrot.lane.b32.xlu1 %v9460_v11, %s7210_s12  ;;  %v9906_v11 = vld [vmem:[#allocation2 + $0x20b] sm:$0xff] }
 0x46e   : > { %3259 = vrot.lane.b32.xlu0 %v9464_v42, %s7210_s12 }
 0x46f   : > { %v9890_v26 = vpop.permute.xlu1 %3021 }
 0x470   : > { %12741 = vst [vmem:[#allocation197_spill] sm:$0xff] %v9890_v26  ;;  %v9892_v45 = vpop.permute.xlu0 %3019  ;;  %v9914_v26 = vld [vmem:[#allocation2 + $0x233] sm:$0xff] }
 0x471   : > { %12742 = vst [vmem:[#allocation135_spill] sm:$0xff] %v9892_v45  ;;  %3265 = vrot.lane.b32.xlu1 %v9472_v56, %s7210_s12 }
 0x472   : > { %3263 = vrot.lane.b32.xlu0 %v9476_v38, %s7210_s12  ;;  %v9918_v38 = vld [vmem:[#allocation2 + $0x22b] sm:$0xff] }
 0x473   : > { %v9898_v36 = vpop.permute.xlu1 %3089 }
 0x474   : > { %v9900_v21 = vpop.permute.xlu0 %3087 }
 0x475   : > { %3269 = vrot.lane.b32.xlu1 %v9902_v32, %s7210_s12 }
 0x476   : > { %3267 = vrot.lane.b32.xlu0 %v9906_v11, %s7210_s12 }
 0x477   : > { %v9910_v42 = vpop.permute.xlu1 %3093 }
 0x478   : > { %v9912_v56 = vpop.permute.xlu0 %3091 }
 0x479   : > { %3273 = vrot.lane.b32.xlu1 %v9914_v26, %s7210_s12 }
 0x47a   : > { %3271 = vrot.lane.b32.xlu0 %v9918_v38, %s7210_s12 }
 0x47b   : > { %v9922_v45 = vpop.permute.xlu1 %3097 }
 0x47c   : > { %v9924_v44 = vpop.permute.xlu0 %3095 }
 0x47d   : > { %3277 = vrot.lane.b32.xlu1 %v9926_v3, %s7210_s12 }
 0x47e   : > { %3275 = vrot.lane.b32.xlu0 %v9930_v51, %s7210_s12 }
 0x47f   : > { %v9934_v61 = vpop.permute.xlu1 %3101 }
 0x480   : > { %v9936_v20 = vpop.permute.xlu0 %3099 }
 0x481   : > { %3345 = vrot.lane.b32.xlu1 %v9500_v54, %s7211_s13  ;;  %v12745_v54 = vld [vmem:[#allocation60_spill] sm:$0xff] }
 0x482   : > { %3343 = vrot.lane.b32.xlu0 %v9504_v33, %s7211_s13 }
 0x483   : > { %v9942_v57 = vpop.permute.xlu1 %3105 }
 0x484   : > { %v9944_v28 = vpop.permute.xlu0 %3103 }
 0x485   : > { %3349 = vrot.lane.b32.xlu1 %v9512_v60, %s7211_s13  ;;  %v12749_v60 = vld [vmem:[#allocation90_spill] sm:$0xff] }
 0x486   : > { %3347 = vrot.lane.b32.xlu0 %v9516_v52, %s7211_s13 }
 0x487   : > { %v9950_v47 = vpop.permute.xlu1 %3109 }
 0x488   : > { %12743 = vst [vmem:[#allocation69_spill] sm:$0xff] %v9950_v47  ;;  %v9952_v53 = vpop.permute.xlu0 %3107 }
 0x489   : > { %3353 = vrot.lane.b32.xlu1 %v12744_v48, %s7211_s13  ;;  %v12753_v48 = vld [vmem:[#allocation164_spill] sm:$0xff] }
 0x48a   : > { %3351 = vrot.lane.b32.xlu0 %v12745_v54, %s7211_s13 }
 0x48b   : > { %v9958_v33 = vpop.permute.xlu1 %3113 }
 0x48c   : > { %12746 = vst [vmem:[#allocation194_spill] sm:$0xff] %v9958_v33  ;;  %v9960_v19 = vpop.permute.xlu0 %3111 }
 0x48d   : > { %12747 = vst [vmem:[#allocation80_spill] sm:$0xff] %v9960_v19  ;;  %3357 = vrot.lane.b32.xlu1 %v12748_v59, %s7211_s13  ;;  %v12757_v59 = vld [vmem:[#allocation187_spill] sm:$0xff]  ;;  %v2614_v19 = vld [vmem:[#allocation2 + $0x130] sm:$0xff] }
 0x48e   : > { %3355 = vrot.lane.b32.xlu0 %v12749_v60, %s7211_s13 }
 0x48f   : > { %v9966_v52 = vpop.permute.xlu1 %3117 }
 0x490   : > { %12750 = vst [vmem:[#allocation62_spill] sm:$0xff] %v9966_v52  ;;  %v9968_v0 = vpop.permute.xlu0 %3115  ;;  %v12760_v52 = vld [vmem:[#allocation47_spill] sm:$0xff] }
 0x491   : > { %12751 = vst [vmem:[#allocation153_spill] sm:$0xff] %v9968_v0  ;;  %3361 = vrot.lane.b32.xlu1 %v12752_v7, %s7211_s13  ;;  %v12761_v7 = vld [vmem:[#allocation108_spill] sm:$0xff]  ;;  %v2642_v0 = vld [vmem:[#allocation2 + $0xf3] sm:$0xff] }
 0x492   : > { %3359 = vrot.lane.b32.xlu0 %v12753_v48, %s7211_s13 }
 0x493   : > { %v9974_v54 = vpop.permute.xlu1 %3121 }
 0x494   : > { %12754 = vst [vmem:[#allocation75_spill] sm:$0xff] %v9974_v54  ;;  %v9976_v35 = vpop.permute.xlu0 %3119 }
 0x495   : > { %12755 = vst [vmem:[#allocation119_spill] sm:$0xff] %v9976_v35  ;;  %3365 = vrot.lane.b32.xlu1 %v12756_v25, %s7211_s13  ;;  %v12764_v35 = vld [vmem:[#allocation94_spill] sm:$0xff]  ;;  %v12765_v25 = vld [vmem:[#allocation127_spill] sm:$0xff] }
 0x496   : > { %3363 = vrot.lane.b32.xlu0 %v12757_v59, %s7211_s13 }
 0x497   : > { %v9982_v60 = vpop.permute.xlu1 %3125 }
 0x498   : > { %12758 = vst [vmem:[#allocation150_spill] sm:$0xff] %v9982_v60  ;;  %v9984_v5 = vpop.permute.xlu0 %3123 }
 0x499   : > { %12759 = vst [vmem:[#allocation176_spill] sm:$0xff] %v9984_v5  ;;  %3369 = vrot.lane.b32.xlu1 %v12760_v52, %s7211_s13  ;;  %v12768_v5 = vld [vmem:[#allocation166_spill] sm:$0xff] }
 0x49a   : > { %3367 = vrot.lane.b32.xlu0 %v12761_v7, %s7211_s13  ;;  %v12769_v52 = vld [vmem:[#allocation130_spill] sm:$0xff] }
 0x49b   : > { %v9990_v48 = vpop.permute.xlu1 %3129 }
 0x49c   : > { %12762 = vst [vmem:[#allocation116_spill] sm:$0xff] %v9990_v48  ;;  %v9992_v54 = vpop.permute.xlu0 %3127 }
 0x49d   : > { %12763 = vst [vmem:[#allocation140_spill] sm:$0xff] %v9992_v54  ;;  %3373 = vrot.lane.b32.xlu1 %v12764_v35, %s7211_s13  ;;  %v3951_v35 = vld [vmem:[%s12083_s3] sm:$0xff]  ;;  %v3954_v54 = vld [vmem:[%s12083_s3 + $0x18] sm:$0xff] }
 0x49e   : > { %3371 = vrot.lane.b32.xlu0 %v12765_v25, %s7211_s13  ;;  %v3952_v25 = vld [vmem:[%s12083_s3 + $0x8] sm:$0xff] }
 0x49f   : > { %v9998_v59 = vpop.permute.xlu1 %3133 }
 0x4a0   : > { %12766 = vst [vmem:[#allocation173_spill] sm:$0xff] %v9998_v59  ;;  %v10000_v60 = vpop.permute.xlu0 %3131  ;;  %v12772_v59 = vld [vmem:[#allocation189_spill] sm:$0xff] }
 0x4a1   : > { %12767 = vst [vmem:[#allocation199_spill] sm:$0xff] %v10000_v60  ;;  %3377 = vrot.lane.b32.xlu1 %v12768_v5, %s7211_s13  ;;  %v6974_v60 = vpack.c.bf16 %v3952_v25, %v3951_v35  ;;  %v12773_v5 = vld [vmem:[#allocation53_spill] sm:$0xff] }
 0x4a2   : > { %3375 = vrot.lane.b32.xlu0 %v12769_v52, %s7211_s13 }
 0x4a3   : > { %v10006_v7 = vpop.permute.xlu1 %3137  ;;  %6975 = vmatprep.subr.bf16.mxu1 %v6974_v60 }
 0x4a4   : > { %12770 = vst [vmem:[#allocation137_spill] sm:$0xff] %v10006_v7  ;;  %v10008_v48 = vpop.permute.xlu0 %3135  ;;  %6977 = vmatpush3.bf16.msra.mxu1 %v6974_v60  ;;  %v12779_v60 = vld [vmem:[#allocation93_spill] sm:$0xff] }
 0x4a5   : > { %12771 = vst [vmem:[#allocation73_spill] sm:$0xff] %v10008_v48  ;;  %3381 = vrot.lane.b32.xlu1 %v12772_v59, %s7211_s13  ;;  %v3953_v48 = vld [vmem:[%s12083_s3 + $0x10] sm:$0xff] }
 0x4a6   : > { %3379 = vrot.lane.b32.xlu0 %v12773_v5, %s7211_s13  ;;  %v12776_v59 = vld [vmem:[#allocation97_spill] sm:$0xff]  ;;  %v6978_v35 = vpack.c.bf16 %v3954_v54, %v3953_v48  ;;  %v12782_v48 = vld [vmem:[#allocation132_spill] sm:$0xff] }
 0x4a7   : > { %v10020_v52 = vpop.permute.xlu1 %3141 }
 0x4a8   : > { %12774 = vst [vmem:[#allocation196_spill] sm:$0xff] %v10020_v52  ;;  %v10022_v7 = vpop.permute.xlu0 %3139  ;;  %6979 = vmatprep.subr.bf16.mxu1 %v6978_v35  ;;  %v3955_v52 = vld [vmem:[%s12083_s3 + $0x20] sm:$0xf] }
 0x4a9   : > { %12775 = vst [vmem:[#allocation84_spill] sm:$0xff] %v10022_v7  ;;  %3385 = vrot.lane.b32.xlu1 %v12776_v59, %s7211_s13  ;;  %6981 = vmatpush3.bf16.msra.mxu1 %v6978_v35 }
 0x4aa   : > { %3383 = vrot.lane.b32.xlu0 %v9626_v2, %s7211_s13  ;;  %6858 = vmatprep.subr.msk.mxu1 %vm2121_vm2, %v3955_v52 }
 0x4ab   : > { %v10034_v25 = vpop.permute.xlu1 %3145 }
 0x4ac   : > { %12777 = vst [vmem:[#allocation66_spill] sm:$0xff] %v10034_v25  ;;  %v10036_v5 = vpop.permute.xlu0 %3143 }
 0x4ad   : > { %12778 = vst [vmem:[#allocation155_spill] sm:$0xff] %v10036_v5  ;;  %3389 = vrot.lane.b32.xlu1 %v12779_v60, %s7211_s13  ;;  %6859 = vmatpush3.msk.msra.mxu1 %vm2121_vm2, %v3955_v52  ;;  %v2608_v60 = vld [vmem:[#allocation2 + $0xd0] sm:$0xff] }
 0x4ae   : > { %3387 = vrot.lane.b32.xlu0 %v9638_v31, %s7211_s13  ;;  %v2607_v31 = vld [vmem:[#allocation2 + $0xc8] sm:$0xff]  ;;  %v2640_v52 = vld [vmem:[#allocation2 + $0xd3] sm:$0xff] }
 0x4af   : > { %v10046_v54 = vpop.permute.xlu1 %3149  ;;  %v2610_v5 = vld [vmem:[#allocation2 + $0xf0] sm:$0xff] }
 0x4b0   : > { %12780 = vst [vmem:[#allocation79_spill] sm:$0xff] %v10046_v54  ;;  %v10048_v2 = vpop.permute.xlu0 %3147 }
 0x4b1   : > { %12781 = vst [vmem:[#allocation121_spill] sm:$0xff] %v10048_v2  ;;  %3393 = vrot.lane.b32.xlu1 %v9646_v8, %s7211_s13  ;;  %v2639_v8 = vld [vmem:[#allocation2 + $0xcb] sm:$0xff] }
 0x4b2   : > { %3391 = vrot.lane.b32.xlu0 %v12782_v48, %s7211_s13 }
 0x4b3   : > { %v10055_v59 = vpop.permute.xlu1 %3217 }
 0x4b4   : > { %v10057_v35 = vpop.permute.xlu0 %3215 }
 0x4b5   : > { %3473 = vrot.lane.b32.xlu1 %v2608_v60, %s7212_s14  ;;  %v2609_v60 = vld [vmem:[#allocation2 + $0xe8] sm:$0xff] }
 0x4b6   : > { %3471 = vrot.lane.b32.xlu0 %v2607_v31, %s7212_s14 }
 0x4b7   : > { %v10061_v54 = vpop.permute.xlu1 %3221 }
 0x4b8   : > { %v10063_v2 = vpop.permute.xlu0 %3219 }
 0x4b9   : > { %3601 = vrot.lane.b32.xlu1 %v2640_v52, %s7213_s28  ;;  %v2641_v52 = vld [vmem:[#allocation2 + $0xeb] sm:$0xff] }
 0x4ba   : > { %3599 = vrot.lane.b32.xlu0 %v2639_v8, %s7213_s28 }
 0x4bb   : > { %v10067_v48 = vpop.permute.xlu1 %3225 }
 0x4bc   : > { %v10069_v25 = vpop.permute.xlu0 %3223 }
 0x4bd   : > { %3477 = vrot.lane.b32.xlu1 %v2610_v5, %s7212_s14  ;;  %v2611_v5 = vld [vmem:[#allocation2 + $0x108] sm:$0xff] }
 0x4be   : > { %3475 = vrot.lane.b32.xlu0 %v2609_v60, %s7212_s14 }
 0x4bf   : > { %v10073_v31 = vpop.permute.xlu1 %3229 }
 0x4c0   : > { %v10075_v7 = vpop.permute.xlu0 %3227 }
 0x4c1   : > { %3605 = vrot.lane.b32.xlu1 %v2642_v0, %s7213_s28  ;;  %v2643_v0 = vld [vmem:[#allocation2 + $0x10b] sm:$0xff] }
 0x4c2   : > { %3603 = vrot.lane.b32.xlu0 %v2641_v52, %s7213_s28 }
 0x4c3   : > { %v10079_v8 = vpop.permute.xlu1 %3233 }
 0x4c4   : > { %v10081_v15 = vpop.permute.xlu0 %3231 }
 0x4c5   : > { %3481 = vrot.lane.b32.xlu1 %v2612_v23, %s7212_s14  ;;  %v2613_v23 = vld [vmem:[#allocation2 + $0x128] sm:$0xff] }
 0x4c6   : > { %3479 = vrot.lane.b32.xlu0 %v2611_v5, %s7212_s14 }
 0x4c7   : > { %v10085_v60 = vpop.permute.xlu1 %3237 }
 0x4c8   : > { %12783 = vst [vmem:[#allocation152_spill] sm:$0xff] %v10085_v60  ;;  %v10087_v41 = vpop.permute.xlu0 %3235 }
 0x4c9   : > { %12784 = vst [vmem:[#allocation178_spill] sm:$0xff] %v10087_v41  ;;  %3609 = vrot.lane.b32.xlu1 %v2644_v16, %s7213_s28  ;;  %v2645_v16 = vld [vmem:[#allocation2 + $0x12b] sm:$0xff]  ;;  %v2658_v41 = vld [vmem:[#allocation2 + $0x1f3] sm:$0xff] }
 0x4ca   : > { %3607 = vrot.lane.b32.xlu0 %v2643_v0, %s7213_s28 }
 0x4cb   : > { %v10091_v52 = vpop.permute.xlu1 %3241 }
 0x4cc   : > { %12785 = vst [vmem:[#allocation118_spill] sm:$0xff] %v10091_v52  ;;  %v10093_v33 = vpop.permute.xlu0 %3239 }
 0x4cd   : > { %12786 = vst [vmem:[#allocation142_spill] sm:$0xff] %v10093_v33  ;;  %3485 = vrot.lane.b32.xlu1 %v2614_v19, %s7212_s14  ;;  %v2616_v33 = vld [vmem:[#allocation2 + $0x150] sm:$0xff]  ;;  %v2615_v19 = vld [vmem:[#allocation2 + $0x148] sm:$0xff] }
 0x4ce   : > { %3483 = vrot.lane.b32.xlu0 %v2613_v23, %s7212_s14 }
 0x4cf   : > { %v10097_v5 = vpop.permute.xlu1 %3245 }
 0x4d0   : > { %12787 = vst [vmem:[#allocation175_spill] sm:$0xff] %v10097_v5  ;;  %v10099_v43 = vpop.permute.xlu0 %3243 }
 0x4d1   : > { %12788 = vst [vmem:[#allocation201_spill] sm:$0xff] %v10099_v43  ;;  %3613 = vrot.lane.b32.xlu1 %v2646_v6, %s7213_s28  ;;  %v2648_v43 = vld [vmem:[#allocation2 + $0x153] sm:$0xff]  ;;  %v2647_v6 = vld [vmem:[#allocation2 + $0x14b] sm:$0xff] }
 0x4d2   : > { %3611 = vrot.lane.b32.xlu0 %v2645_v16, %s7213_s28 }
 0x4d3   : > { %v10103_v0 = vpop.permute.xlu1 %3249 }
 0x4d4   : > { %12789 = vst [vmem:[#allocation139_spill] sm:$0xff] %v10103_v0  ;;  %v10105_v52 = vpop.permute.xlu0 %3247 }
 0x4d5   : > { %12790 = vst [vmem:[#allocation77_spill] sm:$0xff] %v10105_v52  ;;  %3489 = vrot.lane.b32.xlu1 %v2616_v33, %s7212_s14  ;;  %v2618_v52 = vld [vmem:[#allocation2 + $0x170] sm:$0xff]  ;;  %v2617_v33 = vld [vmem:[#allocation2 + $0x168] sm:$0xff] }
 0x4d6   : > { %3487 = vrot.lane.b32.xlu0 %v2615_v19, %s7212_s14 }
 0x4d7   : > { %v10109_v23 = vpop.permute.xlu1 %3253 }
 0x4d8   : > { %12791 = vst [vmem:[#allocation198_spill] sm:$0xff] %v10109_v23  ;;  %v10111_v5 = vpop.permute.xlu0 %3251 }
 0x4d9   : > { %12792 = vst [vmem:[#allocation88_spill] sm:$0xff] %v10111_v5  ;;  %3617 = vrot.lane.b32.xlu1 %v2648_v43, %s7213_s28  ;;  %v2650_v5 = vld [vmem:[#allocation2 + $0x173] sm:$0xff]  ;;  %v2649_v43 = vld [vmem:[#allocation2 + $0x16b] sm:$0xff] }
 0x4da   : > { %3615 = vrot.lane.b32.xlu0 %v2647_v6, %s7213_s28 }
 0x4db   : > { %v10115_v16 = vpop.permute.xlu1 %3257 }
 0x4dc   : > { %12793 = vst [vmem:[#allocation70_spill] sm:$0xff] %v10115_v16  ;;  %v10117_v0 = vpop.permute.xlu0 %3255 }
 0x4dd   : > { %12794 = vst [vmem:[#allocation157_spill] sm:$0xff] %v10117_v0  ;;  %3493 = vrot.lane.b32.xlu1 %v2618_v52, %s7212_s14  ;;  %v2620_v0 = vld [vmem:[#allocation2 + $0x190] sm:$0xff]  ;;  %v2619_v52 = vld [vmem:[#allocation2 + $0x188] sm:$0xff] }
 0x4de   : > { %3491 = vrot.lane.b32.xlu0 %v2617_v33, %s7212_s14 }
 0x4df   : > { %v10121_v19 = vpop.permute.xlu1 %3261 }
 0x4e0   : > { %12795 = vst [vmem:[#allocation83_spill] sm:$0xff] %v10121_v19  ;;  %v10123_v23 = vpop.permute.xlu0 %3259 }
 0x4e1   : > { %12796 = vst [vmem:[#allocation123_spill] sm:$0xff] %v10123_v23  ;;  %3621 = vrot.lane.b32.xlu1 %v2650_v5, %s7213_s28  ;;  %v2652_v23 = vld [vmem:[#allocation2 + $0x193] sm:$0xff]  ;;  %v2651_v5 = vld [vmem:[#allocation2 + $0x18b] sm:$0xff] }
 0x4e2   : > { %3619 = vrot.lane.b32.xlu0 %v2649_v43, %s7213_s28 }
 0x4e3   : > { %v10127_v6 = vpop.permute.xlu1 %3265 }
 0x4e4   : > { %12797 = vst [vmem:[#allocation154_spill] sm:$0xff] %v10127_v6  ;;  %v10129_v16 = vpop.permute.xlu0 %3263 }
 0x4e5   : > { %12798 = vst [vmem:[#allocation180_spill] sm:$0xff] %v10129_v16  ;;  %3497 = vrot.lane.b32.xlu1 %v2620_v0, %s7212_s14  ;;  %v2622_v16 = vld [vmem:[#allocation2 + $0x1b0] sm:$0xff]  ;;  %v2621_v0 = vld [vmem:[#allocation2 + $0x1a8] sm:$0xff] }
 0x4e6   : > { %3495 = vrot.lane.b32.xlu0 %v2619_v52, %s7212_s14 }
 0x4e7   : > { %v10133_v33 = vpop.permute.xlu1 %3269 }
 0x4e8   : > { %12799 = vst [vmem:[#allocation120_spill] sm:$0xff] %v10133_v33  ;;  %v10135_v19 = vpop.permute.xlu0 %3267 }
 0x4e9   : > { %12800 = vst [vmem:[#allocation144_spill] sm:$0xff] %v10135_v19  ;;  %3625 = vrot.lane.b32.xlu1 %v2652_v23, %s7213_s28  ;;  %v2654_v19 = vld [vmem:[#allocation2 + $0x1b3] sm:$0xff]  ;;  %v2653_v23 = vld [vmem:[#allocation2 + $0x1ab] sm:$0xff] }
 0x4ea   : > { %3623 = vrot.lane.b32.xlu0 %v2651_v5, %s7213_s28 }
 0x4eb   : > { %v10139_v43 = vpop.permute.xlu1 %3273 }
 0x4ec   : > { %12801 = vst [vmem:[#allocation177_spill] sm:$0xff] %v10139_v43  ;;  %v10141_v6 = vpop.permute.xlu0 %3271 }
 0x4ed   : > { %12802 = vst [vmem:[#allocation203_spill] sm:$0xff] %v10141_v6  ;;  %3501 = vrot.lane.b32.xlu1 %v2622_v16, %s7212_s14  ;;  %v2624_v6 = vld [vmem:[#allocation2 + $0x1d0] sm:$0xff]  ;;  %v2623_v16 = vld [vmem:[#allocation2 + $0x1c8] sm:$0xff] }
 0x4ee   : > { %3499 = vrot.lane.b32.xlu0 %v2621_v0, %s7212_s14 }
 0x4ef   : > { %v10145_v52 = vpop.permute.xlu1 %3277 }
 0x4f0   : > { %12803 = vst [vmem:[#allocation141_spill] sm:$0xff] %v10145_v52  ;;  %v10147_v33 = vpop.permute.xlu0 %3275 }
 0x4f1   : > { %12804 = vst [vmem:[#allocation81_spill] sm:$0xff] %v10147_v33  ;;  %3629 = vrot.lane.b32.xlu1 %v2654_v19, %s7213_s28  ;;  %v2656_v33 = vld [vmem:[#allocation2 + $0x1d3] sm:$0xff]  ;;  %v2655_v19 = vld [vmem:[#allocation2 + $0x1cb] sm:$0xff] }
 0x4f2   : > { %3627 = vrot.lane.b32.xlu0 %v2653_v23, %s7213_s28 }
 0x4f3   : > { %v10151_v5 = vpop.permute.xlu1 %3345 }
 0x4f4   : > { %v10153_v43 = vpop.permute.xlu0 %3343 }
 0x4f5   : > { %3505 = vrot.lane.b32.xlu1 %v2624_v6, %s7212_s14  ;;  %v2625_v6 = vld [vmem:[#allocation2 + $0x1e8] sm:$0xff] }
 0x4f6   : > { %3503 = vrot.lane.b32.xlu0 %v2623_v16, %s7212_s14 }
 0x4f7   : > { %v10157_v0 = vpop.permute.xlu1 %3349 }
 0x4f8   : > { %v10159_v52 = vpop.permute.xlu0 %3347 }
 0x4f9   : > { %3633 = vrot.lane.b32.xlu1 %v2656_v33, %s7213_s28  ;;  %v2657_v33 = vld [vmem:[#allocation2 + $0x1eb] sm:$0xff] }
 0x4fa   : > { %3631 = vrot.lane.b32.xlu0 %v2655_v19, %s7213_s28 }
 0x4fb   : > { %v10163_v23 = vpop.permute.xlu1 %3353 }
 0x4fc   : > { %v10165_v17 = vpop.permute.xlu0 %3351 }
 0x4fd   : > { %3509 = vrot.lane.b32.xlu1 %v2626_v1, %s7212_s14 }
 0x4fe   : > { %3507 = vrot.lane.b32.xlu0 %v2625_v6, %s7212_s14 }
 0x4ff   : > { %v10169_v16 = vpop.permute.xlu1 %3357 }
 0x500   : > { %v10171_v60 = vpop.permute.xlu0 %3355 }
 0x501   : > { %3637 = vrot.lane.b32.xlu1 %v2658_v41, %s7213_s28 }
 0x502   : > { %3635 = vrot.lane.b32.xlu0 %v2657_v33, %s7213_s28 }
 0x503   : > { %v10175_v19 = vpop.permute.xlu1 %3361 }
 0x504   : > { %v10177_v47 = vpop.permute.xlu0 %3359 }
 0x505   : > { %3513 = vrot.lane.b32.xlu1 %v9762_v39, %s7212_s14 }
 0x506   : > { %3511 = vrot.lane.b32.xlu0 %v9766_v58, %s7212_s14 }
 0x507   : > { %v10183_v1 = vpop.permute.xlu1 %3365 }
 0x508   : > { %12805 = vst [vmem:[#allocation200_spill] sm:$0xff] %v10183_v1  ;;  %v10185_v6 = vpop.permute.xlu0 %3363  ;;  %v12824_v1 = vld [vmem:[#allocation186_spill] sm:$0xff] }
 0x509   : > { %12806 = vst [vmem:[#allocation92_spill] sm:$0xff] %v10185_v6  ;;  %3641 = vrot.lane.b32.xlu1 %v9902_v32, %s7213_s28 }
 0x50a   : > { %3639 = vrot.lane.b32.xlu0 %v9906_v11, %s7213_s28 }
 0x50b   : > { %v10191_v41 = vpop.permute.xlu1 %3369 }
 0x50c   : > { %12807 = vst [vmem:[#allocation74_spill] sm:$0xff] %v10191_v41  ;;  %v10193_v33 = vpop.permute.xlu0 %3367 }
 0x50d   : > { %12808 = vst [vmem:[#allocation159_spill] sm:$0xff] %v10193_v33  ;;  %3517 = vrot.lane.b32.xlu1 %v9774_v46, %s7212_s14 }
 0x50e   : > { %3515 = vrot.lane.b32.xlu0 %v9778_v9, %s7212_s14 }
 0x50f   : > { %v10199_v39 = vpop.permute.xlu1 %3373 }
 0x510   : > { %12809 = vst [vmem:[#allocation87_spill] sm:$0xff] %v10199_v39  ;;  %v10201_v58 = vpop.permute.xlu0 %3371  ;;  %v2665_v39 = vld [vmem:[#allocation2 + $0x26b] sm:$0xff] }
 0x511   : > { %12810 = vst [vmem:[#allocation124_spill] sm:$0xff] %v10201_v58  ;;  %3645 = vrot.lane.b32.xlu1 %v9914_v26, %s7213_s28  ;;  %v2602_v26 = vld [vmem:[#allocation2 + $0x26d] sm:$0xff] }
 0x512   : > { %3643 = vrot.lane.b32.xlu0 %v9918_v38, %s7213_s28 }
 0x513   : > { %v10207_v32 = vpop.permute.xlu1 %3377 }
 0x514   : > { %12811 = vst [vmem:[#allocation156_spill] sm:$0xff] %v10207_v32  ;;  %v10209_v11 = vpop.permute.xlu0 %3375  ;;  %v2601_v32 = vld [vmem:[#allocation2 + $0x265] sm:$0xff] }
 0x515   : > { %12812 = vst [vmem:[#allocation182_spill] sm:$0xff] %v10209_v11  ;;  %3521 = vrot.lane.b32.xlu1 %v9786_v18, %s7212_s14  ;;  %v2634_v18 = vld [vmem:[#allocation2 + $0x270] sm:$0xff] }
 0x516   : > { %3519 = vrot.lane.b32.xlu0 %v9790_v62, %s7212_s14 }
 0x517   : > { %v10215_v46 = vpop.permute.xlu1 %3381 }
 0x518   : > { %12813 = vst [vmem:[#allocation122_spill] sm:$0xff] %v10215_v46  ;;  %v10217_v9 = vpop.permute.xlu0 %3379  ;;  %v2633_v46 = vld [vmem:[#allocation2 + $0x268] sm:$0xff] }
 0x519   : > { %12814 = vst [vmem:[#allocation145_spill] sm:$0xff] %v10217_v9  ;;  %3649 = vrot.lane.b32.xlu1 %v9926_v3, %s7213_s28  ;;  %v2666_v3 = vld [vmem:[#allocation2 + $0x273] sm:$0xff] }
 0x51a   : > { %3647 = vrot.lane.b32.xlu0 %v9930_v51, %s7213_s28  ;;  %v2382_v51 = vld [vmem:[#allocation2 + $0x5] sm:$0xff] }
 0x51b   : > { %v10223_v38 = vpop.permute.xlu1 %3385 }
 0x51c   : > { %12815 = vst [vmem:[#allocation179_spill] sm:$0xff] %v10223_v38  ;;  %v10225_v11 = vpop.permute.xlu0 %3383 }
 0x51d   : > { %12816 = vst [vmem:[#allocation91_spill] sm:$0xff] %v10225_v11  ;;  %3397 = vrot.lane.b32.xlu1 %v2602_v26, %s7211_s13  ;;  %v2383_v11 = vld [vmem:[#allocation2 + $0xd] sm:$0xff] }
 0x51e   : > { %3395 = vrot.lane.b32.xlu0 %v2601_v32, %s7211_s13  ;;  %v12821_v32 = vld [vmem:[#allocation100_spill] sm:$0xff] }
 0x51f   : > { %v10229_v62 = vpop.permute.xlu1 %3389  ;;  %v3695_v26 = vsel %vm279_vm0, %v2382_v51, %v12821_v32  ;;  %v2384_v32 = vld [vmem:[#allocation2 + $0x25] sm:$0xff] }
 0x520   : > { %12817 = vst [vmem:[#allocation143_spill] sm:$0xff] %v10229_v62  ;;  %v10231_v9 = vpop.permute.xlu0 %3387  ;;  %v2604_v62 = vld [vmem:[#allocation2 + $0x28d] sm:$0xff] }
 0x521   : > { %12818 = vst [vmem:[#allocation82_spill] sm:$0xff] %v10231_v9  ;;  %3525 = vrot.lane.b32.xlu1 %v2634_v18, %s7212_s14  ;;  %v12822_v9 = vld [vmem:[#allocation41_spill] sm:$0xff] }
 0x522   : > { %3523 = vrot.lane.b32.xlu0 %v2633_v46, %s7212_s14  ;;  %v3696_v18 = vsel %vm279_vm0, %v2383_v11, %v12822_v9  ;;  %v12823_v46 = vld [vmem:[#allocation42_spill] sm:$0xff] }
 0x523   : > { %v10235_v38 = vpop.permute.xlu1 %3393  ;;  %v3727_v41 = vsel %vm1781_vm3, %v3695_v26, %v12823_v46  ;;  %v3728_v6 = vsel %vm1781_vm3, %v3696_v18, %v12824_v1  ;;  %v2636_v1 = vld [vmem:[#allocation2 + $0x290] sm:$0xff]  ;;  %v12825_v18 = vld [vmem:[#allocation43_spill] sm:$0xff] }
 0x524   : > { %12819 = vst [vmem:[#allocation202_spill] sm:$0xff] %v10235_v38  ;;  %v10237_v58 = vpop.permute.xlu0 %3391  ;;  %v2603_v38 = vld [vmem:[#allocation2 + $0x285] sm:$0xff]  ;;  %v3760_v51 = vsel %vm1814_vm4, %v3728_v6, %v9758_v30  ;;  %v2668_v46 = vld [vmem:[#allocation2 + $0x293] sm:$0xff] }
 0x525   : > { %12820 = vst [vmem:[#allocation96_spill] sm:$0xff] %v10237_v58  ;;  %3653 = vrot.lane.b32.xlu1 %v2666_v3, %s7213_s28  ;;  %v3759_v3 = vsel %vm1814_vm4, %v3727_v41, %v9760_v27  ;;  %v3792_v11 = vsel %vm1847_vm5, %v3760_v51, %v9898_v36  ;;  %v2385_v41 = vld [vmem:[#allocation2 + $0x2d] sm:$0xff] }
 0x526   : > { %3651 = vrot.lane.b32.xlu0 %v2665_v39, %s7213_s28  ;;  %v3791_v39 = vsel %vm1847_vm5, %v3759_v3, %v9900_v21  ;;  %v3824_v27 = vsel %vm1880_vm6, %v3792_v11, %v10055_v59  ;;  %v2635_v21 = vld [vmem:[#allocation2 + $0x288] sm:$0xff]  ;;  %v3697_v59 = vsel %vm279_vm0, %v2384_v32, %v12825_v18  ;;  %v12827_v3 = vld [vmem:[#allocation111_spill] sm:$0xff]  ;;  %v12828_v11 = vld [vmem:[#allocation98_spill] sm:$0xff] }
 0x527   : > { %v3474_v33 = vpop.permute.xlu1 %3473  ;;  %v3823_v9 = vsel %vm1880_vm6, %v3791_v39, %v10057_v35  ;;  %v2667_v39 = vld [vmem:[#allocation2 + $0x28b] sm:$0xff] }
 0x528   : > { %v3472_v58 = vpop.permute.xlu0 %3471  ;;  %v3855_v30 = vsel %vm1913_vm7, %v3823_v9, %v10153_v43 }
 0x529   : > { %3401 = vrot.lane.b32.xlu1 %v2604_v62, %s7211_s13  ;;  %v3856_v62 = vsel %vm1913_vm7, %v3824_v27, %v10151_v5  ;;  %v3887_v36 = vsel %vm1946_vm8, %v3855_v30, %v3472_v58  ;;  %v12826_v5 = vld [vmem:[#allocation40_spill] sm:$0xff] }
 0x52a   : > { %3399 = vrot.lane.b32.xlu0 %v2603_v38, %s7211_s13  ;;  %v3888_v35 = vsel %vm1946_vm8, %v3856_v62, %v3474_v33  ;;  %v3698_v58 = vsel %vm279_vm0, %v2385_v41, %v12826_v5  ;;  %v3729_v33 = vsel %vm1781_vm3, %v3697_v59, %v12827_v3  ;;  %v2606_v41 = vld [vmem:[#allocation2 + $0x2ad] sm:$0xff]  ;;  %v2386_v62 = vld [vmem:[#allocation2 + $0x45] sm:$0xff] }
 0x52b   : > { %v3602_v6 = vpop.permute.xlu1 %3601  ;;  %v3730_v9 = vsel %vm1781_vm3, %v3698_v58, %v12828_v11  ;;  %v12829_v59 = vld [vmem:[#allocation44_spill] sm:$0xff] }
 0x52c   : > { %v3600_v26 = vpop.permute.xlu0 %3599  ;;  %v3920_v43 = vsel %vm1979_vm9, %v3888_v35, %v3602_v6  ;;  %v3762_v27 = vsel %vm1814_vm4, %v3730_v9, %v9770_v55  ;;  %v12831_v5 = vld [vmem:[#allocation168_spill] sm:$0xff] }
 0x52d   : > { %v3919_v38 = vsel %vm1979_vm9, %v3887_v36, %v3600_v26  ;;  %3529 = vrot.lane.b32.xlu1 %v2636_v1, %s7212_s14  ;;  %v3761_v1 = vsel %vm1814_vm4, %v3729_v33, %v9772_v40  ;;  %v3794_v6 = vsel %vm1847_vm5, %v3762_v27, %v9910_v42  ;;  %v2387_v26 = vld [vmem:[#allocation2 + $0x4d] sm:$0xff] }
 0x52e   : > { %3527 = vrot.lane.b32.xlu0 %v2635_v21, %s7212_s14  ;;  %6860 = vmatprep.mubr.msk.f32.mxu1 %vm2024_vm10, %v3919_v38  ;;  %v3793_v30 = vsel %vm1847_vm5, %v3761_v1, %v9912_v56  ;;  %v3826_v40 = vsel %vm1880_vm6, %v3794_v6, %v10061_v54  ;;  %v2605_v56 = vld [vmem:[#allocation2 + $0x2a5] sm:$0xff]  ;;  %v3699_v54 = vsel %vm279_vm0, %v2386_v62, %v12829_v59  ;;  %v2670_v6 = vld [vmem:[#allocation2 + $0x2b3] sm:$0xff] }
 0x52f   : > { %v3478_v51 = vpop.permute.xlu1 %3477  ;;  %6861 = vmatmul.mubr.msk.f32.vlgmr.msra.gmra.mrb[16].mxu1 %vm2024_vm10, %v3920_v43  ;;  %v3825_v21 = vsel %vm1880_vm6, %v3793_v30, %v10063_v2  ;;  %v3858_v35 = vsel %vm1913_vm7, %v3826_v40, %v10157_v0  ;;  %v2638_v43 = vld [vmem:[#allocation2 + $0x2b0] sm:$0xff]  ;;  %v12830_v0 = vld [vmem:[#allocation95_spill] sm:$0xff]  ;;  %v3731_v58 = vsel %vm1781_vm3, %v3699_v54, %v12831_v5  ;;  %v2637_v33 = vld [vmem:[#allocation2 + $0x2a8] sm:$0xff] }
 0x530   : > { %v3476_v32 = vpop.permute.xlu0 %3475  ;;  %v3857_v55 = vsel %vm1913_vm7, %v3825_v21, %v10159_v52  ;;  %v3890_v2 = vsel %vm1946_vm8, %v3858_v35, %v3478_v51  ;;  %v12832_v51 = vld [vmem:[#allocation167_spill] sm:$0xff]  ;;  %v3763_v11 = vsel %vm1814_vm4, %v3731_v58, %v9784_v22 }
 0x531   : > { %3657 = vrot.lane.b32.xlu1 %v2668_v46, %s7213_s28  ;;  %v3889_v42 = vsel %vm1946_vm8, %v3857_v55, %v3476_v32  ;;  %v3700_v46 = vsel %vm279_vm0, %v2387_v26, %v12830_v0  ;;  %v3795_v32 = vsel %vm1847_vm5, %v3763_v11, %v9924_v44  ;;  %v7171_v55 = vld [vmem:[#allocation2 + $0x65] sm:$0xff] }
 0x532   : > { %3655 = vrot.lane.b32.xlu0 %v2667_v39, %s7213_s28  ;;  %v3732_v39 = vsel %vm1781_vm3, %v3700_v46, %v12832_v51  ;;  %v3827_v30 = vsel %vm1880_vm6, %v3795_v32, %v10069_v25  ;;  %v12837_v51 = vld [vmem:[#allocation48_spill] sm:$0xff] }
 0x533   : > { %v3606_v36 = vpop.permute.xlu1 %3605  ;;  %v3764_v1 = vsel %vm1814_vm4, %v3732_v39, %v9782_v24  ;;  %v3859_v24 = vsel %vm1913_vm7, %v3827_v30, %v10165_v17 }
 0x534   : > { %v3604_v38 = vpop.permute.xlu0 %3603  ;;  %v3922_v52 = vsel %vm1979_vm9, %v3890_v2, %v3606_v36  ;;  %v3796_v27 = vsel %vm1847_vm5, %v3764_v1, %v9922_v45  ;;  %v12833_v36 = vld [vmem:[#allocation46_spill] sm:$0xff] }
 0x535   : > { %v3921_v18 = vsel %vm1979_vm9, %v3889_v42, %v3604_v38  ;;  %3405 = vrot.lane.b32.xlu1 %v2606_v41, %s7211_s13  ;;  %v3828_v22 = vsel %vm1880_vm6, %v3796_v27, %v10067_v48  ;;  %v2669_v41 = vld [vmem:[#allocation2 + $0x2ab] sm:$0xff]  ;;  %v3701_v48 = vsel %vm279_vm0, %v7171_v55, %v12833_v36 }
 0x536   : > { %3403 = vrot.lane.b32.xlu0 %v2605_v56, %s7211_s13  ;;  %6863 = vmatprep.mubr.msk.f32.mxu1 %vm2024_vm10, %v3921_v18  ;;  %v3860_v44 = vsel %vm1913_vm7, %v3828_v22, %v10163_v23  ;;  %v7172_v23 = vld [vmem:[#allocation2 + $0x6d] sm:$0xff]  ;;  %v3733_v35 = vsel %vm1781_vm3, %v3701_v48, %v9656_v4 }
 0x537   : > { %v3482_v3 = vpop.permute.xlu1 %3481  ;;  %6864 = vmatmul.mubr.msk.f32.gmra.mrb[18].mxu1 %vm2024_vm10, %v3922_v52  ;;  %v12834_v56 = vld [vmem:[#allocation45_spill] sm:$0xff]  ;;  %v3765_v18 = vsel %vm1814_vm4, %v3733_v35, %v9796_v29  ;;  %v12842_v35 = vld [vmem:[#allocation152_spill] sm:$0xff] }
 0x538   : > { %v3480_v9 = vpop.permute.xlu0 %3479  ;;  %v3892_v40 = vsel %vm1946_vm8, %v3860_v44, %v3482_v3  ;;  %v3702_v26 = vsel %vm279_vm0, %v7172_v23, %v12834_v56  ;;  %v12835_v38 = vld [vmem:[#allocation165_spill] sm:$0xff]  ;;  %v3797_v52 = vsel %vm1847_vm5, %v3765_v18, %v9936_v20  ;;  %v7173_v3 = vld [vmem:[#allocation2 + $0x85] sm:$0xff] }
 0x539   : > { %3533 = vrot.lane.b32.xlu1 %v2638_v43, %s7212_s14  ;;  %v3891_v62 = vsel %vm1946_vm8, %v3859_v24, %v3480_v9  ;;  %v3734_v2 = vsel %vm1781_vm3, %v3702_v26, %v12835_v38  ;;  %v3829_v4 = vsel %vm1880_vm6, %v3797_v52, %v10075_v7  ;;  %v12838_v44 = vld [vmem:[#allocation99_spill] sm:$0xff]  ;;  %v12840_v23 = vld [vmem:[#allocation69_spill] sm:$0xff] }
 0x53a   : > { %3531 = vrot.lane.b32.xlu0 %v2637_v33, %s7212_s14  ;;  %v3766_v54 = vsel %vm1814_vm4, %v3734_v2, %v9794_v49  ;;  %v3861_v46 = vsel %vm1913_vm7, %v3829_v4, %v10171_v60  ;;  %v12836_v33 = vld [vmem:[#allocation49_spill] sm:$0xff]  ;;  %v12844_v2 = vld [vmem:[#allocation200_spill] sm:$0xff] }
 0x53b   : > { %v3610_v21 = vpop.permute.xlu1 %3609  ;;  %v3798_v43 = vsel %vm1847_vm5, %v3766_v54, %v9934_v61  ;;  %v3703_v7 = vsel %vm279_vm0, %v7173_v3, %v12836_v33  ;;  %v7174_v60 = vld [vmem:[#allocation2 + $0x8d] sm:$0xff]  ;;  %v7177_v52 = vld [vmem:[#allocation2 + $0xc5] sm:$0xff] }
 0x53c   : > { %v3608_v45 = vpop.permute.xlu0 %3607  ;;  %v3924_v17 = vsel %vm1979_vm9, %v3892_v40, %v3610_v21  ;;  %v3830_v0 = vsel %vm1880_vm6, %v3798_v43, %v10073_v31  ;;  %v3704_v39 = vsel %vm279_vm0, %v7174_v60, %v12837_v51  ;;  %v12845_v43 = vld [vmem:[#allocation52_spill] sm:$0xff] }
 0x53d   : > { %v3923_v25 = vsel %vm1979_vm9, %v3891_v62, %v3608_v45  ;;  %3661 = vrot.lane.b32.xlu1 %v2670_v6, %s7213_s28  ;;  %v3862_v5 = vsel %vm1913_vm7, %v3830_v0, %v10169_v16  ;;  %v3735_v16 = vsel %vm1781_vm3, %v3703_v7, %v9664_v14  ;;  %v3736_v9 = vsel %vm1781_vm3, %v3704_v39, %v9662_v13  ;;  %v12839_v62 = vld [vmem:[#allocation102_spill] sm:$0xff]  ;;  %v12849_v33 = vld [vmem:[#allocation112_spill] sm:$0xff] }
 0x53e   : > { %3659 = vrot.lane.b32.xlu0 %v2669_v41, %s7213_s28  ;;  %6866 = vmatprep.mubr.msk.f32.mxu1 %vm2024_vm10, %v3923_v25  ;;  %v3767_v1 = vsel %vm1814_vm4, %v3735_v16, %v9804_v63  ;;  %v3768_v27 = vsel %vm1814_vm4, %v3736_v9, %v9802_v37  ;;  %v7175_v41 = vld [vmem:[#allocation2 + $0xa5] sm:$0xff]  ;;  %v3707_v4 = vsel %vm279_vm0, %v7177_v52, %v12845_v43 }
 0x53f   : > { %v3486_v42 = vpop.permute.xlu1 %3485  ;;  %6867 = vmatmul.mubr.msk.f32.gmra.mrb[20].mxu1 %vm2024_vm10, %v3924_v17  ;;  %v3799_v30 = vsel %vm1847_vm5, %v3767_v1, %v9944_v28  ;;  %v3800_v6 = vsel %vm1847_vm5, %v3768_v27, %v9942_v57  ;;  %v12850_v60 = vld [vmem:[#allocation172_spill] sm:$0xff]  ;;  %v12853_v1 = vld [vmem:[#allocation142_spill] sm:$0xff] }
 0x540   : > { %v3484_v59 = vpop.permute.xlu0 %3483  ;;  %v3894_v20 = vsel %vm1946_vm8, %v3862_v5, %v3486_v42  ;;  %v3831_v14 = vsel %vm1880_vm6, %v3799_v30, %v10081_v15  ;;  %v3832_v22 = vsel %vm1880_vm6, %v3800_v6, %v10079_v8  ;;  %v3705_v15 = vsel %vm279_vm0, %v7175_v41, %v12838_v44  ;;  %v12851_v39 = vld [vmem:[#allocation80_spill] sm:$0xff]  ;;  %v12854_v27 = vld [vmem:[#allocation118_spill] sm:$0xff]  ;;  %v12855_v6 = vld [vmem:[#allocation159_spill] sm:$0xff] }
 0x541   : > { %v3893_v49 = vsel %vm1946_vm8, %v3861_v46, %v3484_v59  ;;  %v3863_v13 = vsel %vm1913_vm7, %v3831_v14, %v10177_v47  ;;  %v3864_v24 = vsel %vm1913_vm7, %v3832_v22, %v10175_v19  ;;  %v7176_v47 = vld [vmem:[#allocation2 + $0xad] sm:$0xff]  ;;  %v3737_v19 = vsel %vm1781_vm3, %v3705_v15, %v9672_v10  ;;  %v12841_v10 = vld [vmem:[#allocation178_spill] sm:$0xff]  ;;  %v12857_v41 = vld [vmem:[#allocation55_spill] sm:$0xff] }
 0x542   : > { %v3706_v45 = vsel %vm279_vm0, %v7176_v47, %v12839_v62  ;;  %v3769_v55 = vsel %vm1814_vm4, %v3737_v19, %v9812_v12  ;;  %v7178_v46 = vld [vmem:[#allocation2 + $0xcd] sm:$0xff] }
 0x543   : > { %v3614_v29 = vpop.permute.xlu1 %3613  ;;  %v3738_v25 = vsel %vm1781_vm3, %v3706_v45, %v9670_v34  ;;  %v3801_v17 = vsel %vm1847_vm5, %v3769_v55, %v9952_v53  ;;  %v12843_v34 = vld [vmem:[#allocation92_spill] sm:$0xff]  ;;  %v12858_v47 = vld [vmem:[#allocation101_spill] sm:$0xff] }
 0x544   : > { %v3612_v58 = vpop.permute.xlu0 %3611  ;;  %v3926_v31 = vsel %vm1979_vm9, %v3894_v20, %v3614_v29  ;;  %v3770_v48 = vsel %vm1814_vm4, %v3738_v25, %v9810_v50  ;;  %v3833_v26 = vsel %vm1880_vm6, %v3801_v17, %v12841_v10  ;;  %v12846_v29 = vld [vmem:[#allocation51_spill] sm:$0xff]  ;;  %v12859_v45 = vld [vmem:[#allocation188_spill] sm:$0xff]  ;;  %v12860_v25 = vld [vmem:[#allocation57_spill] sm:$0xff] }
 0x545   : > { %v3925_v61 = vsel %vm1979_vm9, %v3893_v49, %v3612_v58  ;;  %v3802_v56 = vsel %vm1847_vm5, %v3770_v48, %v12840_v23  ;;  %v3865_v38 = vsel %vm1913_vm7, %v3833_v26, %v12843_v34  ;;  %v3708_v5 = vsel %vm279_vm0, %v7178_v46, %v12846_v29  ;;  %v12847_v49 = vld [vmem:[#allocation191_spill] sm:$0xff]  ;;  %v12862_v23 = vld [vmem:[#allocation136_spill] sm:$0xff]  ;;  %v12863_v10 = vld [vmem:[#allocation153_spill] sm:$0xff] }
 0x546   : > { %6869 = vmatprep.mubr.msk.f32.mxu1 %vm2024_vm10, %v3925_v61  ;;  %v3834_v42 = vsel %vm1880_vm6, %v3802_v56, %v12842_v35  ;;  %v3739_v58 = vsel %vm1781_vm3, %v3707_v4, %v12847_v49  ;;  %v12848_v61 = vld [vmem:[#allocation190_spill] sm:$0xff]  ;;  %v12865_v34 = vld [vmem:[#allocation201_spill] sm:$0xff]  ;;  %v7181_v46 = vld [vmem:[#allocation2 + $0x105] sm:$0xff] }
 0x547   : > { %v3490_v11 = vpop.permute.xlu1 %3489  ;;  %6870 = vmatmul.mubr.msk.f32.gmra.mrb[22].mxu1 %vm2024_vm10, %v3926_v31  ;;  %v3866_v18 = vsel %vm1913_vm7, %v3834_v42, %v12844_v2  ;;  %v3740_v3 = vsel %vm1781_vm3, %v3708_v5, %v12848_v61  ;;  %v3771_v7 = vsel %vm1814_vm4, %v3739_v58, %v12849_v33  ;;  %v12864_v35 = vld [vmem:[#allocation62_spill] sm:$0xff]  ;;  %v12869_v29 = vld [vmem:[#allocation59_spill] sm:$0xff]  ;;  %v7182_v58 = vld [vmem:[#allocation2 + $0x10d] sm:$0xff] }
 0x548   : > { %v3488_v32 = vpop.permute.xlu0 %3487  ;;  %v3896_v28 = vsel %vm1946_vm8, %v3864_v24, %v3490_v11  ;;  %v3772_v51 = vsel %vm1814_vm4, %v3740_v3, %v12850_v60  ;;  %v3803_v16 = vsel %vm1847_vm5, %v3771_v7, %v12851_v39  ;;  %v12852_v11 = vld [vmem:[#allocation194_spill] sm:$0xff]  ;;  %v3711_v5 = vsel %vm279_vm0, %v7181_v46, %v12869_v29  ;;  %v12871_v3 = vld [vmem:[#allocation147_spill] sm:$0xff] }
 0x549   : > { %v3895_v37 = vsel %vm1946_vm8, %v3863_v13, %v3488_v32  ;;  %v3804_v9 = vsel %vm1847_vm5, %v3772_v51, %v12852_v11  ;;  %v3835_v32 = vsel %vm1880_vm6, %v3803_v16, %v12853_v1  ;;  %v12856_v13 = vld [vmem:[#allocation74_spill] sm:$0xff]  ;;  %v3743_v33 = vsel %vm1781_vm3, %v3711_v5, %v12871_v3  ;;  %v12873_v51 = vld [vmem:[#allocation133_spill] sm:$0xff]  ;;  %v12874_v11 = vld [vmem:[#allocation195_spill] sm:$0xff] }
 0x54a   : > { %v3836_v30 = vsel %vm1880_vm6, %v3804_v9, %v12854_v27  ;;  %v3867_v14 = vsel %vm1913_vm7, %v3835_v32, %v12855_v6  ;;  %v3775_v39 = vsel %vm1814_vm4, %v3743_v33, %v12873_v51  ;;  %v12875_v1 = vld [vmem:[#allocation119_spill] sm:$0xff]  ;;  %v12877_v6 = vld [vmem:[#allocation77_spill] sm:$0xff] }
 0x54b   : > { %v3618_v63 = vpop.permute.xlu1 %3617  ;;  %v3807_v32 = vsel %vm1847_vm5, %v3775_v39, %v12875_v1  ;;  %v12876_v27 = vld [vmem:[#allocation75_spill] sm:$0xff]  ;;  %v7186_v33 = vld [vmem:[#allocation2 + $0x14d] sm:$0xff] }
 0x54c   : > { %v3616_v21 = vpop.permute.xlu0 %3615  ;;  %v3928_v8 = vsel %vm1979_vm9, %v3896_v28, %v3618_v63  ;;  %v3868_v63 = vsel %vm1913_vm7, %v3836_v30, %v12856_v13 }
 0x54d   : > { %v3927_v57 = vsel %vm1979_vm9, %v3895_v37, %v3616_v21 }
 0x54e   : > { %6872 = vmatprep.mubr.msk.f32.mxu1 %vm2024_vm10, %v3927_v57  ;;  %v7179_v57 = vld [vmem:[#allocation2 + $0xe5] sm:$0xff] }
 0x54f   : > { %v3494_v40 = vpop.permute.xlu1 %3493  ;;  %6873 = vmatmul.mubr.msk.f32.gmra.mrb[24].mxu1 %vm2024_vm10, %v3928_v8  ;;  %v3709_v44 = vsel %vm279_vm0, %v7179_v57, %v12857_v41  ;;  %v7180_v8 = vld [vmem:[#allocation2 + $0xed] sm:$0xff] }
 0x550   : > { %v3492_v36 = vpop.permute.xlu0 %3491  ;;  %v3898_v53 = vsel %vm1946_vm8, %v3866_v18, %v3494_v40  ;;  %v3710_v62 = vsel %vm279_vm0, %v7180_v8, %v12858_v47  ;;  %v3741_v19 = vsel %vm1781_vm3, %v3709_v44, %v12859_v45  ;;  %v12867_v18 = vld [vmem:[#allocation124_spill] sm:$0xff]  ;;  %v12881_v47 = vld [vmem:[#allocation38_spill] sm:$0xff] }
 0x551   : > { %v3897_v50 = vsel %vm1946_vm8, %v3865_v38, %v3492_v36  ;;  %v3742_v55 = vsel %vm1781_vm3, %v3710_v62, %v12860_v25  ;;  %v12861_v36 = vld [vmem:[#allocation169_spill] sm:$0xff]  ;;  %v7183_v8 = vld [vmem:[#allocation2 + $0x125] sm:$0xff] }
 0x552   : > { %v3773_v48 = vsel %vm1814_vm4, %v3741_v19, %v12861_v36  ;;  %v3774_v56 = vsel %vm1814_vm4, %v3742_v55, %v12862_v23  ;;  %v3713_v62 = vsel %vm279_vm0, %v7183_v8, %v12881_v47  ;;  %v7184_v19 = vld [vmem:[#allocation2 + $0x12d] sm:$0xff] }
 0x553   : > { %v3622_v12 = vpop.permute.xlu1 %3621  ;;  %v3805_v26 = vsel %vm1847_vm5, %v3773_v48, %v12863_v10  ;;  %v3806_v42 = vsel %vm1847_vm5, %v3774_v56, %v12864_v35  ;;  %v12883_v55 = vld [vmem:[#allocation113_spill] sm:$0xff]  ;;  %v12885_v56 = vld [vmem:[#allocation192_spill] sm:$0xff] }
 0x554   : > { %v3620_v59 = vpop.permute.xlu0 %3619  ;;  %v3930_v0 = vsel %vm1979_vm9, %v3898_v53, %v3622_v12  ;;  %v3837_v38 = vsel %vm1880_vm6, %v3805_v26, %v12865_v34  ;;  %v12866_v12 = vld [vmem:[#allocation175_spill] sm:$0xff]  ;;  %v3745_v36 = vsel %vm1781_vm3, %v3713_v62, %v12883_v55  ;;  %v12886_v35 = vld [vmem:[#allocation65_spill] sm:$0xff]  ;;  %v12887_v34 = vld [vmem:[#allocation176_spill] sm:$0xff] }
 0x555   : > { %v3929_v54 = vsel %vm1979_vm9, %v3897_v50, %v3620_v59  ;;  %v3838_v2 = vsel %vm1880_vm6, %v3806_v42, %v12866_v12  ;;  %v3869_v50 = vsel %vm1913_vm7, %v3837_v38, %v12867_v18  ;;  %v12868_v53 = vld [vmem:[#allocation87_spill] sm:$0xff]  ;;  %v3777_v10 = vsel %vm1814_vm4, %v3745_v36, %v12885_v56  ;;  %v12888_v12 = vld [vmem:[#allocation150_spill] sm:$0xff]  ;;  %v12889_v18 = vld [vmem:[#allocation88_spill] sm:$0xff] }
 0x556   : > { %6875 = vmatprep.mubr.msk.f32.mxu1 %vm2024_vm10, %v3929_v54  ;;  %v3870_v54 = vsel %vm1913_vm7, %v3838_v2, %v12868_v53  ;;  %v3809_v38 = vsel %vm1847_vm5, %v3777_v10, %v12887_v34  ;;  %v7188_v36 = vld [vmem:[#allocation2 + $0x16d] sm:$0xff] }
 0x557   : > { %v3498_v20 = vpop.permute.xlu1 %3497  ;;  %6876 = vmatmul.mubr.msk.f32.gmra.mrb[26].mxu1 %vm2024_vm10, %v3930_v0 }
 0x558   : > { %v3496_v31 = vpop.permute.xlu0 %3495  ;;  %v3900_v21 = vsel %vm1946_vm8, %v3868_v63, %v3498_v20  ;;  %v12870_v20 = vld [vmem:[#allocation56_spill] sm:$0xff]  ;;  %v12879_v63 = vld [vmem:[#allocation182_spill] sm:$0xff] }
 0x559   : > { %v3899_v24 = vsel %vm1946_vm8, %v3867_v14, %v3496_v31  ;;  %v3712_v61 = vsel %vm279_vm0, %v7182_v58, %v12870_v20  ;;  %v12872_v31 = vld [vmem:[#allocation68_spill] sm:$0xff]  ;;  %v3839_v14 = vsel %vm1880_vm6, %v3807_v32, %v12877_v6  ;;  %v12893_v20 = vld [vmem:[#allocation86_spill] sm:$0xff] }
 0x55a   : > { %v3744_v60 = vsel %vm1781_vm3, %v3712_v61, %v12872_v31  ;;  %v7185_v58 = vld [vmem:[#allocation2 + $0x145] sm:$0xff] }
 0x55b   : > { %v3626_v22 = vpop.permute.xlu1 %3625  ;;  %v3776_v9 = vsel %vm1814_vm4, %v3744_v60, %v12874_v11  ;;  %v3715_v61 = vsel %vm279_vm0, %v7185_v58, %v12893_v20  ;;  %v12895_v60 = vld [vmem:[#allocation110_spill] sm:$0xff]  ;;  %v12899_v6 = vld [vmem:[#allocation140_spill] sm:$0xff] }
 0x55c   : > { %v3624_v37 = vpop.permute.xlu0 %3623  ;;  %v3932_v15 = vsel %vm1979_vm9, %v3900_v21, %v3626_v22  ;;  %v3808_v30 = vsel %vm1847_vm5, %v3776_v9, %v12876_v27  ;;  %v12878_v22 = vld [vmem:[#allocation139_spill] sm:$0xff]  ;;  %v12880_v21 = vld [vmem:[#allocation156_spill] sm:$0xff]  ;;  %v3747_v51 = vsel %vm1781_vm3, %v3715_v61, %v12895_v60  ;;  %v12897_v9 = vld [vmem:[#allocation58_spill] sm:$0xff] }
 0x55d   : > { %v3931_v28 = vsel %vm1979_vm9, %v3899_v24, %v3624_v37  ;;  %v3840_v13 = vsel %vm1880_vm6, %v3808_v30, %v12878_v22  ;;  %v3871_v24 = vsel %vm1913_vm7, %v3839_v14, %v12879_v63  ;;  %v3779_v1 = vsel %vm1814_vm4, %v3747_v51, %v12897_v9  ;;  %v12898_v27 = vld [vmem:[#allocation76_spill] sm:$0xff]  ;;  %v12901_v63 = vld [vmem:[#allocation157_spill] sm:$0xff] }
 0x55e   : > { %6878 = vmatprep.mubr.msk.f32.mxu1 %vm2024_vm10, %v3931_v28  ;;  %v3872_v28 = vsel %vm1913_vm7, %v3840_v13, %v12880_v21  ;;  %v3811_v14 = vsel %vm1847_vm5, %v3779_v1, %v12899_v6  ;;  %v12900_v22 = vld [vmem:[#allocation116_spill] sm:$0xff]  ;;  %v4352_v51 = vld [vmem:[#allocation2 + $0x50] sm:$0xff] }
 0x55f   : > { %v3502_v40 = vpop.permute.xlu1 %3501  ;;  %6879 = vmatmul.mubr.msk.f32.gmra.mrb[28].mxu1 %vm2024_vm10, %v3932_v15  ;;  %v12919_v1 = vld [vmem:[#allocation61_spill] sm:$0xff]  ;;  %4641 = vrot.lane.b32.xlu1 %v4352_v51, %s7206_s8 }
 0x560   : > { %v3500_v17 = vpop.permute.xlu0 %3499  ;;  %v3902_v4 = vsel %vm1946_vm8, %v3870_v54, %v3502_v40  ;;  %v12882_v40 = vld [vmem:[#allocation104_spill] sm:$0xff]  ;;  %v12891_v54 = vld [vmem:[#allocation145_spill] sm:$0xff] }
 0x561   : > { %v3901_v52 = vsel %vm1946_vm8, %v3869_v50, %v3500_v17  ;;  %v3714_v25 = vsel %vm279_vm0, %v7184_v19, %v12882_v40  ;;  %v12884_v17 = vld [vmem:[#allocation63_spill] sm:$0xff]  ;;  %v3841_v50 = vsel %vm1880_vm6, %v3809_v38, %v12889_v18  ;;  %v12905_v40 = vld [vmem:[#allocation162_spill] sm:$0xff] }
 0x562   : > { %v3746_v23 = vsel %vm1781_vm3, %v3714_v25, %v12884_v17  ;;  %v7187_v19 = vld [vmem:[#allocation2 + $0x165] sm:$0xff] }
 0x563   : > { %v3630_v59 = vpop.permute.xlu1 %3629  ;;  %v3778_v42 = vsel %vm1814_vm4, %v3746_v23, %v12886_v35  ;;  %v3717_v25 = vsel %vm279_vm0, %v7187_v19, %v12905_v40  ;;  %v12907_v23 = vld [vmem:[#allocation193_spill] sm:$0xff]  ;;  %v12911_v18 = vld [vmem:[#allocation199_spill] sm:$0xff]  ;;  %v12928_v19 = vld [vmem:[#allocation202_spill] sm:$0xff] }
 0x564   : > { %v3628_v43 = vpop.permute.xlu0 %3627  ;;  %v3934_v49 = vsel %vm1979_vm9, %v3902_v4, %v3630_v59  ;;  %v3810_v2 = vsel %vm1847_vm5, %v3778_v42, %v12888_v12  ;;  %v12890_v59 = vld [vmem:[#allocation198_spill] sm:$0xff]  ;;  %v3749_v56 = vsel %vm1781_vm3, %v3717_v25, %v12907_v23  ;;  %v12909_v42 = vld [vmem:[#allocation71_spill] sm:$0xff] }
 0x565   : > { %v3933_v0 = vsel %vm1979_vm9, %v3901_v52, %v3628_v43  ;;  %v3842_v53 = vsel %vm1880_vm6, %v3810_v2, %v12890_v59  ;;  %v3873_v52 = vsel %vm1913_vm7, %v3841_v50, %v12891_v54  ;;  %v12892_v4 = vld [vmem:[#allocation122_spill] sm:$0xff]  ;;  %v3781_v34 = vsel %vm1814_vm4, %v3749_v56, %v12909_v42  ;;  %v12910_v12 = vld [vmem:[#allocation151_spill] sm:$0xff]  ;;  %v12912_v59 = vld [vmem:[#allocation173_spill] sm:$0xff] }
 0x566   : > { %6881 = vmatprep.mubr.msk.f32.mxu1 %vm2024_vm10, %v3933_v0  ;;  %v3874_v0 = vsel %vm1913_vm7, %v3842_v53, %v12892_v4  ;;  %v3813_v50 = vsel %vm1847_vm5, %v3781_v34, %v12911_v18  ;;  %v12913_v54 = vld [vmem:[#allocation123_spill] sm:$0xff]  ;;  %v7192_v42 = vld [vmem:[#allocation2 + $0x1ad] sm:$0xff] }
 0x567   : > { %v3506_v7 = vpop.permute.xlu1 %3505  ;;  %6882 = vmatmul.mubr.msk.f32.gmra.mrb[30].mxu1 %vm2024_vm10, %v3934_v49  ;;  %v12930_v34 = vld [vmem:[#allocation39_spill] sm:$0xff] }
 0x568   : > { %v3504_v16 = vpop.permute.xlu0 %3503  ;;  %v3904_v44 = vsel %vm1946_vm8, %v3872_v28, %v3506_v7  ;;  %v12894_v7 = vld [vmem:[#allocation105_spill] sm:$0xff]  ;;  %v12903_v28 = vld [vmem:[#allocation91_spill] sm:$0xff] }
 0x569   : > { %v3903_v57 = vsel %vm1946_vm8, %v3871_v24, %v3504_v16  ;;  %v3716_v31 = vsel %vm279_vm0, %v7186_v33, %v12894_v7  ;;  %v12896_v16 = vld [vmem:[#allocation170_spill] sm:$0xff]  ;;  %v3843_v24 = vsel %vm1880_vm6, %v3811_v14, %v12901_v63  ;;  %v7189_v33 = vld [vmem:[#allocation2 + $0x185] sm:$0xff]  ;;  %v12917_v7 = vld [vmem:[#allocation185_spill] sm:$0xff] }
 0x56a   : > { %v3748_v11 = vsel %vm1781_vm3, %v3716_v31, %v12896_v16  ;;  %v3719_v31 = vsel %vm279_vm0, %v7189_v33, %v12917_v7  ;;  %v7190_v16 = vld [vmem:[#allocation2 + $0x18d] sm:$0xff] }
 0x56b   : > { %v3634_v37 = vpop.permute.xlu1 %3633  ;;  %v3780_v30 = vsel %vm1814_vm4, %v3748_v11, %v12898_v27  ;;  %v12918_v11 = vld [vmem:[#allocation126_spill] sm:$0xff]  ;;  %v12921_v14 = vld [vmem:[#allocation148_spill] sm:$0xff]  ;;  %v12922_v63 = vld [vmem:[#allocation117_spill] sm:$0xff] }
 0x56c   : > { %v3632_v41 = vpop.permute.xlu0 %3631  ;;  %v3936_v45 = vsel %vm1979_vm9, %v3904_v44, %v3634_v37  ;;  %v3812_v13 = vsel %vm1847_vm5, %v3780_v30, %v12900_v22  ;;  %v12902_v37 = vld [vmem:[#allocation70_spill] sm:$0xff]  ;;  %v12904_v44 = vld [vmem:[#allocation179_spill] sm:$0xff]  ;;  %v3720_v9 = vsel %vm279_vm0, %v7190_v16, %v12918_v11 }
 0x56d   : > { %v3935_v15 = vsel %vm1979_vm9, %v3903_v57, %v3632_v41  ;;  %v3844_v21 = vsel %vm1880_vm6, %v3812_v13, %v12902_v37  ;;  %v3875_v57 = vsel %vm1913_vm7, %v3843_v24, %v12903_v28  ;;  %v12920_v30 = vld [vmem:[#allocation131_spill] sm:$0xff]  ;;  %v12923_v37 = vld [vmem:[#allocation73_spill] sm:$0xff] }
 0x56e   : > { %6884 = vmatprep.mubr.msk.f32.mxu1 %vm2024_vm10, %v3935_v15  ;;  %v3876_v15 = vsel %vm1913_vm7, %v3844_v21, %v12904_v44  ;;  %v3752_v6 = vsel %vm1781_vm3, %v3720_v9, %v12920_v30  ;;  %v12924_v28 = vld [vmem:[#allocation137_spill] sm:$0xff] }
 0x56f   : > { %v3510_v48 = vpop.permute.xlu1 %3509  ;;  %6885 = vmatmul.mubr.msk.f32.gmra.mrb[32].mxu1 %vm2024_vm10, %v3936_v45  ;;  %v3784_v24 = vsel %vm1814_vm4, %v3752_v6, %v12922_v63  ;;  %v7194_v30 = vld [vmem:[#allocation2 + $0x1cd] sm:$0xff] }
 0x570   : > { %v3508_v26 = vpop.permute.xlu0 %3507  ;;  %v3906_v5 = vsel %vm1946_vm8, %v3874_v0, %v3510_v48  ;;  %v12906_v48 = vld [vmem:[#allocation106_spill] sm:$0xff]  ;;  %v12940_v6 = vld [vmem:[#allocation89_spill] sm:$0xff] }
 0x571   : > { %v3905_v46 = vsel %vm1946_vm8, %v3873_v52, %v3508_v26  ;;  %v3718_v17 = vsel %vm279_vm0, %v7188_v36, %v12906_v48  ;;  %v12908_v26 = vld [vmem:[#allocation134_spill] sm:$0xff]  ;;  %v3845_v52 = vsel %vm1880_vm6, %v3813_v50, %v12913_v54  ;;  %v12932_v50 = vld [vmem:[#allocation72_spill] sm:$0xff] }
 0x572   : > { %v3750_v35 = vsel %vm1781_vm3, %v3718_v17, %v12908_v26  ;;  %v12915_v0 = vld [vmem:[#allocation82_spill] sm:$0xff]  ;;  %v12929_v26 = vld [vmem:[#allocation109_spill] sm:$0xff] }
 0x573   : > { %v3638_v43 = vpop.permute.xlu1 %3637  ;;  %v3782_v2 = vsel %vm1814_vm4, %v3750_v35, %v12910_v12  ;;  %v12931_v12 = vld [vmem:[#allocation54_spill] sm:$0xff] }
 0x574   : > { %v3636_v29 = vpop.permute.xlu0 %3635  ;;  %v3938_v3 = vsel %vm1979_vm9, %v3906_v5, %v3638_v43  ;;  %v3814_v53 = vsel %vm1847_vm5, %v3782_v2, %v12912_v59  ;;  %v12914_v43 = vld [vmem:[#allocation83_spill] sm:$0xff] }
 0x575   : > { %v3937_v49 = vsel %vm1979_vm9, %v3905_v46, %v3636_v29  ;;  %v3846_v4 = vsel %vm1880_vm6, %v3814_v53, %v12914_v43  ;;  %v3877_v46 = vsel %vm1913_vm7, %v3845_v52, %v12915_v0  ;;  %v12916_v5 = vld [vmem:[#allocation143_spill] sm:$0xff]  ;;  %v12933_v53 = vld [vmem:[#allocation114_spill] sm:$0xff]  ;;  %v12935_v0 = vld [vmem:[#allocation84_spill] sm:$0xff] }
 0x576   : > { %6887 = vmatprep.mubr.msk.f32.mxu1 %vm2024_vm10, %v3937_v49  ;;  %v3878_v49 = vsel %vm1913_vm7, %v3846_v4, %v12916_v5  ;;  %v12934_v43 = vld [vmem:[#allocation174_spill] sm:$0xff] }
 0x577   : > { %v3514_v39 = vpop.permute.xlu1 %3513  ;;  %6888 = vmatmul.mubr.msk.f32.gmra.mrb[34].mxu1 %vm2024_vm10, %v3938_v3 }
 0x578   : > { %v3512_v32 = vpop.permute.xlu0 %3511  ;;  %v3908_v62 = vsel %vm1946_vm8, %v3876_v15, %v3514_v39  ;;  %v4351_v39 = vld [vmem:[#allocation2 + $0x48] sm:$0xff]  ;;  %v12926_v15 = vld [vmem:[#allocation154_spill] sm:$0xff] }
 0x579   : > { %v3907_v8 = vsel %vm1946_vm8, %v3875_v57, %v3512_v32  ;;  %v3751_v32 = vsel %vm1781_vm3, %v3719_v31, %v12919_v1  ;;  %4639 = vrot.lane.b32.xlu0 %v4351_v39, %s7206_s8  ;;  %v3816_v57 = vsel %vm1847_vm5, %v3784_v24, %v12924_v28  ;;  %v7193_v1 = vld [vmem:[#allocation2 + $0x1c5] sm:$0xff]  ;;  %v12942_v24 = vld [vmem:[#allocation149_spill] sm:$0xff] }
 0x57a   : > { %v3783_v22 = vsel %vm1814_vm4, %v3751_v32, %v12921_v14  ;;  %v12939_v32 = vld [vmem:[#allocation129_spill] sm:$0xff]  ;;  %v3724_v14 = vsel %vm279_vm0, %v7194_v30, %v12940_v6 }
 0x57b   : > { %v3642_v41 = vpop.permute.xlu1 %3641  ;;  %v3815_v21 = vsel %vm1847_vm5, %v3783_v22, %v12923_v37  ;;  %v12941_v22 = vld [vmem:[#allocation67_spill] sm:$0xff]  ;;  %v3756_v37 = vsel %vm1781_vm3, %v3724_v14, %v12942_v24 }
 0x57c   : > { %v3640_v47 = vpop.permute.xlu0 %3639  ;;  %v3940_v55 = vsel %vm1979_vm9, %v3908_v62, %v3642_v41  ;;  %v12925_v41 = vld [vmem:[#allocation180_spill] sm:$0xff] }
 0x57d   : > { %v3939_v45 = vsel %vm1979_vm9, %v3907_v8, %v3640_v47  ;;  %v3847_v44 = vsel %vm1880_vm6, %v3815_v21, %v12925_v41  ;;  %v3848_v8 = vsel %vm1880_vm6, %v3816_v57, %v12926_v15  ;;  %v12927_v47 = vld [vmem:[#allocation96_spill] sm:$0xff]  ;;  %v12943_v21 = vld [vmem:[#allocation171_spill] sm:$0xff]  ;;  %v12944_v41 = vld [vmem:[#allocation138_spill] sm:$0xff] }
 0x57e   : > { %6890 = vmatprep.mubr.msk.f32.mxu1 %vm2024_vm10, %v3939_v45  ;;  %v3879_v62 = vsel %vm1913_vm7, %v3847_v44, %v12927_v47  ;;  %v3880_v40 = vsel %vm1913_vm7, %v3848_v8, %v12928_v19  ;;  %v3788_v44 = vsel %vm1814_vm4, %v3756_v37, %v12944_v41  ;;  %v12945_v15 = vld [vmem:[#allocation155_spill] sm:$0xff]  ;;  %v12946_v47 = vld [vmem:[#allocation66_spill] sm:$0xff] }
 0x57f   : > { %v3518_v10 = vpop.permute.xlu1 %3517  ;;  %6891 = vmatmul.mubr.msk.f32.gmra.mrb[36].mxu1 %vm2024_vm10, %v3940_v55 }
 0x580   : > { %v3516_v38 = vpop.permute.xlu0 %3515  ;;  %v3910_v61 = vsel %vm1946_vm8, %v3878_v49, %v3518_v10  ;;  %v7191_v10 = vld [vmem:[#allocation2 + $0x1a5] sm:$0xff] }
 0x581   : > { %v3909_v58 = vsel %vm1946_vm8, %v3877_v46, %v3516_v38  ;;  %v3721_v35 = vsel %vm279_vm0, %v7191_v10, %v12929_v26  ;;  %v3722_v38 = vsel %vm279_vm0, %v7192_v42, %v12930_v34  ;;  %v12937_v49 = vld [vmem:[#allocation144_spill] sm:$0xff] }
 0x582   : > { %v3753_v2 = vsel %vm1781_vm3, %v3721_v35, %v12931_v12  ;;  %v3754_v59 = vsel %vm1781_vm3, %v3722_v38, %v12932_v50  ;;  %v7195_v34 = vld [vmem:[#allocation2 + $0x1e5] sm:$0xff]  ;;  %v12949_v38 = vld [vmem:[#allocation50_spill] sm:$0xff] }
 0x583   : > { %v3646_v29 = vpop.permute.xlu1 %3645  ;;  %v3785_v54 = vsel %vm1814_vm4, %v3753_v2, %v12933_v53  ;;  %v3786_v4 = vsel %vm1814_vm4, %v3754_v59, %v12934_v43  ;;  %v3725_v12 = vsel %vm279_vm0, %v7195_v34, %v12949_v38  ;;  %v7196_v2 = vld [vmem:[#allocation2 + $0x1ed] sm:$0xff]  ;;  %v12951_v59 = vld [vmem:[#allocation146_spill] sm:$0xff] }
 0x584   : > { %v3644_v20 = vpop.permute.xlu0 %3643  ;;  %v3942_v60 = vsel %vm1979_vm9, %v3910_v61, %v3646_v29  ;;  %v3817_v46 = vsel %vm1847_vm5, %v3785_v54, %v12935_v0  ;;  %v12936_v29 = vld [vmem:[#allocation196_spill] sm:$0xff]  ;;  %v3757_v53 = vsel %vm1781_vm3, %v3725_v12, %v12951_v59 }
 0x585   : > { %v3941_v3 = vsel %vm1979_vm9, %v3909_v58, %v3644_v20  ;;  %v3818_v5 = vsel %vm1847_vm5, %v3786_v4, %v12936_v29  ;;  %v3849_v58 = vsel %vm1880_vm6, %v3817_v46, %v12937_v49  ;;  %v12938_v20 = vld [vmem:[#allocation120_spill] sm:$0xff]  ;;  %v12953_v4 = vld [vmem:[#allocation135_spill] sm:$0xff]  ;;  %v12954_v29 = vld [vmem:[#allocation197_spill] sm:$0xff] }
 0x586   : > { %6893 = vmatprep.mubr.msk.f32.mxu1 %vm2024_vm10, %v3941_v3  ;;  %v3850_v61 = vsel %vm1880_vm6, %v3818_v5, %v12938_v20  ;;  %v3789_v0 = vsel %vm1814_vm4, %v3757_v53, %v12953_v4  ;;  %v12955_v49 = vld [vmem:[#allocation121_spill] sm:$0xff]  ;;  %v12956_v20 = vld [vmem:[#allocation79_spill] sm:$0xff] }
 0x587   : > { %v3522_v27 = vpop.permute.xlu1 %3521  ;;  %6894 = vmatmul.mubr.msk.f32.gmra.mrb[38].mxu1 %vm2024_vm10, %v3942_v60 }
 0x588   : > { %v3520_v13 = vpop.permute.xlu0 %3519  ;;  %v3912_v36 = vsel %vm1946_vm8, %v3880_v40, %v3522_v27  ;;  %v3723_v27 = vsel %vm279_vm0, %v7193_v1, %v12939_v32  ;;  %v12948_v40 = vld [vmem:[#allocation177_spill] sm:$0xff] }
 0x589   : > { %v3911_v25 = vsel %vm1946_vm8, %v3879_v62, %v3520_v13  ;;  %v3755_v13 = vsel %vm1781_vm3, %v3723_v27, %v12941_v22  ;;  %v3820_v62 = vsel %vm1847_vm5, %v3788_v44, %v12946_v47  ;;  %v10732_v27 = vld [vmem:[%s12084_s4] ss:$0 sm:$0xff] }
 0x58a   : > { %v3787_v28 = vsel %vm1814_vm4, %v3755_v13, %v12943_v21 }
 0x58b   : > { %v3650_v45 = vpop.permute.xlu1 %3649  ;;  %v3819_v8 = vsel %vm1847_vm5, %v3787_v28, %v12945_v15 }
 0x58c   : > { %v3648_v55 = vpop.permute.xlu0 %3647  ;;  %v3944_v17 = vsel %vm1979_vm9, %v3912_v36, %v3650_v45  ;;  %v12947_v45 = vld [vmem:[#allocation203_spill] sm:$0xff] }
 0x58d   : > { %v3943_v48 = vsel %vm1979_vm9, %v3911_v25, %v3648_v55  ;;  %v3851_v19 = vsel %vm1880_vm6, %v3819_v8, %v12947_v45  ;;  %v3852_v25 = vsel %vm1880_vm6, %v3820_v62, %v12948_v40 }
 0x58e   : > { %6896 = vmatprep.mubr.msk.f32.mxu1 %vm2024_vm10, %v3943_v48 }
 0x58f   : > { %v3398_v23 = vpop.permute.xlu1 %3397  ;;  %6897 = vmatmul.mubr.msk.f32.gmra.mrb[40].mxu1 %vm2024_vm10, %v3944_v17 }
 0x590   : > { %v3396_v56 = vpop.permute.xlu0 %3395  ;;  %v3882_v7 = vsel %vm1913_vm7, %v3850_v61, %v3398_v23 }
 0x591   : > { %v3881_v3 = vsel %vm1913_vm7, %v3849_v58, %v3396_v56  ;;  %v3821_v58 = vsel %vm1847_vm5, %v3789_v0, %v12955_v49 }
 0x593   : > { %v3526_v18 = vpop.permute.xlu1 %3525 }
 0x594   : > { %v3524_v52 = vpop.permute.xlu0 %3523  ;;  %v3914_v51 = vsel %vm1946_vm8, %v3882_v7, %v3526_v18  ;;  %v12950_v18 = vld [vmem:[#allocation163_spill] sm:$0xff]  ;;  %v12958_v7 = vld [vmem:[#allocation141_spill] sm:$0xff] }
 0x595   : > { %v3913_v31 = vsel %vm1946_vm8, %v3881_v3, %v3524_v52  ;;  %v3726_v50 = vsel %vm279_vm0, %v7196_v2, %v12950_v18  ;;  %v12952_v52 = vld [vmem:[#allocation115_spill] sm:$0xff]  ;;  %v12957_v3 = vld [vmem:[#allocation81_spill] sm:$0xff] }
 0x596   : > { %v3758_v43 = vsel %vm1781_vm3, %v3726_v50, %v12952_v52 }
 0x597   : > { %v3654_v33 = vpop.permute.xlu1 %3653  ;;  %v3790_v5 = vsel %vm1814_vm4, %v3758_v43, %v12954_v29 }
 0x598   : > { %v3652_v60 = vpop.permute.xlu0 %3651  ;;  %v3946_v16 = vsel %vm1979_vm9, %v3914_v51, %v3654_v33  ;;  %v3822_v61 = vsel %vm1847_vm5, %v3790_v5, %v12956_v20  ;;  %v3853_v33 = vsel %vm1880_vm6, %v3821_v58, %v12957_v3 }
 0x599   : > { %v3945_v39 = vsel %vm1979_vm9, %v3913_v31, %v3652_v60  ;;  %v3854_v31 = vsel %vm1880_vm6, %v3822_v61, %v12958_v7 }
 0x59a   : > { %6899 = vmatprep.mubr.msk.f32.mxu1 %vm2024_vm10, %v3945_v39 }
 0x59b   : > { %v3402_v11 = vpop.permute.xlu1 %3401  ;;  %6900 = vmatmul.mubr.msk.f32.gmra.mrb[42].mxu1 %vm2024_vm10, %v3946_v16 }
 0x59c   : > { %v3400_v9 = vpop.permute.xlu0 %3399  ;;  %v3884_v48 = vsel %vm1913_vm7, %v3852_v25, %v3402_v11 }
 0x59d   : > { %v3883_v55 = vsel %vm1913_vm7, %v3851_v19, %v3400_v9 }
 0x59f   : > { %v3530_v63 = vpop.permute.xlu1 %3529 }
 0x5a0   : > { %v3528_v57 = vpop.permute.xlu0 %3527  ;;  %v3916_v56 = vsel %vm1946_vm8, %v3884_v48, %v3530_v63 }
 0x5a1   : > { %v3915_v17 = vsel %vm1946_vm8, %v3883_v55, %v3528_v57 }
 0x5a3   : > { %v3658_v36 = vpop.permute.xlu1 %3657 }
 0x5a4   : > { %v3656_v23 = vpop.permute.xlu0 %3655  ;;  %v3948_v26 = vsel %vm1979_vm9, %v3916_v56, %v3658_v36 }
 0x5a5   : > { %v3947_v10 = vsel %vm1979_vm9, %v3915_v17, %v3656_v23 }
 0x5a6   : > { %6902 = vmatprep.mubr.msk.f32.mxu1 %vm2024_vm10, %v3947_v10 }
 0x5a7   : > { %v3406_v35 = vpop.permute.xlu1 %3405  ;;  %6903 = vmatmul.mubr.msk.f32.gmra.mrb[44].mxu1 %vm2024_vm10, %v3948_v26 }
 0x5a8   : > { %v3404_v42 = vpop.permute.xlu0 %3403  ;;  %v3886_v39 = vsel %vm1913_vm7, %v3854_v31, %v3406_v35 }
 0x5a9   : > { %v3885_v60 = vsel %vm1913_vm7, %v3853_v33, %v3404_v42 }
 0x5ab   : > { %v3534_v54 = vpop.permute.xlu1 %3533 }
 0x5ac   : > { %v3532_v46 = vpop.permute.xlu0 %3531  ;;  %v3918_v9 = vsel %vm1946_vm8, %v3886_v39, %v3534_v54 }
 0x5ad   : > { %v3917_v16 = vsel %vm1946_vm8, %v3885_v60, %v3532_v46 }
 0x5af   : > { %v3662_v51 = vpop.permute.xlu1 %3661 }
 0x5b0   : > { %v3660_v11 = vpop.permute.xlu0 %3659  ;;  %v3950_v32 = vsel %vm1979_vm9, %v3918_v9, %v3662_v51 }
 0x5b1   : > { %v3949_v1 = vsel %vm1979_vm9, %v3917_v16, %v3660_v11 }
 0x5b2   : > { %6905 = vmatprep.mubr.msk.f32.mxu1 %vm2024_vm10, %v3949_v1 }
 0x5b3   : > { %6906 = vmatmul.mubr.msk.f32.gmra.mrb[46].mxu1 %vm2024_vm10, %v3950_v32 }
 0x602   : > { %v6862_v30 = vpop.f32.mrb[16].mxu1 }
 0x603   : > { %v4134_v6 = vadd.f32 %v6862_v30, %v10732_v27  ;;  %v4128_v14 = vpop.f32.mrb[17].mxu1 }
 0x604   : > { %v4129_v22 = vadd.f32 %v10732_v27, %v4128_v14 }
 0x605   : > { %4288 = vst.msk [vmem:[#allocation2 + $0x70] sm:$0xff] %vm279_vm0, %v4134_v6 }
 0x606   : > { %4287 = vst.msk [vmem:[#allocation2 + $0x68] sm:$0xff] %vm279_vm0, %v4129_v22 }
 0x60a   : > { %v6865_v13 = vpop.f32.mrb[18].mxu1 }
 0x60b   : > { %v4144_v63 = vadd.f32 %v6865_v13, %v10732_v27  ;;  %v4138_v24 = vpop.f32.mrb[19].mxu1 }
 0x60c   : > { %v4139_v37 = vadd.f32 %v10732_v27, %v4138_v24  ;;  %v10740_v21 = vld [vmem:[#allocation2 + $0x70] sm:$0xff] }
 0x60d   : > { %4290 = vst.msk [vmem:[#allocation2 + $0x90] sm:$0xff] %vm279_vm0, %v4144_v63  ;;  %4645 = vrot.lane.b32.xlu1 %v10740_v21, %s7206_s8  ;;  %v10745_v28 = vld [vmem:[#allocation2 + $0x68] sm:$0xff] }
 0x60e   : > { %4289 = vst.msk [vmem:[#allocation2 + $0x88] sm:$0xff] %vm279_vm0, %v4139_v37  ;;  %4643 = vrot.lane.b32.xlu0 %v10745_v28, %s7206_s8 }
 0x612   : > { %v6868_v57 = vpop.f32.mrb[20].mxu1 }
 0x613   : > { %v4154_v41 = vadd.f32 %v6868_v57, %v10732_v27  ;;  %v4148_v44 = vpop.f32.mrb[21].mxu1 }
 0x614   : > { %v4149_v15 = vadd.f32 %v10732_v27, %v4148_v44  ;;  %v10752_v8 = vld [vmem:[#allocation2 + $0x90] sm:$0xff] }
 0x615   : > { %4292 = vst.msk [vmem:[#allocation2 + $0xb0] sm:$0xff] %vm279_vm0, %v4154_v41  ;;  %4649 = vrot.lane.b32.xlu1 %v10752_v8, %s7206_s8  ;;  %v10757_v47 = vld [vmem:[#allocation2 + $0x88] sm:$0xff] }
 0x616   : > { %4291 = vst.msk [vmem:[#allocation2 + $0xa8] sm:$0xff] %vm279_vm0, %v4149_v15  ;;  %4647 = vrot.lane.b32.xlu0 %v10757_v47, %s7206_s8 }
 0x61a   : > { %v6871_v62 = vpop.f32.mrb[22].mxu1 }
 0x61b   : > { %v4164_v45 = vadd.f32 %v6871_v62, %v10732_v27  ;;  %v4158_v19 = vpop.f32.mrb[23].mxu1 }
 0x61c   : > { %v4159_v40 = vadd.f32 %v10732_v27, %v4158_v19  ;;  %v10764_v25 = vld [vmem:[#allocation2 + $0xb0] sm:$0xff] }
 0x61d   : > { %4294 = vst.msk [vmem:[#allocation2 + $0xd0] sm:$0xff] %vm279_vm0, %v4164_v45  ;;  %4653 = vrot.lane.b32.xlu1 %v10764_v25, %s7206_s8  ;;  %v10769_v55 = vld [vmem:[#allocation2 + $0xa8] sm:$0xff] }
 0x61e   : > { %4293 = vst.msk [vmem:[#allocation2 + $0xc8] sm:$0xff] %vm279_vm0, %v4159_v40  ;;  %4651 = vrot.lane.b32.xlu0 %v10769_v55, %s7206_s8 }
 0x622   : > { %v6874_v36 = vpop.f32.mrb[24].mxu1 }
 0x623   : > { %v4174_v48 = vadd.f32 %v6874_v36, %v10732_v27  ;;  %v4168_v17 = vpop.f32.mrb[25].mxu1 }
 0x624   : > { %v4169_v23 = vadd.f32 %v10732_v27, %v4168_v17  ;;  %v10776_v56 = vld [vmem:[#allocation2 + $0xd0] sm:$0xff] }
 0x625   : > { %4296 = vst.msk [vmem:[#allocation2 + $0xf0] sm:$0xff] %vm279_vm0, %v4174_v48  ;;  %4657 = vrot.lane.b32.xlu1 %v10776_v56, %s7206_s8  ;;  %v10781_v10 = vld [vmem:[#allocation2 + $0xc8] sm:$0xff] }
 0x626   : > { %4295 = vst.msk [vmem:[#allocation2 + $0xe8] sm:$0xff] %vm279_vm0, %v4169_v23  ;;  %4655 = vrot.lane.b32.xlu0 %v10781_v10, %s7206_s8 }
 0x62a   : > { %v6877_v26 = vpop.f32.mrb[26].mxu1 }
 0x62b   : > { %v4184_v35 = vadd.f32 %v6877_v26, %v10732_v27  ;;  %v4178_v42 = vpop.f32.mrb[27].mxu1 }
 0x62c   : > { %v4179_v34 = vadd.f32 %v10732_v27, %v4178_v42  ;;  %v10788_v38 = vld [vmem:[#allocation2 + $0xf0] sm:$0xff] }
 0x62d   : > { %4298 = vst.msk [vmem:[#allocation2 + $0x110] sm:$0xff] %vm279_vm0, %v4184_v35  ;;  %4661 = vrot.lane.b32.xlu1 %v10788_v38, %s7206_s8  ;;  %v10793_v12 = vld [vmem:[#allocation2 + $0xe8] sm:$0xff] }
 0x62e   : > { %4297 = vst.msk [vmem:[#allocation2 + $0x108] sm:$0xff] %vm279_vm0, %v4179_v34  ;;  %4659 = vrot.lane.b32.xlu0 %v10793_v12, %s7206_s8 }
 0x632   : > { %v6880_v2 = vpop.f32.mrb[28].mxu1 }
 0x633   : > { %v4194_v18 = vadd.f32 %v6880_v2, %v10732_v27  ;;  %v4188_v50 = vpop.f32.mrb[29].mxu1 }
 0x634   : > { %v4189_v59 = vadd.f32 %v10732_v27, %v4188_v50  ;;  %v10800_v53 = vld [vmem:[#allocation2 + $0x110] sm:$0xff] }
 0x635   : > { %4300 = vst.msk [vmem:[#allocation2 + $0x130] sm:$0xff] %vm279_vm0, %v4194_v18  ;;  %4665 = vrot.lane.b32.xlu1 %v10800_v53, %s7206_s8  ;;  %v10805_v54 = vld [vmem:[#allocation2 + $0x108] sm:$0xff] }
 0x636   : > { %4299 = vst.msk [vmem:[#allocation2 + $0x128] sm:$0xff] %vm279_vm0, %v4189_v59  ;;  %4663 = vrot.lane.b32.xlu0 %v10805_v54, %s7206_s8 }
 0x63a   : > { %v6883_v52 = vpop.f32.mrb[30].mxu1 }
 0x63b   : > { %v4204_v43 = vadd.f32 %v6883_v52, %v10732_v27  ;;  %v4198_v4 = vpop.f32.mrb[31].mxu1  ;;  %v4384_v52 = vld [vmem:[#allocation2 + $0x51] sm:$0xff] }
 0x63c   : > { %v4199_v0 = vadd.f32 %v10732_v27, %v4198_v4  ;;  %v10812_v46 = vld [vmem:[#allocation2 + $0x130] sm:$0xff] }
 0x63d   : > { %4302 = vst.msk [vmem:[#allocation2 + $0x150] sm:$0xff] %vm279_vm0, %v4204_v43  ;;  %4669 = vrot.lane.b32.xlu1 %v10812_v46, %s7206_s8  ;;  %v10817_v29 = vld [vmem:[#allocation2 + $0x128] sm:$0xff] }
 0x63e   : > { %4301 = vst.msk [vmem:[#allocation2 + $0x148] sm:$0xff] %vm279_vm0, %v4199_v0  ;;  %4667 = vrot.lane.b32.xlu0 %v10817_v29, %s7206_s8  ;;  %v4383_v0 = vld [vmem:[#allocation2 + $0x49] sm:$0xff] }
 0x642   : > { %v6886_v5 = vpop.f32.mrb[32].mxu1 }
 0x643   : > { %v4214_v49 = vadd.f32 %v6886_v5, %v10732_v27  ;;  %v4208_v58 = vpop.f32.mrb[33].mxu1 }
 0x644   : > { %v4209_v20 = vadd.f32 %v10732_v27, %v4208_v58  ;;  %v4368_v61 = vld [vmem:[#allocation2 + $0x150] sm:$0xff] }
 0x645   : > { %4304 = vst.msk [vmem:[#allocation2 + $0x170] sm:$0xff] %vm279_vm0, %v4214_v49  ;;  %4673 = vrot.lane.b32.xlu1 %v4368_v61, %s7206_s8  ;;  %v4367_v3 = vld [vmem:[#allocation2 + $0x148] sm:$0xff]  ;;  %v10872_v49 = vld [vmem:[#allocation2 + $0x71] sm:$0xff] }
 0x646   : > { %4303 = vst.msk [vmem:[#allocation2 + $0x168] sm:$0xff] %vm279_vm0, %v4209_v20  ;;  %4671 = vrot.lane.b32.xlu0 %v4367_v3, %s7206_s8  ;;  %v10876_v58 = vld [vmem:[#allocation2 + $0x69] sm:$0xff]  ;;  %v10880_v20 = vld [vmem:[#allocation2 + $0x91] sm:$0xff] }
 0x647   : > { %v10888_v61 = vld [vmem:[#allocation2 + $0xb1] sm:$0xff]  ;;  %v10892_v3 = vld [vmem:[#allocation2 + $0xa9] sm:$0xff] }
 0x64a   : > { %v6889_v33 = vpop.f32.mrb[34].mxu1 }
 0x64b   : > { %v4224_v7 = vadd.f32 %v6889_v33, %v10732_v27  ;;  %v4218_v31 = vpop.f32.mrb[35].mxu1  ;;  %v10896_v33 = vld [vmem:[#allocation2 + $0xd1] sm:$0xff] }
 0x64c   : > { %v4219_v60 = vadd.f32 %v10732_v27, %v4218_v31  ;;  %v4370_v51 = vld [vmem:[#allocation2 + $0x170] sm:$0xff] }
 0x64d   : > { %4306 = vst.msk [vmem:[#allocation2 + $0x190] sm:$0xff] %vm279_vm0, %v4224_v7  ;;  %4677 = vrot.lane.b32.xlu1 %v4370_v51, %s7206_s8  ;;  %v4369_v39 = vld [vmem:[#allocation2 + $0x168] sm:$0xff]  ;;  %v10904_v31 = vld [vmem:[#allocation2 + $0xf1] sm:$0xff] }
 0x64e   : > { %4305 = vst.msk [vmem:[#allocation2 + $0x188] sm:$0xff] %vm279_vm0, %v4219_v60  ;;  %4675 = vrot.lane.b32.xlu0 %v4369_v39, %s7206_s8  ;;  %v10900_v7 = vld [vmem:[#allocation2 + $0xc9] sm:$0xff]  ;;  %v10912_v51 = vld [vmem:[#allocation2 + $0x111] sm:$0xff] }
 0x64f   : > { %v10908_v60 = vld [vmem:[#allocation2 + $0xe9] sm:$0xff] }
 0x650   : > { %v10916_v39 = vld [vmem:[#allocation2 + $0x109] sm:$0xff] }
 0x652   : > { %v6892_v16 = vpop.f32.mrb[36].mxu1 }
 0x653   : > { %v4234_v11 = vadd.f32 %v6892_v16, %v10732_v27  ;;  %v4228_v9 = vpop.f32.mrb[37].mxu1  ;;  %v10920_v16 = vld [vmem:[#allocation2 + $0x131] sm:$0xff] }
 0x654   : > { %v4229_v1 = vadd.f32 %v10732_v27, %v4228_v9  ;;  %v4372_v32 = vld [vmem:[#allocation2 + $0x190] sm:$0xff] }
 0x655   : > { %4308 = vst.msk [vmem:[#allocation2 + $0x1b0] sm:$0xff] %vm279_vm0, %v4234_v11  ;;  %4681 = vrot.lane.b32.xlu1 %v4372_v32, %s7206_s8  ;;  %v4371_v30 = vld [vmem:[#allocation2 + $0x188] sm:$0xff]  ;;  %v10928_v9 = vld [vmem:[#allocation2 + $0x151] sm:$0xff] }
 0x656   : > { %4307 = vst.msk [vmem:[#allocation2 + $0x1a8] sm:$0xff] %vm279_vm0, %v4229_v1  ;;  %4679 = vrot.lane.b32.xlu0 %v4371_v30, %s7206_s8  ;;  %v10924_v11 = vld [vmem:[#allocation2 + $0x129] sm:$0xff]  ;;  %v10936_v32 = vld [vmem:[#allocation2 + $0x171] sm:$0xff] }
 0x657   : > { %v10932_v1 = vld [vmem:[#allocation2 + $0x149] sm:$0xff] }
 0x658   : > { %v10940_v30 = vld [vmem:[#allocation2 + $0x169] sm:$0xff] }
 0x65a   : > { %v6895_v6 = vpop.f32.mrb[38].mxu1 }
 0x65b   : > { %v4244_v14 = vadd.f32 %v6895_v6, %v10732_v27  ;;  %v4238_v22 = vpop.f32.mrb[39].mxu1  ;;  %v10944_v6 = vld [vmem:[#allocation2 + $0x191] sm:$0xff] }
 0x65c   : > { %v4239_v13 = vadd.f32 %v10732_v27, %v4238_v22  ;;  %v4374_v63 = vld [vmem:[#allocation2 + $0x1b0] sm:$0xff] }
 0x65d   : > { %4310 = vst.msk [vmem:[#allocation2 + $0x1d0] sm:$0xff] %vm279_vm0, %v4244_v14  ;;  %4685 = vrot.lane.b32.xlu1 %v4374_v63, %s7206_s8  ;;  %v4373_v24 = vld [vmem:[#allocation2 + $0x1a8] sm:$0xff]  ;;  %v4406_v22 = vld [vmem:[#allocation2 + $0x1b1] sm:$0xff] }
 0x65e   : > { %4309 = vst.msk [vmem:[#allocation2 + $0x1c8] sm:$0xff] %vm279_vm0, %v4239_v13  ;;  %4683 = vrot.lane.b32.xlu0 %v4373_v24, %s7206_s8  ;;  %v10948_v14 = vld [vmem:[#allocation2 + $0x189] sm:$0xff]  ;;  %v10954_v24 = vpop.permute.xlu1 %4641 }
 0x65f   : > { %v4405_v13 = vld [vmem:[#allocation2 + $0x1a9] sm:$0xff] }
 0x662   : > { %v6898_v37 = vpop.f32.mrb[40].mxu1 }
 0x663   : > { %v4254_v57 = vadd.f32 %v6898_v37, %v10732_v27  ;;  %v4248_v41 = vpop.f32.mrb[41].mxu1 }
 0x664   : > { %v4249_v44 = vadd.f32 %v10732_v27, %v4248_v41  ;;  %v4376_v15 = vld [vmem:[#allocation2 + $0x1d0] sm:$0xff] }
 0x665   : > { %4312 = vst.msk [vmem:[#allocation2 + $0x1f0] sm:$0xff] %vm279_vm0, %v4254_v57  ;;  %4689 = vrot.lane.b32.xlu1 %v4376_v15, %s7206_s8  ;;  %v4375_v62 = vld [vmem:[#allocation2 + $0x1c8] sm:$0xff]  ;;  %v4408_v63 = vld [vmem:[#allocation2 + $0x1d1] sm:$0xff]  ;;  %v10957_v57 = vpop.permute.xlu0 %4639 }
 0x666   : > { %4311 = vst.msk [vmem:[#allocation2 + $0x1e8] sm:$0xff] %vm279_vm0, %v4249_v44  ;;  %4687 = vrot.lane.b32.xlu0 %v4375_v62, %s7206_s8  ;;  %v4407_v37 = vld [vmem:[#allocation2 + $0x1c9] sm:$0xff] }
 0x66c   : > { %v4378_v45 = vld [vmem:[#allocation2 + $0x1f0] sm:$0xff] }
 0x66d   : > { %4693 = vrot.lane.b32.xlu1 %v4378_v45, %s7206_s8  ;;  %v4377_v19 = vld [vmem:[#allocation2 + $0x1e8] sm:$0xff]  ;;  %v4410_v41 = vld [vmem:[#allocation2 + $0x1f1] sm:$0xff] }
 0x66e   : > { %v6901_v40 = vpop.f32.mrb[42].mxu1  ;;  %4691 = vrot.lane.b32.xlu0 %v4377_v19, %s7206_s8  ;;  %v4409_v44 = vld [vmem:[#allocation2 + $0x1e9] sm:$0xff] }
 0x66f   : > { %v4264_v36 = vadd.f32 %v6901_v40, %v10732_v27  ;;  %v4258_v48 = vpop.f32.mrb[43].mxu1 }
 0x670   : > { %v4259_v17 = vadd.f32 %v10732_v27, %v4258_v48 }
 0x671   : > { %4314 = vst.msk [vmem:[#allocation2 + $0x210] sm:$0xff] %vm279_vm0, %v4264_v36 }
 0x672   : > { %4313 = vst.msk [vmem:[#allocation2 + $0x208] sm:$0xff] %vm279_vm0, %v4259_v17 }
 0x678   : > { %v4380_v23 = vld [vmem:[#allocation2 + $0x210] sm:$0xff] }
 0x679   : > { %4697 = vrot.lane.b32.xlu1 %v4380_v23, %s7206_s8  ;;  %v4379_v26 = vld [vmem:[#allocation2 + $0x208] sm:$0xff]  ;;  %v4412_v45 = vld [vmem:[#allocation2 + $0x211] sm:$0xff] }
 0x67a   : > { %v6904_v35 = vpop.f32.mrb[44].mxu1  ;;  %4695 = vrot.lane.b32.xlu0 %v4379_v26, %s7206_s8  ;;  %v4411_v19 = vld [vmem:[#allocation2 + $0x209] sm:$0xff] }
 0x67b   : > { %v4274_v42 = vadd.f32 %v6904_v35, %v10732_v27  ;;  %v4268_v34 = vpop.f32.mrb[45].mxu1  ;;  %v10976_v26 = vld [vmem:[#allocation2 + $0x6f] sm:$0xff] }
 0x67c   : > { %v4269_v2 = vadd.f32 %v10732_v27, %v4268_v34 }
 0x67d   : > { %4316 = vst.msk [vmem:[#allocation2 + $0x230] sm:$0xff] %vm279_vm0, %v4274_v42  ;;  %v10980_v42 = vld [vmem:[#allocation2 + $0x67] sm:$0xff] }
 0x67e   : > { %4315 = vst.msk [vmem:[#allocation2 + $0x228] sm:$0xff] %vm279_vm0, %v4269_v2  ;;  %v10988_v2 = vld [vmem:[#allocation2 + $0x8f] sm:$0xff] }
 0x67f   : > { %v10962_v15 = vpop.permute.xlu1 %4645 }
 0x680   : > { %v10964_v62 = vpop.permute.xlu0 %4643 }
 0x684   : > { %v4382_v18 = vld [vmem:[#allocation2 + $0x230] sm:$0xff] }
 0x685   : > { %4701 = vrot.lane.b32.xlu1 %v4382_v18, %s7206_s8  ;;  %v4381_v50 = vld [vmem:[#allocation2 + $0x228] sm:$0xff]  ;;  %v4414_v48 = vld [vmem:[#allocation2 + $0x231] sm:$0xff] }
 0x686   : > { %v6907_v59 = vpop.f32.mrb[46].mxu1  ;;  %4699 = vrot.lane.b32.xlu0 %v4381_v50, %s7206_s8  ;;  %v4413_v17 = vld [vmem:[#allocation2 + $0x229] sm:$0xff] }
 0x687   : > { %v4284_v43 = vadd.f32 %v6907_v59, %v10732_v27  ;;  %v4278_v4 = vpop.f32.mrb[47].mxu1  ;;  %v10968_v40 = vpop.permute.xlu1 %4649  ;;  %v10992_v50 = vld [vmem:[#allocation2 + $0x87] sm:$0xff] }
 0x688   : > { %v4279_v5 = vadd.f32 %v10732_v27, %v4278_v4  ;;  %v10884_v27 = vld [vmem:[#allocation2 + $0x89] sm:$0xff]  ;;  %v10970_v36 = vpop.permute.xlu0 %4647 }
 0x689   : > { %4318 = vst.msk [vmem:[#allocation2 + $0x250] sm:$0xff] %vm279_vm0, %v4284_v43  ;;  %4769 = vrot.lane.b32.xlu1 %v4384_v52, %s7207_s9  ;;  %v11000_v52 = vld [vmem:[#allocation2 + $0xaf] sm:$0xff]  ;;  %v11004_v4 = vld [vmem:[#allocation2 + $0xa7] sm:$0xff] }
 0x68a   : > { %4317 = vst.msk [vmem:[#allocation2 + $0x248] sm:$0xff] %vm279_vm0, %v4279_v5  ;;  %4767 = vrot.lane.b32.xlu0 %v4383_v0, %s7207_s9  ;;  %v11012_v5 = vld [vmem:[#allocation2 + $0xcf] sm:$0xff] }
 0x68d   : > { %4773 = vrot.lane.b32.xlu1 %v10872_v49, %s7207_s9 }
 0x68e   : > { %4771 = vrot.lane.b32.xlu0 %v10876_v58, %s7207_s9 }
 0x68f   : > { %v10974_v23 = vpop.permute.xlu1 %4653 }
 0x690   : > { %v10978_v35 = vpop.permute.xlu0 %4651 }
 0x691   : > { %4777 = vrot.lane.b32.xlu1 %v10880_v20, %s7207_s9 }
 0x692   : > { %4775 = vrot.lane.b32.xlu0 %v10884_v27, %s7207_s9 }
 0x695   : > { %4781 = vrot.lane.b32.xlu1 %v10888_v61, %s7207_s9 }
 0x696   : > { %4779 = vrot.lane.b32.xlu0 %v10892_v3, %s7207_s9 }
 0x697   : > { %v10986_v34 = vpop.permute.xlu1 %4657 }
 0x698   : > { %v10990_v18 = vpop.permute.xlu0 %4655 }
 0x699   : > { %4785 = vrot.lane.b32.xlu1 %v10896_v33, %s7207_s9 }
 0x69a   : > { %4783 = vrot.lane.b32.xlu0 %v10900_v7, %s7207_s9 }
 0x69d   : > { %4789 = vrot.lane.b32.xlu1 %v10904_v31, %s7207_s9 }
 0x69e   : > { %4787 = vrot.lane.b32.xlu0 %v10908_v60, %s7207_s9 }
 0x69f   : > { %v10998_v59 = vpop.permute.xlu1 %4661 }
 0x6a0   : > { %12959 = vst [vmem:[#allocation78_spill] sm:$0xff] %v10998_v59  ;;  %v11002_v43 = vpop.permute.xlu0 %4659 }
 0x6a1   : > { %4793 = vrot.lane.b32.xlu1 %v10912_v51, %s7207_s9 }
 0x6a2   : > { %4791 = vrot.lane.b32.xlu0 %v10916_v39, %s7207_s9 }
 0x6a5   : > { %4797 = vrot.lane.b32.xlu1 %v10920_v16, %s7207_s9 }
 0x6a6   : > { %4795 = vrot.lane.b32.xlu0 %v10924_v11, %s7207_s9 }
 0x6a7   : > { %v11010_v0 = vpop.permute.xlu1 %4665 }
 0x6a8   : > { %12960 = vst [vmem:[#allocation160_spill] sm:$0xff] %v11010_v0  ;;  %v4319_v0 = vld [vmem:[#allocation2 + $0x47] sm:$0xff] }
 0x6a9   : > { %4801 = vrot.lane.b32.xlu1 %v10928_v9, %s7207_s9 }
 0x6aa   : > { %4799 = vrot.lane.b32.xlu0 %v10932_v1, %s7207_s9 }
 0x6ad   : > { %4805 = vrot.lane.b32.xlu1 %v10936_v32, %s7207_s9 }
 0x6ae   : > { %4803 = vrot.lane.b32.xlu0 %v10940_v30, %s7207_s9 }
 0x6b1   : > { %4809 = vrot.lane.b32.xlu1 %v10944_v6, %s7207_s9 }
 0x6b2   : > { %4807 = vrot.lane.b32.xlu0 %v10948_v14, %s7207_s9 }
 0x6b5   : > { %4813 = vrot.lane.b32.xlu1 %v4406_v22, %s7207_s9  ;;  %v11014_v22 = vpop.permute.xlu0 %4663 }
 0x6b6   : > { %4811 = vrot.lane.b32.xlu0 %v4405_v13, %s7207_s9  ;;  %12961 = vst [vmem:[#allocation125_spill] sm:$0xff] %v11014_v22  ;;  %v11016_v13 = vld [vmem:[#allocation2 + $0xc7] sm:$0xff]  ;;  %v5631_v22 = vsel %vm279_vm0, %v4319_v0, %v10957_v57 }
 0x6b9   : > { %4817 = vrot.lane.b32.xlu1 %v4408_v63, %s7207_s9  ;;  %v11022_v63 = vpop.permute.xlu1 %4669 }
 0x6ba   : > { %4815 = vrot.lane.b32.xlu0 %v4407_v37, %s7207_s9  ;;  %12962 = vst [vmem:[#allocation158_spill] sm:$0xff] %v11022_v63  ;;  %v11024_v37 = vpop.permute.xlu0 %4667  ;;  %v5890_v63 = vld [vmem:[%s12085_s5 + $0x18] sm:$0xff] }
 0x6bb   : > { %12963 = vst [vmem:[#allocation183_spill] sm:$0xff] %v11024_v37 }
 0x6bd   : > { %4821 = vrot.lane.b32.xlu1 %v4410_v41, %s7207_s9  ;;  %v11026_v41 = vld [vmem:[#allocation2 + $0xe7] sm:$0xff] }
 0x6be   : > { %4819 = vrot.lane.b32.xlu0 %v4409_v44, %s7207_s9  ;;  %v5887_v44 = vld [vmem:[%s12085_s5] sm:$0xff] }
 0x6c1   : > { %4825 = vrot.lane.b32.xlu1 %v4412_v45, %s7207_s9  ;;  %v5888_v45 = vld [vmem:[%s12085_s5 + $0x8] sm:$0xff] }
 0x6c2   : > { %4823 = vrot.lane.b32.xlu0 %v4411_v19, %s7207_s9  ;;  %v11038_v19 = vpop.permute.xlu1 %4673 }
 0x6c3   : > { %12964 = vst [vmem:[#allocation36_spill] sm:$0xff] %v11038_v19 }
 0x6c5   : > { %4829 = vrot.lane.b32.xlu1 %v4414_v48, %s7207_s9  ;;  %v6982_v48 = vpack.c.bf16 %v5888_v45, %v5887_v44 }
 0x6c6   : > { %4827 = vrot.lane.b32.xlu0 %v4413_v17, %s7207_s9  ;;  %v11040_v17 = vpop.permute.xlu0 %4671  ;;  %v11052_v19 = vpop.permute.xlu1 %4677 }
 0x6c7   : > { %12965 = vst [vmem:[#allocation181_spill] sm:$0xff] %v11040_v17  ;;  %6983 = vmatprep.subr.bf16.mxu0 %v6982_v48  ;;  %12966 = vst [vmem:[#allocation204_spill] sm:$0xff] %v11052_v19 }
 0x6c8   : > { %6985 = vmatpush3.bf16.msra.mxu0 %v6982_v48 }
 0x6c9   : > { %4897 = vrot.lane.b32.xlu1 %v10976_v26, %s7208_s10 }
 0x6ca   : > { %4895 = vrot.lane.b32.xlu0 %v10980_v42, %s7208_s10  ;;  %v11054_v45 = vpop.permute.xlu0 %4675 }
 0x6cb   : > { %12967 = vst [vmem:[#allocation85_spill] sm:$0xff] %v11054_v45 }
 0x6cd   : > { %4901 = vrot.lane.b32.xlu1 %v10988_v2, %s7208_s10 }
 0x6ce   : > { %4899 = vrot.lane.b32.xlu0 %v10992_v50, %s7208_s10  ;;  %v11066_v48 = vpop.permute.xlu0 %4679 }
 0x6cf   : > { %12969 = vst [vmem:[#allocation161_spill] sm:$0xff] %v11066_v48 }
 0x6d1   : > { %4905 = vrot.lane.b32.xlu1 %v11000_v52, %s7208_s10 }
 0x6d2   : > { %4903 = vrot.lane.b32.xlu0 %v11004_v4, %s7208_s10 }
 0x6d5   : > { %4909 = vrot.lane.b32.xlu1 %v11012_v5, %s7208_s10 }
 0x6d6   : > { %4907 = vrot.lane.b32.xlu0 %v11016_v13, %s7208_s10 }
 0x6d9   : > { %5023 = vrot.lane.b32.xlu1 %v10745_v28, %s7209_s11  ;;  %v5889_v28 = vld [vmem:[%s12085_s5 + $0x10] sm:$0xff] }
 0x6da   : > { %4911 = vrot.lane.b32.xlu0 %v11026_v41, %s7208_s10  ;;  %v6986_v44 = vpack.c.bf16 %v5890_v63, %v5889_v28  ;;  %v11075_v63 = vpop.permute.xlu0 %4683 }
 0x6db   : > { %12971 = vst [vmem:[#allocation37_spill] sm:$0xff] %v11075_v63 }
 0x6dc   : > { %6987 = vmatprep.subr.bf16.mxu0 %v6986_v44 }
 0x6dd   : > { %5151 = vrot.lane.b32.xlu1 %v10876_v58, %s7210_s12  ;;  %6989 = vmatpush3.bf16.msra.mxu0 %v6986_v44  ;;  %v11063_v58 = vpop.permute.xlu1 %4681 }
 0x6de   : > { %5025 = vrot.lane.b32.xlu0 %v10740_v21, %s7209_s11  ;;  %v5891_v21 = vld [vmem:[%s12085_s5 + $0x20] sm:$0xf]  ;;  %12968 = vst [vmem:[#allocation35_spill] sm:$0xff] %v11063_v58  ;;  %v11083_v44 = vpop.permute.xlu0 %4687 }
 0x6df   : > { %6916 = vmatprep.subr.msk.mxu0 %vm2121_vm2, %v5891_v21  ;;  %12973 = vst [vmem:[#allocation60_spill] sm:$0xff] %v11083_v44 }
 0x6e1   : > { %5279 = vrot.lane.b32.xlu1 %v10992_v50, %s7211_s13  ;;  %6917 = vmatpush3.msk.msra.mxu0 %vm2121_vm2, %v5891_v21 }
 0x6e2   : > { %5153 = vrot.lane.b32.xlu0 %v10872_v49, %s7210_s12  ;;  %v11073_v49 = vpop.permute.xlu1 %4685 }
 0x6e3   : > { %12970 = vst [vmem:[#allocation184_spill] sm:$0xff] %v11073_v49  ;;  %v11091_v49 = vpop.permute.xlu0 %4691 }
 0x6e4   : > { %12975 = vst [vmem:[#allocation90_spill] sm:$0xff] %v11091_v49 }
 0x6e5   : > { %5407 = vrot.lane.b32.xlu1 %v10757_v47, %s7212_s14 }
 0x6e6   : > { %5281 = vrot.lane.b32.xlu0 %v10988_v2, %s7211_s13  ;;  %v11081_v28 = vpop.permute.xlu1 %4689 }
 0x6e7   : > { %12972 = vst [vmem:[#allocation103_spill] sm:$0xff] %v11081_v28 }
 0x6e9   : > { %5409 = vrot.lane.b32.xlu1 %v10752_v8, %s7212_s14 }
 0x6ea   : > { %5027 = vrot.lane.b32.xlu0 %v10757_v47, %s7209_s11  ;;  %v11089_v21 = vpop.permute.xlu1 %4693 }
 0x6eb   : > { %12974 = vst [vmem:[#allocation64_spill] sm:$0xff] %v11089_v21 }
 0x6ec   : > { %v11099_v28 = vpop.permute.xlu0 %4695 }
 0x6ed   : > { %5029 = vrot.lane.b32.xlu1 %v10752_v8, %s7209_s11  ;;  %12977 = vst [vmem:[#allocation164_spill] sm:$0xff] %v11099_v28 }
 0x6ee   : > { %5535 = vrot.lane.b32.xlu0 %v10884_v27, %s7213_s28  ;;  %v11097_v47 = vpop.permute.xlu1 %4697 }
 0x6ef   : > { %12976 = vst [vmem:[#allocation107_spill] sm:$0xff] %v11097_v47 }
 0x6f1   : > { %5537 = vrot.lane.b32.xlu1 %v10880_v20, %s7213_s28 }
 0x6f2   : > { %5155 = vrot.lane.b32.xlu0 %v10884_v27, %s7210_s12 }
 0x6f5   : > { %5283 = vrot.lane.b32.xlu1 %v11004_v4, %s7211_s13 }
 0x6f6   : > { %5157 = vrot.lane.b32.xlu0 %v10880_v20, %s7210_s12 }
 0x6f7   : > { %v11105_v8 = vpop.permute.xlu1 %4701 }
 0x6f8   : > { %12978 = vst [vmem:[#allocation128_spill] sm:$0xff] %v11105_v8  ;;  %v11107_v21 = vpop.permute.xlu0 %4699 }
 0x6f9   : > { %12979 = vst [vmem:[#allocation187_spill] sm:$0xff] %v11107_v21  ;;  %5411 = vrot.lane.b32.xlu1 %v10769_v55, %s7212_s14 }
 0x6fa   : > { %5285 = vrot.lane.b32.xlu0 %v11000_v52, %s7211_s13 }
 0x6fb   : > { %v11113_v27 = vpop.permute.xlu1 %4769 }
 0x6fc   : > { %v11115_v47 = vpop.permute.xlu0 %4767 }
 0x6fd   : > { %5413 = vrot.lane.b32.xlu1 %v10764_v25, %s7212_s14 }
 0x6fe   : > { %5031 = vrot.lane.b32.xlu0 %v10769_v55, %s7209_s11 }
 0x6ff   : > { %v11121_v20 = vpop.permute.xlu1 %4773 }
 0x700   : > { %v11123_v8 = vpop.permute.xlu0 %4771 }
 0x701   : > { %5033 = vrot.lane.b32.xlu1 %v10764_v25, %s7209_s11 }
 0x702   : > { %5539 = vrot.lane.b32.xlu0 %v10892_v3, %s7213_s28 }
 0x703   : > { %v11129_v21 = vpop.permute.xlu1 %4777 }
 0x704   : > { %v11131_v28 = vpop.permute.xlu0 %4775 }
 0x705   : > { %5541 = vrot.lane.b32.xlu1 %v10888_v61, %s7213_s28 }
 0x706   : > { %5159 = vrot.lane.b32.xlu0 %v10892_v3, %s7210_s12 }
 0x707   : > { %v11137_v55 = vpop.permute.xlu1 %4781 }
 0x708   : > { %v11139_v49 = vpop.permute.xlu0 %4779 }
 0x709   : > { %5287 = vrot.lane.b32.xlu1 %v11016_v13, %s7211_s13 }
 0x70a   : > { %5161 = vrot.lane.b32.xlu0 %v10888_v61, %s7210_s12 }
 0x70b   : > { %v11145_v25 = vpop.permute.xlu1 %4785 }
 0x70c   : > { %v11147_v44 = vpop.permute.xlu0 %4783 }
 0x70d   : > { %5415 = vrot.lane.b32.xlu1 %v10781_v10, %s7212_s14 }
 0x70e   : > { %5289 = vrot.lane.b32.xlu0 %v11012_v5, %s7211_s13 }
 0x70f   : > { %v11153_v3 = vpop.permute.xlu1 %4789 }
 0x710   : > { %12980 = vst [vmem:[#allocation47_spill] sm:$0xff] %v11153_v3  ;;  %v11155_v63 = vpop.permute.xlu0 %4787  ;;  %v5663_v3 = vsel %vm1781_vm3, %v5631_v22, %v11115_v47 }
 0x711   : > { %12981 = vst [vmem:[#allocation108_spill] sm:$0xff] %v11155_v63  ;;  %5417 = vrot.lane.b32.xlu1 %v10776_v56, %s7212_s14 }
 0x712   : > { %5035 = vrot.lane.b32.xlu0 %v10781_v10, %s7209_s11 }
 0x713   : > { %v11161_v61 = vpop.permute.xlu1 %4793 }
 0x714   : > { %12982 = vst [vmem:[#allocation94_spill] sm:$0xff] %v11161_v61  ;;  %v11163_v58 = vpop.permute.xlu0 %4791  ;;  %v11283_v61 = vld [vmem:[#allocation2 + $0x12f] sm:$0xff] }
 0x715   : > { %12983 = vst [vmem:[#allocation127_spill] sm:$0xff] %v11163_v58  ;;  %5037 = vrot.lane.b32.xlu1 %v10776_v56, %s7209_s11  ;;  %13006 = vst [vmem:[#allocation49_spill] sm:$0xff] %v11283_v61 }
 0x716   : > { %5543 = vrot.lane.b32.xlu0 %v10900_v7, %s7213_s28 }
 0x717   : > { %v11169_v48 = vpop.permute.xlu1 %4797 }
 0x718   : > { %12984 = vst [vmem:[#allocation166_spill] sm:$0xff] %v11169_v48  ;;  %v11171_v19 = vpop.permute.xlu0 %4795  ;;  %v11189_v48 = vld [vmem:[#allocation2 + $0xef] sm:$0xff] }
 0x719   : > { %12985 = vst [vmem:[#allocation130_spill] sm:$0xff] %v11171_v19  ;;  %5545 = vrot.lane.b32.xlu1 %v10896_v33, %s7213_s28  ;;  %12990 = vst [vmem:[#allocation132_spill] sm:$0xff] %v11189_v48  ;;  %v11275_v19 = vld [vmem:[#allocation2 + $0x127] sm:$0xff] }
 0x71a   : > { %5163 = vrot.lane.b32.xlu0 %v10900_v7, %s7210_s12  ;;  %13005 = vst [vmem:[#allocation165_spill] sm:$0xff] %v11275_v19 }
 0x71b   : > { %v11177_v10 = vpop.permute.xlu1 %4801 }
 0x71c   : > { %12986 = vst [vmem:[#allocation189_spill] sm:$0xff] %v11177_v10  ;;  %v11179_v45 = vpop.permute.xlu0 %4799 }
 0x71d   : > { %12987 = vst [vmem:[#allocation53_spill] sm:$0xff] %v11179_v45  ;;  %5291 = vrot.lane.b32.xlu1 %v11026_v41, %s7211_s13 }
 0x71e   : > { %5165 = vrot.lane.b32.xlu0 %v10896_v33, %s7210_s12 }
 0x71f   : > { %v11185_v56 = vpop.permute.xlu1 %4805 }
 0x720   : > { %12988 = vst [vmem:[#allocation97_spill] sm:$0xff] %v11185_v56  ;;  %v11187_v17 = vpop.permute.xlu0 %4803 }
 0x721   : > { %12989 = vst [vmem:[#allocation93_spill] sm:$0xff] %v11187_v17  ;;  %5419 = vrot.lane.b32.xlu1 %v10793_v12, %s7212_s14 }
 0x722   : > { %5293 = vrot.lane.b32.xlu0 %v11189_v48, %s7211_s13 }
 0x723   : > { %v11195_v7 = vpop.permute.xlu1 %4809 }
 0x724   : > { %12991 = vst [vmem:[#allocation100_spill] sm:$0xff] %v11195_v7  ;;  %v11197_v10 = vpop.permute.xlu0 %4807 }
 0x725   : > { %12992 = vst [vmem:[#allocation41_spill] sm:$0xff] %v11197_v10  ;;  %5039 = vrot.lane.b32.xlu1 %v10793_v12, %s7209_s11 }
 0x726   : > { %4913 = vrot.lane.b32.xlu0 %v11189_v48, %s7208_s10 }
 0x727   : > { %v11203_v33 = vpop.permute.xlu1 %4813 }
 0x728   : > { %12993 = vst [vmem:[#allocation42_spill] sm:$0xff] %v11203_v33  ;;  %v11205_v56 = vpop.permute.xlu0 %4811 }
 0x729   : > { %12994 = vst [vmem:[#allocation186_spill] sm:$0xff] %v11205_v56  ;;  %5547 = vrot.lane.b32.xlu1 %v10908_v60, %s7213_s28 }
 0x72a   : > { %5421 = vrot.lane.b32.xlu0 %v10788_v38, %s7212_s14 }
 0x72b   : > { %v11211_v17 = vpop.permute.xlu1 %4817 }
 0x72c   : > { %12995 = vst [vmem:[#allocation43_spill] sm:$0xff] %v11211_v17  ;;  %v11213_v7 = vpop.permute.xlu0 %4815  ;;  %v11229_v17 = vld [vmem:[#allocation2 + $0x107] sm:$0xff] }
 0x72d   : > { %12996 = vst [vmem:[#allocation40_spill] sm:$0xff] %v11213_v7  ;;  %5167 = vrot.lane.b32.xlu1 %v10908_v60, %s7210_s12  ;;  %13000 = vst [vmem:[#allocation95_spill] sm:$0xff] %v11229_v17 }
 0x72e   : > { %5041 = vrot.lane.b32.xlu0 %v10788_v38, %s7209_s11 }
 0x72f   : > { %v11219_v12 = vpop.permute.xlu1 %4821 }
 0x730   : > { %12997 = vst [vmem:[#allocation111_spill] sm:$0xff] %v11219_v12  ;;  %v11221_v33 = vpop.permute.xlu0 %4819  ;;  %v11241_v12 = vld [vmem:[#allocation2 + $0x10f] sm:$0xff] }
 0x731   : > { %12998 = vst [vmem:[#allocation98_spill] sm:$0xff] %v11221_v33  ;;  %5169 = vrot.lane.b32.xlu1 %v10904_v31, %s7210_s12  ;;  %13004 = vst [vmem:[#allocation45_spill] sm:$0xff] %v11241_v12 }
 0x732   : > { %5549 = vrot.lane.b32.xlu0 %v10904_v31, %s7213_s28 }
 0x733   : > { %v11227_v56 = vpop.permute.xlu1 %4825 }
 0x734   : > { %12999 = vst [vmem:[#allocation44_spill] sm:$0xff] %v11227_v56  ;;  %v11231_v7 = vpop.permute.xlu0 %4823 }
 0x735   : > { %13001 = vst [vmem:[#allocation168_spill] sm:$0xff] %v11231_v7  ;;  %4915 = vrot.lane.b32.xlu1 %v11229_v17, %s7208_s10 }
 0x736   : > { %5295 = vrot.lane.b32.xlu0 %v11229_v17, %s7211_s13  ;;  %v4320_v17 = vld [vmem:[#allocation2 + $0x4f] sm:$0xff] }
 0x737   : > { %v11237_v38 = vpop.permute.xlu1 %4829  ;;  %v5632_v59 = vsel %vm279_vm0, %v4320_v17, %v10954_v24 }
 0x738   : > { %13002 = vst [vmem:[#allocation167_spill] sm:$0xff] %v11237_v38  ;;  %v11239_v60 = vpop.permute.xlu0 %4827  ;;  %v5664_v57 = vsel %vm1781_vm3, %v5632_v59, %v11113_v27  ;;  %v11325_v27 = vld [vmem:[#allocation2 + $0x147] sm:$0xff] }
 0x739   : > { %13003 = vst [vmem:[#allocation46_spill] sm:$0xff] %v11239_v60  ;;  %5423 = vrot.lane.b32.xlu1 %v10805_v54, %s7212_s14 }
 0x73a   : > { %5297 = vrot.lane.b32.xlu0 %v11241_v12, %s7211_s13 }
 0x73b   : > { %v4898_v31 = vpop.permute.xlu1 %4897 }
 0x73c   : > { %v4896_v56 = vpop.permute.xlu0 %4895  ;;  %v5696_v22 = vsel %vm1814_vm4, %v5664_v57, %v4898_v31  ;;  %v11333_v31 = vld [vmem:[#allocation2 + $0x14f] sm:$0xff] }
 0x73d   : > { %5043 = vrot.lane.b32.xlu1 %v10805_v54, %s7209_s11  ;;  %v5695_v48 = vsel %vm1814_vm4, %v5663_v3, %v4896_v56 }
 0x73e   : > { %4917 = vrot.lane.b32.xlu0 %v11241_v12, %s7208_s10 }
 0x73f   : > { %v11251_v7 = vpop.permute.xlu1 %4901 }
 0x740   : > { %v11253_v38 = vpop.permute.xlu0 %4899 }
 0x741   : > { %5551 = vrot.lane.b32.xlu1 %v10916_v39, %s7213_s28 }
 0x742   : > { %5425 = vrot.lane.b32.xlu0 %v10800_v53, %s7212_s14 }
 0x743   : > { %v11259_v60 = vpop.permute.xlu1 %4905 }
 0x744   : > { %v11261_v33 = vpop.permute.xlu0 %4903 }
 0x745   : > { %5171 = vrot.lane.b32.xlu1 %v10916_v39, %s7210_s12 }
 0x746   : > { %5045 = vrot.lane.b32.xlu0 %v10800_v53, %s7209_s11 }
 0x747   : > { %v11267_v54 = vpop.permute.xlu1 %4909 }
 0x748   : > { %v11269_v10 = vpop.permute.xlu0 %4907 }
 0x749   : > { %5173 = vrot.lane.b32.xlu1 %v10912_v51, %s7210_s12 }
 0x74a   : > { %5553 = vrot.lane.b32.xlu0 %v10912_v51, %s7213_s28 }
 0x74b   : > { %v5024_v45 = vpop.permute.xlu1 %5023 }
 0x74c   : > { %v11277_v37 = vpop.permute.xlu0 %4911  ;;  %v5727_v63 = vsel %vm1847_vm5, %v5695_v48, %v5024_v45 }
 0x74d   : > { %4919 = vrot.lane.b32.xlu1 %v11275_v19, %s7208_s10 }
 0x74e   : > { %5299 = vrot.lane.b32.xlu0 %v11275_v19, %s7211_s13 }
 0x74f   : > { %v5152_v53 = vpop.permute.xlu1 %5151 }
 0x750   : > { %v5026_v39 = vpop.permute.xlu0 %5025  ;;  %v5759_v0 = vsel %vm1880_vm6, %v5727_v63, %v5152_v53 }
 0x751   : > { %5427 = vrot.lane.b32.xlu1 %v10817_v29, %s7212_s14  ;;  %v5728_v24 = vsel %vm1847_vm5, %v5696_v22, %v5026_v39 }
 0x752   : > { %5301 = vrot.lane.b32.xlu0 %v11283_v61, %s7211_s13 }
 0x753   : > { %v5280_v51 = vpop.permute.xlu1 %5279 }
 0x754   : > { %v5154_v12 = vpop.permute.xlu0 %5153  ;;  %v5791_v47 = vsel %vm1913_vm7, %v5759_v0, %v5280_v51  ;;  %v5633_v51 = vsel %vm279_vm0, %v10980_v42, %v10964_v62  ;;  %v4556_v62 = vld [vmem:[#allocation2 + $0x150] sm:$0xff] }
 0x755   : > { %5047 = vrot.lane.b32.xlu1 %v10817_v29, %s7209_s11 }
 0x756   : > { %4921 = vrot.lane.b32.xlu0 %v11283_v61, %s7208_s10 }
 0x757   : > { %v5408_v19 = vpop.permute.xlu1 %5407 }
 0x758   : > { %v5282_v58 = vpop.permute.xlu0 %5281  ;;  %v5823_v17 = vsel %vm1946_vm8, %v5791_v47, %v5408_v19  ;;  %v5634_v47 = vsel %vm279_vm0, %v10976_v26, %v10962_v15 }
 0x759   : > { %5555 = vrot.lane.b32.xlu1 %v10924_v11, %s7213_s28  ;;  %v5666_v42 = vsel %vm1781_vm3, %v5634_v47, %v11121_v20 }
 0x75a   : > { %5429 = vrot.lane.b32.xlu0 %v10812_v46, %s7212_s14 }
 0x75b   : > { %v5410_v29 = vpop.permute.xlu1 %5409 }
 0x75c   : > { %v5028_v61 = vpop.permute.xlu0 %5027 }
 0x75d   : > { %5175 = vrot.lane.b32.xlu1 %v10924_v11, %s7210_s12  ;;  %v5760_v11 = vsel %vm1880_vm6, %v5728_v24, %v5154_v12  ;;  %v4555_v12 = vld [vmem:[#allocation2 + $0x148] sm:$0xff] }
 0x75e   : > { %5049 = vrot.lane.b32.xlu0 %v10812_v46, %s7209_s11  ;;  %v5792_v59 = vsel %vm1913_vm7, %v5760_v11, %v5282_v58 }
 0x75f   : > { %v5030_v3 = vpop.permute.xlu1 %5029  ;;  %v5824_v46 = vsel %vm1946_vm8, %v5792_v59, %v5410_v29  ;;  %v5665_v29 = vsel %vm1781_vm3, %v5633_v51, %v11123_v8 }
 0x760   : > { %v5536_v45 = vpop.permute.xlu0 %5535  ;;  %v5697_v0 = vsel %vm1814_vm4, %v5665_v29, %v11253_v38  ;;  %v5698_v38 = vsel %vm1814_vm4, %v5666_v42, %v11251_v7 }
 0x761   : > { %v5855_v48 = vsel %vm1979_vm9, %v5823_v17, %v5536_v45  ;;  %5177 = vrot.lane.b32.xlu1 %v10920_v16, %s7210_s12  ;;  %v5729_v24 = vsel %vm1847_vm5, %v5697_v0, %v5028_v61  ;;  %v5730_v15 = vsel %vm1847_vm5, %v5698_v38, %v5030_v3 }
 0x762   : > { %5557 = vrot.lane.b32.xlu0 %v10920_v16, %s7213_s28  ;;  %6918 = vmatprep.mubr.msk.f32.mxu0 %vm2024_vm10, %v5855_v48 }
 0x763   : > { %v5538_v63 = vpop.permute.xlu1 %5537 }
 0x764   : > { %v5856_v19 = vsel %vm1979_vm9, %v5824_v46, %v5538_v63  ;;  %v5156_v56 = vpop.permute.xlu0 %5155  ;;  %v11377_v63 = vld [vmem:[#allocation2 + $0x167] sm:$0xff] }
 0x765   : > { %4923 = vrot.lane.b32.xlu1 %v11325_v27, %s7208_s10  ;;  %6919 = vmatmul.mubr.msk.f32.vlgmr.msra.gmra.mrb[16].mxu0 %vm2024_vm10, %v5856_v19  ;;  %v5761_v8 = vsel %vm1880_vm6, %v5729_v24, %v5156_v56 }
 0x766   : > { %5303 = vrot.lane.b32.xlu0 %v11325_v27, %s7211_s13 }
 0x767   : > { %v5284_v58 = vpop.permute.xlu1 %5283 }
 0x768   : > { %v5158_v16 = vpop.permute.xlu0 %5157  ;;  %v5793_v17 = vsel %vm1913_vm7, %v5761_v8, %v5284_v58 }
 0x769   : > { %5431 = vrot.lane.b32.xlu1 %v4555_v12, %s7212_s14  ;;  %v5762_v11 = vsel %vm1880_vm6, %v5730_v15, %v5158_v16  ;;  %v4557_v16 = vld [vmem:[#allocation2 + $0x168] sm:$0xff] }
 0x76a   : > { %5305 = vrot.lane.b32.xlu0 %v11333_v31, %s7211_s13 }
 0x76b   : > { %v5412_v53 = vpop.permute.xlu1 %5411 }
 0x76c   : > { %v5286_v39 = vpop.permute.xlu0 %5285  ;;  %v5825_v26 = vsel %vm1946_vm8, %v5793_v17, %v5412_v53 }
 0x76d   : > { %5051 = vrot.lane.b32.xlu1 %v4555_v12, %s7209_s11  ;;  %v5794_v20 = vsel %vm1913_vm7, %v5762_v11, %v5286_v39  ;;  %v11383_v12 = vld [vmem:[#allocation2 + $0x16f] sm:$0xff] }
 0x76e   : > { %4925 = vrot.lane.b32.xlu0 %v11333_v31, %s7208_s10 }
 0x76f   : > { %v5414_v57 = vpop.permute.xlu1 %5413 }
 0x770   : > { %v5032_v22 = vpop.permute.xlu0 %5031  ;;  %v5826_v7 = vsel %vm1946_vm8, %v5794_v20, %v5414_v57  ;;  %v5636_v57 = vsel %vm279_vm0, %v10988_v2, %v10968_v40 }
 0x771   : > { %5559 = vrot.lane.b32.xlu1 %v10932_v1, %s7213_s28 }
 0x772   : > { %5433 = vrot.lane.b32.xlu0 %v4556_v62, %s7212_s14 }
 0x773   : > { %v5034_v45 = vpop.permute.xlu1 %5033 }
 0x774   : > { %v5540_v61 = vpop.permute.xlu0 %5539 }
 0x775   : > { %v5857_v48 = vsel %vm1979_vm9, %v5825_v26, %v5540_v61  ;;  %5179 = vrot.lane.b32.xlu1 %v10932_v1, %s7210_s12  ;;  %v11427_v61 = vld [vmem:[#allocation2 + $0x187] sm:$0xff] }
 0x776   : > { %5053 = vrot.lane.b32.xlu0 %v4556_v62, %s7209_s11  ;;  %6921 = vmatprep.mubr.msk.f32.mxu0 %vm2024_vm10, %v5857_v48  ;;  %v4558_v62 = vld [vmem:[#allocation2 + $0x170] sm:$0xff] }
 0x777   : > { %v5542_v59 = vpop.permute.xlu1 %5541 }
 0x778   : > { %v5858_v3 = vsel %vm1979_vm9, %v5826_v7, %v5542_v59  ;;  %v5160_v46 = vpop.permute.xlu0 %5159 }
 0x779   : > { %5181 = vrot.lane.b32.xlu1 %v10928_v9, %s7210_s12  ;;  %6922 = vmatmul.mubr.msk.f32.gmra.mrb[18].mxu0 %vm2024_vm10, %v5858_v3  ;;  %v4559_v3 = vld [vmem:[#allocation2 + $0x188] sm:$0xff] }
 0x77a   : > { %5561 = vrot.lane.b32.xlu0 %v10928_v9, %s7213_s28  ;;  %v5635_v9 = vsel %vm279_vm0, %v10992_v50, %v10970_v36  ;;  %v5668_v36 = vsel %vm1781_vm3, %v5636_v57, %v11129_v21 }
 0x77b   : > { %v5288_v1 = vpop.permute.xlu1 %5287  ;;  %v5667_v53 = vsel %vm1781_vm3, %v5635_v9, %v11131_v28  ;;  %v5700_v28 = vsel %vm1814_vm4, %v5668_v36, %v11259_v60 }
 0x77c   : > { %v5162_v19 = vpop.permute.xlu0 %5161  ;;  %v5699_v51 = vsel %vm1814_vm4, %v5667_v53, %v11261_v33  ;;  %v5732_v40 = vsel %vm1847_vm5, %v5700_v28, %v5034_v45  ;;  %v11479_v28 = vld [vmem:[#allocation2 + $0x1a7] sm:$0xff] }
 0x77d   : > { %4927 = vrot.lane.b32.xlu1 %v11377_v63, %s7208_s10  ;;  %v5731_v0 = vsel %vm1847_vm5, %v5699_v51, %v5032_v22  ;;  %v5764_v24 = vsel %vm1880_vm6, %v5732_v40, %v5162_v19  ;;  %v4560_v51 = vld [vmem:[#allocation2 + $0x190] sm:$0xff] }
 0x77e   : > { %5307 = vrot.lane.b32.xlu0 %v11377_v63, %s7211_s13  ;;  %v5763_v50 = vsel %vm1880_vm6, %v5731_v0, %v5160_v46  ;;  %v11443_v46 = vld [vmem:[#allocation2 + $0x18f] sm:$0xff] }
 0x77f   : > { %v5416_v56 = vpop.permute.xlu1 %5415  ;;  %v5795_v33 = vsel %vm1913_vm7, %v5763_v50, %v5288_v1 }
 0x780   : > { %v5290_v58 = vpop.permute.xlu0 %5289  ;;  %v5827_v2 = vsel %vm1946_vm8, %v5795_v33, %v5416_v56  ;;  %v5638_v56 = vsel %vm279_vm0, %v11000_v52, %v10974_v23 }
 0x781   : > { %5435 = vrot.lane.b32.xlu1 %v4557_v16, %s7212_s14  ;;  %v5796_v42 = vsel %vm1913_vm7, %v5764_v24, %v5290_v58  ;;  %v5670_v58 = vsel %vm1781_vm3, %v5638_v56, %v11137_v55  ;;  %v4561_v24 = vld [vmem:[#allocation2 + $0x1a8] sm:$0xff] }
 0x782   : > { %5309 = vrot.lane.b32.xlu0 %v11383_v12, %s7211_s13  ;;  %v5702_v9 = vsel %vm1814_vm4, %v5670_v58, %v11267_v54 }
 0x783   : > { %v5418_v39 = vpop.permute.xlu1 %5417 }
 0x784   : > { %v5036_v29 = vpop.permute.xlu0 %5035  ;;  %v5828_v60 = vsel %vm1946_vm8, %v5796_v42, %v5418_v39 }
 0x785   : > { %5055 = vrot.lane.b32.xlu1 %v4557_v16, %s7209_s11 }
 0x786   : > { %4929 = vrot.lane.b32.xlu0 %v11383_v12, %s7208_s10 }
 0x787   : > { %v5038_v47 = vpop.permute.xlu1 %5037 }
 0x788   : > { %v5544_v22 = vpop.permute.xlu0 %5543  ;;  %v5734_v39 = vsel %vm1847_vm5, %v5702_v9, %v5038_v47  ;;  %v4563_v9 = vld [vmem:[#allocation2 + $0x1c8] sm:$0xff] }
 0x789   : > { %v5859_v21 = vsel %vm1979_vm9, %v5827_v2, %v5544_v22  ;;  %5563 = vrot.lane.b32.xlu1 %v10940_v30, %s7213_s28 }
 0x78a   : > { %5437 = vrot.lane.b32.xlu0 %v4558_v62, %s7212_s14  ;;  %6924 = vmatprep.mubr.msk.f32.mxu0 %vm2024_vm10, %v5859_v21  ;;  %v11495_v21 = vld [vmem:[#allocation2 + $0x1af] sm:$0xff] }
 0x78b   : > { %v5546_v8 = vpop.permute.xlu1 %5545 }
 0x78c   : > { %v5860_v38 = vsel %vm1979_vm9, %v5828_v60, %v5546_v8  ;;  %v5164_v17 = vpop.permute.xlu0 %5163  ;;  %v5640_v60 = vsel %vm279_vm0, %v11012_v5, %v10986_v34 }
 0x78d   : > { %5183 = vrot.lane.b32.xlu1 %v10940_v30, %s7210_s12  ;;  %6925 = vmatmul.mubr.msk.f32.gmra.mrb[20].mxu0 %vm2024_vm10, %v5860_v38  ;;  %v5637_v30 = vsel %vm279_vm0, %v11004_v4, %v10978_v35  ;;  %v5672_v8 = vsel %vm1781_vm3, %v5640_v60, %v11145_v25 }
 0x78e   : > { %5057 = vrot.lane.b32.xlu0 %v4558_v62, %s7209_s11  ;;  %v5669_v48 = vsel %vm1781_vm3, %v5637_v30, %v11139_v49 }
 0x78f   : > { %v5292_v45 = vpop.permute.xlu1 %5291 }
 0x790   : > { %v5166_v15 = vpop.permute.xlu0 %5165 }
 0x791   : > { %5185 = vrot.lane.b32.xlu1 %v10936_v32, %s7210_s12 }
 0x792   : > { %5565 = vrot.lane.b32.xlu0 %v10936_v32, %s7213_s28  ;;  %v5701_v32 = vsel %vm1814_vm4, %v5669_v48, %v11269_v10 }
 0x793   : > { %v5420_v26 = vpop.permute.xlu1 %5419  ;;  %v5733_v7 = vsel %vm1847_vm5, %v5701_v32, %v5036_v29  ;;  %v5766_v29 = vsel %vm1880_vm6, %v5734_v39, %v5166_v15  ;;  %v4593_v15 = vld [vmem:[#allocation2 + $0x1a9] sm:$0xff] }
 0x794   : > { %v5294_v11 = vpop.permute.xlu0 %5293  ;;  %v5765_v35 = vsel %vm1880_vm6, %v5733_v7, %v5164_v17 }
 0x795   : > { %4931 = vrot.lane.b32.xlu1 %v11427_v61, %s7208_s10  ;;  %v5797_v4 = vsel %vm1913_vm7, %v5765_v35, %v5292_v45  ;;  %v5798_v23 = vsel %vm1913_vm7, %v5766_v29, %v5294_v11  ;;  %v4562_v11 = vld [vmem:[#allocation2 + $0x1b0] sm:$0xff]  ;;  %v11527_v35 = vld [vmem:[#allocation2 + $0x1c7] sm:$0xff] }
 0x796   : > { %5311 = vrot.lane.b32.xlu0 %v11427_v61, %s7211_s13  ;;  %v5829_v49 = vsel %vm1946_vm8, %v5797_v4, %v5420_v26 }
 0x797   : > { %v5040_v20 = vpop.permute.xlu1 %5039 }
 0x798   : > { %v11441_v59 = vpop.permute.xlu0 %4913 }
 0x799   : > { %5439 = vrot.lane.b32.xlu1 %v4559_v3, %s7212_s14  ;;  %v5704_v17 = vsel %vm1814_vm4, %v5672_v8, %v11441_v59  ;;  %v4500_v59 = vld [vmem:[#allocation2 + $0x1b1] sm:$0xff]  ;;  %v4439_v8 = vld [vmem:[#allocation2 + $0x1e7] sm:$0xff] }
 0x79a   : > { %5313 = vrot.lane.b32.xlu0 %v11443_v46, %s7211_s13 }
 0x79b   : > { %v5548_v10 = vpop.permute.xlu1 %5547 }
 0x79c   : > { %v5861_v1 = vsel %vm1979_vm9, %v5829_v49, %v5548_v10  ;;  %v5422_v19 = vpop.permute.xlu0 %5421  ;;  %v5641_v49 = vsel %vm279_vm0, %v11026_v41, %v11002_v43  ;;  %v13007_v10 = vld [vmem:[#allocation108_spill] sm:$0xff] }
 0x79d   : > { %5059 = vrot.lane.b32.xlu1 %v4559_v3, %s7209_s11  ;;  %6927 = vmatprep.mubr.msk.f32.mxu0 %vm2024_vm10, %v5861_v1  ;;  %v5830_v55 = vsel %vm1946_vm8, %v5798_v23, %v5422_v19  ;;  %v5673_v1 = vsel %vm1781_vm3, %v5641_v49, %v13007_v10  ;;  %v13014_v49 = vld [vmem:[#allocation160_spill] sm:$0xff]  ;;  %v13015_v10 = vld [vmem:[#allocation45_spill] sm:$0xff] }
 0x79e   : > { %4933 = vrot.lane.b32.xlu0 %v11443_v46, %s7208_s10 }
 0x79f   : > { %v5168_v16 = vpop.permute.xlu1 %5167 }
 0x7a0   : > { %v5042_v53 = vpop.permute.xlu0 %5041 }
 0x7a1   : > { %5567 = vrot.lane.b32.xlu1 %v10948_v14, %s7213_s28  ;;  %v5736_v26 = vsel %vm1847_vm5, %v5704_v17, %v5042_v53  ;;  %v11542_v53 = vld [vmem:[#allocation2 + $0x1cf] sm:$0xff]  ;;  %v13012_v17 = vld [vmem:[#allocation95_spill] sm:$0xff] }
 0x7a2   : > { %5441 = vrot.lane.b32.xlu0 %v4560_v51, %s7212_s14 }
 0x7a3   : > { %v5170_v52 = vpop.permute.xlu1 %5169 }
 0x7a4   : > { %v5550_v57 = vpop.permute.xlu0 %5549  ;;  %v5768_v30 = vsel %vm1880_vm6, %v5736_v26, %v5170_v52  ;;  %v13008_v52 = vld [vmem:[#allocation78_spill] sm:$0xff] }
 0x7a5   : > { %v5862_v0 = vsel %vm1979_vm9, %v5830_v55, %v5550_v57  ;;  %5187 = vrot.lane.b32.xlu1 %v10948_v14, %s7210_s12  ;;  %v5639_v14 = vsel %vm279_vm0, %v11016_v13, %v10990_v18  ;;  %v13009_v55 = vld [vmem:[#allocation132_spill] sm:$0xff] }
 0x7a6   : > { %5061 = vrot.lane.b32.xlu0 %v4560_v51, %s7209_s11  ;;  %6928 = vmatmul.mubr.msk.f32.gmra.mrb[22].mxu0 %vm2024_vm10, %v5862_v0  ;;  %v5671_v47 = vsel %vm1781_vm3, %v5639_v14, %v11147_v44  ;;  %v5642_v57 = vsel %vm279_vm0, %v13009_v55, %v13008_v52  ;;  %v13010_v0 = vld [vmem:[#allocation47_spill] sm:$0xff]  ;;  %v4595_v14 = vld [vmem:[#allocation2 + $0x1c9] sm:$0xff] }
 0x7a7   : > { %v4916_v54 = vpop.permute.xlu1 %4915 }
 0x7a8   : > { %v5296_v36 = vpop.permute.xlu0 %5295  ;;  %v5705_v19 = vsel %vm1814_vm4, %v5673_v1, %v4916_v54  ;;  %v5674_v54 = vsel %vm1781_vm3, %v5642_v57, %v13010_v0  ;;  %v5644_v1 = vsel %vm279_vm0, %v13015_v10, %v13014_v49 }
 0x7a9   : > { %5189 = vrot.lane.b32.xlu1 %v10944_v6, %s7210_s12 }
 0x7aa   : > { %5569 = vrot.lane.b32.xlu0 %v10944_v6, %s7213_s28  ;;  %v5703_v6 = vsel %vm1814_vm4, %v5671_v47, %v11277_v37 }
 0x7ab   : > { %v5424_v50 = vpop.permute.xlu1 %5423  ;;  %v5735_v2 = vsel %vm1847_vm5, %v5703_v6, %v5040_v20  ;;  %v4564_v6 = vld [vmem:[#allocation2 + $0x1d0] sm:$0xff] }
 0x7ac   : > { %v5298_v33 = vpop.permute.xlu0 %5297  ;;  %v5767_v18 = vsel %vm1880_vm6, %v5735_v2, %v5168_v16 }
 0x7ad   : > { %4935 = vrot.lane.b32.xlu1 %v11479_v28, %s7208_s10  ;;  %v5799_v13 = vsel %vm1913_vm7, %v5767_v18, %v5296_v36  ;;  %v5800_v34 = vsel %vm1913_vm7, %v5768_v30, %v5298_v33 }
 0x7ae   : > { %5315 = vrot.lane.b32.xlu0 %v11479_v28, %s7211_s13  ;;  %v5831_v44 = vsel %vm1946_vm8, %v5799_v13, %v5424_v50 }
 0x7af   : > { %v5044_v40 = vpop.permute.xlu1 %5043 }
 0x7b0   : > { %v11493_v22 = vpop.permute.xlu0 %4917  ;;  %v5737_v58 = vsel %vm1847_vm5, %v5705_v19, %v5044_v40  ;;  %v13016_v19 = vld [vmem:[#allocation94_spill] sm:$0xff] }
 0x7b1   : > { %5443 = vrot.lane.b32.xlu1 %v4561_v24, %s7212_s14  ;;  %v5706_v50 = vsel %vm1814_vm4, %v5674_v54, %v11493_v22 }
 0x7b2   : > { %5317 = vrot.lane.b32.xlu0 %v11495_v21, %s7211_s13 }
 0x7b3   : > { %v5552_v37 = vpop.permute.xlu1 %5551 }
 0x7b4   : > { %v5863_v62 = vsel %vm1979_vm9, %v5831_v44, %v5552_v37  ;;  %v5426_v42 = vpop.permute.xlu0 %5425 }
 0x7b5   : > { %5063 = vrot.lane.b32.xlu1 %v4561_v24, %s7209_s11  ;;  %6930 = vmatprep.mubr.msk.f32.mxu0 %vm2024_vm10, %v5863_v62  ;;  %v5832_v25 = vsel %vm1946_vm8, %v5800_v34, %v5426_v42  ;;  %v4502_v62 = vld [vmem:[#allocation2 + $0x1d1] sm:$0xff] }
 0x7b6   : > { %4937 = vrot.lane.b32.xlu0 %v11495_v21, %s7208_s10 }
 0x7b7   : > { %v5172_v38 = vpop.permute.xlu1 %5171 }
 0x7b8   : > { %v5046_v45 = vpop.permute.xlu0 %5045  ;;  %v5769_v43 = vsel %vm1880_vm6, %v5737_v58, %v5172_v38  ;;  %v13011_v38 = vld [vmem:[#allocation125_spill] sm:$0xff] }
 0x7b9   : > { %5571 = vrot.lane.b32.xlu1 %v4593_v15, %s7213_s28  ;;  %v5738_v47 = vsel %vm1847_vm5, %v5706_v50, %v5046_v45  ;;  %v5643_v45 = vsel %vm279_vm0, %v13012_v17, %v13011_v38 }
 0x7ba   : > { %5445 = vrot.lane.b32.xlu0 %v4562_v11, %s7212_s14 }
 0x7bb   : > { %v5174_v5 = vpop.permute.xlu1 %5173 }
 0x7bc   : > { %v5554_v48 = vpop.permute.xlu0 %5553  ;;  %v5770_v40 = vsel %vm1880_vm6, %v5738_v47, %v5174_v5  ;;  %v13017_v47 = vld [vmem:[#allocation183_spill] sm:$0xff] }
 0x7bd   : > { %v5864_v32 = vsel %vm1979_vm9, %v5832_v25, %v5554_v48  ;;  %5191 = vrot.lane.b32.xlu1 %v4593_v15, %s7210_s12  ;;  %v13013_v15 = vld [vmem:[#allocation127_spill] sm:$0xff]  ;;  %v4565_v25 = vld [vmem:[#allocation2 + $0x1e8] sm:$0xff] }
 0x7be   : > { %5065 = vrot.lane.b32.xlu0 %v4562_v11, %s7209_s11  ;;  %6931 = vmatmul.mubr.msk.f32.gmra.mrb[24].mxu0 %vm2024_vm10, %v5864_v32  ;;  %v5675_v26 = vsel %vm1781_vm3, %v5643_v45, %v13013_v15  ;;  %v4534_v32 = vld [vmem:[#allocation2 + $0x1ef] sm:$0xff]  ;;  %v13020_v15 = vld [vmem:[#allocation158_spill] sm:$0xff] }
 0x7bf   : > { %v4920_v20 = vpop.permute.xlu1 %4919 }
 0x7c0   : > { %v5300_v7 = vpop.permute.xlu0 %5299  ;;  %v5707_v11 = vsel %vm1814_vm4, %v5675_v26, %v4920_v20  ;;  %v13021_v26 = vld [vmem:[#allocation49_spill] sm:$0xff] }
 0x7c1   : > { %5193 = vrot.lane.b32.xlu1 %v4500_v59, %s7210_s12  ;;  %v5801_v41 = vsel %vm1913_vm7, %v5769_v43, %v5300_v7 }
 0x7c2   : > { %5573 = vrot.lane.b32.xlu0 %v4500_v59, %s7213_s28 }
 0x7c3   : > { %v5428_v3 = vpop.permute.xlu1 %5427 }
 0x7c4   : > { %v5302_v4 = vpop.permute.xlu0 %5301  ;;  %v5833_v39 = vsel %vm1946_vm8, %v5801_v41, %v5428_v3  ;;  %v4597_v41 = vld [vmem:[#allocation2 + $0x1e9] sm:$0xff] }
 0x7c5   : > { %4939 = vrot.lane.b32.xlu1 %v11527_v35, %s7208_s10  ;;  %v5802_v2 = vsel %vm1913_vm7, %v5770_v40, %v5302_v4 }
 0x7c6   : > { %5319 = vrot.lane.b32.xlu0 %v11527_v35, %s7211_s13 }
 0x7c7   : > { %v5048_v56 = vpop.permute.xlu1 %5047 }
 0x7c8   : > { %v11540_v16 = vpop.permute.xlu0 %4921  ;;  %v5739_v34 = vsel %vm1847_vm5, %v5707_v11, %v5048_v56  ;;  %v5676_v56 = vsel %vm1781_vm3, %v5644_v1, %v13016_v19  ;;  %v5646_v11 = vsel %vm279_vm0, %v13021_v26, %v13020_v15  ;;  %v4508_v26 = vld [vmem:[#allocation2 + $0x231] sm:$0xff] }
 0x7c9   : > { %5447 = vrot.lane.b32.xlu1 %v4563_v9, %s7212_s14 }
 0x7ca   : > { %5321 = vrot.lane.b32.xlu0 %v11542_v53, %s7211_s13 }
 0x7cb   : > { %v5556_v51 = vpop.permute.xlu1 %5555 }
 0x7cc   : > { %v5865_v29 = vsel %vm1979_vm9, %v5833_v39, %v5556_v51  ;;  %v5430_v23 = vpop.permute.xlu0 %5429  ;;  %v4566_v51 = vld [vmem:[#allocation2 + $0x1f0] sm:$0xff] }
 0x7cd   : > { %5067 = vrot.lane.b32.xlu1 %v4563_v9, %s7209_s11  ;;  %6933 = vmatprep.mubr.msk.f32.mxu0 %vm2024_vm10, %v5865_v29  ;;  %v5834_v18 = vsel %vm1946_vm8, %v5802_v2, %v5430_v23  ;;  %v5708_v9 = vsel %vm1814_vm4, %v5676_v56, %v11540_v16  ;;  %v13019_v2 = vld [vmem:[#allocation130_spill] sm:$0xff] }
 0x7ce   : > { %4941 = vrot.lane.b32.xlu0 %v11542_v53, %s7208_s10 }
 0x7cf   : > { %v5176_v36 = vpop.permute.xlu1 %5175 }
 0x7d0   : > { %v5050_v33 = vpop.permute.xlu0 %5049  ;;  %v5771_v48 = vsel %vm1880_vm6, %v5739_v34, %v5176_v36  ;;  %v4504_v36 = vld [vmem:[#allocation2 + $0x1f1] sm:$0xff] }
 0x7d1   : > { %5575 = vrot.lane.b32.xlu1 %v4595_v14, %s7213_s28  ;;  %v5740_v39 = vsel %vm1847_vm5, %v5708_v9, %v5050_v33 }
 0x7d2   : > { %5449 = vrot.lane.b32.xlu0 %v4564_v6, %s7212_s14 }
 0x7d3   : > { %v5178_v24 = vpop.permute.xlu1 %5177 }
 0x7d4   : > { %v5558_v13 = vpop.permute.xlu0 %5557  ;;  %v5772_v29 = vsel %vm1880_vm6, %v5740_v39, %v5178_v24  ;;  %v13023_v39 = vld [vmem:[#allocation181_spill] sm:$0xff] }
 0x7d5   : > { %v5866_v44 = vsel %vm1979_vm9, %v5834_v18, %v5558_v13  ;;  %5195 = vrot.lane.b32.xlu1 %v4595_v14, %s7210_s12  ;;  %v4441_v14 = vld [vmem:[#allocation2 + $0x207] sm:$0xff] }
 0x7d6   : > { %5069 = vrot.lane.b32.xlu0 %v4564_v6, %s7209_s11  ;;  %6934 = vmatmul.mubr.msk.f32.gmra.mrb[26].mxu0 %vm2024_vm10, %v5866_v44  ;;  %v13018_v6 = vld [vmem:[#allocation165_spill] sm:$0xff] }
 0x7d7   : > { %v4924_v22 = vpop.permute.xlu1 %4923  ;;  %v5645_v40 = vsel %vm279_vm0, %v13018_v6, %v13017_v47  ;;  %v13025_v6 = vld [vmem:[#allocation36_spill] sm:$0xff] }
 0x7d8   : > { %v5304_v37 = vpop.permute.xlu0 %5303  ;;  %v5677_v24 = vsel %vm1781_vm3, %v5645_v40, %v13019_v2  ;;  %v5648_v40 = vsel %vm279_vm0, %v11333_v31, %v13025_v6  ;;  %v13026_v2 = vld [vmem:[#allocation189_spill] sm:$0xff] }
 0x7d9   : > { %5197 = vrot.lane.b32.xlu1 %v4502_v62, %s7210_s12  ;;  %v5803_v7 = vsel %vm1913_vm7, %v5771_v48, %v5304_v37  ;;  %v5709_v18 = vsel %vm1814_vm4, %v5677_v24, %v4924_v22  ;;  %v5680_v24 = vsel %vm1781_vm3, %v5648_v40, %v13026_v2  ;;  %v4510_v6 = vld [vmem:[#allocation2 + $0x251] sm:$0xff] }
 0x7da   : > { %5577 = vrot.lane.b32.xlu0 %v4502_v62, %s7213_s28  ;;  %v4567_v62 = vld [vmem:[#allocation2 + $0x208] sm:$0xff] }
 0x7db   : > { %v5432_v42 = vpop.permute.xlu1 %5431 }
 0x7dc   : > { %v5306_v60 = vpop.permute.xlu0 %5305  ;;  %v5835_v59 = vsel %vm1946_vm8, %v5803_v7, %v5432_v42  ;;  %v4599_v7 = vld [vmem:[#allocation2 + $0x209] sm:$0xff] }
 0x7dd   : > { %4943 = vrot.lane.b32.xlu1 %v4439_v8, %s7208_s10  ;;  %v5804_v23 = vsel %vm1913_vm7, %v5772_v29, %v5306_v60  ;;  %v4536_v60 = vld [vmem:[#allocation2 + $0x20f] sm:$0xff] }
 0x7de   : > { %5323 = vrot.lane.b32.xlu0 %v4439_v8, %s7211_s13  ;;  %v13024_v29 = vld [vmem:[#allocation53_spill] sm:$0xff] }
 0x7df   : > { %v5052_v30 = vpop.permute.xlu1 %5051 }
 0x7e0   : > { %v11583_v5 = vpop.permute.xlu0 %4925  ;;  %v5741_v44 = vsel %vm1847_vm5, %v5709_v18, %v5052_v30  ;;  %v13022_v30 = vld [vmem:[#allocation166_spill] sm:$0xff] }
 0x7e1   : > { %5451 = vrot.lane.b32.xlu1 %v4565_v25, %s7212_s14  ;;  %v5678_v34 = vsel %vm1781_vm3, %v5646_v11, %v13022_v30 }
 0x7e2   : > { %5325 = vrot.lane.b32.xlu0 %v4534_v32, %s7211_s13  ;;  %v5710_v48 = vsel %vm1814_vm4, %v5678_v34, %v11583_v5  ;;  %v4445_v34 = vld [vmem:[#allocation2 + $0x247] sm:$0xff] }
 0x7e3   : > { %v5560_v3 = vpop.permute.xlu1 %5559 }
 0x7e4   : > { %v5867_v20 = vsel %vm1979_vm9, %v5835_v59, %v5560_v3  ;;  %v5434_v4 = vpop.permute.xlu0 %5433  ;;  %v4568_v3 = vld [vmem:[#allocation2 + $0x210] sm:$0xff] }
 0x7e5   : > { %5071 = vrot.lane.b32.xlu1 %v4565_v25, %s7209_s11  ;;  %6936 = vmatprep.mubr.msk.f32.mxu0 %vm2024_vm10, %v5867_v20  ;;  %v5836_v55 = vsel %vm1946_vm8, %v5804_v23, %v5434_v4 }
 0x7e6   : > { %4945 = vrot.lane.b32.xlu0 %v4534_v32, %s7208_s10 }
 0x7e7   : > { %v5180_v58 = vpop.permute.xlu1 %5179 }
 0x7e8   : > { %v5054_v43 = vpop.permute.xlu0 %5053  ;;  %v5773_v42 = vsel %vm1880_vm6, %v5741_v44, %v5180_v58  ;;  %v4506_v58 = vld [vmem:[#allocation2 + $0x211] sm:$0xff] }
 0x7e9   : > { %5579 = vrot.lane.b32.xlu1 %v4597_v41, %s7213_s28  ;;  %v5742_v59 = vsel %vm1847_vm5, %v5710_v48, %v5054_v43 }
 0x7ea   : > { %5453 = vrot.lane.b32.xlu0 %v4566_v51, %s7212_s14 }
 0x7eb   : > { %v5182_v52 = vpop.permute.xlu1 %5181 }
 0x7ec   : > { %v5562_v57 = vpop.permute.xlu0 %5561  ;;  %v5774_v20 = vsel %vm1880_vm6, %v5742_v59, %v5182_v52 }
 0x7ed   : > { %v5868_v0 = vsel %vm1979_vm9, %v5836_v55, %v5562_v57  ;;  %5199 = vrot.lane.b32.xlu1 %v4597_v41, %s7210_s12  ;;  %v4443_v41 = vld [vmem:[#allocation2 + $0x227] sm:$0xff] }
 0x7ee   : > { %5073 = vrot.lane.b32.xlu0 %v4566_v51, %s7209_s11  ;;  %6937 = vmatmul.mubr.msk.f32.gmra.mrb[28].mxu0 %vm2024_vm10, %v5868_v0  ;;  %v5647_v51 = vsel %vm279_vm0, %v11325_v27, %v13023_v39  ;;  %v4538_v27 = vld [vmem:[#allocation2 + $0x22f] sm:$0xff] }
 0x7ef   : > { %v4928_v16 = vpop.permute.xlu1 %4927  ;;  %v5679_v23 = vsel %vm1781_vm3, %v5647_v51, %v13024_v29 }
 0x7f0   : > { %v5308_v54 = vpop.permute.xlu0 %5307  ;;  %v5711_v52 = vsel %vm1814_vm4, %v5679_v23, %v4928_v16 }
 0x7f1   : > { %5201 = vrot.lane.b32.xlu1 %v4504_v36, %s7210_s12  ;;  %v5805_v8 = vsel %vm1913_vm7, %v5773_v42, %v5308_v54  ;;  %v4569_v54 = vld [vmem:[#allocation2 + $0x228] sm:$0xff] }
 0x7f2   : > { %5581 = vrot.lane.b32.xlu0 %v4504_v36, %s7213_s28 }
 0x7f3   : > { %v5436_v50 = vpop.permute.xlu1 %5435 }
 0x7f4   : > { %v5310_v33 = vpop.permute.xlu0 %5309  ;;  %v5837_v38 = vsel %vm1946_vm8, %v5805_v8, %v5436_v50 }
 0x7f5   : > { %4947 = vrot.lane.b32.xlu1 %v4441_v14, %s7208_s10  ;;  %v5806_v4 = vsel %vm1913_vm7, %v5774_v20, %v5310_v33 }
 0x7f6   : > { %5327 = vrot.lane.b32.xlu0 %v4441_v14, %s7211_s13 }
 0x7f7   : > { %v5056_v13 = vpop.permute.xlu1 %5055 }
 0x7f8   : > { %v11622_v37 = vpop.permute.xlu0 %4929  ;;  %v5743_v57 = vsel %vm1847_vm5, %v5711_v52, %v5056_v13  ;;  %v4603_v52 = vld [vmem:[#allocation2 + $0x249] sm:$0xff] }
 0x7f9   : > { %5455 = vrot.lane.b32.xlu1 %v4567_v62, %s7212_s14  ;;  %v5712_v13 = vsel %vm1814_vm4, %v5680_v24, %v11622_v37 }
 0x7fa   : > { %5329 = vrot.lane.b32.xlu0 %v4536_v60, %s7211_s13 }
 0x7fb   : > { %v5564_v17 = vpop.permute.xlu1 %5563 }
 0x7fc   : > { %v5869_v22 = vsel %vm1979_vm9, %v5837_v38, %v5564_v17  ;;  %v5438_v45 = vpop.permute.xlu0 %5437 }
 0x7fd   : > { %5075 = vrot.lane.b32.xlu1 %v4567_v62, %s7209_s11  ;;  %6939 = vmatprep.mubr.msk.f32.mxu0 %vm2024_vm10, %v5869_v22  ;;  %v5838_v10 = vsel %vm1946_vm8, %v5806_v4, %v5438_v45  ;;  %v4601_v62 = vld [vmem:[#allocation2 + $0x229] sm:$0xff] }
 0x7fe   : > { %4949 = vrot.lane.b32.xlu0 %v4536_v60, %s7208_s10  ;;  %v4570_v60 = vld [vmem:[#allocation2 + $0x230] sm:$0xff] }
 0x7ff   : > { %v5184_v25 = vpop.permute.xlu1 %5183 }
 0x800   : > { %v5058_v32 = vpop.permute.xlu0 %5057  ;;  %v5775_v36 = vsel %vm1880_vm6, %v5743_v57, %v5184_v25  ;;  %v13027_v25 = vld [vmem:[#allocation85_spill] sm:$0xff] }
 0x801   : > { %5583 = vrot.lane.b32.xlu1 %v4599_v7, %s7213_s28  ;;  %v5744_v42 = vsel %vm1847_vm5, %v5712_v13, %v5058_v32  ;;  %v5649_v48 = vsel %vm279_vm0, %v11377_v63, %v13027_v25  ;;  %v13028_v32 = vld [vmem:[#allocation93_spill] sm:$0xff] }
 0x802   : > { %5457 = vrot.lane.b32.xlu0 %v4568_v3, %s7212_s14  ;;  %v4540_v63 = vld [vmem:[#allocation2 + $0x24f] sm:$0xff] }
 0x803   : > { %v5186_v49 = vpop.permute.xlu1 %5185  ;;  %v4572_v57 = vld [vmem:[#allocation2 + $0x250] sm:$0xff] }
 0x804   : > { %v5566_v1 = vpop.permute.xlu0 %5565  ;;  %v5776_v8 = vsel %vm1880_vm6, %v5744_v42, %v5186_v49  ;;  %v4571_v49 = vld [vmem:[#allocation2 + $0x248] sm:$0xff]  ;;  %v4606_v25 = vld [vmem:[#allocation2 + $0x271] sm:$0xff] }
 0x805   : > { %v5870_v19 = vsel %vm1979_vm9, %v5838_v10, %v5566_v1  ;;  %5203 = vrot.lane.b32.xlu1 %v4599_v7, %s7210_s12  ;;  %v5681_v7 = vsel %vm1781_vm3, %v5649_v48, %v13028_v32 }
 0x806   : > { %5077 = vrot.lane.b32.xlu0 %v4568_v3, %s7209_s11  ;;  %6940 = vmatmul.mubr.msk.f32.gmra.mrb[30].mxu0 %vm2024_vm10, %v5870_v19 }
 0x807   : > { %v4932_v5 = vpop.permute.xlu1 %4931 }
 0x808   : > { %v5312_v56 = vpop.permute.xlu0 %5311  ;;  %v5713_v59 = vsel %vm1814_vm4, %v5681_v7, %v4932_v5  ;;  %v4605_v7 = vld [vmem:[#allocation2 + $0x269] sm:$0xff] }
 0x809   : > { %5205 = vrot.lane.b32.xlu1 %v4506_v58, %s7210_s12  ;;  %v5807_v50 = vsel %vm1913_vm7, %v5775_v36, %v5312_v56 }
 0x80a   : > { %5585 = vrot.lane.b32.xlu0 %v4506_v58, %s7213_s28 }
 0x80b   : > { %v5440_v9 = vpop.permute.xlu1 %5439 }
 0x80c   : > { %v5314_v43 = vpop.permute.xlu0 %5313  ;;  %v5839_v33 = vsel %vm1946_vm8, %v5807_v50, %v5440_v9  ;;  %v13029_v9 = vld [vmem:[#allocation204_spill] sm:$0xff] }
 0x80d   : > { %4951 = vrot.lane.b32.xlu1 %v4443_v41, %s7208_s10  ;;  %v5808_v31 = vsel %vm1913_vm7, %v5776_v8, %v5314_v43  ;;  %v5650_v43 = vsel %vm279_vm0, %v11383_v12, %v13029_v9  ;;  %v13031_v8 = vld [vmem:[#allocation161_spill] sm:$0xff] }
 0x80e   : > { %5331 = vrot.lane.b32.xlu0 %v4443_v41, %s7211_s13  ;;  %v13030_v41 = vld [vmem:[#allocation97_spill] sm:$0xff] }
 0x80f   : > { %v5060_v55 = vpop.permute.xlu1 %5059  ;;  %v5682_v39 = vsel %vm1781_vm3, %v5650_v43, %v13030_v41 }
 0x810   : > { %v11661_v0 = vpop.permute.xlu0 %4933  ;;  %v5745_v20 = vsel %vm1847_vm5, %v5713_v59, %v5060_v55 }
 0x811   : > { %5459 = vrot.lane.b32.xlu1 %v4569_v54, %s7212_s14  ;;  %v5714_v29 = vsel %vm1814_vm4, %v5682_v39, %v11661_v0 }
 0x812   : > { %5333 = vrot.lane.b32.xlu0 %v4538_v27, %s7211_s13 }
 0x813   : > { %v5568_v14 = vpop.permute.xlu1 %5567 }
 0x814   : > { %v5871_v16 = vsel %vm1979_vm9, %v5839_v33, %v5568_v14  ;;  %v5442_v47 = vpop.permute.xlu0 %5441  ;;  %v11735_v33 = vld [vmem:[%s12086_s6] ss:$0 sm:$0xff] }
 0x815   : > { %5079 = vrot.lane.b32.xlu1 %v4569_v54, %s7209_s11  ;;  %6942 = vmatprep.mubr.msk.f32.mxu0 %vm2024_vm10, %v5871_v16  ;;  %v5840_v17 = vsel %vm1946_vm8, %v5808_v31, %v5442_v47  ;;  %v5651_v31 = vsel %vm279_vm0, %v11427_v61, %v13031_v8 }
 0x816   : > { %4953 = vrot.lane.b32.xlu0 %v4538_v27, %s7208_s10 }
 0x817   : > { %v5188_v18 = vpop.permute.xlu1 %5187 }
 0x818   : > { %v5062_v44 = vpop.permute.xlu0 %5061  ;;  %v5777_v10 = vsel %vm1880_vm6, %v5745_v20, %v5188_v18  ;;  %v4542_v18 = vld [vmem:[#allocation2 + $0x26f] sm:$0xff] }
 0x819   : > { %5587 = vrot.lane.b32.xlu1 %v4601_v62, %s7213_s28  ;;  %v5746_v55 = vsel %vm1847_vm5, %v5714_v29, %v5062_v44 }
 0x81a   : > { %5461 = vrot.lane.b32.xlu0 %v4570_v60, %s7212_s14 }
 0x81b   : > { %v5190_v38 = vpop.permute.xlu1 %5189 }
 0x81c   : > { %v5570_v22 = vpop.permute.xlu0 %5569  ;;  %v5778_v54 = vsel %vm1880_vm6, %v5746_v55, %v5190_v38  ;;  %v13032_v38 = vld [vmem:[#allocation41_spill] sm:$0xff] }
 0x81d   : > { %v5872_v45 = vsel %vm1979_vm9, %v5840_v17, %v5570_v22  ;;  %5207 = vrot.lane.b32.xlu1 %v4601_v62, %s7210_s12  ;;  %v4541_v62 = vld [vmem:[#allocation2 + $0x267] sm:$0xff]  ;;  %v5683_v17 = vsel %vm1781_vm3, %v5651_v31, %v13032_v38  ;;  %v4574_v22 = vld [vmem:[#allocation2 + $0x270] sm:$0xff] }
 0x81e   : > { %5081 = vrot.lane.b32.xlu0 %v4570_v60, %s7209_s11  ;;  %6943 = vmatmul.mubr.msk.f32.gmra.mrb[32].mxu0 %vm2024_vm10, %v5872_v45 }
 0x81f   : > { %v11689_v37 = vpop.permute.xlu1 %4935 }
 0x820   : > { %v5316_v15 = vpop.permute.xlu0 %5315  ;;  %v5715_v45 = vsel %vm1814_vm4, %v5683_v17, %v11689_v37 }
 0x821   : > { %5209 = vrot.lane.b32.xlu1 %v4508_v26, %s7210_s12  ;;  %v5809_v1 = vsel %vm1913_vm7, %v5777_v10, %v5316_v15  ;;  %v13034_v10 = vld [vmem:[#allocation100_spill] sm:$0xff] }
 0x822   : > { %5589 = vrot.lane.b32.xlu0 %v4508_v26, %s7213_s28  ;;  %v4573_v26 = vld [vmem:[#allocation2 + $0x268] sm:$0xff] }
 0x823   : > { %v5444_v11 = vpop.permute.xlu1 %5443 }
 0x824   : > { %v5318_v30 = vpop.permute.xlu0 %5317  ;;  %v5841_v19 = vsel %vm1946_vm8, %v5809_v1, %v5444_v11 }
 0x825   : > { %4955 = vrot.lane.b32.xlu1 %v4445_v34, %s7208_s10  ;;  %v5810_v12 = vsel %vm1913_vm7, %v5778_v54, %v5318_v30 }
 0x826   : > { %5335 = vrot.lane.b32.xlu0 %v4445_v34, %s7211_s13 }
 0x827   : > { %v5064_v3 = vpop.permute.xlu1 %5063 }
 0x828   : > { %v11702_v4 = vpop.permute.xlu0 %4937  ;;  %v5747_v11 = vsel %vm1847_vm5, %v5715_v45, %v5064_v3  ;;  %v13033_v3 = vld [vmem:[#allocation35_spill] sm:$0xff] }
 0x829   : > { %5463 = vrot.lane.b32.xlu1 %v4571_v49, %s7212_s14  ;;  %v5652_v20 = vsel %vm279_vm0, %v11443_v46, %v13033_v3 }
 0x82a   : > { %5337 = vrot.lane.b32.xlu0 %v4540_v63, %s7211_s13 }
 0x82b   : > { %v5572_v56 = vpop.permute.xlu1 %5571 }
 0x82c   : > { %v5873_v5 = vsel %vm1979_vm9, %v5841_v19, %v5572_v56  ;;  %v5446_v58 = vpop.permute.xlu0 %5445 }
 0x82d   : > { %5083 = vrot.lane.b32.xlu1 %v4571_v49, %s7209_s11  ;;  %6945 = vmatprep.mubr.msk.f32.mxu0 %vm2024_vm10, %v5873_v5  ;;  %v5842_v27 = vsel %vm1946_vm8, %v5810_v12, %v5446_v58 }
 0x82e   : > { %4957 = vrot.lane.b32.xlu0 %v4540_v63, %s7208_s10  ;;  %v5684_v63 = vsel %vm1781_vm3, %v5652_v20, %v13034_v10 }
 0x82f   : > { %v5192_v51 = vpop.permute.xlu1 %5191  ;;  %v5716_v56 = vsel %vm1814_vm4, %v5684_v63, %v11702_v4 }
 0x830   : > { %v11720_v23 = vpop.permute.xlu0 %5065  ;;  %v5779_v61 = vsel %vm1880_vm6, %v5747_v11, %v5192_v51 }
 0x831   : > { %5591 = vrot.lane.b32.xlu1 %v4603_v52, %s7213_s28  ;;  %v5748_v9 = vsel %vm1847_vm5, %v5716_v56, %v11720_v23 }
 0x832   : > { %5465 = vrot.lane.b32.xlu0 %v4572_v57, %s7212_s14 }
 0x833   : > { %v5194_v36 = vpop.permute.xlu1 %5193 }
 0x834   : > { %v5574_v50 = vpop.permute.xlu0 %5573  ;;  %v5780_v41 = vsel %vm1880_vm6, %v5748_v9, %v5194_v36 }
 0x835   : > { %v5874_v0 = vsel %vm1979_vm9, %v5842_v27, %v5574_v50  ;;  %5211 = vrot.lane.b32.xlu1 %v4603_v52, %s7210_s12 }
 0x836   : > { %5085 = vrot.lane.b32.xlu0 %v4572_v57, %s7209_s11  ;;  %6946 = vmatmul.mubr.msk.f32.gmra.mrb[34].mxu0 %vm2024_vm10, %v5874_v0 }
 0x837   : > { %v11737_v14 = vpop.permute.xlu1 %4939 }
 0x838   : > { %v6920_v16 = vpop.f32.mrb[16].mxu0  ;;  %v5320_v47 = vpop.permute.xlu0 %5319 }
 0x839   : > { %v6070_v40 = vadd.f32 %v6920_v16, %v11735_v33  ;;  %5213 = vrot.lane.b32.xlu1 %v4510_v6, %s7210_s12  ;;  %v6064_v2 = vpop.f32.mrb[17].mxu0  ;;  %v5811_v34 = vsel %vm1913_vm7, %v5779_v61, %v5320_v47 }
 0x83a   : > { %v6065_v24 = vadd.f32 %v11735_v33, %v6064_v2  ;;  %5593 = vrot.lane.b32.xlu0 %v4510_v6, %s7213_s28  ;;  %v13035_v6 = vld [vmem:[#allocation37_spill] sm:$0xff]  ;;  %v13036_v2 = vld [vmem:[#allocation6_spill] sm:$0xff] }
 0x83b   : > { %v6646_v13 = vmul.f32 -1.442695, %v6070_v40  ;;  %v5448_v44 = vpop.permute.xlu1 %5447  ;;  %v5653_v40 = vsel %vm279_vm0, %v11479_v28, %v13035_v6 }
 0x83c   : > { %v6645_v42 = vmul.f32 -1.442695, %v6065_v24  ;;  %v5322_v60 = vpop.permute.xlu0 %5321  ;;  %v5843_v48 = vsel %vm1946_vm8, %v5811_v34, %v5448_v44  ;;  %v13037_v24 = vmax.f32 %v13036_v2, 0.0 }
 0x83d   : > { %7013 = vpow2.f32 %v6646_v13  ;;  %5341 = vrot.lane.b32.xlu1 %v4542_v18, %s7211_s13  ;;  %v5812_v46 = vsel %vm1913_vm7, %v5780_v41, %v5322_v60  ;;  %v13038_v13 = vld [vmem:[#allocation186_spill] sm:$0xff] }
 0x83e   : > { %7015 = vpow2.f32 %v6645_v42  ;;  %5339 = vrot.lane.b32.xlu0 %v4541_v62, %s7211_s13  ;;  %s11787_s13 = scalar_lea.vmem %s12087_s7, %s6679_s27  ;;  %v5685_v44 = vsel %vm1781_vm3, %v5653_v40, %v13038_v13  ;;  %v13039_v62 = vld [vmem:[#allocation4_spill] sm:$0xff] }
 0x83f   : > { %v5068_v15 = vpop.permute.xlu1 %5067  ;;  %v13040_v42 = vmax.f32 %v13039_v62, 0.0  ;;  %v5717_v8 = vsel %vm1814_vm4, %v5685_v44, %v11737_v14 }
 0x840   : > { %v11753_v30 = vpop.permute.xlu0 %4941  ;;  %v5749_v38 = vsel %vm1847_vm5, %v5717_v8, %v5068_v15 }
 0x841   : > { %5469 = vrot.lane.b32.xlu1 %v4574_v22, %s7212_s14 }
 0x842   : > { %5467 = vrot.lane.b32.xlu0 %v4573_v26, %s7212_s14 }
 0x843   : > { %v5576_v32 = vpop.permute.xlu1 %5575 }
 0x844   : > { %v5875_v37 = vsel %vm1979_vm9, %v5843_v48, %v5576_v32  ;;  %v5450_v59 = vpop.permute.xlu0 %5449  ;;  %v13041_v32 = vld [vmem:[#allocation184_spill] sm:$0xff] }
 0x845   : > { %5597 = vrot.lane.b32.xlu1 %v4606_v25, %s7213_s28  ;;  %6948 = vmatprep.mubr.msk.f32.mxu0 %vm2024_vm10, %v5875_v37  ;;  %v5844_v51 = vsel %vm1946_vm8, %v5812_v46, %v5450_v59  ;;  %v5654_v15 = vsel %vm279_vm0, %v11495_v21, %v13041_v32 }
 0x846   : > { %5595 = vrot.lane.b32.xlu0 %v4605_v7, %s7213_s28  ;;  %v13042_v7 = vld [vmem:[#allocation42_spill] sm:$0xff] }
 0x847   : > { %v7014_v49 = vpop.eup %7013  ;;  %v5196_v1 = vpop.permute.xlu1 %5195  ;;  %v5686_v37 = vsel %vm1781_vm3, %v5654_v15, %v13042_v7 }
 0x848   : > { %v7016_v19 = vpop.eup %7015  ;;  %v6320_v5 = vadd.f32 1.0, %v7014_v49  ;;  %v5070_v58 = vpop.permute.xlu0 %5069  ;;  %v5781_v17 = vsel %vm1880_vm6, %v5749_v38, %v5196_v1  ;;  %v5718_v3 = vsel %vm1814_vm4, %v5686_v37, %v11753_v30 }
 0x849   : > { %v6319_v43 = vadd.f32 1.0, %v7016_v19  ;;  %v5750_v10 = vsel %vm1847_vm5, %v5718_v3, %v5070_v58 }
 0x84a   : > { %7017 = vrcp.f32 %v6320_v5 }
 0x84b   : > { %7019 = vrcp.f32 %v6319_v43  ;;  %v5198_v39 = vpop.permute.xlu1 %5197 }
 0x84c   : > { %v6923_v29 = vpop.f32.mrb[18].mxu0  ;;  %v5578_v52 = vpop.permute.xlu0 %5577  ;;  %v5782_v19 = vsel %vm1880_vm6, %v5750_v10, %v5198_v39 }
 0x84d   : > { %v6080_v4 = vadd.f32 %v6923_v29, %v11735_v33  ;;  %v5876_v55 = vsel %vm1979_vm9, %v5844_v51, %v5578_v52  ;;  %v6074_v57 = vpop.f32.mrb[19].mxu0  ;;  %v13043_v52 = vld [vmem:[#allocation8_spill] sm:$0xff] }
 0x84e   : > { %v6075_v23 = vadd.f32 %v11735_v33, %v6074_v57  ;;  %6949 = vmatmul.mubr.msk.f32.gmra.mrb[36].mxu0 %vm2024_vm10, %v5876_v55  ;;  %v13045_v57 = vld [vmem:[#allocation3_spill] sm:$0xff] }
 0x84f   : > { %v6648_v54 = vmul.f32 -1.442695, %v6080_v4  ;;  %v11780_v12 = vpop.permute.xlu1 %4943  ;;  %v13044_v4 = vmax.f32 %v13043_v52, 0.0 }
 0x850   : > { %v6647_v36 = vmul.f32 -1.442695, %v6075_v23  ;;  %v5324_v27 = vpop.permute.xlu0 %5323  ;;  %v13046_v23 = vmax.f32 %v13045_v57, 0.0 }
 0x851   : > { %7021 = vpow2.f32 %v6648_v54  ;;  %v5813_v22 = vsel %vm1913_vm7, %v5781_v17, %v5324_v27  ;;  %v13049_v17 = vld [vmem:[#allocation103_spill] sm:$0xff] }
 0x852   : > { %7023 = vpow2.f32 %v6647_v36 }
 0x853   : > { %v5452_v50 = vpop.permute.xlu1 %5451 }
 0x854   : > { %v7018_v0 = vpop.eup %7017  ;;  %v5326_v16 = vpop.permute.xlu0 %5325  ;;  %v5845_v26 = vsel %vm1946_vm8, %v5813_v22, %v5452_v50  ;;  %v13047_v50 = vld [vmem:[#allocation60_spill] sm:$0xff]  ;;  %v13050_v22 = vld [vmem:[#allocation43_spill] sm:$0xff] }
 0x855   : > { %v7020_v47 = vpop.eup %7019  ;;  %v6416_v18 = vmul.f32 %v7018_v0, %v13037_v24  ;;  %v5814_v56 = vsel %vm1913_vm7, %v5782_v19, %v5326_v16  ;;  %v5655_v0 = vsel %vm279_vm0, %v11527_v35, %v13047_v50  ;;  %v13048_v16 = vld [vmem:[#allocation40_spill] sm:$0xff] }
 0x856   : > { %v6415_v60 = vmul.f32 %v7020_v47, %v13040_v42  ;;  %v5687_v47 = vsel %vm1781_vm3, %v5655_v0, %v13048_v16 }
 0x857   : > { %6448 = vst.msk [vmem:[%s11787_s13 + $0x8] sm:$0xff] %vm279_vm0, %v6416_v18  ;;  %v5072_v31 = vpop.permute.xlu1 %5071  ;;  %v5719_v40 = vsel %vm1814_vm4, %v5687_v47, %v11780_v12 }
 0x858   : > { %6447 = vst.msk [vmem:[%s11787_s13] sm:$0xff] %vm279_vm0, %v6415_v60  ;;  %v11805_v28 = vpop.permute.xlu0 %4945  ;;  %v5751_v18 = vsel %vm1847_vm5, %v5719_v40, %v5072_v31  ;;  %v5656_v31 = vsel %vm279_vm0, %v11542_v53, %v13049_v17 }
 0x85b   : > { %v7022_v45 = vpop.eup %7021  ;;  %v5580_v11 = vpop.permute.xlu1 %5579 }
 0x85c   : > { %v7024_v61 = vpop.eup %7023  ;;  %v6322_v34 = vadd.f32 1.0, %v7022_v45  ;;  %v5877_v14 = vsel %vm1979_vm9, %v5845_v26, %v5580_v11  ;;  %v5454_v25 = vpop.permute.xlu0 %5453  ;;  %v5688_v45 = vsel %vm1781_vm3, %v5656_v31, %v13050_v22 }
 0x85d   : > { %v6321_v48 = vadd.f32 1.0, %v7024_v61  ;;  %6951 = vmatprep.mubr.msk.f32.mxu0 %vm2024_vm10, %v5877_v14  ;;  %v5846_v43 = vsel %vm1946_vm8, %v5814_v56, %v5454_v25  ;;  %v5720_v11 = vsel %vm1814_vm4, %v5688_v45, %v11805_v28 }
 0x85e   : > { %7025 = vrcp.f32 %v6322_v34 }
 0x85f   : > { %7027 = vrcp.f32 %v6321_v48  ;;  %v5200_v59 = vpop.permute.xlu1 %5199 }
 0x860   : > { %v6926_v20 = vpop.f32.mrb[20].mxu0  ;;  %v5074_v49 = vpop.permute.xlu0 %5073  ;;  %v5783_v62 = vsel %vm1880_vm6, %v5751_v18, %v5200_v59 }
 0x861   : > { %v6090_v63 = vadd.f32 %v6926_v20, %v11735_v33  ;;  %v6084_v1 = vpop.f32.mrb[21].mxu0  ;;  %v5752_v34 = vsel %vm1847_vm5, %v5720_v11, %v5074_v49  ;;  %v13051_v49 = vld [vmem:[#allocation10_spill] sm:$0xff] }
 0x862   : > { %v6085_v21 = vadd.f32 %v11735_v33, %v6084_v1  ;;  %v13052_v10 = vmax.f32 %v13051_v49, 0.0  ;;  %v4347_v49 = vld [vmem:[#allocation2 + $0x207] sm:$0xff] }
 0x863   : > { %v6650_v5 = vmul.f32 -1.442695, %v6090_v63  ;;  %v5202_v9 = vpop.permute.xlu1 %5201 }
 0x864   : > { %v6649_v30 = vmul.f32 -1.442695, %v6085_v21  ;;  %v5582_v41 = vpop.permute.xlu0 %5581  ;;  %v5784_v25 = vsel %vm1880_vm6, %v5752_v34, %v5202_v9  ;;  %v13053_v21 = vld [vmem:[#allocation5_spill] sm:$0xff] }
 0x865   : > { %7029 = vpow2.f32 %v6650_v5  ;;  %v5878_v58 = vsel %vm1979_vm9, %v5846_v43, %v5582_v41  ;;  %v13054_v56 = vmax.f32 %v13053_v21, 0.0  ;;  %v4345_v41 = vld [vmem:[#allocation2 + $0x1e7] sm:$0xff] }
 0x866   : > { %7031 = vpow2.f32 %v6649_v30  ;;  %6952 = vmatmul.mubr.msk.f32.gmra.mrb[38].mxu0 %vm2024_vm10, %v5878_v58 }
 0x867   : > { %v11827_v46 = vpop.permute.xlu1 %4947 }
 0x868   : > { %v7026_v39 = vpop.eup %7025  ;;  %v5328_v51 = vpop.permute.xlu0 %5327 }
 0x869   : > { %v7028_v29 = vpop.eup %7027  ;;  %v6418_v55 = vmul.f32 %v7026_v39, %v13044_v4  ;;  %v5815_v35 = vsel %vm1913_vm7, %v5783_v62, %v5328_v51  ;;  %v13055_v39 = vld [vmem:[#allocation90_spill] sm:$0xff] }
 0x86a   : > { %v6417_v54 = vmul.f32 %v7028_v29, %v13046_v23  ;;  %v5657_v51 = vsel %vm279_vm0, %v4345_v41, %v13055_v39  ;;  %v13056_v29 = vld [vmem:[#allocation98_spill] sm:$0xff] }
 0x86b   : > { %6450 = vst.msk [vmem:[%s11787_s13 + $0x18] sm:$0xff] %vm279_vm0, %v6418_v55  ;;  %v5456_v36 = vpop.permute.xlu1 %5455  ;;  %v5689_v52 = vsel %vm1781_vm3, %v5657_v51, %v13056_v29 }
 0x86c   : > { %6449 = vst.msk [vmem:[%s11787_s13 + $0x10] sm:$0xff] %vm279_vm0, %v6417_v54  ;;  %v5330_v27 = vpop.permute.xlu0 %5329  ;;  %v5847_v60 = vsel %vm1946_vm8, %v5815_v35, %v5456_v36  ;;  %v5721_v4 = vsel %vm1814_vm4, %v5689_v52, %v11827_v46 }
 0x86d   : > { %v5816_v15 = vsel %vm1913_vm7, %v5784_v25, %v5330_v27 }
 0x86f   : > { %v7030_v6 = vpop.eup %7029  ;;  %v5076_v2 = vpop.permute.xlu1 %5075 }
 0x870   : > { %v7032_v24 = vpop.eup %7031  ;;  %v6324_v13 = vadd.f32 1.0, %v7030_v6  ;;  %v11845_v44 = vpop.permute.xlu0 %4949  ;;  %v5753_v23 = vsel %vm1847_vm5, %v5721_v4, %v5076_v2  ;;  %v13057_v2 = vld [vmem:[#allocation64_spill] sm:$0xff] }
 0x871   : > { %v6323_v42 = vadd.f32 1.0, %v7032_v24  ;;  %v4346_v24 = vld [vmem:[#allocation2 + $0x1ef] sm:$0xff] }
 0x872   : > { %7033 = vrcp.f32 %v6324_v13  ;;  %v5658_v18 = vsel %vm279_vm0, %v4346_v24, %v13057_v2  ;;  %v13058_v13 = vld [vmem:[#allocation111_spill] sm:$0xff] }
 0x873   : > { %7035 = vrcp.f32 %v6323_v42  ;;  %v5584_v8 = vpop.permute.xlu1 %5583  ;;  %v5690_v62 = vsel %vm1781_vm3, %v5658_v18, %v13058_v13 }
 0x874   : > { %v5879_v38 = vsel %vm1979_vm9, %v5847_v60, %v5584_v8  ;;  %v5458_v12 = vpop.permute.xlu0 %5457  ;;  %v5722_v35 = vsel %vm1814_vm4, %v5690_v62, %v11845_v44 }
 0x875   : > { %6954 = vmatprep.mubr.msk.f32.mxu0 %vm2024_vm10, %v5879_v38  ;;  %v5848_v59 = vsel %vm1946_vm8, %v5816_v15, %v5458_v12 }
 0x877   : > { %v5204_v26 = vpop.permute.xlu1 %5203 }
 0x878   : > { %v5078_v61 = vpop.permute.xlu0 %5077  ;;  %v5785_v27 = vsel %vm1880_vm6, %v5753_v23, %v5204_v26 }
 0x879   : > { %v6929_v14 = vpop.f32.mrb[22].mxu0  ;;  %v5754_v8 = vsel %vm1847_vm5, %v5722_v35, %v5078_v61 }
 0x87a   : > { %v6100_v48 = vadd.f32 %v6929_v14, %v11735_v33  ;;  %v6094_v32 = vpop.f32.mrb[23].mxu0 }
 0x87b   : > { %v6095_v53 = vadd.f32 %v11735_v33, %v6094_v32  ;;  %v5206_v7 = vpop.permute.xlu1 %5205  ;;  %v13059_v32 = vld [vmem:[#allocation12_spill] sm:$0xff] }
 0x87c   : > { %v7034_v37 = vpop.eup %7033  ;;  %v6652_v28 = vmul.f32 -1.442695, %v6100_v48  ;;  %v5586_v3 = vpop.permute.xlu0 %5585  ;;  %v5786_v12 = vsel %vm1880_vm6, %v5754_v8, %v5206_v7  ;;  %v13060_v15 = vmax.f32 %v13059_v32, 0.0  ;;  %v13061_v7 = vld [vmem:[#allocation7_spill] sm:$0xff] }
 0x87d   : > { %v7036_v20 = vpop.eup %7035  ;;  %v6420_v63 = vmul.f32 %v7034_v37, %v13052_v10  ;;  %v6651_v1 = vmul.f32 -1.442695, %v6095_v53  ;;  %v5880_v19 = vsel %vm1979_vm9, %v5848_v59, %v5586_v3  ;;  %v13062_v37 = vmax.f32 %v13061_v7, 0.0  ;;  %v13073_v7 = vld [vmem:[#allocation46_spill] sm:$0xff] }
 0x87e   : > { %v6419_v5 = vmul.f32 %v7036_v20, %v13054_v56  ;;  %7037 = vpow2.f32 %v6652_v28  ;;  %6955 = vmatmul.mubr.msk.f32.gmra.mrb[40].mxu0 %vm2024_vm10, %v5880_v19  ;;  %v13064_v19 = vld [vmem:[#allocation168_spill] sm:$0xff] }
 0x87f   : > { %6452 = vst.msk [vmem:[%s11787_s13 + $0x28] sm:$0xff] %vm279_vm0, %v6420_v63  ;;  %7039 = vpow2.f32 %v6651_v1  ;;  %v4952_v9 = vpop.permute.xlu1 %4951  ;;  %v13063_v63 = vld [vmem:[#allocation164_spill] sm:$0xff] }
 0x880   : > { %6451 = vst.msk [vmem:[%s11787_s13 + $0x20] sm:$0xff] %vm279_vm0, %v6419_v5  ;;  %v5332_v43 = vpop.permute.xlu0 %5331  ;;  %v5659_v1 = vsel %vm279_vm0, %v4347_v49, %v13063_v63 }
 0x881   : > { %v5817_v16 = vsel %vm1913_vm7, %v5785_v27, %v5332_v43  ;;  %v5691_v21 = vsel %vm1781_vm3, %v5659_v1, %v13064_v19 }
 0x882   : > { %v5723_v56 = vsel %vm1814_vm4, %v5691_v21, %v4952_v9 }
 0x883   : > { %v5460_v30 = vpop.permute.xlu1 %5459 }
 0x884   : > { %v5334_v58 = vpop.permute.xlu0 %5333  ;;  %v5849_v47 = vsel %vm1946_vm8, %v5817_v16, %v5460_v30 }
 0x885   : > { %v5818_v22 = vsel %vm1913_vm7, %v5786_v12, %v5334_v58 }
 0x887   : > { %v5080_v55 = vpop.permute.xlu1 %5079 }
 0x888   : > { %v7038_v57 = vpop.eup %7037  ;;  %v11882_v54 = vpop.permute.xlu0 %4953  ;;  %v5755_v30 = vsel %vm1847_vm5, %v5723_v56, %v5080_v55  ;;  %v13065_v55 = vld [vmem:[#allocation107_spill] sm:$0xff] }
 0x889   : > { %v7040_v36 = vpop.eup %7039  ;;  %v6326_v50 = vadd.f32 1.0, %v7038_v57 }
 0x88a   : > { %v6325_v0 = vadd.f32 1.0, %v7040_v36  ;;  %v4348_v36 = vld [vmem:[#allocation2 + $0x20f] sm:$0xff] }
 0x88b   : > { %7041 = vrcp.f32 %v6326_v50  ;;  %v5588_v6 = vpop.permute.xlu1 %5587  ;;  %v5660_v27 = vsel %vm279_vm0, %v4348_v36, %v13065_v55  ;;  %v13066_v50 = vld [vmem:[#allocation44_spill] sm:$0xff] }
 0x88c   : > { %7043 = vrcp.f32 %v6325_v0  ;;  %v5881_v46 = vsel %vm1979_vm9, %v5849_v47, %v5588_v6  ;;  %v5462_v40 = vpop.permute.xlu0 %5461  ;;  %v5692_v0 = vsel %vm1781_vm3, %v5660_v27, %v13066_v50 }
 0x88d   : > { %6957 = vmatprep.mubr.msk.f32.mxu0 %vm2024_vm10, %v5881_v46  ;;  %v5850_v11 = vsel %vm1946_vm8, %v5818_v22, %v5462_v40  ;;  %v5724_v47 = vsel %vm1814_vm4, %v5692_v0, %v11882_v54 }
 0x88f   : > { %v5208_v42 = vpop.permute.xlu1 %5207 }
 0x890   : > { %v5082_v60 = vpop.permute.xlu0 %5081  ;;  %v5787_v39 = vsel %vm1880_vm6, %v5755_v30, %v5208_v42 }
 0x891   : > { %v6932_v38 = vpop.f32.mrb[24].mxu0  ;;  %v5756_v46 = vsel %vm1847_vm5, %v5724_v47, %v5082_v60  ;;  %v13075_v47 = vld [vmem:[#allocation16_spill] sm:$0xff] }
 0x892   : > { %v6110_v17 = vadd.f32 %v6932_v38, %v11735_v33  ;;  %v6104_v31 = vpop.f32.mrb[25].mxu0 }
 0x893   : > { %v6105_v45 = vadd.f32 %v11735_v33, %v6104_v31  ;;  %v5210_v26 = vpop.permute.xlu1 %5209  ;;  %v13067_v31 = vld [vmem:[#allocation14_spill] sm:$0xff] }
 0x894   : > { %v6654_v34 = vmul.f32 -1.442695, %v6110_v17  ;;  %v5590_v44 = vpop.permute.xlu0 %5589  ;;  %v5788_v24 = vsel %vm1880_vm6, %v5756_v46, %v5210_v26  ;;  %v13068_v22 = vmax.f32 %v13067_v31, 0.0  ;;  %v13069_v26 = vld [vmem:[#allocation9_spill] sm:$0xff] }
 0x895   : > { %v7042_v14 = vpop.eup %7041  ;;  %v6653_v25 = vmul.f32 -1.442695, %v6105_v45  ;;  %v5882_v61 = vsel %vm1979_vm9, %v5850_v11, %v5590_v44  ;;  %v13070_v11 = vmax.f32 %v13069_v26, 0.0 }
 0x896   : > { %v7044_v48 = vpop.eup %7043  ;;  %v6422_v53 = vmul.f32 %v7042_v14, %v13060_v15  ;;  %7045 = vpow2.f32 %v6654_v34  ;;  %6958 = vmatmul.mubr.msk.f32.gmra.mrb[42].mxu0 %vm2024_vm10, %v5882_v61  ;;  %v4350_v61 = vld [vmem:[#allocation2 + $0x22f] sm:$0xff] }
 0x897   : > { %v6421_v59 = vmul.f32 %v7044_v48, %v13062_v37  ;;  %7047 = vpow2.f32 %v6653_v25  ;;  %v11907_v28 = vpop.permute.xlu1 %4955  ;;  %v4349_v25 = vld [vmem:[#allocation2 + $0x227] sm:$0xff] }
 0x898   : > { %6454 = vst.msk [vmem:[%s11787_s13 + $0x38] sm:$0xff] %vm279_vm0, %v6422_v53  ;;  %v5336_v3 = vpop.permute.xlu0 %5335  ;;  %v13071_v48 = vld [vmem:[#allocation187_spill] sm:$0xff]  ;;  %v13072_v15 = vld [vmem:[#allocation128_spill] sm:$0xff] }
 0x899   : > { %6453 = vst.msk [vmem:[%s11787_s13 + $0x30] sm:$0xff] %vm279_vm0, %v6421_v59  ;;  %v5819_v52 = vsel %vm1913_vm7, %v5787_v39, %v5336_v3  ;;  %v5661_v32 = vsel %vm279_vm0, %v4349_v25, %v13071_v48  ;;  %v5662_v53 = vsel %vm279_vm0, %v4350_v61, %v13072_v15  ;;  %v13074_v3 = vld [vmem:[#allocation167_spill] sm:$0xff] }
 0x89a   : > { %v5693_v37 = vsel %vm1781_vm3, %v5661_v32, %v13073_v7 }
 0x89b   : > { %v5464_v20 = vpop.permute.xlu1 %5463  ;;  %v5725_v49 = vsel %vm1814_vm4, %v5693_v37, %v11907_v28 }
 0x89c   : > { %v5338_v10 = vpop.permute.xlu0 %5337  ;;  %v5851_v4 = vsel %vm1946_vm8, %v5819_v52, %v5464_v20  ;;  %v5694_v20 = vsel %vm1781_vm3, %v5662_v53, %v13074_v3 }
 0x89d   : > { %v5820_v13 = vsel %vm1913_vm7, %v5788_v24, %v5338_v10 }
 0x89f   : > { %v5084_v5 = vpop.permute.xlu1 %5083 }
 0x8a0   : > { %v7046_v43 = vpop.eup %7045  ;;  %v4958_v41 = vpop.permute.xlu0 %4957  ;;  %v5757_v63 = vsel %vm1847_vm5, %v5725_v49, %v5084_v5  ;;  %v13083_v49 = vld [vmem:[#allocation20_spill] sm:$0xff] }
 0x8a1   : > { %v7048_v58 = vpop.eup %7047  ;;  %v6328_v51 = vadd.f32 1.0, %v7046_v43  ;;  %v5726_v1 = vsel %vm1814_vm4, %v5694_v20, %v4958_v41 }
 0x8a2   : > { %v6327_v29 = vadd.f32 1.0, %v7048_v58 }
 0x8a3   : > { %7049 = vrcp.f32 %v6328_v51  ;;  %v5592_v57 = vpop.permute.xlu1 %5591 }
 0x8a4   : > { %7051 = vrcp.f32 %v6327_v29  ;;  %v5883_v23 = vsel %vm1979_vm9, %v5851_v4, %v5592_v57  ;;  %v5466_v9 = vpop.permute.xlu0 %5465 }
 0x8a5   : > { %6960 = vmatprep.mubr.msk.f32.mxu0 %vm2024_vm10, %v5883_v23  ;;  %v5852_v35 = vsel %vm1946_vm8, %v5820_v13, %v5466_v9 }
 0x8a7   : > { %v5212_v16 = vpop.permute.xlu1 %5211 }
 0x8a8   : > { %v5086_v6 = vpop.permute.xlu0 %5085  ;;  %v5789_v19 = vsel %vm1880_vm6, %v5757_v63, %v5212_v16 }
 0x8a9   : > { %v6935_v40 = vpop.f32.mrb[26].mxu0  ;;  %v5758_v21 = vsel %vm1847_vm5, %v5726_v1, %v5086_v6  ;;  %v13076_v6 = vmax.f32 %v13075_v47, 0.0  ;;  %v13085_v1 = vld [vmem:[#allocation15_spill] sm:$0xff] }
 0x8aa   : > { %v6120_v2 = vadd.f32 %v6935_v40, %v11735_v33  ;;  %v6114_v18 = vpop.f32.mrb[27].mxu0  ;;  %v13077_v40 = vld [vmem:[#allocation11_spill] sm:$0xff] }
 0x8ab   : > { %v6115_v62 = vadd.f32 %v11735_v33, %v6114_v18  ;;  %v5214_v42 = vpop.permute.xlu1 %5213  ;;  %v13078_v24 = vmax.f32 %v13077_v40, 0.0 }
 0x8ac   : > { %v6656_v8 = vmul.f32 -1.442695, %v6120_v2  ;;  %v5594_v54 = vpop.permute.xlu0 %5593  ;;  %v5790_v56 = vsel %vm1880_vm6, %v5758_v21, %v5214_v42 }
 0x8ad   : > { %v7050_v38 = vpop.eup %7049  ;;  %v6655_v12 = vmul.f32 -1.442695, %v6115_v62  ;;  %v5884_v60 = vsel %vm1979_vm9, %v5852_v35, %v5594_v54 }
 0x8ae   : > { %v7052_v17 = vpop.eup %7051  ;;  %v6424_v45 = vmul.f32 %v7050_v38, %v13068_v22  ;;  %7053 = vpow2.f32 %v6656_v8  ;;  %6961 = vmatmul.mubr.msk.f32.gmra.mrb[44].mxu0 %vm2024_vm10, %v5884_v60  ;;  %v13079_v22 = vld [vmem:[#allocation18_spill] sm:$0xff] }
 0x8af   : > { %v6423_v34 = vmul.f32 %v7052_v17, %v13070_v11  ;;  %7055 = vpow2.f32 %v6655_v12  ;;  %v5342_v44 = vpop.permute.xlu1 %5341  ;;  %v13081_v11 = vld [vmem:[#allocation13_spill] sm:$0xff] }
 0x8b0   : > { %6456 = vst.msk [vmem:[%s11787_s13 + $0x48] sm:$0xff] %vm279_vm0, %v6424_v45  ;;  %v5340_v14 = vpop.permute.xlu0 %5339  ;;  %v5822_v39 = vsel %vm1913_vm7, %v5790_v56, %v5342_v44  ;;  %v13080_v45 = vmax.f32 %v13079_v22, 0.0 }
 0x8b1   : > { %6455 = vst.msk [vmem:[%s11787_s13 + $0x40] sm:$0xff] %vm279_vm0, %v6423_v34  ;;  %v5821_v43 = vsel %vm1913_vm7, %v5789_v19, %v5340_v14  ;;  %v13082_v34 = vmax.f32 %v13081_v11, 0.0  ;;  %v13086_v19 = vmax.f32 %v13085_v1, 0.0 }
 0x8b3   : > { %v5470_v59 = vpop.permute.xlu1 %5469 }
 0x8b4   : > { %v5468_v10 = vpop.permute.xlu0 %5467  ;;  %v5854_v5 = vsel %vm1946_vm8, %v5822_v39, %v5470_v59 }
 0x8b5   : > { %v5853_v51 = vsel %vm1946_vm8, %v5821_v43, %v5468_v10  ;;  %v13084_v10 = vmax.f32 %v13083_v49, 0.0 }
 0x8b7   : > { %v5598_v30 = vpop.permute.xlu1 %5597 }
 0x8b8   : > { %v7054_v58 = vpop.eup %7053  ;;  %v5596_v28 = vpop.permute.xlu0 %5595  ;;  %v5886_v57 = vsel %vm1979_vm9, %v5854_v5, %v5598_v30 }
 0x8b9   : > { %v7056_v29 = vpop.eup %7055  ;;  %v6330_v52 = vadd.f32 1.0, %v7054_v58  ;;  %v5885_v41 = vsel %vm1979_vm9, %v5853_v51, %v5596_v28 }
 0x8ba   : > { %v6329_v4 = vadd.f32 1.0, %v7056_v29  ;;  %6963 = vmatprep.mubr.msk.f32.mxu0 %vm2024_vm10, %v5885_v41 }
 0x8bb   : > { %7057 = vrcp.f32 %v6330_v52  ;;  %6964 = vmatmul.mubr.msk.f32.gmra.mrb[46].mxu0 %vm2024_vm10, %v5886_v57  ;;  %v13087_v57 = vld [vmem:[#allocation22_spill] sm:$0xff] }
 0x8bc   : > { %7059 = vrcp.f32 %v6329_v4 }
 0x8c1   : > { %v6938_v23 = vpop.f32.mrb[28].mxu0 }
 0x8c2   : > { %v6130_v9 = vadd.f32 %v6938_v23, %v11735_v33  ;;  %v6124_v36 = vpop.f32.mrb[29].mxu0  ;;  %v13088_v23 = vmax.f32 %v13087_v57, 0.0 }
 0x8c3   : > { %v6125_v55 = vadd.f32 %v11735_v33, %v6124_v36  ;;  %v13089_v36 = vld [vmem:[#allocation17_spill] sm:$0xff] }
 0x8c4   : > { %v6658_v27 = vmul.f32 -1.442695, %v6130_v9 }
 0x8c5   : > { %v7058_v50 = vpop.eup %7057  ;;  %v6657_v0 = vmul.f32 -1.442695, %v6125_v55  ;;  %v13090_v55 = vmax.f32 %v13089_v36, 0.0 }
 0x8c6   : > { %v7060_v16 = vpop.eup %7059  ;;  %v6426_v46 = vmul.f32 %v7058_v50, %v13076_v6  ;;  %7061 = vpow2.f32 %v6658_v27 }
 0x8c7   : > { %v6425_v2 = vmul.f32 %v7060_v16, %v13078_v24  ;;  %7063 = vpow2.f32 %v6657_v0 }
 0x8c8   : > { %6458 = vst.msk [vmem:[%s11787_s13 + $0x58] sm:$0xff] %vm279_vm0, %v6426_v46 }
 0x8c9   : > { %6457 = vst.msk [vmem:[%s11787_s13 + $0x50] sm:$0xff] %vm279_vm0, %v6425_v2 }
 0x8d0   : > { %v7062_v18 = vpop.eup %7061 }
 0x8d1   : > { %v7064_v13 = vpop.eup %7063  ;;  %v6332_v62 = vadd.f32 1.0, %v7062_v18 }
 0x8d2   : > { %v6331_v42 = vadd.f32 1.0, %v7064_v13 }
 0x8d3   : > { %7065 = vrcp.f32 %v6332_v62 }
 0x8d4   : > { %7067 = vrcp.f32 %v6331_v42  ;;  %v13091_v42 = vld [vmem:[#allocation24_spill] sm:$0xff] }
 0x8d9   : > { %v6941_v35 = vpop.f32.mrb[30].mxu0 }
 0x8da   : > { %v6140_v8 = vadd.f32 %v6941_v35, %v11735_v33  ;;  %v6134_v54 = vpop.f32.mrb[31].mxu0  ;;  %v13092_v35 = vmax.f32 %v13091_v42, 0.0 }
 0x8db   : > { %v6135_v38 = vadd.f32 %v11735_v33, %v6134_v54  ;;  %v13093_v54 = vld [vmem:[#allocation19_spill] sm:$0xff] }
 0x8dc   : > { %v6660_v12 = vmul.f32 -1.442695, %v6140_v8 }
 0x8dd   : > { %v7066_v60 = vpop.eup %7065  ;;  %v6659_v17 = vmul.f32 -1.442695, %v6135_v38  ;;  %v13094_v38 = vmax.f32 %v13093_v54, 0.0 }
 0x8de   : > { %v7068_v31 = vpop.eup %7067  ;;  %v6428_v26 = vmul.f32 %v7066_v60, %v13080_v45  ;;  %7069 = vpow2.f32 %v6660_v12 }
 0x8df   : > { %v6427_v44 = vmul.f32 %v7068_v31, %v13082_v34  ;;  %7071 = vpow2.f32 %v6659_v17 }
 0x8e0   : > { %6460 = vst.msk [vmem:[%s11787_s13 + $0x68] sm:$0xff] %vm279_vm0, %v6428_v26 }
 0x8e1   : > { %6459 = vst.msk [vmem:[%s11787_s13 + $0x60] sm:$0xff] %vm279_vm0, %v6427_v44 }
 0x8e8   : > { %v7070_v14 = vpop.eup %7069 }
 0x8e9   : > { %v7072_v25 = vpop.eup %7071  ;;  %v6334_v61 = vadd.f32 1.0, %v7070_v14 }
 0x8ea   : > { %v6333_v48 = vadd.f32 1.0, %v7072_v25 }
 0x8eb   : > { %7073 = vrcp.f32 %v6334_v61 }
 0x8ec   : > { %7075 = vrcp.f32 %v6333_v48  ;;  %v13095_v48 = vld [vmem:[#allocation26_spill] sm:$0xff] }
 0x8f1   : > { %v6944_v32 = vpop.f32.mrb[32].mxu0 }
 0x8f2   : > { %v6150_v15 = vadd.f32 %v6944_v32, %v11735_v33  ;;  %v6144_v53 = vpop.f32.mrb[33].mxu0  ;;  %v13096_v32 = vmax.f32 %v13095_v48, 0.0 }
 0x8f3   : > { %v6145_v7 = vadd.f32 %v11735_v33, %v6144_v53  ;;  %v13097_v53 = vld [vmem:[#allocation21_spill] sm:$0xff] }
 0x8f4   : > { %v6662_v37 = vmul.f32 -1.442695, %v6150_v15 }
 0x8f5   : > { %v7074_v59 = vpop.eup %7073  ;;  %v6661_v3 = vmul.f32 -1.442695, %v6145_v7  ;;  %v13098_v7 = vmax.f32 %v13097_v53, 0.0 }
 0x8f6   : > { %v7076_v20 = vpop.eup %7075  ;;  %v6430_v63 = vmul.f32 %v7074_v59, %v13084_v10  ;;  %7077 = vpow2.f32 %v6662_v37 }
 0x8f7   : > { %v6429_v21 = vmul.f32 %v7076_v20, %v13086_v19  ;;  %7079 = vpow2.f32 %v6661_v3 }
 0x8f8   : > { %6462 = vst.msk [vmem:[%s11787_s13 + $0x78] sm:$0xff] %vm279_vm0, %v6430_v63 }
 0x8f9   : > { %6461 = vst.msk [vmem:[%s11787_s13 + $0x70] sm:$0xff] %vm279_vm0, %v6429_v21 }
 0x900   : > { %v7078_v56 = vpop.eup %7077 }
 0x901   : > { %v7080_v43 = vpop.eup %7079  ;;  %v6336_v30 = vadd.f32 1.0, %v7078_v56 }
 0x902   : > { %v6335_v58 = vadd.f32 1.0, %v7080_v43 }
 0x903   : > { %7081 = vrcp.f32 %v6336_v30 }
 0x904   : > { %7083 = vrcp.f32 %v6335_v58  ;;  %v13099_v58 = vld [vmem:[#allocation28_spill] sm:$0xff] }
 0x909   : > { %v6947_v39 = vpop.f32.mrb[34].mxu0 }
 0x90a   : > { %v6160_v51 = vadd.f32 %v6947_v39, %v11735_v33  ;;  %v6154_v28 = vpop.f32.mrb[35].mxu0  ;;  %v13100_v39 = vmax.f32 %v13099_v58, 0.0 }
 0x90b   : > { %v6155_v29 = vadd.f32 %v11735_v33, %v6154_v28  ;;  %v13101_v28 = vld [vmem:[#allocation23_spill] sm:$0xff] }
 0x90c   : > { %v6664_v52 = vmul.f32 -1.442695, %v6160_v51 }
 0x90d   : > { %v7082_v5 = vpop.eup %7081  ;;  %v6663_v41 = vmul.f32 -1.442695, %v6155_v29  ;;  %v13102_v29 = vmax.f32 %v13101_v28, 0.0 }
 0x90e   : > { %v7084_v4 = vpop.eup %7083  ;;  %v6432_v9 = vmul.f32 %v7082_v5, %v13088_v23  ;;  %7085 = vpow2.f32 %v6664_v52 }
 0x90f   : > { %v6431_v27 = vmul.f32 %v7084_v4, %v13090_v55  ;;  %7087 = vpow2.f32 %v6663_v41 }
 0x910   : > { %6464 = vst.msk [vmem:[%s11787_s13 + $0x88] sm:$0xff] %vm279_vm0, %v6432_v9 }
 0x911   : > { %6463 = vst.msk [vmem:[%s11787_s13 + $0x80] sm:$0xff] %vm279_vm0, %v6431_v27 }
 0x918   : > { %v7086_v50 = vpop.eup %7085 }
 0x919   : > { %v7088_v0 = vpop.eup %7087  ;;  %v6338_v16 = vadd.f32 1.0, %v7086_v50 }
 0x91a   : > { %v6337_v47 = vadd.f32 1.0, %v7088_v0 }
 0x91b   : > { %7089 = vrcp.f32 %v6338_v16 }
 0x91c   : > { %7091 = vrcp.f32 %v6337_v47  ;;  %v13103_v47 = vld [vmem:[#allocation30_spill] sm:$0xff] }
 0x921   : > { %v6950_v6 = vpop.f32.mrb[36].mxu0 }
 0x922   : > { %v6170_v46 = vadd.f32 %v6950_v6, %v11735_v33  ;;  %v6164_v40 = vpop.f32.mrb[37].mxu0  ;;  %v13104_v6 = vmax.f32 %v13103_v47, 0.0 }
 0x923   : > { %v6165_v24 = vadd.f32 %v11735_v33, %v6164_v40  ;;  %v13105_v40 = vld [vmem:[#allocation25_spill] sm:$0xff] }
 0x924   : > { %v6666_v2 = vmul.f32 -1.442695, %v6170_v46 }
 0x925   : > { %v7090_v18 = vpop.eup %7089  ;;  %v6665_v13 = vmul.f32 -1.442695, %v6165_v24  ;;  %v13106_v24 = vmax.f32 %v13105_v40, 0.0 }
 0x926   : > { %v7092_v62 = vpop.eup %7091  ;;  %v6434_v8 = vmul.f32 %v7090_v18, %v13092_v35  ;;  %7093 = vpow2.f32 %v6666_v2 }
 0x927   : > { %v6433_v12 = vmul.f32 %v7092_v62, %v13094_v38  ;;  %7095 = vpow2.f32 %v6665_v13 }
 0x928   : > { %6466 = vst.msk [vmem:[%s11787_s13 + $0x98] sm:$0xff] %vm279_vm0, %v6434_v8 }
 0x929   : > { %6465 = vst.msk [vmem:[%s11787_s13 + $0x90] sm:$0xff] %vm279_vm0, %v6433_v12 }
 0x930   : > { %v7094_v60 = vpop.eup %7093 }
 0x931   : > { %v7096_v17 = vpop.eup %7095  ;;  %v6340_v31 = vadd.f32 1.0, %v7094_v60 }
 0x932   : > { %v6339_v22 = vadd.f32 1.0, %v7096_v17 }
 0x933   : > { %7097 = vrcp.f32 %v6340_v31 }
 0x934   : > { %7099 = vrcp.f32 %v6339_v22  ;;  %v13107_v22 = vld [vmem:[#allocation31_spill] sm:$0xff] }
 0x939   : > { %v6953_v45 = vpop.f32.mrb[38].mxu0 }
 0x93a   : > { %v6180_v26 = vadd.f32 %v6953_v45, %v11735_v33  ;;  %v6174_v11 = vpop.f32.mrb[39].mxu0  ;;  %v13108_v45 = vmax.f32 %v13107_v22, 0.0 }
 0x93b   : > { %v6175_v34 = vadd.f32 %v11735_v33, %v6174_v11  ;;  %v13109_v11 = vld [vmem:[#allocation27_spill] sm:$0xff] }
 0x93c   : > { %v6668_v44 = vmul.f32 -1.442695, %v6180_v26 }
 0x93d   : > { %v7098_v14 = vpop.eup %7097  ;;  %v6667_v25 = vmul.f32 -1.442695, %v6175_v34  ;;  %v13110_v34 = vmax.f32 %v13109_v11, 0.0 }
 0x93e   : > { %v7100_v61 = vpop.eup %7099  ;;  %v6436_v15 = vmul.f32 %v7098_v14, %v13096_v32  ;;  %7101 = vpow2.f32 %v6668_v44 }
 0x93f   : > { %v6435_v37 = vmul.f32 %v7100_v61, %v13098_v7  ;;  %7103 = vpow2.f32 %v6667_v25 }
 0x940   : > { %6468 = vst.msk [vmem:[%s11787_s13 + $0xa8] sm:$0xff] %vm279_vm0, %v6436_v15 }
 0x941   : > { %6467 = vst.msk [vmem:[%s11787_s13 + $0xa0] sm:$0xff] %vm279_vm0, %v6435_v37 }
 0x948   : > { %v7102_v59 = vpop.eup %7101 }
 0x949   : > { %v7104_v3 = vpop.eup %7103  ;;  %v6342_v20 = vadd.f32 1.0, %v7102_v59 }
 0x94a   : > { %v6341_v49 = vadd.f32 1.0, %v7104_v3 }
 0x94b   : > { %7105 = vrcp.f32 %v6342_v20 }
 0x94c   : > { %7107 = vrcp.f32 %v6341_v49  ;;  %v13111_v49 = vld [vmem:[#allocation32_spill] sm:$0xff] }
 0x951   : > { %v6956_v10 = vpop.f32.mrb[40].mxu0 }
 0x952   : > { %v6190_v63 = vadd.f32 %v6956_v10, %v11735_v33  ;;  %v6184_v1 = vpop.f32.mrb[41].mxu0  ;;  %v13112_v10 = vmax.f32 %v13111_v49, 0.0 }
 0x953   : > { %v6185_v19 = vadd.f32 %v11735_v33, %v6184_v1 }
 0x954   : > { %v6670_v21 = vmul.f32 -1.442695, %v6190_v63 }
 0x955   : > { %v7106_v56 = vpop.eup %7105  ;;  %v6669_v43 = vmul.f32 -1.442695, %v6185_v19 }
 0x956   : > { %v7108_v30 = vpop.eup %7107  ;;  %v6438_v51 = vmul.f32 %v7106_v56, %v13100_v39  ;;  %7109 = vpow2.f32 %v6670_v21 }
 0x957   : > { %v6437_v52 = vmul.f32 %v7108_v30, %v13102_v29  ;;  %7111 = vpow2.f32 %v6669_v43 }
 0x958   : > { %6470 = vst.msk [vmem:[%s11787_s13 + $0xb8] sm:$0xff] %vm279_vm0, %v6438_v51  ;;  %v13115_v51 = vld [vmem:[#allocation34_spill] sm:$0xff] }
 0x959   : > { %6469 = vst.msk [vmem:[%s11787_s13 + $0xb0] sm:$0xff] %vm279_vm0, %v6437_v52  ;;  %v13116_v28 = vmax.f32 %v13115_v51, 0.0  ;;  %v13117_v52 = vld [vmem:[#allocation33_spill] sm:$0xff] }
 0x960   : > { %v7110_v5 = vpop.eup %7109 }
 0x961   : > { %v7112_v41 = vpop.eup %7111  ;;  %v6344_v4 = vadd.f32 1.0, %v7110_v5  ;;  %v13118_v5 = vmax.f32 %v13117_v52, 0.0 }
 0x962   : > { %v6343_v57 = vadd.f32 1.0, %v7112_v41 }
 0x963   : > { %7113 = vrcp.f32 %v6344_v4 }
 0x964   : > { %7115 = vrcp.f32 %v6343_v57 }
 0x969   : > { %v6959_v23 = vpop.f32.mrb[42].mxu0 }
 0x96a   : > { %v6200_v9 = vadd.f32 %v6959_v23, %v11735_v33  ;;  %v6194_v36 = vpop.f32.mrb[43].mxu0 }
 0x96b   : > { %v6195_v55 = vadd.f32 %v11735_v33, %v6194_v36 }
 0x96c   : > { %v6672_v27 = vmul.f32 -1.442695, %v6200_v9 }
 0x96d   : > { %v7114_v50 = vpop.eup %7113  ;;  %v6671_v0 = vmul.f32 -1.442695, %v6195_v55 }
 0x96e   : > { %v7116_v16 = vpop.eup %7115  ;;  %v6440_v46 = vmul.f32 %v7114_v50, %v13104_v6  ;;  %7117 = vpow2.f32 %v6672_v27 }
 0x96f   : > { %v6439_v2 = vmul.f32 %v7116_v16, %v13106_v24  ;;  %7119 = vpow2.f32 %v6671_v0 }
 0x970   : > { %6472 = vst.msk [vmem:[%s11787_s13 + $0xc8] sm:$0xff] %vm279_vm0, %v6440_v46 }
 0x971   : > { %6471 = vst.msk [vmem:[%s11787_s13 + $0xc0] sm:$0xff] %vm279_vm0, %v6439_v2 }
 0x978   : > { %v7118_v18 = vpop.eup %7117 }
 0x979   : > { %v7120_v13 = vpop.eup %7119  ;;  %v6346_v62 = vadd.f32 1.0, %v7118_v18 }
 0x97a   : > { %v6345_v42 = vadd.f32 1.0, %v7120_v13 }
 0x97b   : > { %7121 = vrcp.f32 %v6346_v62 }
 0x97c   : > { %7123 = vrcp.f32 %v6345_v42 }
 0x981   : > { %v6962_v35 = vpop.f32.mrb[44].mxu0 }
 0x982   : > { %v6210_v8 = vadd.f32 %v6962_v35, %v11735_v33  ;;  %v6204_v54 = vpop.f32.mrb[45].mxu0 }
 0x983   : > { %v6205_v38 = vadd.f32 %v11735_v33, %v6204_v54 }
 0x984   : > { %v6674_v12 = vmul.f32 -1.442695, %v6210_v8 }
 0x985   : > { %v7122_v60 = vpop.eup %7121  ;;  %v6673_v17 = vmul.f32 -1.442695, %v6205_v38 }
 0x986   : > { %v7124_v31 = vpop.eup %7123  ;;  %v6442_v26 = vmul.f32 %v7122_v60, %v13108_v45  ;;  %7125 = vpow2.f32 %v6674_v12 }
 0x987   : > { %v6441_v44 = vmul.f32 %v7124_v31, %v13110_v34  ;;  %7127 = vpow2.f32 %v6673_v17 }
 0x988   : > { %6474 = vst.msk [vmem:[%s11787_s13 + $0xd8] sm:$0xff] %vm279_vm0, %v6442_v26 }
 0x989   : > { %6473 = vst.msk [vmem:[%s11787_s13 + $0xd0] sm:$0xff] %vm279_vm0, %v6441_v44 }
 0x98e   : > { %v6965_v14 = vpop.f32.mrb[46].mxu0 }
 0x98f   : > { %v6220_v25 = vadd.f32 %v6965_v14, %v11735_v33  ;;  %v6214_v61 = vpop.f32.mrb[47].mxu0 }
 0x990   : > { %v7126_v48 = vpop.eup %7125  ;;  %v6215_v32 = vadd.f32 %v11735_v33, %v6214_v61  ;;  %v13113_v33 = vld [vmem:[#allocation29_spill] sm:$0xff] }
 0x991   : > { %v7128_v15 = vpop.eup %7127  ;;  %v6348_v53 = vadd.f32 1.0, %v7126_v48  ;;  %v6676_v7 = vmul.f32 -1.442695, %v6220_v25  ;;  %v13114_v19 = vmax.f32 %v13113_v33, 0.0 }
 0x992   : > { %v6347_v37 = vadd.f32 1.0, %v7128_v15  ;;  %v6675_v59 = vmul.f32 -1.442695, %v6215_v32 }
 0x993   : > { %7129 = vrcp.f32 %v6348_v53 }
 0x994   : > { %7131 = vrcp.f32 %v6347_v37 }
 0x995   : > { %7133 = vpow2.f32 %v6676_v7 }
 0x996   : > { %7135 = vpow2.f32 %v6675_v59 }
 0x99d   : > { %v7130_v3 = vpop.eup %7129 }
 0x99e   : > { %v7132_v20 = vpop.eup %7131  ;;  %v6444_v63 = vmul.f32 %v7130_v3, %v13112_v10 }
 0x99f   : > { %v7134_v1 = vpop.eup %7133  ;;  %v6443_v21 = vmul.f32 %v7132_v20, %v13114_v19 }
 0x9a0   : > { %v7136_v56 = vpop.eup %7135  ;;  %6476 = vst.msk [vmem:[%s11787_s13 + $0xe8] sm:$0xff] %vm279_vm0, %v6444_v63  ;;  %v6350_v43 = vadd.f32 1.0, %v7134_v1 }
 0x9a1   : > { %6475 = vst.msk [vmem:[%s11787_s13 + $0xe0] sm:$0xff] %vm279_vm0, %v6443_v21  ;;  %v6349_v30 = vadd.f32 1.0, %v7136_v56 }
 0x9a2   : > { %7137 = vrcp.f32 %v6350_v43 }
 0x9a3   : > { %7139 = vrcp.f32 %v6349_v30 }
 0x9ac   : > { %v7138_v58 = vpop.eup %7137 }
 0x9ad   : > { %v7140_v39 = vpop.eup %7139  ;;  %v6446_v29 = vmul.f32 %v7138_v58, %v13116_v28 }
 0x9ae   : > { %v6445_v41 = vmul.f32 %v7140_v39, %v13118_v5 }
 0x9af   : > { %6478 = vst.msk [vmem:[%s11787_s13 + $0xf8] sm:$0xff] %vm279_vm0, %v6446_v29 }
 0x9b0   : > { %6477 = vst.msk [vmem:[%s11787_s13 + $0xf0] sm:$0xff] %vm279_vm0, %v6445_v41 }
 0x9b1 PF: > { %s17_s24 = sadd.s32 1, %s7203_s24  }
 0x9b2   : > { %p14_p4 = scmp.ge.s32.totalorder %s17_s24, 4  }
 0x9b4   :  { %16 = sbr.rel (!%p14_p4) target bundleno = 1 (0x1), region = 83 }

</bundles_post_ra>
